<compile_context>
chip_gen: v6e
topology: v6e:2x2x1
jax: 0.10.0
libtpu: 0.0.40
codegen_flags: <defaults>
</compile_context>

<pallas_src>
import functools

import jax
import jax.numpy as jnp
import numpy as np
from jax.experimental import pallas as pl
from jax.experimental.pallas import tpu as pltpu


def _round_up(x, m):
    return (x + m - 1) // m * m


def _rroi_kernel(gmeta_ref, krows_ref, coords_ref, hw_ref, feat_ref, out_ref,
                 *, GS, TK):
    """One grid step == (one ROI group, one K tile of the flattened feature map).

    gmeta_ref  : SMEM int32 [5, G]      (batch idx, h_lo, h_hi, k_lo, k_hi) per group
    krows_ref  : SMEM int32 [2, KT]     (first pixel row, last pixel row) per K tile
    coords_ref : VMEM f32  (1, M, 2*GS) per-slot sample coords [yc | xc]; invalid/dead = -2
    hw_ref     : VMEM f32  (2, TK)      (h index, w index) of this K tile's pixels
    feat_ref   : VMEM      (1, TK, C)   K tile of the group's batch image (NHWC flat, bf16/f32)
    out_ref    : VMEM f32  (1, M, C)    resident across the K axis (accumulator)
    """
    g = pl.program_id(0)
    k = pl.program_id(1)

    @pl.when(k == 0)
    def _init():
        out_ref[...] = jnp.zeros_like(out_ref)

    # Rotated-bbox row range of this group vs. the rows covered by this K tile:
    # skip the whole weight build + matmul when they cannot overlap.  (The
    # feature DMA for such tiles is also skipped via the clamped index map.)
    h_lo = gmeta_ref[1, g]
    h_hi = gmeta_ref[2, g]
    row_lo = krows_ref[0, k]
    row_hi = krows_ref[1, k]

    @pl.when((row_lo <= h_hi) & (row_hi >= h_lo))
    def _compute():
        hg = hw_ref[0:1, :]                         # [1, TK] pixel row index
        wg = hw_ref[1:2, :]                         # [1, TK] pixel col index
        coords = coords_ref[0]                      # [M, 2*GS]
        m = coords.shape[0]

        # Separable bilinear "tent" weights, accumulated over the G*G sample grid.
        # Invalid / dead samples carry coord -2 -> tent weight exactly 0.
        # TODO(synk): on v6e/v7x this build could run in packed bf16 for ~2x VPU
        # throughput; kept f32 so v5e (no bf16 VALU) and precision are untouched.
        wsum = jnp.zeros((m, TK), jnp.float32)
        for s in range(GS):                         # static unroll over sample grid
            yc = coords[:, s:s + 1]                 # [M, 1]
            xc = coords[:, GS + s:GS + s + 1]       # [M, 1]
            wy = jnp.maximum(1.0 - jnp.abs(yc - hg), 0.0)   # [M, TK]
            wx = jnp.maximum(1.0 - jnp.abs(xc - wg), 0.0)   # [M, TK]
            wsum = wsum + wy * wx

        feat = feat_ref[0]                          # [TK, C]
        out_ref[0] = out_ref[0] + jnp.dot(
            wsum.astype(feat.dtype), feat, preferred_element_type=jnp.float32)


def roi_align_rotated(features, rois, out_size, spatial_scale, sample_num=2,
                      rois_per_group=None, k_tile=1024, feat_dtype=jnp.bfloat16,
                      target_rows=256):
    """features: [N, C, H, W]; rois: [R, 6] = (batch_idx, cx, cy, w, h, theta_rad)."""
    # TODO(synk): sample_num <= 0 (adaptive per-ROI sampling grid) needs dynamic loop bounds.
    assert sample_num > 0
    N, C, H, W = features.shape
    R = rois.shape[0]
    OH = OW = int(out_size)
    NB = OH * OW
    G = int(sample_num)
    GS = G * G
    HW = H * W

    # ---------------- ROI grouping: TR ROIs sharing one batch image per grid step ----------------
    if rois_per_group is None:
        # target_rows=256 fills the 256-wide v6e/v7x MXU (use 128 for v5e if desired)
        TR = max(1, -(-int(target_rows) // NB))
    else:
        TR = int(rois_per_group)
    M0 = TR * NB
    M = _round_up(M0, 8)                    # sublane-aligned gather-matmul M
    G_MAX = R // TR + N                     # static upper bound on #groups

    rois = rois.astype(jnp.float32)
    batch_inds = jnp.clip(rois[:, 0].astype(jnp.int32), 0, N - 1)   # clamp (safety)

    order = jnp.argsort(batch_inds).astype(jnp.int32)
    sorted_b = batch_inds[order]
    counts = jnp.zeros((N,), jnp.int32).at[batch_inds].add(1)
    starts = jnp.concatenate([jnp.zeros((1,), jnp.int32), jnp.cumsum(counts)[:-1]])
    gper = (counts + TR - 1) // TR
    gstart = jnp.concatenate([jnp.zeros((1,), jnp.int32), jnp.cumsum(gper)[:-1]])
    rank = jnp.arange(R, dtype=jnp.int32) - starts[sorted_b]
    group_id = gstart[sorted_b] + rank // TR
    slot = rank % TR

    roi_for_slot = jnp.full((G_MAX * TR,), -1, jnp.int32).at[group_id * TR + slot].set(order)
    group_bidx = jnp.zeros((G_MAX,), jnp.int32).at[group_id].set(sorted_b)
    pos_of_roi = jnp.zeros((R,), jnp.int32).at[order].set(group_id * TR + slot)

    # ---------------- per-ROI sample coordinates (tiny; plain JAX, computed once) ----------------
    cx = rois[:, 1] * spatial_scale
    cy = rois[:, 2] * spatial_scale
    rw = jnp.maximum(rois[:, 3] * spatial_scale, 1.0)
    rh = jnp.maximum(rois[:, 4] * spatial_scale, 1.0)
    theta = rois[:, 5]
    c5 = jnp.cos(theta)[:, None, None, None, None]
    s5 = jnp.sin(theta)[:, None, None, None, None]

    bin_h = (rh / OH)[:, None, None, None, None]
    bin_w = (rw / OW)[:, None, None, None, None]
    start_h = (-0.5 * rh)[:, None, None, None, None]
    start_w = (-0.5 * rw)[:, None, None, None, None]
    ph = jnp.arange(OH, dtype=jnp.float32)[None, :, None, None, None]
    pw = jnp.arange(OW, dtype=jnp.float32)[None, None, :, None, None]
    iy = jnp.arange(G, dtype=jnp.float32)[None, None, None, :, None]
    ix = jnp.arange(G, dtype=jnp.float32)[None, None, None, None, :]
    yy = start_h + ph * bin_h + (iy + 0.5) * bin_h / G
    xx = start_w + pw * bin_w + (ix + 0.5) * bin_w / G
    x = xx * c5 + yy * s5 + cx[:, None, None, None, None]     # [R, OH, OW, G, G]
    y = yy * c5 - xx * s5 + cy[:, None, None, None, None]

    valid = (y >= -1.0) & (y <= float(H)) & (x >= -1.0) & (x <= float(W))
    yc_clip = jnp.clip(y, 0.0, float(H - 1))    # corner clamping (matches CUDA 4-corner kernel)
    xc_clip = jnp.clip(x, 0.0, float(W - 1))

    # per-ROI row bbox from the actual (clipped) sample rows; tent support is +/-1 row
    ymin = yc_clip.min(axis=(1, 2, 3, 4))
    ymax = yc_clip.max(axis=(1, 2, 3, 4))
    h_lo_r = jnp.floor(ymin).astype(jnp.int32)
    h_hi_r = jnp.minimum(H - 1, jnp.floor(ymax).astype(jnp.int32) + 1)
    h_lo_g = jnp.full((G_MAX,), H, jnp.int32).at[group_id].min(h_lo_r[order])
    h_hi_g = jnp.full((G_MAX,), -1, jnp.int32).at[group_id].max(h_hi_r[order])

    # invalid samples contribute zero weight: push their coords out of tent range
    yc = jnp.where(valid, yc_clip, -2.0).reshape(R, NB, GS)
    xc = jnp.where(valid, xc_clip, -2.0).reshape(R, NB, GS)

    # gather sample coords into (group, slot) layout; dead slots / padded rows get coord -2
    sel = jnp.maximum(roi_for_slot, 0)
    live = (roi_for_slot >= 0)[:, None, None]
    coords_slots = jnp.where(live, jnp.concatenate([yc[sel], xc[sel]], axis=-1), -2.0)
    coords_g = coords_slots.reshape(G_MAX, M0, 2 * GS)
    coords_g = jnp.pad(coords_g, ((0, 0), (0, M - M0), (0, 0)), constant_values=-2.0)

    # ---------------- features: NHWC flat, lane-dense C, K-tiled along H*W ----------------
    C_PAD = _round_up(C, 128)               # lane-dense feat tiles + unmasked output stores
    feat_bytes = jnp.dtype(feat_dtype).itemsize

    TK = _round_up(min(int(k_tile), _round_up(HW, 128)), 128)
    # Conservative VMEM budget (v7x: 64 MiB physical, 32 MiB scoped default):
    # double-buffered feat tile + double-buffered resident out block + weight temporaries.
    while TK > 128:
        vmem_est = (2 * TK * C_PAD * feat_bytes
                    + 2 * M * C_PAD * 4
                    + 4 * M * TK * 4
                    + 2 * M * 2 * GS * 4 + 2 * 2 * TK * 4)
        if vmem_est <= 20 * 1024 * 1024:
            break
        TK -= 128
    HW_PAD = _round_up(HW, TK)
    KT = HW_PAD // TK

    feat_flat = jnp.transpose(features, (0, 2, 3, 1)).reshape(N, HW, C)
    feat_flat = jnp.pad(feat_flat, ((0, 0), (0, HW_PAD - HW), (0, C_PAD - C)))
    feat_flat = feat_flat.astype(feat_dtype)

    flat = jnp.arange(HW_PAD, dtype=jnp.int32)
    grid_hw = jnp.stack([flat // W, flat % W], axis=0).astype(jnp.float32)   # [2, HW_PAD]
    kk = jnp.arange(KT, dtype=jnp.int32)
    krows = jnp.stack([(kk * TK) // W, (kk * TK + TK - 1) // W], axis=0)     # [2, KT] int32

    # per-group live K-tile range for DMA-level tile skipping; dead groups pin to tile 0
    dead = h_hi_g < h_lo_g
    k_lo_g = jnp.where(dead, 0, jnp.maximum(0, (h_lo_g * W) // TK))
    k_hi_g = jnp.where(dead, 0, jnp.minimum(KT - 1, ((h_hi_g + 1) * W - 1) // TK))
    gmeta = jnp.stack([group_bidx, h_lo_g, h_hi_g, k_lo_g, k_hi_g], axis=0)  # [5, G_MAX] int32

    kernel = functools.partial(_rroi_kernel, GS=GS, TK=TK)

    def feat_index_map(g, k, gm, kr):
        # Clamp K steps outside the group's live tile range onto its boundary tile:
        # consecutive identical block indices are not re-DMA'd by the pipeline, so
        # out-of-range tiles cost no HBM traffic (their compute is skipped via pl.when).
        kc = jnp.maximum(gm[3, g], jnp.minimum(k, gm[4, g]))
        return (gm[0, g], kc, 0)

    out = pl.pallas_call(
        kernel,
        out_shape=jax.ShapeDtypeStruct((G_MAX, M, C_PAD), jnp.float32),
        grid_spec=pltpu.PrefetchScalarGridSpec(
            num_scalar_prefetch=2,
            grid=(G_MAX, KT),
            in_specs=[
                pl.BlockSpec((1, M, 2 * GS), lambda g, k, gm, kr: (g, 0, 0)),
                pl.BlockSpec((2, TK), lambda g, k, gm, kr: (0, k)),
                # TODO(synk): pipeline_mode=pl.Buffered(3) here would deepen feature
                # prefetch now that many K steps are DMA/compute no-ops; left at the
                # default double-buffer depth to stay on the proven API surface.
                pl.BlockSpec((1, TK, C_PAD), feat_index_map),
            ],
            out_specs=pl.BlockSpec((1, M, C_PAD), lambda g, k, gm, kr: (g, 0, 0)),
        ),
        compiler_params=pltpu.CompilerParams(
            dimension_semantics=("parallel", "arbitrary")),
    )(gmeta, krows, coords_g, grid_hw, feat_flat)

    # ungroup, restore original ROI order, apply the 1/(G*G) sample average
    out = out[:, :M0, :C].reshape(G_MAX * TR, NB, C)[pos_of_roi] * (1.0 / GS)
    return jnp.transpose(out, (0, 2, 1)).reshape(R, C, OH, OW).astype(features.dtype)


class ROIAlignRotated:
    """JAX/Pallas equivalent of mmdet's ROIAlignRotated module (forward only)."""

    def __init__(self, out_size, spatial_scale, sample_num):
        self.out_size = out_size
        self.spatial_scale = spatial_scale
        self.sample_num = sample_num

    def __call__(self, input, rois):
        return roi_align_rotated(input, rois, self.out_size, self.spatial_scale,
                                 self.sample_num)


# ---------------- pure-JAX reference (mirrors the CUDA 4-corner kernel) ----------------
def roi_align_rotated_ref(features, rois, out_size, spatial_scale, sample_num):
    N, C, H, W = features.shape
    OH = OW = int(out_size)
    G = int(sample_num)
    rois = rois.astype(jnp.float32)
    bi = jnp.clip(rois[:, 0].astype(jnp.int32), 0, N - 1)
    cx = rois[:, 1] * spatial_scale
    cy = rois[:, 2] * spatial_scale
    rw = jnp.maximum(rois[:, 3] * spatial_scale, 1.0)
    rh = jnp.maximum(rois[:, 4] * spatial_scale, 1.0)
    theta = rois[:, 5]

    bin_h = (rh / OH)[:, None, None, None, None]
    bin_w = (rw / OW)[:, None, None, None, None]
    start_h = (-rh / 2.0)[:, None, None, None, None]
    start_w = (-rw / 2.0)[:, None, None, None, None]
    ph = jnp.arange(OH, dtype=jnp.float32)[None, :, None, None, None]
    pw = jnp.arange(OW, dtype=jnp.float32)[None, None, :, None, None]
    iy = jnp.arange(G, dtype=jnp.float32)[None, None, None, :, None]
    ix = jnp.arange(G, dtype=jnp.float32)[None, None, None, None, :]
    yy = start_h + ph * bin_h + (iy + 0.5) * bin_h / G
    xx = start_w + pw * bin_w + (ix + 0.5) * bin_w / G
    cos_t = jnp.cos(theta)[:, None, None, None, None]
    sin_t = jnp.sin(theta)[:, None, None, None, None]
    x = xx * cos_t + yy * sin_t + cx[:, None, None, None, None]
    y = yy * cos_t - xx * sin_t + cy[:, None, None, None, None]

    valid = (y >= -1.0) & (y <= H) & (x >= -1.0) & (x <= W)
    yc = jnp.clip(y, 0.0, H - 1.0)
    xc = jnp.clip(x, 0.0, W - 1.0)
    y0 = jnp.floor(yc)
    x0 = jnp.floor(xc)
    yl = y0.astype(jnp.int32)
    xl = x0.astype(jnp.int32)
    yh = jnp.minimum(yl + 1, H - 1)
    xh = jnp.minimum(xl + 1, W - 1)
    ly = yc - y0
    lx = xc - x0
    hy = 1.0 - ly
    hx = 1.0 - lx
    feat_b = features[bi].astype(jnp.float32)  # [R, C, H, W]

    def interp_one(feat, yl, xl, yh, xh, hy, hx, ly, lx, valid):
        v1 = feat[:, yl, xl]
        v2 = feat[:, yl, xh]
        v3 = feat[:, yh, xl]
        v4 = feat[:, yh, xh]
        val = hy * hx * v1 + hy * lx * v2 + ly * hx * v3 + ly * lx * v4
        return jnp.where(valid, val, 0.0)

    vals = jax.vmap(interp_one)(feat_b, yl, xl, yh, xh, hy, hx, ly, lx, valid)
    return vals.mean(axis=(-1, -2))  # [R, C, OH, OW]


if __name__ == "__main__":
    key = jax.random.PRNGKey(0)
    N, C, H, W = 2, 4, 16, 16
    features = jax.random.normal(key, (N, C, H, W), dtype=jnp.float32)

    # rois: (batch_idx, cx, cy, w, h, theta_radians) in image coords (spatial_scale=0.5)
    rois = jnp.array(
        [
            [0.0, 16.0, 12.0, 10.0, 8.0, 0.3],
            [0.0, 8.0, 20.0, 6.0, 12.0, -0.7],
            [1.0, 20.0, 16.0, 14.0, 6.0, 1.2],
            [1.0, 10.0, 10.0, 5.0, 5.0, 2.4],
            [0.0, 24.0, 24.0, 12.0, 10.0, -2.0],
            [1.0, 30.0, 4.0, 20.0, 8.0, 0.9],   # partially outside the image
        ],
        dtype=jnp.float32,
    )

    out_size, spatial_scale, sample_num = 4, 0.5, 2
    module = ROIAlignRotated(out_size, spatial_scale, sample_num)

    ref = jax.block_until_ready(
        roi_align_rotated_ref(features, rois, out_size, spatial_scale, sample_num))

    # default path: bf16 feature streaming (halved HBM traffic, native MXU rate)
    out_bf16 = jax.block_until_ready(module(features, rois))
    assert out_bf16.shape == (rois.shape[0], C, out_size, out_size), out_bf16.shape
    np.testing.assert_allclose(np.asarray(out_bf16), np.asarray(ref), rtol=5e-2, atol=5e-2)

    # f32 feature path: tight check against the 4-corner bilinear reference
    out_f32 = jax.block_until_ready(
        roi_align_rotated(features, rois, out_size, spatial_scale, sample_num,
                          feat_dtype=jnp.float32))
    np.testing.assert_allclose(np.asarray(out_f32), np.asarray(ref), rtol=1e-4, atol=1e-4)

    print("KERNEL_OK")
</pallas_src>

<mosaic_0001>
module attributes {stable_mosaic.version = 11 : i64} {
  func.func @_rroi_kernel(%arg0: i32, %arg1: i32, %arg2: memref<5x2xi32, #tpu.memory_space<smem>>, %arg3: memref<2x1xi32, #tpu.memory_space<smem>>, %arg4: memref<1x256x8xf32, #tpu.memory_space<vmem>>, %arg5: memref<2x256xf32, #tpu.memory_space<vmem>>, %arg6: memref<1x256x128xbf16, #tpu.memory_space<vmem>>, %arg7: memref<1x256x128xf32, #tpu.memory_space<vmem>>) attributes {dimension_semantics = [#tpu.dimension_semantics<parallel>, #tpu.dimension_semantics<arbitrary>], iteration_bounds = array<i64: 2, 1>, scalar_prefetch = 2 : i64, scratch_operands = 0 : i64, tpu.core_type = #tpu.core_type<tc>, window_params = [{transform_indices = @transform_0, window_bounds = array<i64: 1, 256, 8>}, {transform_indices = @transform_1, window_bounds = array<i64: 2, 256>}, {transform_indices = @transform_2, window_bounds = array<i64: 1, 256, 128>}, {transform_indices = @transform_3, window_bounds = array<i64: 1, 256, 128>}]} {
    %c0_i32 = arith.constant 0 : i32
    %0 = arith.cmpi eq, %arg1, %c0_i32 : i32
    %1 = arith.extui %0 : i1 to i32
    %c0_i32_0 = arith.constant 0 : i32
    %2 = arith.cmpi ne, %1, %c0_i32_0 : i32
    scf.if %2 {
      %cst = arith.constant 0.000000e+00 : f32
      %16 = vector.broadcast %cst : f32 to vector<1x256x128xf32>
      %c0_3 = arith.constant 0 : index
      %c0_4 = arith.constant 0 : index
      %c0_5 = arith.constant 0 : index
      %17 = vector.load %arg7[%c0_3, %c0_4, %c0_5] : memref<1x256x128xf32, #tpu.memory_space<vmem>>, vector<1x256x128xf32>
      tpu.vector_store %arg7[%c0_3, %c0_4, %c0_5], %16 {strides = array<i32>} : memref<1x256x128xf32, #tpu.memory_space<vmem>>, vector<1x256x128xf32>,
    } else {
    }
    %c1 = arith.constant 1 : index
    %3 = arith.index_cast %arg0 : i32 to index
    %4 = memref.load %arg2[%c1, %3] : memref<5x2xi32, #tpu.memory_space<smem>>
    %c2 = arith.constant 2 : index
    %5 = arith.index_cast %arg0 : i32 to index
    %6 = memref.load %arg2[%c2, %5] : memref<5x2xi32, #tpu.memory_space<smem>>
    %c0 = arith.constant 0 : index
    %7 = arith.index_cast %arg1 : i32 to index
    %8 = memref.load %arg3[%c0, %7] : memref<2x1xi32, #tpu.memory_space<smem>>
    %c1_1 = arith.constant 1 : index
    %9 = arith.index_cast %arg1 : i32 to index
    %10 = memref.load %arg3[%c1_1, %9] : memref<2x1xi32, #tpu.memory_space<smem>>
    %11 = arith.cmpi sle, %8, %6 : i32
    %12 = arith.cmpi sge, %10, %4 : i32
    %13 = arith.andi %11, %12 : i1
    %14 = arith.extui %13 : i1 to i32
    %c0_i32_2 = arith.constant 0 : i32
    %15 = arith.cmpi ne, %14, %c0_i32_2 : i32
    scf.if %15 {
      %c0_3 = arith.constant 0 : index
      %c0_4 = arith.constant 0 : index
      %16 = vector.load %arg5[%c0_3, %c0_4] : memref<2x256xf32, #tpu.memory_space<vmem>>, vector<1x256xf32>
      %c1_5 = arith.constant 1 : index
      %c0_6 = arith.constant 0 : index
      %17 = vector.load %arg5[%c1_5, %c0_6] : memref<2x256xf32, #tpu.memory_space<vmem>>, vector<1x256xf32>
      %c0_7 = arith.constant 0 : index
      %c0_8 = arith.constant 0 : index
      %c0_9 = arith.constant 0 : index
      %18 = vector.load %arg4[%c0_7, %c0_8, %c0_9] : memref<1x256x8xf32, #tpu.memory_space<vmem>>, vector<1x256x8xf32>
      %19 = vector.shape_cast %18 : vector<1x256x8xf32> to vector<256x8xf32>
      %cst = arith.constant 0.000000e+00 : f32
      %20 = vector.broadcast %cst : f32 to vector<256x256xf32>
      %21 = vector.extract_strided_slice %19 {offsets = [0, 0], sizes = [256, 1], strides = [1, 1]} : vector<256x8xf32> to vector<256x1xf32>
      %22 = vector.extract_strided_slice %19 {offsets = [0, 4], sizes = [256, 1], strides = [1, 1]} : vector<256x8xf32> to vector<256x1xf32>
      %23 = vector.broadcast %21 : vector<256x1xf32> to vector<256x256xf32>
      %24 = vector.broadcast %16 : vector<1x256xf32> to vector<256x256xf32>
      %25 = arith.subf %23, %24 : vector<256x256xf32>
      %26 = math.absf %25 : vector<256x256xf32>
      %cst_10 = arith.constant 1.000000e+00 : f32
      %27 = vector.broadcast %cst_10 : f32 to vector<256x256xf32>
      %28 = arith.subf %27, %26 : vector<256x256xf32>
      %cst_11 = arith.constant 0.000000e+00 : f32
      %29 = vector.broadcast %cst_11 : f32 to vector<256x256xf32>
      %30 = arith.maximumf %28, %29 : vector<256x256xf32>
      %31 = vector.broadcast %22 : vector<256x1xf32> to vector<256x256xf32>
      %32 = vector.broadcast %17 : vector<1x256xf32> to vector<256x256xf32>
      %33 = arith.subf %31, %32 : vector<256x256xf32>
      %34 = math.absf %33 : vector<256x256xf32>
      %cst_12 = arith.constant 1.000000e+00 : f32
      %35 = vector.broadcast %cst_12 : f32 to vector<256x256xf32>
      %36 = arith.subf %35, %34 : vector<256x256xf32>
      %cst_13 = arith.constant 0.000000e+00 : f32
      %37 = vector.broadcast %cst_13 : f32 to vector<256x256xf32>
      %38 = arith.maximumf %36, %37 : vector<256x256xf32>
      %39 = arith.mulf %30, %38 : vector<256x256xf32>
      %40 = arith.addf %20, %39 : vector<256x256xf32>
      %41 = vector.extract_strided_slice %19 {offsets = [0, 1], sizes = [256, 1], strides = [1, 1]} : vector<256x8xf32> to vector<256x1xf32>
      %42 = vector.extract_strided_slice %19 {offsets = [0, 5], sizes = [256, 1], strides = [1, 1]} : vector<256x8xf32> to vector<256x1xf32>
      %43 = vector.broadcast %41 : vector<256x1xf32> to vector<256x256xf32>
      %44 = vector.broadcast %16 : vector<1x256xf32> to vector<256x256xf32>
      %45 = arith.subf %43, %44 : vector<256x256xf32>
      %46 = math.absf %45 : vector<256x256xf32>
      %cst_14 = arith.constant 1.000000e+00 : f32
      %47 = vector.broadcast %cst_14 : f32 to vector<256x256xf32>
      %48 = arith.subf %47, %46 : vector<256x256xf32>
      %cst_15 = arith.constant 0.000000e+00 : f32
      %49 = vector.broadcast %cst_15 : f32 to vector<256x256xf32>
      %50 = arith.maximumf %48, %49 : vector<256x256xf32>
      %51 = vector.broadcast %42 : vector<256x1xf32> to vector<256x256xf32>
      %52 = vector.broadcast %17 : vector<1x256xf32> to vector<256x256xf32>
      %53 = arith.subf %51, %52 : vector<256x256xf32>
      %54 = math.absf %53 : vector<256x256xf32>
      %cst_16 = arith.constant 1.000000e+00 : f32
      %55 = vector.broadcast %cst_16 : f32 to vector<256x256xf32>
      %56 = arith.subf %55, %54 : vector<256x256xf32>
      %cst_17 = arith.constant 0.000000e+00 : f32
      %57 = vector.broadcast %cst_17 : f32 to vector<256x256xf32>
      %58 = arith.maximumf %56, %57 : vector<256x256xf32>
      %59 = arith.mulf %50, %58 : vector<256x256xf32>
      %60 = arith.addf %40, %59 : vector<256x256xf32>
      %61 = vector.extract_strided_slice %19 {offsets = [0, 2], sizes = [256, 1], strides = [1, 1]} : vector<256x8xf32> to vector<256x1xf32>
      %62 = vector.extract_strided_slice %19 {offsets = [0, 6], sizes = [256, 1], strides = [1, 1]} : vector<256x8xf32> to vector<256x1xf32>
      %63 = vector.broadcast %61 : vector<256x1xf32> to vector<256x256xf32>
      %64 = vector.broadcast %16 : vector<1x256xf32> to vector<256x256xf32>
      %65 = arith.subf %63, %64 : vector<256x256xf32>
      %66 = math.absf %65 : vector<256x256xf32>
      %cst_18 = arith.constant 1.000000e+00 : f32
      %67 = vector.broadcast %cst_18 : f32 to vector<256x256xf32>
      %68 = arith.subf %67, %66 : vector<256x256xf32>
      %cst_19 = arith.constant 0.000000e+00 : f32
      %69 = vector.broadcast %cst_19 : f32 to vector<256x256xf32>
      %70 = arith.maximumf %68, %69 : vector<256x256xf32>
      %71 = vector.broadcast %62 : vector<256x1xf32> to vector<256x256xf32>
      %72 = vector.broadcast %17 : vector<1x256xf32> to vector<256x256xf32>
      %73 = arith.subf %71, %72 : vector<256x256xf32>
      %74 = math.absf %73 : vector<256x256xf32>
      %cst_20 = arith.constant 1.000000e+00 : f32
      %75 = vector.broadcast %cst_20 : f32 to vector<256x256xf32>
      %76 = arith.subf %75, %74 : vector<256x256xf32>
      %cst_21 = arith.constant 0.000000e+00 : f32
      %77 = vector.broadcast %cst_21 : f32 to vector<256x256xf32>
      %78 = arith.maximumf %76, %77 : vector<256x256xf32>
      %79 = arith.mulf %70, %78 : vector<256x256xf32>
      %80 = arith.addf %60, %79 : vector<256x256xf32>
      %81 = vector.extract_strided_slice %19 {offsets = [0, 3], sizes = [256, 1], strides = [1, 1]} : vector<256x8xf32> to vector<256x1xf32>
      %82 = vector.extract_strided_slice %19 {offsets = [0, 7], sizes = [256, 1], strides = [1, 1]} : vector<256x8xf32> to vector<256x1xf32>
      %83 = vector.broadcast %81 : vector<256x1xf32> to vector<256x256xf32>
      %84 = vector.broadcast %16 : vector<1x256xf32> to vector<256x256xf32>
      %85 = arith.subf %83, %84 : vector<256x256xf32>
      %86 = math.absf %85 : vector<256x256xf32>
      %cst_22 = arith.constant 1.000000e+00 : f32
      %87 = vector.broadcast %cst_22 : f32 to vector<256x256xf32>
      %88 = arith.subf %87, %86 : vector<256x256xf32>
      %cst_23 = arith.constant 0.000000e+00 : f32
      %89 = vector.broadcast %cst_23 : f32 to vector<256x256xf32>
      %90 = arith.maximumf %88, %89 : vector<256x256xf32>
      %91 = vector.broadcast %82 : vector<256x1xf32> to vector<256x256xf32>
      %92 = vector.broadcast %17 : vector<1x256xf32> to vector<256x256xf32>
      %93 = arith.subf %91, %92 : vector<256x256xf32>
      %94 = math.absf %93 : vector<256x256xf32>
      %cst_24 = arith.constant 1.000000e+00 : f32
      %95 = vector.broadcast %cst_24 : f32 to vector<256x256xf32>
      %96 = arith.subf %95, %94 : vector<256x256xf32>
      %cst_25 = arith.constant 0.000000e+00 : f32
      %97 = vector.broadcast %cst_25 : f32 to vector<256x256xf32>
      %98 = arith.maximumf %96, %97 : vector<256x256xf32>
      %99 = arith.mulf %90, %98 : vector<256x256xf32>
      %100 = arith.addf %80, %99 : vector<256x256xf32>
      %c0_26 = arith.constant 0 : index
      %c0_27 = arith.constant 0 : index
      %c0_28 = arith.constant 0 : index
      %101 = vector.load %arg6[%c0_26, %c0_27, %c0_28] : memref<1x256x128xbf16, #tpu.memory_space<vmem>>, vector<1x256x128xbf16>
      %102 = vector.shape_cast %101 : vector<1x256x128xbf16> to vector<256x128xbf16>
      %c0_29 = arith.constant 0 : index
      %c0_30 = arith.constant 0 : index
      %c0_31 = arith.constant 0 : index
      %103 = vector.load %arg7[%c0_29, %c0_30, %c0_31] : memref<1x256x128xf32, #tpu.memory_space<vmem>>, vector<1x256x128xf32>
      %104 = vector.shape_cast %103 : vector<1x256x128xf32> to vector<256x128xf32>
      %105 = arith.truncf %100 : vector<256x256xf32> to vector<256x256xbf16>
      %cst_32 = arith.constant dense<0.000000e+00> : vector<256x128xf32>
      %106 = tpu.matmul %105, %102, %cst_32 {dimension_numbers = #tpu.dot_dimension_numbers<[1], [0], [0], [1], [0, 0, 1, 1], [], []>} : vector<256x256xbf16>, vector<256x128xbf16>, vector<256x128xf32> -> vector<256x128xf32>
      %107 = arith.addf %104, %106 : vector<256x128xf32>
      %c0_33 = arith.constant 0 : index
      %c0_34 = arith.constant 0 : index
      %c0_35 = arith.constant 0 : index
      %108 = vector.load %arg7[%c0_33, %c0_34, %c0_35] : memref<1x256x128xf32, #tpu.memory_space<vmem>>, vector<1x256x128xf32>
      %109 = vector.shape_cast %108 : vector<1x256x128xf32> to vector<256x128xf32>
      %110 = vector.shape_cast %107 : vector<256x128xf32> to vector<1x256x128xf32>
      tpu.vector_store %arg7[%c0_33, %c0_34, %c0_35], %110 {strides = array<i32>} : memref<1x256x128xf32, #tpu.memory_space<vmem>>, vector<1x256x128xf32>,
    } else {
    }
    return
  }
  func.func @transform_0(%arg0: i32, %arg1: i32, %arg2: memref<5x2xi32, #tpu.memory_space<smem>>, %arg3: memref<2x1xi32, #tpu.memory_space<smem>>) -> (i32, i32, i32) {
    %c0_i32 = arith.constant 0 : i32
    %c0_i32_0 = arith.constant 0 : i32
    %c0_i32_1 = arith.constant 0 : i32
    return %arg0, %c0_i32, %c0_i32_0 : i32, i32, i32
  }
  func.func @transform_1(%arg0: i32, %arg1: i32, %arg2: memref<5x2xi32, #tpu.memory_space<smem>>, %arg3: memref<2x1xi32, #tpu.memory_space<smem>>) -> (i32, i32) {
    %c0_i32 = arith.constant 0 : i32
    %c0_i32_0 = arith.constant 0 : i32
    return %c0_i32, %arg1 : i32, i32
  }
  func.func @transform_2(%arg0: i32, %arg1: i32, %arg2: memref<5x2xi32, #tpu.memory_space<smem>>, %arg3: memref<2x1xi32, #tpu.memory_space<smem>>) -> (i32, i32, i32) {
    %c3 = arith.constant 3 : index
    %0 = arith.index_cast %arg0 : i32 to index
    %1 = memref.load %arg2[%c3, %0] : memref<5x2xi32, #tpu.memory_space<smem>>
    %c4 = arith.constant 4 : index
    %2 = arith.index_cast %arg0 : i32 to index
    %3 = memref.load %arg2[%c4, %2] : memref<5x2xi32, #tpu.memory_space<smem>>
    %4 = arith.minsi %arg1, %3 : i32
    %5 = arith.maxsi %1, %4 : i32
    %c0 = arith.constant 0 : index
    %6 = arith.index_cast %arg0 : i32 to index
    %7 = memref.load %arg2[%c0, %6] : memref<5x2xi32, #tpu.memory_space<smem>>
    %c0_i32 = arith.constant 0 : i32
    %c0_i32_0 = arith.constant 0 : i32
    return %7, %5, %c0_i32 : i32, i32, i32
  }
  func.func @transform_3(%arg0: i32, %arg1: i32, %arg2: memref<5x2xi32, #tpu.memory_space<smem>>, %arg3: memref<2x1xi32, #tpu.memory_space<smem>>) -> (i32, i32, i32) {
    %c0_i32 = arith.constant 0 : i32
    %c0_i32_0 = arith.constant 0 : i32
    %c0_i32_1 = arith.constant 0 : i32
    return %arg0, %c0_i32, %c0_i32_0 : i32, i32, i32
  }
}

</mosaic_0001>

<bundles_post_ra>
// kernel: tpu_custom_call.1
= control target key start
LH: loop header
LB: loop body
LE: loop exit
PB: predicated region body
PF: predicated region fallthrough
CT: control target
= control target key end

     0   :  { %s8569_s0 = inlined_call_operand.vmem [shape: s32[5,2], index: 0, kind: input, shape index: {}]   ;;  %s8570_s2 = inlined_call_operand.vmem [shape: f32[2,256,8], index: 2, kind: input, shape index: {}]   ;;  %s8571_s3 = inlined_call_operand.vmem [shape: f32[2,256], index: 3, kind: input, shape index: {}]   ;;  %s8572_s4 = inlined_call_operand.vmem [shape: bf16[2,256,128], index: 4, kind: input, shape index: {}]   ;;  %s8573_s5 = inlined_call_operand.hbm [shape: f32[2,256,128], index: 5, kind: output, shape index: {}]   ;;  %s8574_s1 = inlined_call_operand.vmem [shape: s32[2,1], index: 1, kind: input, shape index: {}]  }
   0x1   :  { %s10_s20 = sshll.u32 %s8569_s0, 4  ;;  %s14_s23 = sshll.u32 %s8574_s1, 4  ;;  %s11_s20 = int_to_ptr.vmem [resolvable:$true] %s10_s20  ;;  %s15_s23 = int_to_ptr.vmem [resolvable:$true] %s14_s23 }
   0x2   :  { %s5032_s24 = scalar_lea.vmem %s11_s20, 128  ;;  %p5037_p1 = scmp.lt.s32.totalorder %s11_s20, %s11_s20 }
   0x3   :  { %p5033_p0 = scmp.ne.s32.totalorder %s11_s20, %s5032_s24  ;;  %p5038_p2 = scmp.lt.s32.totalorder %s5032_s24, %s5032_s24 }
   0x5   :  { %p5039_p3 = por %p5038_p2, %p5037_p1 }
   0x7   :  { %p5040_p4 = pnand %p5039_p3, %p5033_p0 }
   0x9   :  { %5043 = shalt.err (!%p5040_p4)  }
   0xa   :  { %s5136_s25 = smov [#allocation3]   ;;  %s5044_s26 = scalar_lea.vmem %s15_s23, 32 }
   0xb   :  { %13 = dma.vmem_to_smem %s11_s20, 128, %s5136_s25, [#allocation2] }
   0xc   :  { %p5045_p5 = scmp.ne.s32.totalorder %s15_s23, %s5044_s26  ;;  %p5049_p6 = scmp.lt.s32.totalorder %s15_s23, %s15_s23 }
   0xd   :  { %p5050_p7 = scmp.lt.s32.totalorder %s5044_s26, %s5044_s26 }
   0xf   :  { %p5051_p8 = por %p5050_p7, %p5049_p6 }
  0x11   :  { %p5052_p9 = pnand %p5051_p8, %p5045_p5 }
  0x13   :  { %5055 = shalt.err (!%p5052_p9)  }
  0x14   :  { %s5137_s0 = smov [#allocation4]  }
  0x15   :  { %17 = dma.vmem_to_smem %s15_s23, 32, %s5137_s0, [#allocation2] }
  0x16   :  { %5106 = dma.done.wait [#allocation2], 160 }
  0x17   :  { %5107 = vsyncadd [#allocation2], 4294967136 }
  0x18   :  { %19 = sfence }
  0x19   :  { %20 = vsyncpa [#allocation6], 0 }
  0x1a   :  { %22 = vsyncpa [#allocation6 + $0x1], 0  ;;  %s5186_s1 = smov 0   ;;  %s5188_s27 = smov 0  }
  0x1b   :  { %s5190_s28 = smov 0   ;;  %s5192_s29 = smov 0  }
  0x1c   :  { %s5194_s30 = smov 0   ;;  %s5196_s6 = smov 0  }
  0x1d LB: > { %8607 = sst [smem:[#allocation9_spill]] %s5114_s1  ;;  %s4641_s7 = sadd.s32 4294967295, %s5134_s6   ;;  %s5134_s6 = sphi %s5196_s6, %s28_s6   ;;  %s5130_s30 = sphi %s5194_s30, %s9238_s30   ;;  %s5126_s29 = sphi %s5192_s29, %s9237_s29   ;;  %s5122_s28 = sphi %s5190_s28, %s9236_s28   ;;  %s5118_s27 = sphi %s5188_s27, %s9240_s27   ;;  %s5114_s1 = sphi %s5186_s1, %s9239_s1  }
  0x1e   : > { %8608 = sst [smem:[#allocation10_spill]] %s5122_s28  ;;  %s4642_s8 = sadd.s32 4294967294, %s5134_s6  }
  0x1f   : > { %8609 = sst [smem:[#allocation11_spill]] %s5130_s30  ;;  %s40_s9 = sadd.s32 1, %s5130_s30 }
  0x20   : > { %s161_s10 = sadd.s32 1, %s5122_s28  ;;  %p42_p10 = scmp.ge.s32.totalorder %s40_s9, 2 }
  0x21   : > { %p171_p11 = scmp.ne.s32.totalorder %s5122_s28, %s5118_s27  ;;  %p172_p12 = scmp.eq.s32.totalorder %s4641_s7, 1 }
  0x22   : > { %p177_p13 = scmp.ne.s32.totalorder %s5118_s27, %s5114_s1  ;;  %s9242_s9 = smov (%p42_p10, %s40_s9), 0 }
  0x23   : > { %8610 = sst [smem:[#allocation12_spill]] %s9242_s9  ;;  %p5226_p0 = por %p172_p12, %p171_p11 }
  0x24   : > { %p178_p1 = scmp.eq.s32.totalorder %s4642_s8, 1  ;;  %s158_s12 = ssub.s32 %s5130_s30, %s9242_s9 }
  0x25   : > { %p4652_p2 = scmp.ge.s32.totalorder %s5134_s6, 1  ;;  %p159_p3 = scmp.eq.s32.totalorder %s158_s12, 0 }
  0x26   : > { %p5233_p4 = por %p178_p1, %p177_p13  ;;  %p260_p5 = scmp.lt.s32.totalorder %s5134_s6, 3 }
  0x27   : > { %s5239_s14 = scalar_select %p159_p3, %s5122_s28, %s161_s10  }
  0x28   : > { %s8612_s13 = scalar_select %p5233_p4, 1, 0 }
  0x29   : > { %8614 = sst [smem:[#allocation14_spill]] %s5239_s14  ;;  %p261_p6 = pnand %p4652_p2, %p260_p5 }
  0x2a   : > { %8613 = sst [smem:[#allocation13_spill]] %s8612_s13  ;;  %s8575_s15 = sand.u32 (!%p261_p6), 1, %s5118_s27  }
  0x2b   : > { %264 = sbr.rel (%p261_p6) target bundleno = 1070 (0x42e), region = 32  ;;  %p315_p7 = scmp.lt.s32.totalorder (!%p261_p6), %s5126_s29, 1 }
  0x2c   : > { %s4653_s16 = sshll.u32 (!%p261_p6), %s8575_s15, 8  ;;  %s326_s17 = sshra.s32 (!%p261_p6), %s5126_s29, 7 }
  0x2d   : > { %s5246_s18 = sshll.u32 (!%p261_p6), %s326_s17, 7  ;;  %s5251_s20 = scalar_lea.vmem (!%p261_p6), [#allocation5], %s4653_s16 }
  0x2e   : > { %s4697_s21 = sadd.s32 (!%p261_p6), 384, %s5246_s18  ;;  %s331_s22 = sand.u32 (!%p261_p6), 127, %s5126_s29 }
  0x2f   : > { %s332_s24 = sadd.s32 (!%p261_p6), %s4697_s21, %s331_s22  ;;  %s4699_s8 = sadd.s32 (!%p261_p6), 512, %s5246_s18 }
  0x30   : > { %s5249_s19 = scalar_select %p315_p7, %s5126_s29, 1  ;;  %v5138_v0 = vmov 0.0  }
  0x31   : > { %375 = vst [vmem:[%s5251_s20] sm:$0xff] %v5138_v0  ;;  %376 = vst [vmem:[%s5251_s20 + $0x8] sm:$0xff] %v5138_v0  ;;  %s333_s7 = sld [smem:[#allocation3 + %s332_s24]]  ;;  %s336_s12 = sadd.s32 %s4699_s8, %s331_s22 }
  0x32   : > { %377 = vst [vmem:[%s5251_s20 + $0x10] sm:$0xff] %v5138_v0  ;;  %378 = vst [vmem:[%s5251_s20 + $0x18] sm:$0xff] %v5138_v0  ;;  %s4695_s23 = sshll.u32 %s5249_s19, 8  ;;  %s342_s10 = sld [smem:[#allocation3 + %s5126_s29]] }
  0x33   : > { %379 = vst [vmem:[%s5251_s20 + $0x20] sm:$0xff] %v5138_v0  ;;  %380 = vst [vmem:[%s5251_s20 + $0x28] sm:$0xff] %v5138_v0  ;;  %s5291_s0 = scalar_lea.vmem %s8570_s2, %s4695_s23  ;;  %s4701_s16 = sadd.s32 128, %s5246_s18 }
  0x34   : > { %381 = vst [vmem:[%s5251_s20 + $0x30] sm:$0xff] %v5138_v0  ;;  %382 = vst [vmem:[%s5251_s20 + $0x38] sm:$0xff] %v5138_v0  ;;  %s337_s17 = sld [smem:[#allocation3 + %s336_s12]]  ;;  %s413_s15 = sadd.s32 %s4701_s16, %s331_s22 }
  0x35   : > { %383 = vst [vmem:[%s5251_s20 + $0x40] sm:$0xff] %v5138_v0  ;;  %384 = vst [vmem:[%s5251_s20 + $0x48] sm:$0xff] %v5138_v0  ;;  %s414_s9 = sld [smem:[#allocation3 + %s413_s15]]  ;;  %s4703_s30 = sadd.s32 256, %s5246_s18 }
  0x36   : > { %385 = vst [vmem:[%s5251_s20 + $0x50] sm:$0xff] %v5138_v0  ;;  %386 = vst [vmem:[%s5251_s20 + $0x58] sm:$0xff] %v5138_v0  ;;  %s417_s14 = sadd.s32 %s4703_s30, %s331_s22  ;;  %s419_s28 = sld [smem:[#allocation4]] }
  0x37   : > { %387 = vst [vmem:[%s5251_s20 + $0x60] sm:$0xff] %v5138_v0  ;;  %388 = vst [vmem:[%s5251_s20 + $0x68] sm:$0xff] %v5138_v0  ;;  %s418_s13 = sld [smem:[#allocation3 + %s417_s14]] }
  0x38   : > { %389 = vst [vmem:[%s5251_s20 + $0x70] sm:$0xff] %v5138_v0  ;;  %390 = vst [vmem:[%s5251_s20 + $0x78] sm:$0xff] %v5138_v0  ;;  %s4664_s1 = sld [smem:[#allocation4 + $0x80]]  ;;  %p344_p9 = scmp.lt.s32.totalorder %s342_s10, 1 }
  0x39   : > { %391 = vst [vmem:[%s5251_s20 + $0x80] sm:$0xff] %v5138_v0  ;;  %392 = vst [vmem:[%s5251_s20 + $0x88] sm:$0xff] %v5138_v0 }
  0x3a   : > { %393 = vst [vmem:[%s5251_s20 + $0x90] sm:$0xff] %v5138_v0  ;;  %394 = vst [vmem:[%s5251_s20 + $0x98] sm:$0xff] %v5138_v0  ;;  %p4658_p8 = scmp.gt.s32.totalorder %s337_s17, 0  ;;  %s9246_s10 = smov (!%p344_p9, %s342_s10), 1 }
  0x3b   : > { %395 = vst [vmem:[%s5251_s20 + $0xa0] sm:$0xff] %v5138_v0  ;;  %396 = vst [vmem:[%s5251_s20 + $0xa8] sm:$0xff] %v5138_v0  ;;  %s4660_s21 = sshll.u32 %s9246_s10, 5 }
  0x3c   : > { %397 = vst [vmem:[%s5251_s20 + $0xb0] sm:$0xff] %v5138_v0  ;;  %398 = vst [vmem:[%s5251_s20 + $0xb8] sm:$0xff] %v5138_v0  ;;  %s9244_s17 = smov (%p4658_p8, %s337_s17), 0 }
  0x3d   : > { %399 = vst [vmem:[%s5251_s20 + $0xc0] sm:$0xff] %v5138_v0  ;;  %400 = vst [vmem:[%s5251_s20 + $0xc8] sm:$0xff] %v5138_v0  ;;  %p428_p10 = scmp.le.s32.totalorder %s419_s28, %s418_s13  ;;  %p340_p11 = scmp.gt.s32.totalorder %s333_s7, %s9244_s17 }
  0x3e   : > { %401 = vst [vmem:[%s5251_s20 + $0xd0] sm:$0xff] %v5138_v0  ;;  %402 = vst [vmem:[%s5251_s20 + $0xd8] sm:$0xff] %v5138_v0  ;;  %p429_p12 = scmp.ge.s32.totalorder %s4664_s1, %s414_s9 }
  0x3f   : > { %403 = vst [vmem:[%s5251_s20 + $0xe0] sm:$0xff] %v5138_v0  ;;  %404 = vst [vmem:[%s5251_s20 + $0xe8] sm:$0xff] %v5138_v0  ;;  %s9248_s7 = smov (!%p340_p11, %s333_s7), %s9244_s17 }
  0x40   : > { %405 = vst [vmem:[%s5251_s20 + $0xf0] sm:$0xff] %v5138_v0  ;;  %406 = vst [vmem:[%s5251_s20 + $0xf8] sm:$0xff] %v5138_v0  ;;  %p430_p13 = pnand %p429_p12, %p428_p10  ;;  %s4659_s19 = sshll.u32 %s9248_s7, 5 }
  0x41   : > { %p346_p1 = scmp.lt.s32.totalorder %s4659_s19, 31 }
  0x42   : > { %433 = sbr.rel (%p430_p13) target bundleno = 1045 (0x415), region = 40 }
  0x43   : > { %s9250_s19 = smov (!%p346_p1, %s4659_s19), 31 }
  0x44   : > { %s349_s23 = sadd.s32 %s4660_s21, %s9250_s19 }
  0x45   : > { %s4661_s15 = sshll.u32 %s349_s23, 2 }
  0x46   : > { %s5300_s14 = scalar_lea.vmem %s8572_s4, %s4661_s15 }
  0x47   : > { %v5303_v1 = vld [vmem:[%s5291_s0 + $0x10] sm:$0xff]  ;;  %v5306_v2 = vld [vmem:[%s5291_s0] sm:$0xff]  ;;  %v5139_v3 = vmov 0   ;;  %v5311_v4 = vld [vmem:[%s5291_s0 + $0x18] sm:$0xff]  ;;  %v5140_v34 = vmov 4   ;;  %v630_v35 = vlaneseq  ;;  %v5141_v57 = vmov 1  }
  0x48   : > { %4902 = vset.pattern.permute.xlu1 %v5139_v3  ;;  %4901 = vset.pattern.permute.xlu0 %v5139_v3  ;;  %v5314_v5 = vld [vmem:[%s5291_s0 + $0x8] sm:$0xff]  ;;  %v5322_v7 = vld [vmem:[%s5291_s0 + $0x20] sm:$0xff]  ;;  %v5327_v8 = vld [vmem:[%s5291_s0 + $0x38] sm:$0xff] }
  0x49   : > { %481 = vperm.xlu1 %4902, %v5303_v1   ;;  %471 = vperm.xlu0 %4901, %v5306_v2   ;;  %v5319_v6 = vld [vmem:[%s5291_s0 + $0x28] sm:$0xff]  ;;  %v5330_v9 = vld [vmem:[%s5291_s0 + $0x30] sm:$0xff]  ;;  %v5336_v11 = vld [vmem:[%s5291_s0 + $0x40] sm:$0xff]  ;;  %v631_v36 = vshrl.u32 %v630_v35, 7 }
  0x4a   : > { %v5333_v10 = vld [vmem:[%s5291_s0 + $0x48] sm:$0xff]  ;;  %v5341_v12 = vld [vmem:[%s5291_s0 + $0x58] sm:$0xff]  ;;  %v5344_v13 = vld [vmem:[%s5291_s0 + $0x50] sm:$0xff] }
  0x4b   : > { %v5351_v14 = vld [vmem:[%s5291_s0 + $0x68] sm:$0xff]  ;;  %v5354_v15 = vld [vmem:[%s5291_s0 + $0x60] sm:$0xff]  ;;  %v5359_v16 = vld [vmem:[%s5291_s0 + $0x78] sm:$0xff]  ;;  %v632_v37 = vsub.s32 0, %v631_v36  ;;  %v636_v38 = vsub.s32 1, %v631_v36 }
  0x4c   : > { %v5362_v17 = vld [vmem:[%s5291_s0 + $0x70] sm:$0xff]  ;;  %v5367_v18 = vld [vmem:[%s5291_s0 + $0x88] sm:$0xff]  ;;  %v5370_v19 = vld [vmem:[%s5291_s0 + $0x80] sm:$0xff] }
  0x4d   : > { %486 = vperm.xlu1 %4902, %v5311_v4   ;;  %476 = vperm.xlu0 %4901, %v5314_v5   ;;  %v5375_v20 = vld [vmem:[%s5291_s0 + $0x98] sm:$0xff]  ;;  %v5378_v21 = vld [vmem:[%s5291_s0 + $0x90] sm:$0xff]  ;;  %v5383_v22 = vld [vmem:[%s5291_s0 + $0xa8] sm:$0xff] }
  0x4e   : > { %v5386_v23 = vld [vmem:[%s5291_s0 + $0xa0] sm:$0xff]  ;;  %v5391_v24 = vld [vmem:[%s5291_s0 + $0xb8] sm:$0xff]  ;;  %v5394_v25 = vld [vmem:[%s5291_s0 + $0xb0] sm:$0xff] }
  0x4f   : > { %v5399_v26 = vld [vmem:[%s5291_s0 + $0xc8] sm:$0xff]  ;;  %v5402_v27 = vld [vmem:[%s5291_s0 + $0xc0] sm:$0xff]  ;;  %v5407_v28 = vld [vmem:[%s5291_s0 + $0xd8] sm:$0xff] }
  0x50   : > { %v5410_v29 = vld [vmem:[%s5291_s0 + $0xd0] sm:$0xff]  ;;  %v5415_v30 = vld [vmem:[%s5291_s0 + $0xe8] sm:$0xff]  ;;  %v5418_v31 = vld [vmem:[%s5291_s0 + $0xe0] sm:$0xff] }
  0x51   : > { %496 = vperm.xlu1 %4902, %v5319_v6   ;;  %491 = vperm.xlu0 %4901, %v5322_v7   ;;  %v5423_v32 = vld [vmem:[%s5291_s0 + $0xf8] sm:$0xff]  ;;  %v5426_v33 = vld [vmem:[%s5291_s0 + $0xf0] sm:$0xff]  ;;  %v434_v39 = vld [vmem:[%s8571_s3] ss:$2 sm:$0x3] }
  0x52   : > { %v5461_v40 = vrot.slane %v434_v39, %v632_v37  ;;  %v5463_v41 = vrot.slane %v434_v39, %v636_v38  ;;  %v4665_v53 = vld [vmem:[%s8571_s3 + $0x1] ss:$2 sm:$0x3] }
  0x53   : > { %v5482_v3 = vrot.slane %v4665_v53, %v632_v37  ;;  %v5486_v39 = vrot.slane %v4665_v53, %v636_v38 }
  0x54   : > { %8615 = vst [vmem:[#allocation15_spill] sm:$0xff] %v5461_v40  ;;  %8616 = vst [vmem:[#allocation16_spill] sm:$0xff] %v5463_v41 }
  0x55   : > { %506 = vperm.xlu1 %4902, %v5327_v8   ;;  %501 = vperm.xlu0 %4901, %v5330_v9  }
  0x59   : > { %516 = vperm.xlu1 %4902, %v5333_v10   ;;  %511 = vperm.xlu0 %4901, %v5336_v11  }
  0x5d   : > { %526 = vperm.xlu1 %4902, %v5341_v12   ;;  %521 = vperm.xlu0 %4901, %v5344_v13  }
  0x61   : > { %536 = vperm.xlu1 %4902, %v5351_v14   ;;  %531 = vperm.xlu0 %4901, %v5354_v15  }
  0x65   : > { %546 = vperm.xlu1 %4902, %v5359_v16   ;;  %541 = vperm.xlu0 %4901, %v5362_v17  }
  0x69   : > { %556 = vperm.xlu1 %4902, %v5367_v18   ;;  %551 = vperm.xlu0 %4901, %v5370_v19  }
  0x6d   : > { %566 = vperm.xlu1 %4902, %v5375_v20   ;;  %561 = vperm.xlu0 %4901, %v5378_v21  }
  0x71   : > { %576 = vperm.xlu1 %4902, %v5383_v22   ;;  %571 = vperm.xlu0 %4901, %v5386_v23  }
  0x75   : > { %586 = vperm.xlu1 %4902, %v5391_v24   ;;  %581 = vperm.xlu0 %4901, %v5394_v25  }
  0x79   : > { %596 = vperm.xlu1 %4902, %v5399_v26   ;;  %591 = vperm.xlu0 %4901, %v5402_v27  }
  0x7d   : > { %606 = vperm.xlu1 %4902, %v5407_v28   ;;  %601 = vperm.xlu0 %4901, %v5410_v29  }
  0x81   : > { %616 = vperm.xlu1 %4902, %v5415_v30   ;;  %611 = vperm.xlu0 %4901, %v5418_v31  }
  0x85   : > { %626 = vperm.xlu1 %4902, %v5423_v32   ;;  %621 = vperm.xlu0 %4901, %v5426_v33  }
  0x89   : > { %4904 = vset.pattern.permute.xlu1 %v5140_v34  ;;  %4903 = vset.pattern.permute.xlu0 %v5140_v34 }
  0x8a   : > { %901 = vperm.xlu1 %4904, %v5314_v5   ;;  %897 = vperm.xlu0 %4903, %v5306_v2  }
  0x8e   : > { %905 = vperm.xlu1 %4904, %v5303_v1   ;;  %909 = vperm.xlu0 %4903, %v5311_v4  }
  0x92   : > { %913 = vperm.xlu1 %4904, %v5322_v7   ;;  %917 = vperm.xlu0 %4903, %v5319_v6  }
  0x96   : > { %921 = vperm.xlu1 %4904, %v5330_v9   ;;  %925 = vperm.xlu0 %4903, %v5327_v8  }
  0x9a   : > { %929 = vperm.xlu1 %4904, %v5336_v11   ;;  %933 = vperm.xlu0 %4903, %v5333_v10  }
  0x9e   : > { %937 = vperm.xlu1 %4904, %v5344_v13   ;;  %941 = vperm.xlu0 %4903, %v5341_v12  }
  0xa2   : > { %945 = vperm.xlu1 %4904, %v5354_v15   ;;  %949 = vperm.xlu0 %4903, %v5351_v14  }
  0xa6   : > { %953 = vperm.xlu1 %4904, %v5362_v17   ;;  %957 = vperm.xlu0 %4903, %v5359_v16  }
  0xaa   : > { %961 = vperm.xlu1 %4904, %v5370_v19   ;;  %965 = vperm.xlu0 %4903, %v5367_v18  }
  0xae   : > { %969 = vperm.xlu1 %4904, %v5378_v21   ;;  %973 = vperm.xlu0 %4903, %v5375_v20  }
  0xb2   : > { %977 = vperm.xlu1 %4904, %v5386_v23   ;;  %981 = vperm.xlu0 %4903, %v5383_v22  }
  0xb6   : > { %985 = vperm.xlu1 %4904, %v5394_v25   ;;  %989 = vperm.xlu0 %4903, %v5391_v24  }
  0xba   : > { %993 = vperm.xlu1 %4904, %v5402_v27   ;;  %997 = vperm.xlu0 %4903, %v5399_v26  }
  0xbe   : > { %1001 = vperm.xlu1 %4904, %v5410_v29   ;;  %1005 = vperm.xlu0 %4903, %v5407_v28  }
  0xc2   : > { %1009 = vperm.xlu1 %4904, %v5418_v31   ;;  %1013 = vperm.xlu0 %4903, %v5415_v30  }
  0xc4   : > { %v482_v42 = vpop.permute.xlu1 %481  ;;  %v472_v43 = vpop.permute.xlu0 %471 }
  0xc5   : > { %v644_v44 = vsub.f32 %v482_v42, %v5461_v40  ;;  %v645_v45 = vsub.f32 %v482_v42, %v5463_v41  ;;  %v640_v46 = vsub.f32 %v472_v43, %v5461_v40  ;;  %v641_v47 = vsub.f32 %v472_v43, %v5463_v41 }
  0xc6   : > { %1017 = vperm.xlu1 %4904, %v5426_v33   ;;  %1021 = vperm.xlu0 %4903, %v5423_v32  }
  0xc7   : > { %v708_v48 = vand.u32 2147483647, %v644_v44  ;;  %v709_v51 = vand.u32 2147483647, %v645_v45  ;;  %v704_v54 = vand.u32 2147483647, %v640_v46 }
  0xc8   : > { %v487_v49 = vpop.permute.xlu1 %486  ;;  %v477_v50 = vpop.permute.xlu0 %476  ;;  %v705_v58 = vand.u32 2147483647, %v641_v47 }
  0xc9   : > { %v646_v52 = vsub.f32 %v487_v49, %v5461_v40  ;;  %v647_v55 = vsub.f32 %v487_v49, %v5463_v41  ;;  %v642_v56 = vsub.f32 %v477_v50, %v5461_v40  ;;  %v643_v59 = vsub.f32 %v477_v50, %v5463_v41 }
  0xca   : > { %4905 = vset.pattern.permute.xlu1 %v5141_v57  ;;  %4906 = vset.pattern.permute.xlu0 %v5141_v57  ;;  %v772_v60 = vsub.f32 1.0, %v708_v48  ;;  %v773_v34 = vsub.f32 1.0, %v709_v51  ;;  %v768_v42 = vsub.f32 1.0, %v704_v54  ;;  %v769_v46 = vsub.f32 1.0, %v705_v58 }
  0xcb   : > { %1420 = vperm.xlu1 %4905, %v5306_v2   ;;  %1424 = vperm.xlu0 %4906, %v5314_v5   ;;  %v710_v61 = vand.u32 2147483647, %v646_v52  ;;  %v711_v62 = vand.u32 2147483647, %v647_v55  ;;  %v706_v43 = vand.u32 2147483647, %v642_v56 }
  0xcc   : > { %v497_v63 = vpop.permute.xlu1 %496  ;;  %v492_v0 = vpop.permute.xlu0 %491  ;;  %v707_v47 = vand.u32 2147483647, %v643_v59  ;;  %v5492_v37 = vmax.f32 %v772_v60, 0.0  ;;  %v5494_v53 = vmax.f32 %v773_v34, 0.0  ;;  %v5497_v57 = vmax.f32 %v768_v42, 0.0 }
  0xcd   : > { %v650_v35 = vsub.f32 %v497_v63, %v5461_v40  ;;  %v651_v36 = vsub.f32 %v497_v63, %v5463_v41  ;;  %v648_v44 = vsub.f32 %v492_v0, %v5461_v40  ;;  %v649_v45 = vsub.f32 %v492_v0, %v5463_v41 }
  0xce   : > { %v774_v49 = vsub.f32 1.0, %v710_v61  ;;  %v775_v50 = vsub.f32 1.0, %v711_v62  ;;  %v770_v58 = vsub.f32 1.0, %v706_v43  ;;  %v5501_v59 = vmax.f32 %v769_v46, 0.0 }
  0xcf   : > { %v714_v48 = vand.u32 2147483647, %v650_v35  ;;  %1428 = vperm.xlu1 %4905, %v5303_v1   ;;  %1436 = vperm.xlu0 %4906, %v5322_v7   ;;  %v715_v51 = vand.u32 2147483647, %v651_v36  ;;  %v712_v54 = vand.u32 2147483647, %v648_v44 }
  0xd0   : > { %v507_v38 = vpop.permute.xlu1 %506  ;;  %v502_v52 = vpop.permute.xlu0 %501  ;;  %v713_v55 = vand.u32 2147483647, %v649_v45  ;;  %v771_v60 = vsub.f32 1.0, %v707_v47  ;;  %v5506_v63 = vmax.f32 %v774_v49, 0.0  ;;  %v5508_v0 = vmax.f32 %v775_v50, 0.0 }
  0xd1   : > { %v654_v56 = vsub.f32 %v507_v38, %v5461_v40  ;;  %v655_v1 = vsub.f32 %v507_v38, %v5463_v41  ;;  %v652_v7 = vsub.f32 %v502_v52, %v5461_v40  ;;  %v778_v61 = vsub.f32 1.0, %v714_v48 }
  0xd2   : > { %v653_v62 = vsub.f32 %v502_v52, %v5463_v41  ;;  %8617 = vst [vmem:[#allocation17_spill] sm:$0xff] %v5508_v0  ;;  %v779_v34 = vsub.f32 1.0, %v715_v51  ;;  %v776_v43 = vsub.f32 1.0, %v712_v54  ;;  %v777_v44 = vsub.f32 1.0, %v713_v55 }
  0xd3   : > { %1432 = vperm.xlu1 %4905, %v5311_v4   ;;  %1444 = vperm.xlu0 %4906, %v5330_v9   ;;  %v718_v35 = vand.u32 2147483647, %v654_v56  ;;  %v5512_v47 = vmax.f32 %v770_v58, 0.0  ;;  %v719_v48 = vand.u32 2147483647, %v655_v1  ;;  %v5515_v49 = vmax.f32 %v771_v60, 0.0 }
  0xd4   : > { %v517_v36 = vpop.permute.xlu1 %516  ;;  %v512_v42 = vpop.permute.xlu0 %511  ;;  %v716_v38 = vand.u32 2147483647, %v652_v7  ;;  %v5517_v50 = vmax.f32 %v778_v61, 0.0  ;;  %v717_v51 = vand.u32 2147483647, %v653_v62  ;;  %v5522_v54 = vmax.f32 %v779_v34, 0.0 }
  0xd5   : > { %v658_v45 = vsub.f32 %v517_v36, %v5461_v40  ;;  %v659_v46 = vsub.f32 %v517_v36, %v5463_v41  ;;  %v656_v9 = vsub.f32 %v512_v42, %v5461_v40  ;;  %v657_v52 = vsub.f32 %v512_v42, %v5463_v41 }
  0xd6   : > { %8618 = vst [vmem:[#allocation18_spill] sm:$0xff] %v5517_v50  ;;  %8619 = vst [vmem:[#allocation19_spill] sm:$0xff] %v5522_v54  ;;  %v782_v55 = vsub.f32 1.0, %v718_v35  ;;  %v5524_v36 = vmax.f32 %v776_v43, 0.0  ;;  %v5526_v60 = vmax.f32 %v777_v44, 0.0  ;;  %v783_v50 = vsub.f32 1.0, %v719_v48 }
  0xd7   : > { %1440 = vperm.xlu1 %4905, %v5319_v6   ;;  %1452 = vperm.xlu0 %4906, %v5336_v11   ;;  %v722_v56 = vand.u32 2147483647, %v658_v45  ;;  %v723_v58 = vand.u32 2147483647, %v659_v46  ;;  %v720_v61 = vand.u32 2147483647, %v656_v9 }
  0xd8   : > { %v527_v1 = vpop.permute.xlu1 %526  ;;  %v522_v7 = vpop.permute.xlu0 %521  ;;  %8620 = vst [vmem:[#allocation20_spill] sm:$0xff] %v5524_v36  ;;  %8621 = vst [vmem:[#allocation21_spill] sm:$0xff] %v5526_v60  ;;  %v780_v42 = vsub.f32 1.0, %v716_v38  ;;  %v781_v34 = vsub.f32 1.0, %v717_v51  ;;  %v721_v54 = vand.u32 2147483647, %v657_v52 }
  0xd9   : > { %v662_v62 = vsub.f32 %v527_v1, %v5461_v40  ;;  %v663_v0 = vsub.f32 %v527_v1, %v5463_v41  ;;  %v660_v11 = vsub.f32 %v522_v7, %v5461_v40  ;;  %v661_v45 = vsub.f32 %v522_v7, %v5463_v41 }
  0xda   : > { %v5534_v43 = vmax.f32 %v782_v55, 0.0  ;;  %v786_v44 = vsub.f32 1.0, %v722_v56  ;;  %v787_v46 = vsub.f32 1.0, %v723_v58  ;;  %v784_v60 = vsub.f32 1.0, %v720_v61 }
  0xdb   : > { %v726_v35 = vand.u32 2147483647, %v662_v62  ;;  %1448 = vperm.xlu1 %4905, %v5327_v8   ;;  %1460 = vperm.xlu0 %4906, %v5344_v13   ;;  %v727_v9 = vand.u32 2147483647, %v663_v0  ;;  %v724_v1 = vand.u32 2147483647, %v660_v11 }
  0xdc   : > { %v537_v48 = vpop.permute.xlu1 %536  ;;  %v532_v38 = vpop.permute.xlu0 %531  ;;  %v5538_v52 = vmax.f32 %v783_v50, 0.0  ;;  %v5540_v7 = vmax.f32 %v780_v42, 0.0  ;;  %v5544_v55 = vmax.f32 %v781_v34, 0.0  ;;  %v785_v56 = vsub.f32 1.0, %v721_v54 }
  0xdd   : > { %v666_v36 = vsub.f32 %v537_v48, %v5461_v40  ;;  %v667_v51 = vsub.f32 %v537_v48, %v5463_v41  ;;  %v664_v8 = vsub.f32 %v532_v38, %v5461_v40  ;;  %v665_v13 = vsub.f32 %v532_v38, %v5463_v41 }
  0xde   : > { %8622 = vst [vmem:[#allocation22_spill] sm:$0xff] %v5538_v52  ;;  %v790_v0 = vsub.f32 1.0, %v726_v35  ;;  %v725_v58 = vand.u32 2147483647, %v661_v45  ;;  %v5548_v61 = vmax.f32 %v786_v44, 0.0  ;;  %v5550_v62 = vmax.f32 %v787_v46, 0.0 }
  0xdf   : > { %1456 = vperm.xlu1 %4905, %v5333_v10   ;;  %1468 = vperm.xlu0 %4906, %v5354_v15   ;;  %v791_v50 = vsub.f32 1.0, %v727_v9  ;;  %v730_v42 = vand.u32 2147483647, %v666_v36  ;;  %v5552_v52 = vmax.f32 %v784_v60, 0.0  ;;  %v788_v38 = vsub.f32 1.0, %v724_v1 }
  0xe0   : > { %8623 = vst [vmem:[#allocation23_spill] sm:$0xff] %v5548_v61  ;;  %8624 = vst [vmem:[#allocation24_spill] sm:$0xff] %v5550_v62  ;;  %v547_v11 = vpop.permute.xlu1 %546  ;;  %v542_v48 = vpop.permute.xlu0 %541  ;;  %v731_v34 = vand.u32 2147483647, %v667_v51  ;;  %v728_v35 = vand.u32 2147483647, %v664_v8 }
  0xe1   : > { %v670_v54 = vsub.f32 %v547_v11, %v5461_v40  ;;  %v729_v45 = vand.u32 2147483647, %v665_v13  ;;  %v671_v10 = vsub.f32 %v547_v11, %v5463_v41  ;;  %v668_v15 = vsub.f32 %v542_v48, %v5461_v40 }
  0xe2   : > { %v5557_v44 = vmax.f32 %v785_v56, 0.0  ;;  %v5559_v46 = vmax.f32 %v790_v0, 0.0  ;;  %v789_v9 = vsub.f32 1.0, %v725_v58  ;;  %v669_v36 = vsub.f32 %v542_v48, %v5463_v41 }
  0xe3   : > { %1464 = vperm.xlu1 %4905, %v5341_v12   ;;  %1476 = vperm.xlu0 %4906, %v5362_v17   ;;  %v5564_v60 = vmax.f32 %v791_v50, 0.0  ;;  %v794_v1 = vsub.f32 1.0, %v730_v42  ;;  %v734_v51 = vand.u32 2147483647, %v670_v54  ;;  %v735_v8 = vand.u32 2147483647, %v671_v10 }
  0xe4   : > { %8625 = vst [vmem:[#allocation25_spill] sm:$0xff] %v5559_v46  ;;  %v557_v13 = vpop.permute.xlu1 %556  ;;  %v552_v11 = vpop.permute.xlu0 %551  ;;  %v795_v62 = vsub.f32 1.0, %v731_v34  ;;  %v732_v61 = vand.u32 2147483647, %v668_v15  ;;  %v5568_v58 = vmax.f32 %v788_v38, 0.0  ;;  %v792_v48 = vsub.f32 1.0, %v728_v35 }
  0xe5   : > { %8626 = vst [vmem:[#allocation26_spill] sm:$0xff] %v5564_v60  ;;  %v674_v56 = vsub.f32 %v557_v13, %v5461_v40  ;;  %v675_v0 = vsub.f32 %v557_v13, %v5463_v41  ;;  %v793_v46 = vsub.f32 1.0, %v729_v45  ;;  %v672_v12 = vsub.f32 %v552_v11, %v5461_v40 }
  0xe6   : > { %v5571_v17 = vmax.f32 %v789_v9, 0.0  ;;  %v733_v50 = vand.u32 2147483647, %v669_v36  ;;  %v673_v54 = vsub.f32 %v552_v11, %v5463_v41  ;;  %v798_v34 = vsub.f32 1.0, %v734_v51 }
  0xe7   : > { %v738_v42 = vand.u32 2147483647, %v674_v56  ;;  %1472 = vperm.xlu1 %4905, %v5351_v14   ;;  %1484 = vperm.xlu0 %4906, %v5370_v19   ;;  %v799_v10 = vsub.f32 1.0, %v735_v8  ;;  %v739_v15 = vand.u32 2147483647, %v675_v0  ;;  %v5576_v35 = vmax.f32 %v794_v1, 0.0 }
  0xe8   : > { %v736_v13 = vand.u32 2147483647, %v672_v12  ;;  %v567_v38 = vpop.permute.xlu1 %566  ;;  %v562_v60 = vpop.permute.xlu0 %561  ;;  %v5578_v45 = vmax.f32 %v795_v62, 0.0  ;;  %v796_v9 = vsub.f32 1.0, %v732_v61  ;;  %v5581_v56 = vmax.f32 %v792_v48, 0.0 }
  0xe9   : > { %8627 = vst [vmem:[#allocation27_spill] sm:$0xff] %v5576_v35  ;;  %v678_v36 = vsub.f32 %v567_v38, %v5461_v40  ;;  %v5583_v11 = vmax.f32 %v793_v46, 0.0  ;;  %v679_v14 = vsub.f32 %v567_v38, %v5463_v41  ;;  %v676_v19 = vsub.f32 %v562_v60, %v5461_v40 }
  0xea   : > { %8628 = vst [vmem:[#allocation28_spill] sm:$0xff] %v5578_v45  ;;  %v797_v51 = vsub.f32 1.0, %v733_v50  ;;  %v802_v8 = vsub.f32 1.0, %v738_v42  ;;  %v737_v0 = vand.u32 2147483647, %v673_v54  ;;  %v677_v12 = vsub.f32 %v562_v60, %v5463_v41 }
  0xeb   : > { %1480 = vperm.xlu1 %4905, %v5359_v16   ;;  %1492 = vperm.xlu0 %4906, %v5378_v21   ;;  %v5590_v61 = vmax.f32 %v798_v34, 0.0  ;;  %v5592_v62 = vmax.f32 %v799_v10, 0.0  ;;  %v803_v1 = vsub.f32 1.0, %v739_v15  ;;  %v800_v46 = vsub.f32 1.0, %v736_v13 }
  0xec   : > { %v577_v48 = vpop.permute.xlu1 %576  ;;  %v572_v45 = vpop.permute.xlu0 %571  ;;  %v5594_v38 = vmax.f32 %v796_v9, 0.0  ;;  %v742_v35 = vand.u32 2147483647, %v678_v36  ;;  %v743_v60 = vand.u32 2147483647, %v679_v14  ;;  %v5600_v34 = vmax.f32 %v797_v51, 0.0 }
  0xed   : > { %8629 = vst [vmem:[#allocation29_spill] sm:$0xff] %v5590_v61  ;;  %8630 = vst [vmem:[#allocation30_spill] sm:$0xff] %v5592_v62  ;;  %v682_v50 = vsub.f32 %v577_v48, %v5461_v40  ;;  %v683_v42 = vsub.f32 %v577_v48, %v5463_v41  ;;  %v740_v54 = vand.u32 2147483647, %v676_v19  ;;  %v680_v16 = vsub.f32 %v572_v45, %v5461_v40 }
  0xee   : > { %v681_v21 = vsub.f32 %v572_v45, %v5463_v41  ;;  %v5602_v10 = vmax.f32 %v802_v8, 0.0  ;;  %v801_v15 = vsub.f32 1.0, %v737_v0  ;;  %v741_v13 = vand.u32 2147483647, %v677_v12 }
  0xef   : > { %1488 = vperm.xlu1 %4905, %v5367_v18   ;;  %1500 = vperm.xlu0 %4906, %v5386_v23   ;;  %v5606_v9 = vmax.f32 %v803_v1, 0.0  ;;  %v5608_v36 = vmax.f32 %v800_v46, 0.0  ;;  %v746_v14 = vand.u32 2147483647, %v682_v50  ;;  %v747_v19 = vand.u32 2147483647, %v683_v42 }
  0xf0   : > { %8631 = vst [vmem:[#allocation31_spill] sm:$0xff] %v5602_v10  ;;  %v587_v48 = vpop.permute.xlu1 %586  ;;  %v582_v62 = vpop.permute.xlu0 %581  ;;  %v806_v61 = vsub.f32 1.0, %v742_v35  ;;  %v744_v45 = vand.u32 2147483647, %v680_v16  ;;  %v745_v51 = vand.u32 2147483647, %v681_v21 }
  0xf1   : > { %8632 = vst [vmem:[#allocation32_spill] sm:$0xff] %v5606_v9  ;;  %8633 = vst [vmem:[#allocation33_spill] sm:$0xff] %v5608_v36  ;;  %v686_v8 = vsub.f32 %v587_v48, %v5461_v40  ;;  %v807_v10 = vsub.f32 1.0, %v743_v60  ;;  %v804_v0 = vsub.f32 1.0, %v740_v54  ;;  %v687_v12 = vsub.f32 %v587_v48, %v5463_v41 }
  0xf2   : > { %v684_v18 = vsub.f32 %v582_v62, %v5461_v40  ;;  %v5613_v23 = vmax.f32 %v801_v15, 0.0  ;;  %v805_v1 = vsub.f32 1.0, %v741_v13  ;;  %v685_v50 = vsub.f32 %v582_v62, %v5463_v41 }
  0xf3   : > { %v750_v46 = vand.u32 2147483647, %v686_v8  ;;  %1496 = vperm.xlu1 %4905, %v5375_v20   ;;  %1508 = vperm.xlu0 %4906, %v5394_v25   ;;  %v810_v35 = vsub.f32 1.0, %v746_v14  ;;  %v811_v42 = vsub.f32 1.0, %v747_v19  ;;  %v751_v16 = vand.u32 2147483647, %v687_v12 }
  0xf4   : > { %8634 = vst [vmem:[#allocation34_spill] sm:$0xff] %v5613_v23  ;;  %v748_v21 = vand.u32 2147483647, %v684_v18  ;;  %v597_v60 = vpop.permute.xlu1 %596  ;;  %v592_v54 = vpop.permute.xlu0 %591  ;;  %v5618_v9 = vmax.f32 %v806_v61, 0.0  ;;  %v808_v48 = vsub.f32 1.0, %v744_v45  ;;  %v809_v36 = vsub.f32 1.0, %v745_v51 }
  0xf5   : > { %v814_v15 = vsub.f32 1.0, %v750_v46  ;;  %v5620_v23 = vmax.f32 %v807_v10, 0.0  ;;  %v5622_v13 = vmax.f32 %v804_v0, 0.0  ;;  %v690_v62 = vsub.f32 %v597_v60, %v5461_v40 }
  0xf6   : > { %v691_v20 = vsub.f32 %v597_v60, %v5463_v41  ;;  %v5626_v25 = vmax.f32 %v805_v1, 0.0  ;;  %v749_v14 = vand.u32 2147483647, %v685_v50  ;;  %v688_v19 = vsub.f32 %v592_v54, %v5461_v40 }
  0xf7   : > { %v689_v8 = vsub.f32 %v592_v54, %v5463_v41  ;;  %1504 = vperm.xlu1 %4905, %v5383_v22   ;;  %1516 = vperm.xlu0 %4906, %v5402_v27   ;;  %v5632_v61 = vmax.f32 %v810_v35, 0.0  ;;  %v5634_v10 = vmax.f32 %v811_v42, 0.0  ;;  %v815_v45 = vsub.f32 1.0, %v751_v16 }
  0xf8   : > { %v812_v51 = vsub.f32 1.0, %v748_v21  ;;  %v607_v0 = vpop.permute.xlu1 %606  ;;  %v602_v12 = vpop.permute.xlu0 %601  ;;  %v5636_v18 = vmax.f32 %v808_v48, 0.0  ;;  %v5638_v1 = vmax.f32 %v809_v36, 0.0  ;;  %v5640_v46 = vmax.f32 %v814_v15, 0.0 }
  0xf9   : > { %8635 = vst [vmem:[#allocation35_spill] sm:$0xff] %v5632_v61  ;;  %8636 = vst [vmem:[#allocation36_spill] sm:$0xff] %v5634_v10  ;;  %v694_v50 = vsub.f32 %v607_v0, %v5461_v40  ;;  %v754_v60 = vand.u32 2147483647, %v690_v62  ;;  %v755_v22 = vand.u32 2147483647, %v691_v20  ;;  %v695_v27 = vsub.f32 %v607_v0, %v5463_v41 }
  0xfa   : > { %8637 = vst [vmem:[#allocation37_spill] sm:$0xff] %v5638_v1  ;;  %8638 = vst [vmem:[#allocation38_spill] sm:$0xff] %v5640_v46  ;;  %v692_v35 = vsub.f32 %v602_v12, %v5461_v40  ;;  %v813_v42 = vsub.f32 1.0, %v749_v14  ;;  %v752_v54 = vand.u32 2147483647, %v688_v19  ;;  %v693_v21 = vsub.f32 %v602_v12, %v5463_v41 }
  0xfb   : > { %v753_v16 = vand.u32 2147483647, %v689_v8  ;;  %1512 = vperm.xlu1 %4905, %v5391_v24   ;;  %1524 = vperm.xlu0 %4906, %v5410_v29   ;;  %v5648_v36 = vmax.f32 %v815_v45, 0.0  ;;  %v5650_v48 = vmax.f32 %v812_v51, 0.0  ;;  %v758_v15 = vand.u32 2147483647, %v694_v50 }
  0xfc   : > { %v759_v62 = vand.u32 2147483647, %v695_v27  ;;  %v617_v20 = vpop.permute.xlu1 %616  ;;  %v612_v46 = vpop.permute.xlu0 %611  ;;  %v756_v0 = vand.u32 2147483647, %v692_v35  ;;  %v757_v10 = vand.u32 2147483647, %v693_v21 }
  0xfd   : > { %8639 = vst [vmem:[#allocation39_spill] sm:$0xff] %v5648_v36  ;;  %8640 = vst [vmem:[#allocation40_spill] sm:$0xff] %v5650_v48  ;;  %v698_v14 = vsub.f32 %v617_v20, %v5461_v40  ;;  %v699_v19 = vsub.f32 %v617_v20, %v5463_v41  ;;  %v818_v8 = vsub.f32 1.0, %v754_v60  ;;  %v819_v12 = vsub.f32 1.0, %v755_v22 }
  0xfe   : > { %v696_v24 = vsub.f32 %v612_v46, %v5461_v40  ;;  %v697_v29 = vsub.f32 %v612_v46, %v5463_v41  ;;  %v5656_v45 = vmax.f32 %v813_v42, 0.0  ;;  %v816_v51 = vsub.f32 1.0, %v752_v54 }
  0xff   : > { %v817_v36 = vsub.f32 1.0, %v753_v16  ;;  %v762_v50 = vand.u32 2147483647, %v698_v14  ;;  %1520 = vperm.xlu1 %4905, %v5399_v26   ;;  %1532 = vperm.xlu0 %4906, %v5418_v31   ;;  %v822_v27 = vsub.f32 1.0, %v758_v15  ;;  %v823_v35 = vsub.f32 1.0, %v759_v62 }
 0x100   : > { %v763_v21 = vand.u32 2147483647, %v699_v19  ;;  %v760_v48 = vand.u32 2147483647, %v696_v24  ;;  %v627_v20 = vpop.permute.xlu1 %626  ;;  %v622_v60 = vpop.permute.xlu0 %621  ;;  %v820_v22 = vsub.f32 1.0, %v756_v0  ;;  %v821_v61 = vsub.f32 1.0, %v757_v10 }
 0x101   : > { %v761_v1 = vand.u32 2147483647, %v697_v29  ;;  %v702_v46 = vsub.f32 %v627_v20, %v5461_v40  ;;  %v5661_v42 = vmax.f32 %v818_v8, 0.0  ;;  %v5663_v54 = vmax.f32 %v819_v12, 0.0 }
 0x102   : > { %v826_v16 = vsub.f32 1.0, %v762_v50  ;;  %v703_v26 = vsub.f32 %v627_v20, %v5463_v41  ;;  %v5666_v14 = vmax.f32 %v816_v51, 0.0  ;;  %v5668_v31 = vmax.f32 %v817_v36, 0.0 }
 0x103   : > { %v700_v15 = vsub.f32 %v622_v60, %v5461_v40  ;;  %v701_v62 = vsub.f32 %v622_v60, %v5463_v41  ;;  %1528 = vperm.xlu1 %4905, %v5407_v28   ;;  %1540 = vperm.xlu0 %4906, %v5426_v33   ;;  %v5674_v10 = vmax.f32 %v822_v27, 0.0  ;;  %v5676_v0 = vmax.f32 %v823_v35, 0.0 }
 0x104   : > { %v827_v19 = vsub.f32 1.0, %v763_v21  ;;  %v824_v8 = vsub.f32 1.0, %v760_v48  ;;  %v5678_v12 = vmax.f32 %v820_v22, 0.0  ;;  %v5680_v24 = vmax.f32 %v821_v61, 0.0 }
 0x105   : > { %8641 = vst [vmem:[#allocation41_spill] sm:$0xff] %v5674_v10  ;;  %8642 = vst [vmem:[#allocation42_spill] sm:$0xff] %v5676_v0  ;;  %v825_v36 = vsub.f32 1.0, %v761_v1  ;;  %v766_v29 = vand.u32 2147483647, %v702_v46  ;;  %v902_v51 = vpop.permute.xlu1 %901  ;;  %v898_v50 = vpop.permute.xlu0 %897  ;;  %v5682_v20 = vmax.f32 %v826_v16, 0.0 }
 0x106   : > { %v767_v60 = vand.u32 2147483647, %v703_v26  ;;  %v1037_v28 = vsub.f32 %v902_v51, %v5482_v3  ;;  %v1038_v33 = vsub.f32 %v902_v51, %v5486_v39  ;;  %v764_v27 = vand.u32 2147483647, %v700_v15 }
 0x107   : > { %8643 = vst [vmem:[#allocation43_spill] sm:$0xff] %v5682_v20  ;;  %v765_v35 = vand.u32 2147483647, %v701_v62  ;;  %v1035_v21 = vsub.f32 %v898_v50, %v5482_v3  ;;  %v1036_v48 = vsub.f32 %v898_v50, %v5486_v39  ;;  %1536 = vperm.xlu1 %4905, %v5415_v30   ;;  %v5142_v61 = vmov 5  }
 0x108   : > { %4907 = vset.pattern.permute.xlu0 %v5142_v61  ;;  %v5689_v1 = vmax.f32 %v827_v19, 0.0  ;;  %v5691_v22 = vmax.f32 %v824_v8, 0.0  ;;  %v1101_v46 = vand.u32 2147483647, %v1037_v28  ;;  %v1102_v16 = vand.u32 2147483647, %v1038_v33 }
 0x109   : > { %1804 = vperm.xlu0 %4907, %v5306_v2   ;;  %v5694_v26 = vmax.f32 %v825_v36, 0.0  ;;  %v830_v15 = vsub.f32 1.0, %v766_v29  ;;  %v1099_v62 = vand.u32 2147483647, %v1035_v21  ;;  %v1100_v51 = vand.u32 2147483647, %v1036_v48  ;;  %v906_v20 = vpop.permute.xlu1 %905  ;;  %v910_v41 = vpop.permute.xlu0 %909 }
 0x10a   : > { %8644 = vst [vmem:[#allocation44_spill] sm:$0xff] %v5689_v1  ;;  %8645 = vst [vmem:[#allocation45_spill] sm:$0xff] %v5691_v22  ;;  %v831_v50 = vsub.f32 1.0, %v767_v60  ;;  %v1039_v30 = vsub.f32 %v906_v20, %v5482_v3  ;;  %v1040_v40 = vsub.f32 %v906_v20, %v5486_v39  ;;  %v828_v19 = vsub.f32 1.0, %v764_v27 }
 0x10b   : > { %8646 = vst [vmem:[#allocation46_spill] sm:$0xff] %v5694_v26  ;;  %v829_v1 = vsub.f32 1.0, %v765_v35  ;;  %v1041_v8 = vsub.f32 %v910_v41, %v5482_v3  ;;  %v1042_v28 = vsub.f32 %v910_v41, %v5486_v39  ;;  %1544 = vperm.xlu1 %4905, %v5423_v32   ;;  %v1165_v2 = vsub.f32 1.0, %v1101_v46 }
 0x10c   : > { %v1166_v36 = vsub.f32 1.0, %v1102_v16  ;;  %v1103_v29 = vand.u32 2147483647, %v1039_v30  ;;  %v1104_v33 = vand.u32 2147483647, %v1040_v40  ;;  %v1163_v21 = vsub.f32 1.0, %v1099_v62 }
 0x10d   : > { %1816 = vperm.xlu0 %4907, %v5311_v4   ;;  %v1164_v60 = vsub.f32 1.0, %v1100_v51  ;;  %v1105_v48 = vand.u32 2147483647, %v1041_v8  ;;  %v1106_v26 = vand.u32 2147483647, %v1042_v28  ;;  %v914_v22 = vpop.permute.xlu1 %913  ;;  %v918_v20 = vpop.permute.xlu0 %917  ;;  %v5702_v27 = vmax.f32 %v830_v15, 0.0 }
 0x10e   : > { %v5704_v35 = vmax.f32 %v831_v50, 0.0  ;;  %v1167_v0 = vsub.f32 1.0, %v1103_v29  ;;  %v1168_v41 = vsub.f32 1.0, %v1104_v33  ;;  %v5706_v10 = vmax.f32 %v828_v19, 0.0 }
 0x10f   : > { %8647 = vst [vmem:[#allocation47_spill] sm:$0xff] %v5702_v27  ;;  %v5708_v32 = vmax.f32 %v829_v1, 0.0  ;;  %v1169_v46 = vsub.f32 1.0, %v1105_v48  ;;  %v1170_v40 = vsub.f32 1.0, %v1106_v26  ;;  %4908 = vset.pattern.permute.xlu1 %v5142_v61  ;;  %v1229_v4 = vmax.f32 %v1165_v2, 0.0  ;;  %v5719_v48 = vld [vmem:[%s5291_s0 + $0x10] sm:$0xff] }
 0x110   : > { %8648 = vst [vmem:[#allocation48_spill] sm:$0xff] %v5704_v35  ;;  %v1230_v16 = vmax.f32 %v1166_v36, 0.0  ;;  %v1043_v62 = vsub.f32 %v914_v22, %v5482_v3  ;;  %v1044_v51 = vsub.f32 %v914_v22, %v5486_v39  ;;  %1808 = vperm.xlu1 %4908, %v5314_v5   ;;  %v1227_v15 = vmax.f32 %v1163_v21, 0.0 }
 0x111   : > { %1824 = vperm.xlu0 %4907, %v5319_v6   ;;  %v1228_v50 = vmax.f32 %v1164_v60, 0.0  ;;  %v1045_v30 = vsub.f32 %v918_v20, %v5482_v3  ;;  %v1046_v1 = vsub.f32 %v918_v20, %v5486_v39  ;;  %v922_v19 = vpop.permute.xlu1 %921  ;;  %v926_v61 = vpop.permute.xlu0 %925  ;;  %v1231_v26 = vmax.f32 %v1167_v0, 0.0  ;;  %v5723_v20 = vld [vmem:[%s5291_s0 + $0x38] sm:$0xff] }
 0x112   : > { %v1232_v8 = vmax.f32 %v1168_v41, 0.0  ;;  %v1107_v28 = vand.u32 2147483647, %v1043_v62  ;;  %v1108_v2 = vand.u32 2147483647, %v1044_v51  ;;  %v1233_v36 = vmax.f32 %v1169_v46, 0.0 }
 0x113   : > { %v1234_v22 = vmax.f32 %v1170_v40, 0.0  ;;  %v1109_v29 = vand.u32 2147483647, %v1045_v30  ;;  %v1110_v5 = vand.u32 2147483647, %v1046_v1  ;;  %v1047_v21 = vsub.f32 %v922_v19, %v5482_v3 }
 0x114   : > { %v1171_v33 = vsub.f32 1.0, %v1107_v28  ;;  %v1172_v6 = vsub.f32 1.0, %v1108_v2  ;;  %v1048_v60 = vsub.f32 %v922_v19, %v5486_v39  ;;  %1812 = vperm.xlu1 %4908, %v5719_v48   ;;  %v1049_v46 = vsub.f32 %v926_v61, %v5482_v3 }
 0x115   : > { %1832 = vperm.xlu0 %4907, %v5723_v20   ;;  %v1173_v0 = vsub.f32 1.0, %v1109_v29  ;;  %v1174_v41 = vsub.f32 1.0, %v1110_v5  ;;  %v1050_v40 = vsub.f32 %v926_v61, %v5486_v39  ;;  %v930_v62 = vpop.permute.xlu1 %929  ;;  %v934_v51 = vpop.permute.xlu0 %933  ;;  %v5729_v30 = vmul.f32 %v1229_v4, %v5512_v47 }
 0x116   : > { %v5732_v1 = vmul.f32 %v1230_v16, %v5515_v49  ;;  %v1111_v19 = vand.u32 2147483647, %v1047_v21  ;;  %v1112_v28 = vand.u32 2147483647, %v1048_v60  ;;  %v5735_v2 = vmul.f32 %v1227_v15, %v5497_v57  ;;  %v5747_v49 = vld [vmem:[%s5291_s0 + $0x20] sm:$0xff]  ;;  %v5751_v16 = vld [vmem:[%s5291_s0 + $0x48] sm:$0xff] }
 0x117   : > { %8649 = vst [vmem:[#allocation49_spill] sm:$0xff] %v5729_v30  ;;  %v5738_v29 = vmul.f32 %v1228_v50, %v5501_v59  ;;  %v1113_v5 = vand.u32 2147483647, %v1049_v46  ;;  %v1114_v35 = vand.u32 2147483647, %v1050_v40  ;;  %v5741_v61 = vmul.f32 %v1231_v26, %v5492_v37  ;;  %v8656_v59 = vld [vmem:[#allocation17_spill] sm:$0xff] }
 0x118   : > { %8650 = vst [vmem:[#allocation50_spill] sm:$0xff] %v5732_v1  ;;  %8651 = vst [vmem:[#allocation51_spill] sm:$0xff] %v5735_v2  ;;  %v5744_v27 = vmul.f32 %v1232_v8, %v5494_v53  ;;  %v1235_v47 = vmax.f32 %v1171_v33, 0.0  ;;  %v1236_v4 = vmax.f32 %v1172_v6, 0.0  ;;  %1820 = vperm.xlu1 %4908, %v5747_v49   ;;  %v5755_v57 = vmul.f32 %v1233_v36, %v5506_v63  ;;  %v8671_v30 = vld [vmem:[#allocation22_spill] sm:$0xff]  ;;  %v5825_v2 = vld [vmem:[%s5291_s0 + $0x60] sm:$0xff] }
 0x119   : > { %8652 = vst [vmem:[#allocation52_spill] sm:$0xff] %v5738_v29  ;;  %8653 = vst [vmem:[#allocation53_spill] sm:$0xff] %v5741_v61  ;;  %1840 = vperm.xlu0 %4907, %v5751_v16   ;;  %v5758_v15 = vmul.f32 %v1234_v22, %v8656_v59  ;;  %v1237_v37 = vmax.f32 %v1173_v0, 0.0  ;;  %v1238_v53 = vmax.f32 %v1174_v41, 0.0  ;;  %v938_v50 = vpop.permute.xlu1 %937  ;;  %v942_v26 = vpop.permute.xlu0 %941  ;;  %v1175_v8 = vsub.f32 1.0, %v1111_v19  ;;  %v8658_v22 = vld [vmem:[#allocation20_spill] sm:$0xff] }
 0x11a   : > { %8654 = vst [vmem:[#allocation54_spill] sm:$0xff] %v5744_v27  ;;  %8655 = vst [vmem:[#allocation55_spill] sm:$0xff] %v5755_v57  ;;  %v1176_v33 = vsub.f32 1.0, %v1112_v28  ;;  %v1051_v6 = vsub.f32 %v930_v62, %v5482_v3  ;;  %v1052_v21 = vsub.f32 %v930_v62, %v5486_v39  ;;  %v1177_v60 = vsub.f32 1.0, %v1113_v5  ;;  %v8660_v0 = vld [vmem:[#allocation21_spill] sm:$0xff]  ;;  %v5775_v28 = vld [vmem:[%s5291_s0 + $0x58] sm:$0xff] }
 0x11b   : > { %8657 = vst [vmem:[#allocation17_spill] sm:$0xff] %v5758_v15  ;;  %v1178_v46 = vsub.f32 1.0, %v1114_v35  ;;  %v1053_v63 = vsub.f32 %v934_v51, %v5482_v3  ;;  %v1054_v36 = vsub.f32 %v934_v51, %v5486_v39  ;;  %v5765_v40 = vmul.f32 %v1235_v47, %v8658_v22  ;;  %v5771_v19 = vld [vmem:[%s5291_s0 + $0x30] sm:$0xff]  ;;  %8662 = vst [vmem:[#allocation56_spill] sm:$0xff] %v5775_v28  ;;  %v8663_v35 = vld [vmem:[#allocation18_spill] sm:$0xff] }
 0x11c   : > { %v5768_v41 = vmul.f32 %v1236_v4, %v8660_v0  ;;  %v1115_v59 = vand.u32 2147483647, %v1051_v6  ;;  %v1116_v1 = vand.u32 2147483647, %v1052_v21  ;;  %1828 = vperm.xlu1 %4908, %v5771_v19   ;;  %v5779_v62 = vmul.f32 %v1237_v37, %v8663_v35  ;;  %v8665_v51 = vld [vmem:[#allocation19_spill] sm:$0xff] }
 0x11d   : > { %8659 = vst [vmem:[#allocation20_spill] sm:$0xff] %v5765_v40  ;;  %1848 = vperm.xlu0 %4907, %v5775_v28   ;;  %v5782_v5 = vmul.f32 %v1238_v53, %v8665_v51  ;;  %v1117_v47 = vand.u32 2147483647, %v1053_v63  ;;  %v1118_v4 = vand.u32 2147483647, %v1054_v36  ;;  %v946_v22 = vpop.permute.xlu1 %945  ;;  %v950_v6 = vpop.permute.xlu0 %949  ;;  %v1239_v21 = vmax.f32 %v1175_v8, 0.0 }
 0x11e   : > { %8661 = vst [vmem:[#allocation21_spill] sm:$0xff] %v5768_v41  ;;  %8664 = vst [vmem:[#allocation18_spill] sm:$0xff] %v5779_v62  ;;  %v1240_v0 = vmax.f32 %v1176_v33, 0.0  ;;  %v1055_v29 = vsub.f32 %v938_v50, %v5482_v3  ;;  %v1056_v41 = vsub.f32 %v938_v50, %v5486_v39  ;;  %v1241_v40 = vmax.f32 %v1177_v60, 0.0  ;;  %v5789_v36 = vld [vmem:[%s5291_s0 + $0x40] sm:$0xff]  ;;  %v5793_v8 = vld [vmem:[%s5291_s0 + $0x68] sm:$0xff] }
 0x11f   : > { %8666 = vst [vmem:[#allocation19_spill] sm:$0xff] %v5782_v5  ;;  %v1242_v27 = vmax.f32 %v1178_v46, 0.0  ;;  %v1057_v37 = vsub.f32 %v942_v26, %v5482_v3  ;;  %v1058_v35 = vsub.f32 %v942_v26, %v5486_v39  ;;  %v1179_v53 = vsub.f32 1.0, %v1115_v59  ;;  %8667 = vst [vmem:[#allocation57_spill] sm:$0xff] %v5793_v8 }
 0x120   : > { %v1180_v51 = vsub.f32 1.0, %v1116_v1  ;;  %v1119_v63 = vand.u32 2147483647, %v1055_v29  ;;  %v1120_v61 = vand.u32 2147483647, %v1056_v41  ;;  %1836 = vperm.xlu1 %4908, %v5789_v36   ;;  %v1181_v33 = vsub.f32 1.0, %v1117_v47 }
 0x121   : > { %1856 = vperm.xlu0 %4907, %v5793_v8   ;;  %v1182_v50 = vsub.f32 1.0, %v1118_v4  ;;  %v1121_v60 = vand.u32 2147483647, %v1057_v37  ;;  %v1122_v46 = vand.u32 2147483647, %v1058_v35  ;;  %v954_v5 = vpop.permute.xlu1 %953  ;;  %v958_v26 = vpop.permute.xlu0 %957  ;;  %v5797_v1 = vmul.f32 %v1239_v21, %v5540_v7  ;;  %v5811_v21 = vld [vmem:[%s5291_s0 + $0x50] sm:$0xff] }
 0x122   : > { %v5800_v29 = vmul.f32 %v1240_v0, %v5544_v55  ;;  %v1183_v41 = vsub.f32 1.0, %v1119_v63  ;;  %v1184_v59 = vsub.f32 1.0, %v1120_v61  ;;  %v5803_v62 = vmul.f32 %v1241_v40, %v5534_v43  ;;  %v5815_v55 = vld [vmem:[%s5291_s0 + $0x78] sm:$0xff] }
 0x123   : > { %8668 = vst [vmem:[#allocation58_spill] sm:$0xff] %v5797_v1  ;;  %v5806_v47 = vmul.f32 %v1242_v27, %v8671_v30  ;;  %v1185_v4 = vsub.f32 1.0, %v1121_v60  ;;  %v1186_v37 = vsub.f32 1.0, %v1122_v46  ;;  %v1243_v35 = vmax.f32 %v1179_v53, 0.0  ;;  %8673 = vst [vmem:[#allocation61_spill] sm:$0xff] %v5815_v55 }
 0x124   : > { %8669 = vst [vmem:[#allocation59_spill] sm:$0xff] %v5800_v29  ;;  %8670 = vst [vmem:[#allocation60_spill] sm:$0xff] %v5803_v62  ;;  %v1244_v15 = vmax.f32 %v1180_v51, 0.0  ;;  %v1059_v57 = vsub.f32 %v946_v22, %v5482_v3  ;;  %v1060_v7 = vsub.f32 %v946_v22, %v5486_v39  ;;  %1844 = vperm.xlu1 %4908, %v5811_v21   ;;  %v1245_v43 = vmax.f32 %v1181_v33, 0.0 }
 0x125   : > { %8672 = vst [vmem:[#allocation22_spill] sm:$0xff] %v5806_v47  ;;  %1864 = vperm.xlu0 %4907, %v5815_v55   ;;  %v1246_v61 = vmax.f32 %v1182_v50, 0.0  ;;  %v1061_v27 = vsub.f32 %v950_v6, %v5482_v3  ;;  %v1062_v30 = vsub.f32 %v950_v6, %v5486_v39  ;;  %v962_v40 = vpop.permute.xlu1 %961  ;;  %v5820_v0 = vpop.permute.xlu0 %965  ;;  %v1247_v22 = vmax.f32 %v1183_v41, 0.0  ;;  %v5829_v6 = vld [vmem:[%s5291_s0 + $0x88] sm:$0xff] }
 0x126   : > { %v1248_v53 = vmax.f32 %v1184_v59, 0.0  ;;  %v1123_v51 = vand.u32 2147483647, %v1059_v57  ;;  %v1124_v63 = vand.u32 2147483647, %v1060_v7  ;;  %v1249_v60 = vmax.f32 %v1185_v4, 0.0 }
 0x127   : > { %v1250_v46 = vmax.f32 %v1186_v37, 0.0  ;;  %v1125_v29 = vand.u32 2147483647, %v1061_v27  ;;  %v1126_v1 = vand.u32 2147483647, %v1062_v30  ;;  %v1063_v50 = vsub.f32 %v954_v5, %v5482_v3  ;;  %8674 = vst [vmem:[#allocation62_spill] sm:$0xff] %v5829_v6 }
 0x128   : > { %v1187_v47 = vsub.f32 1.0, %v1123_v51  ;;  %v1188_v33 = vsub.f32 1.0, %v1124_v63  ;;  %v1064_v62 = vsub.f32 %v954_v5, %v5486_v39  ;;  %1852 = vperm.xlu1 %4908, %v5825_v2   ;;  %v1065_v59 = vsub.f32 %v958_v26, %v5482_v3  ;;  %v8677_v63 = vld [vmem:[#allocation23_spill] sm:$0xff] }
 0x129   : > { %1872 = vperm.xlu0 %4907, %v5829_v6   ;;  %v1189_v57 = vsub.f32 1.0, %v1125_v29  ;;  %v1190_v41 = vsub.f32 1.0, %v1126_v1  ;;  %v1066_v4 = vsub.f32 %v958_v26, %v5486_v39  ;;  %v970_v37 = vpop.permute.xlu1 %969  ;;  %v5834_v7 = vpop.permute.xlu0 %973  ;;  %v5837_v5 = vmul.f32 %v1243_v35, %v5552_v52  ;;  %v8679_v1 = vld [vmem:[#allocation24_spill] sm:$0xff] }
 0x12a   : > { %v5840_v27 = vmul.f32 %v1244_v15, %v5557_v44  ;;  %v1127_v30 = vand.u32 2147483647, %v1063_v50  ;;  %v1128_v51 = vand.u32 2147483647, %v1064_v62  ;;  %v5843_v29 = vmul.f32 %v1245_v43, %v8677_v63  ;;  %v5855_v44 = vld [vmem:[%s5291_s0 + $0x70] sm:$0xff]  ;;  %v5859_v15 = vld [vmem:[%s5291_s0 + $0x98] sm:$0xff] }
 0x12b   : > { %8675 = vst [vmem:[#allocation63_spill] sm:$0xff] %v5837_v5  ;;  %v5846_v6 = vmul.f32 %v1246_v61, %v8679_v1  ;;  %v1129_v55 = vand.u32 2147483647, %v1065_v59  ;;  %v1130_v26 = vand.u32 2147483647, %v1066_v4  ;;  %v5849_v8 = vmul.f32 %v1247_v22, %v5568_v58  ;;  %8683 = vst [vmem:[#allocation67_spill] sm:$0xff] %v5859_v15 }
 0x12c   : > { %8676 = vst [vmem:[#allocation64_spill] sm:$0xff] %v5840_v27  ;;  %8678 = vst [vmem:[#allocation23_spill] sm:$0xff] %v5843_v29  ;;  %v5852_v28 = vmul.f32 %v1248_v53, %v5571_v17  ;;  %v1251_v52 = vmax.f32 %v1187_v47, 0.0  ;;  %v1252_v35 = vmax.f32 %v1188_v33, 0.0  ;;  %1860 = vperm.xlu1 %4908, %v5855_v44   ;;  %v8684_v62 = vld [vmem:[#allocation25_spill] sm:$0xff]  ;;  %v8686_v61 = vld [vmem:[#allocation26_spill] sm:$0xff]  ;;  %v1067_v59 = vsub.f32 %v962_v40, %v5482_v3 }
 0x12d   : > { %8680 = vst [vmem:[#allocation24_spill] sm:$0xff] %v5846_v6  ;;  %8681 = vst [vmem:[#allocation65_spill] sm:$0xff] %v5849_v8  ;;  %1880 = vperm.xlu0 %4907, %v5859_v15   ;;  %v5863_v43 = vmul.f32 %v1249_v60, %v8684_v62  ;;  %v5866_v50 = vmul.f32 %v1250_v46, %v8686_v61  ;;  %v1253_v58 = vmax.f32 %v1189_v57, 0.0  ;;  %v1254_v17 = vmax.f32 %v1190_v41, 0.0  ;;  %v5868_v22 = vpop.permute.xlu1 %977  ;;  %v5870_v47 = vpop.permute.xlu0 %981  ;;  %v5885_v62 = vld [vmem:[%s5291_s0 + $0x80] sm:$0xff]  ;;  %v8698_v27 = vld [vmem:[#allocation29_spill] sm:$0xff] }
 0x12e   : > { %8682 = vst [vmem:[#allocation66_spill] sm:$0xff] %v5852_v28  ;;  %v1191_v53 = vsub.f32 1.0, %v1127_v30  ;;  %v1192_v33 = vsub.f32 1.0, %v1128_v51  ;;  %v1068_v4 = vsub.f32 %v962_v40, %v5486_v39  ;;  %v1193_v63 = vsub.f32 1.0, %v1129_v55  ;;  %v5889_v55 = vld [vmem:[%s5291_s0 + $0xa8] sm:$0xff]  ;;  %v8691_v40 = vld [vmem:[#allocation27_spill] sm:$0xff] }
 0x12f   : > { %8685 = vst [vmem:[#allocation25_spill] sm:$0xff] %v5863_v43  ;;  %8687 = vst [vmem:[#allocation26_spill] sm:$0xff] %v5866_v50  ;;  %v1194_v60 = vsub.f32 1.0, %v1130_v26  ;;  %v1069_v46 = vsub.f32 %v5820_v0, %v5482_v3  ;;  %v1070_v57 = vsub.f32 %v5820_v0, %v5486_v39  ;;  %v5879_v41 = vmul.f32 %v1251_v52, %v5581_v56  ;;  %v8693_v0 = vld [vmem:[#allocation28_spill] sm:$0xff]  ;;  %v8709_v29 = vld [vmem:[#allocation31_spill] sm:$0xff] }
 0x130   : > { %v5882_v1 = vmul.f32 %v1252_v35, %v5583_v11  ;;  %v1131_v30 = vand.u32 2147483647, %v1067_v59  ;;  %v1132_v51 = vand.u32 2147483647, %v1068_v4  ;;  %1868 = vperm.xlu1 %4908, %v5885_v62   ;;  %8690 = vst [vmem:[#allocation70_spill] sm:$0xff] %v5889_v55  ;;  %v5893_v26 = vmul.f32 %v1253_v58, %v8691_v40 }
 0x131   : > { %8688 = vst [vmem:[#allocation68_spill] sm:$0xff] %v5879_v41  ;;  %1888 = vperm.xlu0 %4907, %v5889_v55   ;;  %v5896_v61 = vmul.f32 %v1254_v17, %v8693_v0  ;;  %v1133_v56 = vand.u32 2147483647, %v1069_v46  ;;  %v1134_v11 = vand.u32 2147483647, %v1070_v57  ;;  %v5898_v52 = vpop.permute.xlu1 %985  ;;  %v5900_v35 = vpop.permute.xlu0 %989  ;;  %v1255_v59 = vmax.f32 %v1191_v53, 0.0 }
 0x132   : > { %8689 = vst [vmem:[#allocation69_spill] sm:$0xff] %v5882_v1  ;;  %8692 = vst [vmem:[#allocation27_spill] sm:$0xff] %v5893_v26  ;;  %v1256_v4 = vmax.f32 %v1192_v33, 0.0  ;;  %v1071_v1 = vsub.f32 %v970_v37, %v5482_v3  ;;  %v1072_v41 = vsub.f32 %v970_v37, %v5486_v39  ;;  %v1257_v28 = vmax.f32 %v1193_v63, 0.0  ;;  %v5913_v53 = vld [vmem:[%s5291_s0 + $0xb8] sm:$0xff] }
 0x133   : > { %8694 = vst [vmem:[#allocation28_spill] sm:$0xff] %v5896_v61  ;;  %v1258_v58 = vmax.f32 %v1194_v60, 0.0  ;;  %v1073_v17 = vsub.f32 %v5834_v7, %v5482_v3  ;;  %v1074_v46 = vsub.f32 %v5834_v7, %v5486_v39  ;;  %v1195_v57 = vsub.f32 1.0, %v1131_v30  ;;  %v5909_v61 = vld [vmem:[%s5291_s0 + $0x90] sm:$0xff]  ;;  %8695 = vst [vmem:[#allocation71_spill] sm:$0xff] %v5913_v53 }
 0x134   : > { %v1196_v40 = vsub.f32 1.0, %v1132_v51  ;;  %v1135_v0 = vand.u32 2147483647, %v1071_v1  ;;  %v1136_v8 = vand.u32 2147483647, %v1072_v41  ;;  %1876 = vperm.xlu1 %4908, %v5909_v61   ;;  %v1197_v37 = vsub.f32 1.0, %v1133_v56 }
 0x135   : > { %1896 = vperm.xlu0 %4907, %v5913_v53   ;;  %v1198_v33 = vsub.f32 1.0, %v1134_v11  ;;  %v1137_v63 = vand.u32 2147483647, %v1073_v17  ;;  %v1138_v60 = vand.u32 2147483647, %v1074_v46  ;;  %v5916_v26 = vpop.permute.xlu1 %993  ;;  %v5918_v7 = vpop.permute.xlu0 %997  ;;  %v5921_v41 = vmul.f32 %v1255_v59, %v5594_v38  ;;  %v8700_v56 = vld [vmem:[#allocation30_spill] sm:$0xff] }
 0x136   : > { %v5924_v1 = vmul.f32 %v1256_v4, %v5600_v34  ;;  %v1199_v30 = vsub.f32 1.0, %v1135_v0  ;;  %v1200_v51 = vsub.f32 1.0, %v1136_v8  ;;  %v5927_v5 = vmul.f32 %v1257_v28, %v8698_v27  ;;  %v5937_v34 = vld [vmem:[%s5291_s0 + $0xa0] sm:$0xff]  ;;  %v5941_v8 = vld [vmem:[%s5291_s0 + $0xc8] sm:$0xff] }
 0x137   : > { %8696 = vst [vmem:[#allocation72_spill] sm:$0xff] %v5921_v41  ;;  %v5930_v11 = vmul.f32 %v1258_v58, %v8700_v56  ;;  %v1201_v17 = vsub.f32 1.0, %v1137_v63  ;;  %v1202_v46 = vsub.f32 1.0, %v1138_v60  ;;  %v1259_v50 = vmax.f32 %v1195_v57, 0.0  ;;  %8702 = vst [vmem:[#allocation74_spill] sm:$0xff] %v5941_v8 }
 0x138   : > { %8697 = vst [vmem:[#allocation73_spill] sm:$0xff] %v5924_v1  ;;  %8699 = vst [vmem:[#allocation29_spill] sm:$0xff] %v5927_v5  ;;  %v1260_v43 = vmax.f32 %v1196_v40, 0.0  ;;  %v1075_v6 = vsub.f32 %v5868_v22, %v5482_v3  ;;  %v1076_v38 = vsub.f32 %v5868_v22, %v5486_v39  ;;  %1884 = vperm.xlu1 %4908, %v5937_v34   ;;  %v1261_v28 = vmax.f32 %v1197_v37, 0.0  ;;  %v5957_v5 = vld [vmem:[%s5291_s0 + $0xb0] sm:$0xff] }
 0x139   : > { %8701 = vst [vmem:[#allocation30_spill] sm:$0xff] %v5930_v11  ;;  %1904 = vperm.xlu0 %4907, %v5941_v8   ;;  %v1262_v27 = vmax.f32 %v1198_v33, 0.0  ;;  %v1077_v59 = vsub.f32 %v5870_v47, %v5482_v3  ;;  %v1078_v4 = vsub.f32 %v5870_v47, %v5486_v39  ;;  %v5948_v58 = vpop.permute.xlu1 %1001  ;;  %v5950_v22 = vpop.permute.xlu0 %1005  ;;  %v1263_v57 = vmax.f32 %v1199_v30, 0.0  ;;  %8703 = vst [vmem:[#allocation75_spill] sm:$0xff] %v5957_v5  ;;  %v5961_v30 = vld [vmem:[%s5291_s0 + $0xd8] sm:$0xff]  ;;  %v8711_v8 = vld [vmem:[#allocation32_spill] sm:$0xff] }
 0x13a   : > { %v1264_v40 = vmax.f32 %v1200_v51, 0.0  ;;  %v1139_v0 = vand.u32 2147483647, %v1075_v6  ;;  %v1140_v63 = vand.u32 2147483647, %v1076_v38  ;;  %v1265_v60 = vmax.f32 %v1201_v17, 0.0 }
 0x13b   : > { %v1266_v56 = vmax.f32 %v1202_v46, 0.0  ;;  %v1141_v37 = vand.u32 2147483647, %v1077_v59  ;;  %v1142_v33 = vand.u32 2147483647, %v1078_v4  ;;  %v1079_v11 = vsub.f32 %v5898_v52, %v5482_v3  ;;  %8704 = vst [vmem:[#allocation76_spill] sm:$0xff] %v5961_v30 }
 0x13c   : > { %v1203_v1 = vsub.f32 1.0, %v1139_v0  ;;  %v1204_v41 = vsub.f32 1.0, %v1140_v63  ;;  %v1080_v47 = vsub.f32 %v5898_v52, %v5486_v39  ;;  %1892 = vperm.xlu1 %4908, %v5957_v5   ;;  %v1081_v17 = vsub.f32 %v5900_v35, %v5482_v3  ;;  %v8705_v59 = vld [vmem:[#allocation33_spill] sm:$0xff]  ;;  %v8707_v0 = vld [vmem:[#allocation34_spill] sm:$0xff] }
 0x13d   : > { %1912 = vperm.xlu0 %4907, %v5961_v30   ;;  %v1205_v6 = vsub.f32 1.0, %v1141_v37  ;;  %v1206_v51 = vsub.f32 1.0, %v1142_v33  ;;  %v1082_v46 = vsub.f32 %v5900_v35, %v5486_v39  ;;  %v5968_v38 = vpop.permute.xlu1 %1009  ;;  %v5970_v52 = vpop.permute.xlu0 %1013  ;;  %v5973_v4 = vmul.f32 %v1259_v50, %v8705_v59 }
 0x13e   : > { %v5976_v63 = vmul.f32 %v1260_v43, %v8707_v0  ;;  %v1143_v37 = vand.u32 2147483647, %v1079_v11  ;;  %v1144_v33 = vand.u32 2147483647, %v1080_v47  ;;  %v5979_v30 = vmul.f32 %v1261_v28, %v8709_v29  ;;  %v5991_v43 = vld [vmem:[%s5291_s0 + $0xc0] sm:$0xff]  ;;  %v5995_v11 = vld [vmem:[%s5291_s0 + $0xe8] sm:$0xff] }
 0x13f   : > { %8706 = vst [vmem:[#allocation33_spill] sm:$0xff] %v5973_v4  ;;  %v5982_v53 = vmul.f32 %v1262_v27, %v8711_v8  ;;  %v1145_v35 = vand.u32 2147483647, %v1081_v17  ;;  %v1146_v55 = vand.u32 2147483647, %v1082_v46  ;;  %v5985_v15 = vmul.f32 %v1263_v57, %v5622_v13  ;;  %v6023_v0 = vld [vmem:[%s5291_s0 + $0xd0] sm:$0xff] }
 0x140   : > { %8708 = vst [vmem:[#allocation34_spill] sm:$0xff] %v5976_v63  ;;  %8710 = vst [vmem:[#allocation31_spill] sm:$0xff] %v5979_v30  ;;  %v5988_v5 = vmul.f32 %v1264_v40, %v5626_v25  ;;  %v1267_v50 = vmax.f32 %v1203_v1, 0.0  ;;  %v1268_v59 = vmax.f32 %v1204_v41, 0.0  ;;  %1900 = vperm.xlu1 %4908, %v5991_v43   ;;  %v5999_v29 = vmul.f32 %v1265_v60, %v5618_v9 }
 0x141   : > { %8712 = vst [vmem:[#allocation32_spill] sm:$0xff] %v5982_v53  ;;  %8713 = vst [vmem:[#allocation77_spill] sm:$0xff] %v5985_v15  ;;  %1920 = vperm.xlu0 %4907, %v5995_v11   ;;  %v6002_v8 = vmul.f32 %v1266_v56, %v5620_v23  ;;  %v1269_v13 = vmax.f32 %v1205_v6, 0.0  ;;  %v1270_v25 = vmax.f32 %v1206_v51, 0.0  ;;  %v6004_v28 = vpop.permute.xlu1 %1017  ;;  %v1207_v41 = vsub.f32 1.0, %v1143_v37  ;;  %v6010_v40 = vpop.permute.xlu0 %1021  ;;  %v8718_v6 = vld [vmem:[#allocation37_spill] sm:$0xff] }
 0x142   : > { %8714 = vst [vmem:[#allocation78_spill] sm:$0xff] %v5988_v5  ;;  %8715 = vst [vmem:[#allocation79_spill] sm:$0xff] %v5999_v29  ;;  %v1208_v1 = vsub.f32 1.0, %v1144_v33  ;;  %v1083_v27 = vsub.f32 %v5916_v26, %v5482_v3  ;;  %v1084_v57 = vsub.f32 %v5916_v26, %v5486_v39  ;;  %v1209_v9 = vsub.f32 1.0, %v1145_v35  ;;  %v6027_v26 = vld [vmem:[%s5291_s0 + $0xf8] sm:$0xff]  ;;  %v6049_v53 = vld [vmem:[%s5291_s0 + $0xe0] sm:$0xff] }
 0x143   : > { %8716 = vst [vmem:[#allocation80_spill] sm:$0xff] %v6002_v8  ;;  %v1210_v60 = vsub.f32 1.0, %v1146_v55  ;;  %v1085_v23 = vsub.f32 %v5918_v7, %v5482_v3  ;;  %v1086_v56 = vsub.f32 %v5918_v7, %v5486_v39  ;;  %v6017_v47 = vmul.f32 %v1267_v50, %v5636_v18  ;;  %v8720_v55 = vld [vmem:[#allocation35_spill] sm:$0xff]  ;;  %v8722_v7 = vld [vmem:[#allocation36_spill] sm:$0xff] }
 0x144   : > { %v6020_v51 = vmul.f32 %v1268_v59, %v8718_v6  ;;  %v1147_v17 = vand.u32 2147483647, %v1083_v27  ;;  %v1148_v46 = vand.u32 2147483647, %v1084_v57  ;;  %1908 = vperm.xlu1 %4908, %v6023_v0   ;;  %v6031_v37 = vmul.f32 %v1269_v13, %v8720_v55  ;;  %v6053_v5 = vld [vmem:[%s5291_s0 + $0x8] sm:$0xff] }
 0x145   : > { %8717 = vst [vmem:[#allocation81_spill] sm:$0xff] %v6017_v47  ;;  %1928 = vperm.xlu0 %4907, %v6027_v26   ;;  %v6034_v33 = vmul.f32 %v1270_v25, %v8722_v7  ;;  %v1149_v18 = vand.u32 2147483647, %v1085_v23  ;;  %v1150_v35 = vand.u32 2147483647, %v1086_v56  ;;  %v1271_v50 = vmax.f32 %v1207_v41, 0.0 }
 0x146   : > { %8719 = vst [vmem:[#allocation37_spill] sm:$0xff] %v6020_v51  ;;  %8721 = vst [vmem:[#allocation35_spill] sm:$0xff] %v6031_v37  ;;  %v1272_v59 = vmax.f32 %v1208_v1, 0.0  ;;  %v1087_v27 = vsub.f32 %v5948_v58, %v5482_v3  ;;  %v1088_v57 = vsub.f32 %v5948_v58, %v5486_v39  ;;  %v6040_v6 = vpop.permute.xlu1 %1420  ;;  %v6042_v63 = vpop.permute.xlu0 %1424  ;;  %v1273_v13 = vmax.f32 %v1209_v9, 0.0 }
 0x147   : > { %8723 = vst [vmem:[#allocation36_spill] sm:$0xff] %v6034_v33  ;;  %v1274_v55 = vmax.f32 %v1210_v60, 0.0  ;;  %v1089_v25 = vsub.f32 %v5950_v22, %v5482_v3  ;;  %v1090_v41 = vsub.f32 %v5950_v22, %v5486_v39  ;;  %v1211_v1 = vsub.f32 1.0, %v1147_v17  ;;  %v8724_v22 = vld [vmem:[#allocation40_spill] sm:$0xff] }
 0x148   : > { %v1212_v23 = vsub.f32 1.0, %v1148_v46  ;;  %v1151_v56 = vand.u32 2147483647, %v1087_v27  ;;  %v1152_v7 = vand.u32 2147483647, %v1088_v57  ;;  %1916 = vperm.xlu1 %4908, %v6049_v53   ;;  %v5143_v58 = vmov 2  }
 0x149   : > { %4910 = vset.pattern.permute.xlu0 %v5143_v58  ;;  %v1213_v51 = vsub.f32 1.0, %v1149_v18  ;;  %v1214_v9 = vsub.f32 1.0, %v1150_v35  ;;  %v1153_v47 = vand.u32 2147483647, %v1089_v25  ;;  %v1154_v60 = vand.u32 2147483647, %v1090_v41 }
 0x14a   : > { %2320 = vperm.xlu0 %4910, %v6053_v5   ;;  %v6057_v17 = vmul.f32 %v1271_v50, %v8724_v22  ;;  %v6060_v46 = vmul.f32 %v1272_v59, %v5656_v45  ;;  %v1215_v27 = vsub.f32 1.0, %v1151_v56  ;;  %v1216_v57 = vsub.f32 1.0, %v1152_v7  ;;  %v6062_v15 = vpop.permute.xlu1 %1428  ;;  %v6064_v33 = vpop.permute.xlu0 %1436  ;;  %v8727_v18 = vld [vmem:[#allocation38_spill] sm:$0xff]  ;;  %v8729_v25 = vld [vmem:[#allocation39_spill] sm:$0xff]  ;;  %v6077_v56 = vld [vmem:[%s5291_s0 + $0xf0] sm:$0xff] }
 0x14b   : > { %v6067_v35 = vmul.f32 %v1273_v13, %v8727_v18  ;;  %v6070_v41 = vmul.f32 %v1274_v55, %v8729_v25  ;;  %v1217_v37 = vsub.f32 1.0, %v1153_v47  ;;  %v1218_v4 = vsub.f32 1.0, %v1154_v60 }
 0x14c   : > { %8725 = vst [vmem:[#allocation40_spill] sm:$0xff] %v6057_v17  ;;  %8726 = vst [vmem:[#allocation82_spill] sm:$0xff] %v6060_v46  ;;  %v1275_v8 = vmax.f32 %v1211_v1, 0.0  ;;  %v1276_v50 = vmax.f32 %v1212_v23, 0.0  ;;  %v1091_v45 = vsub.f32 %v5968_v38, %v5482_v3  ;;  %v1092_v59 = vsub.f32 %v5968_v38, %v5486_v39  ;;  %1924 = vperm.xlu1 %4908, %v6077_v56  }
 0x14d   : > { %8728 = vst [vmem:[#allocation38_spill] sm:$0xff] %v6067_v35  ;;  %8730 = vst [vmem:[#allocation39_spill] sm:$0xff] %v6070_v41  ;;  %v1277_v7 = vmax.f32 %v1213_v51, 0.0  ;;  %v1278_v13 = vmax.f32 %v1214_v9, 0.0  ;;  %v1093_v55 = vsub.f32 %v5970_v52, %v5482_v3  ;;  %v1094_v47 = vsub.f32 %v5970_v52, %v5486_v39 }
 0x14e   : > { %2332 = vperm.xlu0 %4910, %v5747_v49   ;;  %v1279_v1 = vmax.f32 %v1215_v27, 0.0  ;;  %v1280_v23 = vmax.f32 %v1216_v57, 0.0  ;;  %v1155_v60 = vand.u32 2147483647, %v1091_v45  ;;  %v1156_v22 = vand.u32 2147483647, %v1092_v59  ;;  %v6085_v38 = vpop.permute.xlu1 %1432  ;;  %v6087_v18 = vpop.permute.xlu0 %1444 }
 0x14f   : > { %v1281_v25 = vmax.f32 %v1217_v37, 0.0  ;;  %v1282_v51 = vmax.f32 %v1218_v4, 0.0  ;;  %v1157_v9 = vand.u32 2147483647, %v1093_v55  ;;  %v1158_v46 = vand.u32 2147483647, %v1094_v47 }
 0x150   : > { %v1219_v17 = vsub.f32 1.0, %v1155_v60  ;;  %v1220_v41 = vsub.f32 1.0, %v1156_v22  ;;  %v1095_v52 = vsub.f32 %v6004_v28, %v5482_v3  ;;  %v1096_v49 = vsub.f32 %v6004_v28, %v5486_v39  ;;  %4909 = vset.pattern.permute.xlu1 %v5143_v58  ;;  %v6098_v4 = vld [vmem:[%s5291_s0] sm:$0xff] }
 0x151   : > { %v1221_v27 = vsub.f32 1.0, %v1157_v9  ;;  %v1222_v57 = vsub.f32 1.0, %v1158_v46  ;;  %v1097_v45 = vsub.f32 %v6010_v40, %v5482_v3  ;;  %v1098_v37 = vsub.f32 %v6010_v40, %v5486_v39  ;;  %2316 = vperm.xlu1 %4909, %v6098_v4   ;;  %v8737_v9 = vld [vmem:[#allocation41_spill] sm:$0xff] }
 0x152   : > { %2340 = vperm.xlu0 %4910, %v5771_v19   ;;  %v6103_v59 = vmul.f32 %v1275_v8, %v5666_v14  ;;  %v6106_v28 = vmul.f32 %v1276_v50, %v5668_v31  ;;  %v1159_v58 = vand.u32 2147483647, %v1095_v52  ;;  %v1160_v46 = vand.u32 2147483647, %v1096_v49  ;;  %v6108_v55 = vpop.permute.xlu1 %1440  ;;  %v6110_v47 = vpop.permute.xlu0 %1452  ;;  %v8739_v49 = vld [vmem:[#allocation42_spill] sm:$0xff] }
 0x153   : > { %v6113_v40 = vmul.f32 %v1277_v7, %v5661_v42  ;;  %v6116_v60 = vmul.f32 %v1278_v13, %v5663_v54  ;;  %v1283_v22 = vmax.f32 %v1219_v17, 0.0  ;;  %v1161_v19 = vand.u32 2147483647, %v1097_v45  ;;  %v8741_v17 = vld [vmem:[#allocation15_spill] sm:$0xff]  ;;  %v8742_v13 = vld [vmem:[#allocation16_spill] sm:$0xff] }
 0x154   : > { %8731 = vst [vmem:[#allocation83_spill] sm:$0xff] %v6103_v59  ;;  %8732 = vst [vmem:[#allocation84_spill] sm:$0xff] %v6106_v28  ;;  %v6119_v14 = vmul.f32 %v1279_v1, %v5678_v12  ;;  %v6122_v31 = vmul.f32 %v1280_v23, %v5680_v24  ;;  %v1284_v8 = vmax.f32 %v1220_v41, 0.0  ;;  %v1162_v50 = vand.u32 2147483647, %v1098_v37 }
 0x155   : > { %8733 = vst [vmem:[#allocation85_spill] sm:$0xff] %v6113_v40  ;;  %8734 = vst [vmem:[#allocation86_spill] sm:$0xff] %v6116_v60  ;;  %v6125_v52 = vmul.f32 %v1281_v25, %v8737_v9  ;;  %v6128_v28 = vmul.f32 %v1282_v51, %v8739_v49  ;;  %v1285_v42 = vmax.f32 %v1221_v27, 0.0  ;;  %v1286_v7 = vmax.f32 %v1222_v57, 0.0  ;;  %2324 = vperm.xlu1 %4909, %v5719_v48   ;;  %v8743_v25 = vld [vmem:[#allocation45_spill] sm:$0xff]  ;;  %v8745_v57 = vld [vmem:[#allocation46_spill] sm:$0xff] }
 0x156   : > { %8735 = vst [vmem:[#allocation87_spill] sm:$0xff] %v6119_v14  ;;  %8736 = vst [vmem:[#allocation88_spill] sm:$0xff] %v6122_v31  ;;  %2348 = vperm.xlu0 %4910, %v5789_v36   ;;  %v1223_v54 = vsub.f32 1.0, %v1159_v58  ;;  %v1224_v12 = vsub.f32 1.0, %v1160_v46  ;;  %v1547_v24 = vsub.f32 %v6040_v6, %v8741_v17  ;;  %v1548_v41 = vsub.f32 %v6040_v6, %v8742_v13  ;;  %v6136_v1 = vpop.permute.xlu1 %1448  ;;  %v6138_v23 = vpop.permute.xlu0 %1460  ;;  %v8747_v46 = vld [vmem:[#allocation43_spill] sm:$0xff]  ;;  %v8749_v49 = vld [vmem:[#allocation44_spill] sm:$0xff] }
 0x157   : > { %8738 = vst [vmem:[#allocation41_spill] sm:$0xff] %v6125_v52  ;;  %8740 = vst [vmem:[#allocation42_spill] sm:$0xff] %v6128_v28  ;;  %v6141_v51 = vmul.f32 %v1283_v22, %v8743_v25  ;;  %v1225_v27 = vsub.f32 1.0, %v1161_v19  ;;  %v1549_v48 = vsub.f32 %v6042_v63, %v8741_v17  ;;  %v1550_v36 = vsub.f32 %v6042_v63, %v8742_v13  ;;  %v6157_v25 = vld [vmem:[%s5291_s0 + $0x18] sm:$0xff]  ;;  %v6178_v14 = vld [vmem:[%s5291_s0 + $0x28] sm:$0xff] }
 0x158   : > { %v6148_v45 = vmul.f32 %v1284_v8, %v8745_v57  ;;  %v1226_v37 = vsub.f32 1.0, %v1162_v50  ;;  %v1611_v58 = vand.u32 2147483647, %v1547_v24  ;;  %v1612_v6 = vand.u32 2147483647, %v1548_v41  ;;  %v8753_v28 = vld [vmem:[#allocation56_spill] sm:$0xff] }
 0x159   : > { %8744 = vst [vmem:[#allocation45_spill] sm:$0xff] %v6141_v51  ;;  %v6151_v9 = vmul.f32 %v1285_v42, %v8747_v46  ;;  %v6154_v31 = vmul.f32 %v1286_v7, %v8749_v49  ;;  %v1613_v22 = vand.u32 2147483647, %v1549_v48  ;;  %v1614_v19 = vand.u32 2147483647, %v1550_v36  ;;  %2328 = vperm.xlu1 %4909, %v6157_v25  }
 0x15a   : > { %8746 = vst [vmem:[#allocation46_spill] sm:$0xff] %v6148_v45  ;;  %2356 = vperm.xlu0 %4910, %v5811_v21   ;;  %v1287_v63 = vmax.f32 %v1223_v54, 0.0  ;;  %v1288_v8 = vmax.f32 %v1224_v12, 0.0  ;;  %v1551_v50 = vsub.f32 %v6062_v15, %v8741_v17  ;;  %v1552_v42 = vsub.f32 %v6062_v15, %v8742_v13  ;;  %v6165_v24 = vpop.permute.xlu1 %1456  ;;  %v6167_v7 = vpop.permute.xlu0 %1468 }
 0x15b   : > { %8748 = vst [vmem:[#allocation43_spill] sm:$0xff] %v6151_v9  ;;  %8750 = vst [vmem:[#allocation44_spill] sm:$0xff] %v6154_v31  ;;  %v6169_v41 = vmax.f32 %v1225_v27, 0.0  ;;  %v1675_v48 = vsub.f32 1.0, %v1611_v58  ;;  %v1555_v36 = vsub.f32 %v6064_v33, %v8741_v17  ;;  %v1556_v21 = vsub.f32 %v6064_v33, %v8742_v13 }
 0x15c   : > { %v6175_v54 = vmax.f32 %v1226_v37, 0.0  ;;  %v1676_v12 = vsub.f32 1.0, %v1612_v6  ;;  %v1615_v57 = vand.u32 2147483647, %v1551_v50  ;;  %v1616_v46 = vand.u32 2147483647, %v1552_v42 }
 0x15d   : > { %v1677_v49 = vsub.f32 1.0, %v1613_v22  ;;  %v1678_v15 = vsub.f32 1.0, %v1614_v19  ;;  %v1619_v45 = vand.u32 2147483647, %v1555_v36  ;;  %v1620_v51 = vand.u32 2147483647, %v1556_v21  ;;  %2336 = vperm.xlu1 %4909, %v6178_v14  }
 0x15e   : > { %2364 = vperm.xlu0 %4910, %v5825_v2   ;;  %v6183_v27 = vmul.f32 %v1287_v63, %v5706_v10  ;;  %v6186_v33 = vmul.f32 %v1288_v8, %v5708_v32  ;;  %v1553_v37 = vsub.f32 %v6085_v38, %v8741_v17  ;;  %v1554_v58 = vsub.f32 %v6085_v38, %v8742_v13  ;;  %v6192_v6 = vpop.permute.xlu1 %1464  ;;  %v6194_v22 = vpop.permute.xlu0 %1476 }
 0x15f   : > { %v6196_v19 = vmax.f32 %v1675_v48, 0.0  ;;  %v1679_v50 = vsub.f32 1.0, %v1615_v57  ;;  %v1559_v10 = vsub.f32 %v6087_v18, %v8741_v17  ;;  %v1560_v32 = vsub.f32 %v6087_v18, %v8742_v13 }
 0x160   : > { %8751 = vst [vmem:[#allocation89_spill] sm:$0xff] %v6183_v27  ;;  %8752 = vst [vmem:[#allocation90_spill] sm:$0xff] %v6186_v33  ;;  %v6202_v2 = vmax.f32 %v1676_v12, 0.0  ;;  %v1680_v63 = vsub.f32 1.0, %v1616_v46  ;;  %v1617_v8 = vand.u32 2147483647, %v1553_v37  ;;  %v1557_v18 = vsub.f32 %v6108_v55, %v8741_v17 }
 0x161   : > { %v1618_v42 = vand.u32 2147483647, %v1554_v58  ;;  %v6204_v36 = vmax.f32 %v1677_v49, 0.0  ;;  %v6206_v38 = vmax.f32 %v1678_v15, 0.0  ;;  %v1683_v21 = vsub.f32 1.0, %v1619_v45  ;;  %2344 = vperm.xlu1 %4909, %v5723_v20  }
 0x162   : > { %v1684_v33 = vsub.f32 1.0, %v1620_v51  ;;  %2372 = vperm.xlu0 %4910, %v5855_v44   ;;  %v1623_v48 = vand.u32 2147483647, %v1559_v10  ;;  %v1624_v57 = vand.u32 2147483647, %v1560_v32  ;;  %v1558_v12 = vsub.f32 %v6108_v55, %v8742_v13  ;;  %v6214_v46 = vpop.permute.xlu1 %1472  ;;  %v6216_v49 = vpop.permute.xlu0 %1484 }
 0x163   : > { %v6218_v15 = vmax.f32 %v1679_v50, 0.0  ;;  %v1681_v45 = vsub.f32 1.0, %v1617_v8  ;;  %v1563_v20 = vsub.f32 %v6110_v47, %v8741_v17  ;;  %v1564_v44 = vsub.f32 %v6110_v47, %v8742_v13 }
 0x164   : > { %v6224_v51 = vmax.f32 %v1680_v63, 0.0  ;;  %v1682_v37 = vsub.f32 1.0, %v1618_v42  ;;  %v1621_v58 = vand.u32 2147483647, %v1557_v18  ;;  %v1622_v10 = vand.u32 2147483647, %v1558_v12 }
 0x165   : > { %v6226_v32 = vmax.f32 %v1683_v21, 0.0  ;;  %v6228_v55 = vmax.f32 %v1684_v33, 0.0  ;;  %v1627_v27 = vand.u32 2147483647, %v1563_v20  ;;  %v1628_v31 = vand.u32 2147483647, %v1564_v44  ;;  %2352 = vperm.xlu1 %4909, %v5751_v16  }
 0x166   : > { %2380 = vperm.xlu0 %4910, %v5885_v62   ;;  %v1687_v50 = vsub.f32 1.0, %v1623_v48  ;;  %v1688_v8 = vsub.f32 1.0, %v1624_v57  ;;  %v1561_v47 = vsub.f32 %v6136_v1, %v8741_v17  ;;  %v1562_v63 = vsub.f32 %v6136_v1, %v8742_v13  ;;  %v6236_v42 = vpop.permute.xlu1 %1480  ;;  %v6238_v21 = vpop.permute.xlu0 %1492 }
 0x167   : > { %v6240_v33 = vmax.f32 %v1681_v45, 0.0  ;;  %v1685_v18 = vsub.f32 1.0, %v1621_v58  ;;  %v1567_v16 = vsub.f32 %v6138_v23, %v8741_v17  ;;  %v1568_v62 = vsub.f32 %v6138_v23, %v8742_v13 }
 0x168   : > { %v6246_v48 = vmax.f32 %v1682_v37, 0.0  ;;  %v1686_v57 = vsub.f32 1.0, %v1622_v10  ;;  %v1625_v12 = vand.u32 2147483647, %v1561_v47  ;;  %v1626_v20 = vand.u32 2147483647, %v1562_v63 }
 0x169   : > { %v1691_v44 = vsub.f32 1.0, %v1627_v27  ;;  %v1692_v1 = vsub.f32 1.0, %v1628_v31  ;;  %v1631_v9 = vand.u32 2147483647, %v1567_v16  ;;  %v1632_v59 = vand.u32 2147483647, %v1568_v62  ;;  %2360 = vperm.xlu1 %4909, %v8753_v28  }
 0x16a   : > { %2388 = vperm.xlu0 %4910, %v5909_v61   ;;  %v6250_v45 = vmax.f32 %v1687_v50, 0.0  ;;  %v6252_v58 = vmax.f32 %v1688_v8, 0.0  ;;  %v1565_v23 = vsub.f32 %v6165_v24, %v8741_v17  ;;  %v1566_v37 = vsub.f32 %v6165_v24, %v8742_v13  ;;  %v6258_v10 = vpop.permute.xlu1 %1488  ;;  %v6260_v27 = vpop.permute.xlu0 %1500 }
 0x16b   : > { %v6262_v31 = vmax.f32 %v1685_v18, 0.0  ;;  %v1689_v47 = vsub.f32 1.0, %v1625_v12  ;;  %v1571_v61 = vsub.f32 %v6167_v7, %v8741_v17  ;;  %v1572_v28 = vsub.f32 %v6167_v7, %v8742_v13  ;;  %v8756_v18 = vld [vmem:[#allocation57_spill] sm:$0xff] }
 0x16c   : > { %v6268_v50 = vmax.f32 %v1686_v57, 0.0  ;;  %v1690_v8 = vsub.f32 1.0, %v1626_v20  ;;  %v1629_v63 = vand.u32 2147483647, %v1565_v23  ;;  %v1630_v16 = vand.u32 2147483647, %v1566_v37 }
 0x16d   : > { %v6270_v62 = vmax.f32 %v1691_v44, 0.0  ;;  %v6272_v24 = vmax.f32 %v1692_v1, 0.0  ;;  %v1695_v52 = vsub.f32 1.0, %v1631_v9  ;;  %v1696_v60 = vsub.f32 1.0, %v1632_v59  ;;  %2368 = vperm.xlu1 %4909, %v8756_v18  }
 0x16e   : > { %2396 = vperm.xlu0 %4910, %v5937_v34   ;;  %v1635_v12 = vand.u32 2147483647, %v1571_v61  ;;  %v1636_v40 = vand.u32 2147483647, %v1572_v28  ;;  %v1569_v7 = vsub.f32 %v6192_v6, %v8741_v17  ;;  %v1570_v57 = vsub.f32 %v6192_v6, %v8742_v13  ;;  %v6280_v20 = vpop.permute.xlu1 %1496  ;;  %v6282_v44 = vpop.permute.xlu0 %1508 }
 0x16f   : > { %8754 = vst [vmem:[#allocation56_spill] sm:$0xff] %v6270_v62  ;;  %8755 = vst [vmem:[#allocation91_spill] sm:$0xff] %v6272_v24  ;;  %v6284_v1 = vmax.f32 %v1689_v47, 0.0  ;;  %v1693_v9 = vsub.f32 1.0, %v1629_v63  ;;  %v1575_v59 = vsub.f32 %v6194_v22, %v8741_v17  ;;  %v1576_v34 = vsub.f32 %v6194_v22, %v8742_v13  ;;  %v8759_v47 = vld [vmem:[#allocation61_spill] sm:$0xff]  ;;  %v8760_v63 = vld [vmem:[#allocation75_spill] sm:$0xff] }
 0x170   : > { %v6290_v23 = vmax.f32 %v1690_v8, 0.0  ;;  %v1694_v37 = vsub.f32 1.0, %v1630_v16  ;;  %v1633_v61 = vand.u32 2147483647, %v1569_v7  ;;  %v1634_v28 = vand.u32 2147483647, %v1570_v57 }
 0x171   : > { %v6292_v18 = vmax.f32 %v1695_v52, 0.0  ;;  %v6294_v6 = vmax.f32 %v1696_v60, 0.0  ;;  %v1639_v35 = vand.u32 2147483647, %v1575_v59  ;;  %v1640_v29 = vand.u32 2147483647, %v1576_v34  ;;  %2376 = vperm.xlu1 %4909, %v8759_v47  }
 0x172   : > { %2404 = vperm.xlu0 %4910, %v8760_v63   ;;  %v1699_v30 = vsub.f32 1.0, %v1635_v12  ;;  %v1700_v24 = vsub.f32 1.0, %v1636_v40  ;;  %v1573_v22 = vsub.f32 %v6214_v46, %v8741_v17  ;;  %v1574_v8 = vsub.f32 %v6214_v46, %v8742_v13  ;;  %v6302_v16 = vpop.permute.xlu1 %1504  ;;  %v6304_v52 = vpop.permute.xlu0 %1516  ;;  %v8761_v62 = vld [vmem:[#allocation62_spill] sm:$0xff] }
 0x173   : > { %8757 = vst [vmem:[#allocation57_spill] sm:$0xff] %v6292_v18  ;;  %8758 = vst [vmem:[#allocation92_spill] sm:$0xff] %v6294_v6  ;;  %v6306_v60 = vmax.f32 %v1693_v9, 0.0  ;;  %v1697_v7 = vsub.f32 1.0, %v1633_v61  ;;  %v1579_v57 = vsub.f32 %v6216_v49, %v8741_v17  ;;  %v1580_v12 = vsub.f32 %v6216_v49, %v8742_v13 }
 0x174   : > { %v6312_v40 = vmax.f32 %v1694_v37, 0.0  ;;  %v1698_v59 = vsub.f32 1.0, %v1634_v28  ;;  %v1637_v34 = vand.u32 2147483647, %v1573_v22  ;;  %v1638_v47 = vand.u32 2147483647, %v1574_v8 }
 0x175   : > { %v1703_v63 = vsub.f32 1.0, %v1639_v35  ;;  %v1704_v46 = vsub.f32 1.0, %v1640_v29  ;;  %v1643_v6 = vand.u32 2147483647, %v1579_v57  ;;  %v1644_v18 = vand.u32 2147483647, %v1580_v12  ;;  %2384 = vperm.xlu1 %4909, %v8761_v62  }
 0x176   : > { %2412 = vperm.xlu0 %4910, %v5991_v43   ;;  %v6316_v9 = vmax.f32 %v1699_v30, 0.0  ;;  %v6318_v61 = vmax.f32 %v1700_v24, 0.0  ;;  %v1577_v49 = vsub.f32 %v6236_v42, %v8741_v17  ;;  %v1578_v37 = vsub.f32 %v6236_v42, %v8742_v13  ;;  %v6324_v28 = vpop.permute.xlu1 %1512  ;;  %v6326_v35 = vpop.permute.xlu0 %1524 }
 0x177   : > { %v6328_v29 = vmax.f32 %v1697_v7, 0.0  ;;  %v1701_v22 = vsub.f32 1.0, %v1637_v34  ;;  %v1583_v43 = vsub.f32 %v6238_v21, %v8741_v17  ;;  %v1584_v30 = vsub.f32 %v6238_v21, %v8742_v13  ;;  %v8767_v7 = vld [vmem:[#allocation67_spill] sm:$0xff] }
 0x178   : > { %8762 = vst [vmem:[#allocation61_spill] sm:$0xff] %v6316_v9  ;;  %8763 = vst [vmem:[#allocation75_spill] sm:$0xff] %v6318_v61  ;;  %v6334_v62 = vmax.f32 %v1698_v59, 0.0  ;;  %v1702_v24 = vsub.f32 1.0, %v1638_v47  ;;  %v1641_v8 = vand.u32 2147483647, %v1577_v49  ;;  %v1581_v21 = vsub.f32 %v6258_v10, %v8741_v17 }
 0x179   : > { %8764 = vst [vmem:[#allocation62_spill] sm:$0xff] %v6328_v29  ;;  %v1642_v57 = vand.u32 2147483647, %v1578_v37  ;;  %v6336_v12 = vmax.f32 %v1703_v63, 0.0  ;;  %v6338_v42 = vmax.f32 %v1704_v46, 0.0  ;;  %v1707_v61 = vsub.f32 1.0, %v1643_v6  ;;  %2392 = vperm.xlu1 %4909, %v8767_v7  }
 0x17a   : > { %v1708_v9 = vsub.f32 1.0, %v1644_v18  ;;  %2420 = vperm.xlu0 %4910, %v6023_v0   ;;  %v1647_v34 = vand.u32 2147483647, %v1583_v43  ;;  %v1648_v29 = vand.u32 2147483647, %v1584_v30  ;;  %v1582_v59 = vsub.f32 %v6258_v10, %v8742_v13  ;;  %v6346_v47 = vpop.permute.xlu1 %1520  ;;  %v6348_v63 = vpop.permute.xlu0 %1532 }
 0x17b   : > { %8765 = vst [vmem:[#allocation93_spill] sm:$0xff] %v6336_v12  ;;  %8766 = vst [vmem:[#allocation94_spill] sm:$0xff] %v6338_v42  ;;  %v6350_v46 = vmax.f32 %v1701_v22, 0.0  ;;  %v1705_v6 = vsub.f32 1.0, %v1641_v8  ;;  %v1587_v18 = vsub.f32 %v6260_v27, %v8741_v17  ;;  %v1588_v0 = vsub.f32 %v6260_v27, %v8742_v13  ;;  %v8772_v22 = vld [vmem:[#allocation70_spill] sm:$0xff] }
 0x17c   : > { %v6356_v49 = vmax.f32 %v1702_v24, 0.0  ;;  %v1706_v37 = vsub.f32 1.0, %v1642_v57  ;;  %v1645_v43 = vand.u32 2147483647, %v1581_v21  ;;  %v1646_v30 = vand.u32 2147483647, %v1582_v59 }
 0x17d   : > { %8768 = vst [vmem:[#allocation67_spill] sm:$0xff] %v6350_v46  ;;  %v6358_v7 = vmax.f32 %v1707_v61, 0.0  ;;  %v6360_v10 = vmax.f32 %v1708_v9, 0.0  ;;  %v1651_v42 = vand.u32 2147483647, %v1587_v18  ;;  %2400 = vperm.xlu1 %4909, %v8772_v22   ;;  %v1711_v8 = vsub.f32 1.0, %v1647_v34 }
 0x17e   : > { %8769 = vst [vmem:[#allocation95_spill] sm:$0xff] %v6356_v49  ;;  %v1652_v12 = vand.u32 2147483647, %v1588_v0  ;;  %2428 = vperm.xlu0 %4910, %v6049_v53   ;;  %v1712_v46 = vsub.f32 1.0, %v1648_v29  ;;  %v1585_v27 = vsub.f32 %v6280_v20, %v8741_v17  ;;  %v1586_v24 = vsub.f32 %v6280_v20, %v8742_v13  ;;  %v6368_v57 = vpop.permute.xlu1 %1528  ;;  %v6370_v61 = vpop.permute.xlu0 %1540  ;;  %v8774_v49 = vld [vmem:[#allocation71_spill] sm:$0xff] }
 0x17f   : > { %8770 = vst [vmem:[#allocation96_spill] sm:$0xff] %v6358_v7  ;;  %8771 = vst [vmem:[#allocation97_spill] sm:$0xff] %v6360_v10  ;;  %v6372_v9 = vmax.f32 %v1705_v6, 0.0  ;;  %v1709_v21 = vsub.f32 1.0, %v1645_v43  ;;  %v1591_v59 = vsub.f32 %v6282_v44, %v8741_v17  ;;  %v1592_v53 = vsub.f32 %v6282_v44, %v8742_v13 }
 0x180   : > { %v6378_v29 = vmax.f32 %v1706_v37, 0.0  ;;  %v1710_v34 = vsub.f32 1.0, %v1646_v30  ;;  %v1649_v18 = vand.u32 2147483647, %v1585_v27  ;;  %v1650_v0 = vand.u32 2147483647, %v1586_v24 }
 0x181   : > { %8773 = vst [vmem:[#allocation70_spill] sm:$0xff] %v6372_v9  ;;  %v1715_v22 = vsub.f32 1.0, %v1651_v42  ;;  %v1716_v20 = vsub.f32 1.0, %v1652_v12  ;;  %v1655_v10 = vand.u32 2147483647, %v1591_v59  ;;  %2408 = vperm.xlu1 %4909, %v8774_v49   ;;  %v6382_v6 = vmax.f32 %v1711_v8, 0.0 }
 0x182   : > { %v1656_v7 = vand.u32 2147483647, %v1592_v53  ;;  %2436 = vperm.xlu0 %4910, %v6077_v56   ;;  %v1713_v43 = vsub.f32 1.0, %v1649_v18  ;;  %v1589_v9 = vsub.f32 %v6302_v16, %v8741_v17  ;;  %v1590_v44 = vsub.f32 %v6302_v16, %v8742_v13  ;;  %v6388_v37 = vpop.permute.xlu1 %1536  ;;  %v8780_v18 = vld [vmem:[#allocation74_spill] sm:$0xff] }
 0x183   : > { %8775 = vst [vmem:[#allocation71_spill] sm:$0xff] %v6382_v6  ;;  %v6390_v30 = vmax.f32 %v1712_v46, 0.0  ;;  %v6392_v12 = vmax.f32 %v1709_v21, 0.0  ;;  %v1595_v42 = vsub.f32 %v6304_v52, %v8741_v17  ;;  %v1596_v56 = vsub.f32 %v6304_v52, %v8742_v13 }
 0x184   : > { %v6398_v49 = vpop.permute.xlu0 %1804  ;;  %v1714_v8 = vsub.f32 1.0, %v1650_v0  ;;  %v1719_v27 = vsub.f32 1.0, %v1655_v10  ;;  %v1653_v24 = vand.u32 2147483647, %v1589_v9  ;;  %v1654_v59 = vand.u32 2147483647, %v1590_v44 }
 0x185   : > { %8776 = vst [vmem:[#allocation98_spill] sm:$0xff] %v6390_v30  ;;  %v6400_v53 = vmax.f32 %v1710_v34, 0.0  ;;  %v6402_v16 = vmax.f32 %v1715_v22, 0.0  ;;  %v6404_v46 = vmax.f32 %v1716_v20, 0.0  ;;  %v1720_v21 = vsub.f32 1.0, %v1656_v7  ;;  %2416 = vperm.xlu1 %4909, %v8780_v18  }
 0x186   : > { %v6407_v30 = vmax.f32 %v1713_v43, 0.0  ;;  %v1659_v6 = vand.u32 2147483647, %v1595_v42  ;;  %v1593_v52 = vsub.f32 %v6324_v28, %v8741_v17  ;;  %v1594_v10 = vsub.f32 %v6324_v28, %v8742_v13  ;;  %v6413_v9 = vpop.permute.xlu1 %1544 }
 0x187   : > { %8777 = vst [vmem:[#allocation99_spill] sm:$0xff] %v6400_v53  ;;  %8778 = vst [vmem:[#allocation100_spill] sm:$0xff] %v6402_v16  ;;  %v1717_v34 = vsub.f32 1.0, %v1653_v24  ;;  %v1660_v0 = vand.u32 2147483647, %v1596_v56  ;;  %v1599_v22 = vsub.f32 %v6326_v35, %v8741_v17  ;;  %v1600_v7 = vsub.f32 %v6326_v35, %v8742_v13 }
 0x188   : > { %8779 = vst [vmem:[#allocation101_spill] sm:$0xff] %v6404_v46  ;;  %8781 = vst [vmem:[#allocation74_spill] sm:$0xff] %v6407_v30  ;;  %v6419_v20 = vpop.permute.xlu0 %1816  ;;  %v6421_v43 = vmax.f32 %v1714_v8, 0.0  ;;  %v6423_v44 = vmax.f32 %v1719_v27, 0.0  ;;  %v1718_v42 = vsub.f32 1.0, %v1654_v59  ;;  %v8784_v46 = vld [vmem:[#allocation47_spill] sm:$0xff]  ;;  %v1597_v8 = vsub.f32 %v6346_v47, %v8741_v17 }
 0x189   : > { %v1657_v18 = vand.u32 2147483647, %v1593_v52  ;;  %v6427_v28 = vmul.f32 %v6169_v41, %v8784_v46  ;;  %v1658_v24 = vand.u32 2147483647, %v1594_v10  ;;  %v1663_v56 = vand.u32 2147483647, %v1599_v22 }
 0x18a   : > { %8782 = vst [vmem:[#allocation102_spill] sm:$0xff] %v6421_v43  ;;  %8783 = vst [vmem:[#allocation103_spill] sm:$0xff] %v6423_v44  ;;  %v1664_v16 = vand.u32 2147483647, %v1600_v7  ;;  %v8786_v30 = vld [vmem:[#allocation76_spill] sm:$0xff]  ;;  %v6430_v53 = vmax.f32 %v1720_v21, 0.0  ;;  %v1598_v27 = vsub.f32 %v6346_v47, %v8742_v13  ;;  %v1603_v41 = vsub.f32 %v6348_v63, %v8741_v17 }
 0x18b   : > { %8785 = vst [vmem:[#allocation47_spill] sm:$0xff] %v6427_v28  ;;  %2424 = vperm.xlu1 %4909, %v8786_v30   ;;  %v1723_v35 = vsub.f32 1.0, %v1659_v6  ;;  %v6436_v59 = vmax.f32 %v1717_v34, 0.0  ;;  %v1724_v52 = vsub.f32 1.0, %v1660_v0  ;;  %v1604_v46 = vsub.f32 %v6348_v63, %v8742_v13  ;;  %v6442_v10 = vpop.permute.xlu1 %1808 }
 0x18c   : > { %8787 = vst [vmem:[#allocation76_spill] sm:$0xff] %v6430_v53  ;;  %v6444_v30 = vpop.permute.xlu0 %1824  ;;  %v6446_v6 = vmax.f32 %v1718_v42, 0.0  ;;  %v1721_v21 = vsub.f32 1.0, %v1657_v18  ;;  %v1661_v22 = vand.u32 2147483647, %v1597_v8  ;;  %v1722_v28 = vsub.f32 1.0, %v1658_v24 }
 0x18d   : > { %8788 = vst [vmem:[#allocation104_spill] sm:$0xff] %v6436_v59  ;;  %v1662_v7 = vand.u32 2147483647, %v1598_v27  ;;  %v1727_v47 = vsub.f32 1.0, %v1663_v56  ;;  %v1728_v34 = vsub.f32 1.0, %v1664_v16  ;;  %v1601_v63 = vsub.f32 %v6368_v57, %v8741_v17 }
 0x18e   : > { %v1667_v53 = vand.u32 2147483647, %v1603_v41  ;;  %v1725_v0 = vsub.f32 1.0, %v1661_v22  ;;  %v1668_v44 = vand.u32 2147483647, %v1604_v46  ;;  %v1602_v59 = vsub.f32 %v6368_v57, %v8742_v13 }
 0x18f   : > { %2432 = vperm.xlu1 %4909, %v5995_v11   ;;  %v6453_v43 = vmax.f32 %v1723_v35, 0.0  ;;  %v6455_v42 = vmax.f32 %v1724_v52, 0.0  ;;  %v1607_v18 = vsub.f32 %v6370_v61, %v8741_v17  ;;  %v1608_v16 = vsub.f32 %v6370_v61, %v8742_v13  ;;  %v6461_v24 = vpop.permute.xlu1 %1812 }
 0x190   : > { %v6463_v11 = vpop.permute.xlu0 %1832  ;;  %v6465_v56 = vmax.f32 %v1721_v21, 0.0  ;;  %v1726_v8 = vsub.f32 1.0, %v1662_v7  ;;  %v1665_v27 = vand.u32 2147483647, %v1601_v63  ;;  %v1666_v41 = vand.u32 2147483647, %v1602_v59 }
 0x191   : > { %8789 = vst [vmem:[#allocation105_spill] sm:$0xff] %v6453_v43  ;;  %8790 = vst [vmem:[#allocation106_spill] sm:$0xff] %v6455_v42  ;;  %v6467_v57 = vmax.f32 %v1722_v28, 0.0  ;;  %v6469_v35 = vmax.f32 %v1727_v47, 0.0  ;;  %v6471_v52 = vmax.f32 %v1728_v34, 0.0  ;;  %v1731_v46 = vsub.f32 1.0, %v1667_v53 }
 0x192   : > { %v6474_v22 = vmax.f32 %v1725_v0, 0.0  ;;  %v1732_v61 = vsub.f32 1.0, %v1668_v44  ;;  %v1605_v42 = vsub.f32 %v6388_v37, %v8741_v17  ;;  %v1606_v21 = vsub.f32 %v6388_v37, %v8742_v13 }
 0x193   : > { %8791 = vst [vmem:[#allocation107_spill] sm:$0xff] %v6467_v57  ;;  %8792 = vst [vmem:[#allocation108_spill] sm:$0xff] %v6469_v35  ;;  %2440 = vperm.xlu1 %4909, %v6027_v26   ;;  %v1671_v7 = vand.u32 2147483647, %v1607_v18  ;;  %v1672_v59 = vand.u32 2147483647, %v1608_v16  ;;  %v1931_v28 = vsub.f32 %v6398_v49, %v5482_v3  ;;  %v1932_v47 = vsub.f32 %v6398_v49, %v5486_v39  ;;  %v6484_v53 = vpop.permute.xlu1 %1820 }
 0x194   : > { %8793 = vst [vmem:[#allocation109_spill] sm:$0xff] %v6471_v52  ;;  %8794 = vst [vmem:[#allocation110_spill] sm:$0xff] %v6474_v22  ;;  %v6486_v26 = vpop.permute.xlu0 %1840  ;;  %v6488_v34 = vmax.f32 %v1726_v8, 0.0  ;;  %v1729_v44 = vsub.f32 1.0, %v1665_v27  ;;  %v1730_v0 = vsub.f32 1.0, %v1666_v41  ;;  %v8796_v52 = vld [vmem:[#allocation48_spill] sm:$0xff]  ;;  %v1609_v49 = vsub.f32 %v6413_v9, %v8741_v17 }
 0x195   : > { %v1669_v63 = vand.u32 2147483647, %v1605_v42  ;;  %v6492_v37 = vmul.f32 %v6175_v54, %v8796_v52  ;;  %v1670_v18 = vand.u32 2147483647, %v1606_v21  ;;  %v1995_v16 = vand.u32 2147483647, %v1931_v28 }
 0x196   : > { %8795 = vst [vmem:[#allocation111_spill] sm:$0xff] %v6488_v34  ;;  %v1996_v35 = vand.u32 2147483647, %v1932_v47  ;;  %v6494_v43 = vmax.f32 %v1731_v46, 0.0  ;;  %v6496_v22 = vmax.f32 %v1732_v61, 0.0  ;;  %v1735_v57 = vsub.f32 1.0, %v1671_v7 }
 0x197   : > { %8797 = vst [vmem:[#allocation48_spill] sm:$0xff] %v6492_v37  ;;  %v1736_v8 = vsub.f32 1.0, %v1672_v59  ;;  %v2059_v34 = vsub.f32 1.0, %v1995_v16  ;;  %v8595_v27 = vmov 3   ;;  %v1937_v54 = vsub.f32 %v6419_v20, %v5482_v3  ;;  %v6503_v42 = vpop.permute.xlu1 %1828 }
 0x198   : > { %8798 = vst [vmem:[#allocation112_spill] sm:$0xff] %v6494_v43  ;;  %8799 = vst [vmem:[#allocation113_spill] sm:$0xff] %v6496_v22  ;;  %4913 = vset.pattern.permute.xlu0 %v8595_v27  ;;  %v6505_v41 = vpop.permute.xlu0 %1848  ;;  %v6507_v52 = vmax.f32 %v1729_v44, 0.0  ;;  %v6509_v46 = vmax.f32 %v1730_v0, 0.0  ;;  %v2060_v61 = vsub.f32 1.0, %v1996_v35  ;;  %v1938_v21 = vsub.f32 %v6419_v20, %v5486_v39 }
 0x199   : > { %3216 = vperm.xlu0 %4913, %v6053_v5   ;;  %v1733_v7 = vsub.f32 1.0, %v1669_v63  ;;  %v1734_v59 = vsub.f32 1.0, %v1670_v18  ;;  %v1610_v28 = vsub.f32 %v6413_v9, %v8742_v13  ;;  %v2001_v47 = vand.u32 2147483647, %v1937_v54 }
 0x19a   : > { %8800 = vst [vmem:[#allocation114_spill] sm:$0xff] %v6509_v46  ;;  %v1673_v16 = vand.u32 2147483647, %v1609_v49  ;;  %v2002_v27 = vand.u32 2147483647, %v1938_v21  ;;  %v1933_v44 = vsub.f32 %v6442_v10, %v5482_v3  ;;  %v1934_v35 = vsub.f32 %v6442_v10, %v5486_v39  ;;  %v6529_v49 = vld [vmem:[%s5291_s0 + $0x90] sm:$0xff] }
 0x19b   : > { %v6520_v0 = vmax.f32 %v1735_v57, 0.0  ;;  %v6522_v37 = vmax.f32 %v1736_v8, 0.0  ;;  %v2123_v20 = vmax.f32 %v2059_v34, 0.0  ;;  %v2065_v63 = vsub.f32 1.0, %v2001_v47  ;;  %v6524_v22 = vpop.permute.xlu1 %1836 }
 0x19c   : > { %v6526_v18 = vpop.permute.xlu0 %1856  ;;  %v2124_v9 = vmax.f32 %v2060_v61, 0.0  ;;  %v2066_v54 = vsub.f32 1.0, %v2002_v27  ;;  %v1997_v21 = vand.u32 2147483647, %v1933_v44  ;;  %v1998_v43 = vand.u32 2147483647, %v1934_v35 }
 0x19d   : > { %8801 = vst [vmem:[#allocation115_spill] sm:$0xff] %v6520_v0  ;;  %8802 = vst [vmem:[#allocation116_spill] sm:$0xff] %v6522_v37  ;;  %3284 = vperm.xlu0 %4913, %v6529_v49   ;;  %v6532_v13 = vmax.f32 %v1733_v7, 0.0  ;;  %v6534_v10 = vmax.f32 %v1734_v59, 0.0  ;;  %v1674_v57 = vand.u32 2147483647, %v1610_v28  ;;  %v1941_v34 = vsub.f32 %v6444_v30, %v5482_v3 }
 0x19e   : > { %v1737_v8 = vsub.f32 1.0, %v1673_v16  ;;  %v2129_v47 = vmax.f32 %v2065_v63, 0.0  ;;  %v2061_v37 = vsub.f32 1.0, %v1997_v21  ;;  %v1942_v27 = vsub.f32 %v6444_v30, %v5486_v39 }
 0x19f   : > { %8803 = vst [vmem:[#allocation117_spill] sm:$0xff] %v6532_v13  ;;  %8804 = vst [vmem:[#allocation118_spill] sm:$0xff] %v6534_v10  ;;  %v2130_v61 = vmax.f32 %v2066_v54, 0.0  ;;  %v2005_v0 = vand.u32 2147483647, %v1941_v34  ;;  %v1935_v44 = vsub.f32 %v6461_v24, %v5482_v3  ;;  %v1936_v7 = vsub.f32 %v6461_v24, %v5486_v39  ;;  %v6544_v59 = vpop.permute.xlu1 %1844 }
 0x1a0   : > { %v6546_v28 = vpop.permute.xlu0 %1864  ;;  %v2187_v35 = vmul.f32 %v2123_v20, %v6196_v19  ;;  %v6550_v16 = vmul.f32 %v2124_v9, %v6202_v2  ;;  %v2062_v63 = vsub.f32 1.0, %v1998_v43  ;;  %v2006_v21 = vand.u32 2147483647, %v1942_v27 }
 0x1a1   : > { %3232 = vperm.xlu0 %4913, %v6178_v14   ;;  %v2125_v30 = vmax.f32 %v2061_v37, 0.0  ;;  %v2069_v54 = vsub.f32 1.0, %v2005_v0  ;;  %v1999_v34 = vand.u32 2147483647, %v1935_v44  ;;  %v2000_v17 = vand.u32 2147483647, %v1936_v7 }
 0x1a2   : > { %8805 = vst [vmem:[#allocation119_spill] sm:$0xff] %v6550_v16  ;;  %v1738_v10 = vsub.f32 1.0, %v1674_v57  ;;  %v6553_v24 = vmax.f32 %v1737_v8, 0.0  ;;  %v2193_v13 = vmul.f32 %v2129_v47, %v6240_v33  ;;  %v2070_v46 = vsub.f32 1.0, %v2006_v21  ;;  %v4989_v8 = vld [vmem:[%s5291_s0 + $0xb0] sm:$0xff] }
 0x1a3   : > { %v2194_v19 = vmul.f32 %v2130_v61, %v6246_v48  ;;  %v2133_v20 = vmax.f32 %v2069_v54, 0.0  ;;  %v2063_v2 = vsub.f32 1.0, %v1999_v34  ;;  %v1945_v43 = vsub.f32 %v6463_v11, %v5482_v3  ;;  %v6559_v9 = vpop.permute.xlu1 %1852  ;;  %v8806_v48 = vld [vmem:[#allocation51_spill] sm:$0xff] }
 0x1a4   : > { %v6561_v14 = vpop.permute.xlu0 %1872  ;;  %v2134_v37 = vmax.f32 %v2070_v46, 0.0  ;;  %v2064_v0 = vsub.f32 1.0, %v2000_v17  ;;  %v1946_v57 = vsub.f32 %v6463_v11, %v5486_v39  ;;  %v1939_v33 = vsub.f32 %v6484_v53, %v5482_v3  ;;  %v8808_v11 = vld [vmem:[#allocation55_spill] sm:$0xff] }
 0x1a5   : > { %3300 = vperm.xlu0 %4913, %v4989_v8   ;;  %v6569_v47 = vadd.f32 %v2187_v35, %v8806_v48  ;;  %v2126_v27 = vmax.f32 %v2062_v63, 0.0  ;;  %v2189_v61 = vmul.f32 %v2125_v30, %v6204_v36  ;;  %v2009_v44 = vand.u32 2147483647, %v1945_v43  ;;  %v8810_v8 = vld [vmem:[#allocation17_spill] sm:$0xff] }
 0x1a6   : > { %v2127_v7 = vmax.f32 %v2063_v2, 0.0  ;;  %v2010_v21 = vand.u32 2147483647, %v1946_v57  ;;  %v1940_v17 = vsub.f32 %v6484_v53, %v5486_v39  ;;  %v2003_v46 = vand.u32 2147483647, %v1939_v33  ;;  %v8813_v43 = vld [vmem:[#allocation49_spill] sm:$0xff] }
 0x1a7   : > { %8807 = vst [vmem:[#allocation51_spill] sm:$0xff] %v6569_v47  ;;  %v6574_v54 = vmax.f32 %v1738_v10, 0.0  ;;  %v6577_v34 = vadd.f32 %v2193_v13, %v8808_v11  ;;  %v6580_v16 = vadd.f32 %v2194_v19, %v8810_v8  ;;  %v2073_v35 = vsub.f32 1.0, %v2009_v44  ;;  %v6582_v48 = vpop.permute.xlu1 %1860 }
 0x1a8   : > { %v6584_v63 = vpop.permute.xlu0 %1880  ;;  %v2197_v36 = vmul.f32 %v2133_v20, %v6262_v31  ;;  %v2198_v30 = vmul.f32 %v2134_v37, %v6268_v50  ;;  %v2128_v2 = vmax.f32 %v2064_v0, 0.0  ;;  %v2004_v53 = vand.u32 2147483647, %v1940_v17  ;;  %v8815_v0 = vld [vmem:[#allocation18_spill] sm:$0xff] }
 0x1a9   : > { %8809 = vst [vmem:[#allocation55_spill] sm:$0xff] %v6577_v34  ;;  %8811 = vst [vmem:[#allocation17_spill] sm:$0xff] %v6580_v16  ;;  %v6589_v10 = vmul.f32 %v2126_v27, %v6206_v38  ;;  %v6592_v13 = vadd.f32 %v2189_v61, %v8813_v43  ;;  %v2074_v57 = vsub.f32 1.0, %v2010_v21  ;;  %v1949_v19 = vsub.f32 %v6486_v26, %v5482_v3  ;;  %v8817_v61 = vld [vmem:[#allocation19_spill] sm:$0xff] }
 0x1aa   : > { %v2191_v33 = vmul.f32 %v2127_v7, %v6218_v15  ;;  %v2137_v44 = vmax.f32 %v2073_v35, 0.0  ;;  %v2067_v11 = vsub.f32 1.0, %v2003_v46  ;;  %v1950_v31 = vsub.f32 %v6486_v26, %v5486_v39 }
 0x1ab   : > { %8812 = vst [vmem:[#allocation120_spill] sm:$0xff] %v6589_v10  ;;  %8814 = vst [vmem:[#allocation49_spill] sm:$0xff] %v6592_v13  ;;  %v2068_v50 = vsub.f32 1.0, %v2004_v53  ;;  %v2013_v20 = vand.u32 2147483647, %v1949_v19  ;;  %v6599_v37 = vpop.permute.xlu1 %1868  ;;  %v6604_v27 = vadd.f32 %v2197_v36, %v8815_v0  ;;  %v6607_v21 = vadd.f32 %v2198_v30, %v8817_v61  ;;  %v8876_v10 = vld [vmem:[#allocation99_spill] sm:$0xff] }
 0x1ac   : > { %v6601_v38 = vpop.permute.xlu0 %1888  ;;  %v2192_v17 = vmul.f32 %v2128_v2, %v6224_v51  ;;  %v2014_v15 = vand.u32 2147483647, %v1950_v31  ;;  %v8599_v7 = vmov 6   ;;  %v8601_v46 = vmov 7   ;;  %v8819_v51 = vld [vmem:[#allocation53_spill] sm:$0xff] }
 0x1ad   : > { %8816 = vst [vmem:[#allocation18_spill] sm:$0xff] %v6604_v27  ;;  %8818 = vst [vmem:[#allocation19_spill] sm:$0xff] %v6607_v21  ;;  %4911 = vset.pattern.permute.xlu1 %v8599_v7  ;;  %4923 = vset.pattern.permute.xlu0 %v8601_v46  ;;  %v2138_v26 = vmax.f32 %v2074_v57, 0.0  ;;  %v2077_v8 = vsub.f32 1.0, %v2013_v20  ;;  %v1943_v35 = vsub.f32 %v6503_v42, %v5482_v3  ;;  %v2131_v53 = vmax.f32 %v2067_v11, 0.0 }
 0x1ae   : > { %2704 = vperm.xlu1 %4911, %v6053_v5   ;;  %v1944_v36 = vsub.f32 %v6503_v42, %v5486_v39  ;;  %3596 = vperm.xlu0 %4923, %v6098_v4   ;;  %v6619_v30 = vadd.f32 %v2191_v33, %v8819_v51  ;;  %v2201_v2 = vmul.f32 %v2137_v44, %v6284_v1  ;;  %v2078_v43 = vsub.f32 1.0, %v2014_v15  ;;  %v6634_v15 = vld [vmem:[%s5291_s0 + $0x10] sm:$0xff] }
 0x1af   : > { %v2132_v57 = vmax.f32 %v2068_v50, 0.0  ;;  %v2007_v19 = vand.u32 2147483647, %v1943_v35  ;;  %v1953_v31 = vsub.f32 %v6505_v41, %v5482_v3  ;;  %v6624_v20 = vpop.permute.xlu1 %1876  ;;  %v2141_v4 = vmax.f32 %v2077_v8, 0.0  ;;  %v6638_v35 = vld [vmem:[%s5291_s0 + $0x88] sm:$0xff]  ;;  %v8821_v8 = vld [vmem:[#allocation54_spill] sm:$0xff] }
 0x1b0   : > { %8820 = vst [vmem:[#allocation53_spill] sm:$0xff] %v6619_v30  ;;  %v2008_v5 = vand.u32 2147483647, %v1944_v36  ;;  %v6626_v42 = vpop.permute.xlu0 %1896  ;;  %v2142_v0 = vmax.f32 %v2078_v43, 0.0  ;;  %v1954_v33 = vsub.f32 %v6505_v41, %v5486_v39  ;;  %v1947_v1 = vsub.f32 %v6524_v22, %v5482_v3  ;;  %v8823_v30 = vld [vmem:[#allocation60_spill] sm:$0xff] }
 0x1b1   : > { %v2202_v44 = vmul.f32 %v2138_v26, %v6290_v23  ;;  %v2071_v11 = vsub.f32 1.0, %v2007_v19  ;;  %v2017_v61 = vand.u32 2147483647, %v1953_v31  ;;  %v6642_v36 = vadd.f32 %v2192_v17, %v8821_v8 }
 0x1b2   : > { %v2072_v50 = vsub.f32 1.0, %v2008_v5  ;;  %2708 = vperm.xlu1 %4911, %v6634_v15   ;;  %3664 = vperm.xlu0 %4923, %v6638_v35   ;;  %v2018_v41 = vand.u32 2147483647, %v1954_v33  ;;  %v1948_v51 = vsub.f32 %v6524_v22, %v5486_v39  ;;  %v2011_v23 = vand.u32 2147483647, %v1947_v1  ;;  %v8825_v1 = vld [vmem:[#allocation22_spill] sm:$0xff] }
 0x1b3   : > { %8822 = vst [vmem:[#allocation54_spill] sm:$0xff] %v6642_v36  ;;  %v2195_v26 = vmul.f32 %v2131_v53, %v6226_v32  ;;  %v2196_v43 = vmul.f32 %v2132_v57, %v6228_v55  ;;  %v2135_v19 = vmax.f32 %v2071_v11, 0.0  ;;  %v6648_v31 = vpop.permute.xlu1 %1884  ;;  %v2205_v46 = vmul.f32 %v2141_v4, %v6306_v60  ;;  %v6663_v53 = vld [vmem:[%s5291_s0 + $0x20] sm:$0xff] }
 0x1b4   : > { %v2136_v5 = vmax.f32 %v2072_v50, 0.0  ;;  %v6650_v7 = vpop.permute.xlu0 %1904  ;;  %v2206_v17 = vmul.f32 %v2142_v0, %v6312_v40  ;;  %v2081_v33 = vsub.f32 1.0, %v2017_v61  ;;  %v2012_v8 = vand.u32 2147483647, %v1948_v51  ;;  %v8829_v0 = vld [vmem:[#allocation21_spill] sm:$0xff] }
 0x1b5   : > { %v6655_v22 = vadd.f32 %v2201_v2, %v8823_v30  ;;  %v6658_v36 = vadd.f32 %v2202_v44, %v8825_v1  ;;  %v2082_v32 = vsub.f32 1.0, %v2018_v41  ;;  %v1957_v55 = vsub.f32 %v6526_v18, %v5482_v3  ;;  %v8827_v2 = vld [vmem:[#allocation20_spill] sm:$0xff]  ;;  %v8835_v1 = vld [vmem:[#allocation58_spill] sm:$0xff] }
 0x1b6   : > { %2716 = vperm.xlu1 %4911, %v6663_v53   ;;  %3608 = vperm.xlu0 %4923, %v6157_v25   ;;  %v2199_v60 = vmul.f32 %v2135_v19, %v6250_v45  ;;  %v2200_v40 = vmul.f32 %v2136_v5, %v6252_v58  ;;  %v2075_v57 = vsub.f32 1.0, %v2011_v23  ;;  %v1958_v30 = vsub.f32 %v6526_v18, %v5486_v39  ;;  %v8831_v45 = vld [vmem:[#allocation23_spill] sm:$0xff]  ;;  %v8833_v58 = vld [vmem:[#allocation24_spill] sm:$0xff] }
 0x1b7   : > { %8824 = vst [vmem:[#allocation60_spill] sm:$0xff] %v6655_v22  ;;  %8826 = vst [vmem:[#allocation22_spill] sm:$0xff] %v6658_v36  ;;  %v6672_v4 = vadd.f32 %v2195_v26, %v8827_v2  ;;  %v6675_v44 = vadd.f32 %v2196_v43, %v8829_v0  ;;  %v2076_v11 = vsub.f32 1.0, %v2012_v8  ;;  %v2021_v50 = vand.u32 2147483647, %v1957_v55  ;;  %v6677_v61 = vpop.permute.xlu1 %1892  ;;  %v4993_v8 = vld [vmem:[%s5291_s0 + $0x30] sm:$0xff] }
 0x1b8   : > { %v6679_v25 = vpop.permute.xlu0 %1912  ;;  %v6682_v41 = vadd.f32 %v2205_v46, %v8831_v45  ;;  %v6685_v51 = vadd.f32 %v2206_v17, %v8833_v58  ;;  %v2145_v23 = vmax.f32 %v2081_v33, 0.0  ;;  %v2022_v18 = vand.u32 2147483647, %v1958_v30  ;;  %v8837_v55 = vld [vmem:[#allocation59_spill] sm:$0xff] }
 0x1b9   : > { %8828 = vst [vmem:[#allocation20_spill] sm:$0xff] %v6672_v4  ;;  %8830 = vst [vmem:[#allocation21_spill] sm:$0xff] %v6675_v44  ;;  %v2146_v19 = vmax.f32 %v2082_v32, 0.0  ;;  %v2085_v26 = vsub.f32 1.0, %v2021_v50  ;;  %v1951_v43 = vsub.f32 %v6544_v59, %v5482_v3  ;;  %v1952_v5 = vsub.f32 %v6544_v59, %v5486_v39  ;;  %v8843_v36 = vld [vmem:[#allocation95_spill] sm:$0xff] }
 0x1ba   : > { %8832 = vst [vmem:[#allocation23_spill] sm:$0xff] %v6682_v41  ;;  %8834 = vst [vmem:[#allocation24_spill] sm:$0xff] %v6685_v51  ;;  %2724 = vperm.xlu1 %4911, %v4993_v8   ;;  %3612 = vperm.xlu0 %4923, %v6663_v53   ;;  %v6694_v46 = vadd.f32 %v2199_v60, %v8835_v1  ;;  %v6697_v17 = vadd.f32 %v2200_v40, %v8837_v55  ;;  %v2139_v33 = vmax.f32 %v2075_v57, 0.0  ;;  %v4994_v1 = vld [vmem:[%s5291_s0 + $0x40] sm:$0xff]  ;;  %v6712_v55 = vld [vmem:[%s5291_s0 + $0xa8] sm:$0xff] }
 0x1bb   : > { %v2086_v32 = vsub.f32 1.0, %v2022_v18  ;;  %v2140_v30 = vmax.f32 %v2076_v11, 0.0  ;;  %v2015_v2 = vand.u32 2147483647, %v1951_v43  ;;  %v2016_v0 = vand.u32 2147483647, %v1952_v5  ;;  %v6701_v50 = vpop.permute.xlu1 %1900 }
 0x1bc   : > { %8836 = vst [vmem:[#allocation58_spill] sm:$0xff] %v6694_v46  ;;  %8838 = vst [vmem:[#allocation59_spill] sm:$0xff] %v6697_v17  ;;  %v1961_v59 = vsub.f32 %v6546_v28, %v5482_v3  ;;  %v6703_v45 = vpop.permute.xlu0 %1920  ;;  %v2149_v58 = vmax.f32 %v2085_v26, 0.0  ;;  %v1962_v40 = vsub.f32 %v6546_v28, %v5486_v39  ;;  %v1955_v57 = vsub.f32 %v6559_v9, %v5482_v3  ;;  %v8839_v18 = vld [vmem:[#allocation62_spill] sm:$0xff]  ;;  %v8840_v17 = vld [vmem:[#allocation56_spill] sm:$0xff] }
 0x1bd   : > { %v2150_v60 = vmax.f32 %v2086_v32, 0.0  ;;  %v2209_v11 = vmul.f32 %v2145_v23, %v8839_v18  ;;  %v2079_v8 = vsub.f32 1.0, %v2015_v2  ;;  %v2080_v43 = vsub.f32 1.0, %v2016_v0  ;;  %v8841_v18 = vld [vmem:[#allocation91_spill] sm:$0xff] }
 0x1be   : > { %v2025_v5 = vand.u32 2147483647, %v1961_v59  ;;  %2732 = vperm.xlu1 %4911, %v4994_v1   ;;  %3680 = vperm.xlu0 %4923, %v6712_v55   ;;  %v2210_v26 = vmul.f32 %v2146_v19, %v6334_v62  ;;  %v2026_v32 = vand.u32 2147483647, %v1962_v40  ;;  %v1956_v28 = vsub.f32 %v6559_v9, %v5486_v39  ;;  %v8842_v51 = vld [vmem:[#allocation67_spill] sm:$0xff]  ;;  %v8844_v9 = vld [vmem:[#allocation25_spill] sm:$0xff] }
 0x1bf   : > { %v2019_v46 = vand.u32 2147483647, %v1955_v57  ;;  %v2203_v4 = vmul.f32 %v2139_v33, %v8840_v17  ;;  %v2143_v23 = vmax.f32 %v2079_v8, 0.0  ;;  %v2144_v2 = vmax.f32 %v2080_v43, 0.0  ;;  %v6719_v59 = vpop.permute.xlu1 %1908  ;;  %v4996_v8 = vld [vmem:[%s5291_s0 + $0x50] sm:$0xff]  ;;  %v6733_v43 = vld [vmem:[%s5291_s0 + $0x38] sm:$0xff] }
 0x1c0   : > { %v2089_v0 = vsub.f32 1.0, %v2025_v5  ;;  %v2204_v44 = vmul.f32 %v2140_v30, %v8841_v18  ;;  %v2213_v41 = vmul.f32 %v2149_v58, %v8842_v51  ;;  %v2214_v62 = vmul.f32 %v2150_v60, %v8843_v36  ;;  %v6724_v40 = vpop.permute.xlu0 %1928  ;;  %v8846_v51 = vld [vmem:[#allocation57_spill] sm:$0xff]  ;;  %v8847_v36 = vld [vmem:[#allocation92_spill] sm:$0xff]  ;;  %v8848_v5 = vld [vmem:[#allocation26_spill] sm:$0xff] }
 0x1c1   : > { %v2020_v19 = vand.u32 2147483647, %v1956_v28  ;;  %v6727_v22 = vadd.f32 %v2209_v11, %v8844_v9  ;;  %v2090_v57 = vsub.f32 1.0, %v2026_v32  ;;  %v2083_v17 = vsub.f32 1.0, %v2019_v46  ;;  %v8850_v32 = vld [vmem:[#allocation63_spill] sm:$0xff] }
 0x1c2   : > { %v1965_v33 = vsub.f32 %v6561_v14, %v5482_v3  ;;  %2740 = vperm.xlu1 %4911, %v4996_v8   ;;  %3624 = vperm.xlu0 %4923, %v6733_v43   ;;  %v2207_v30 = vmul.f32 %v2143_v23, %v8846_v51  ;;  %v2208_v58 = vmul.f32 %v2144_v2, %v8847_v36  ;;  %v2153_v60 = vmax.f32 %v2089_v0, 0.0  ;;  %v8854_v23 = vld [vmem:[#allocation27_spill] sm:$0xff]  ;;  %v8856_v0 = vld [vmem:[#allocation28_spill] sm:$0xff] }
 0x1c3   : > { %8845 = vst [vmem:[#allocation62_spill] sm:$0xff] %v6727_v22  ;;  %v1966_v11 = vsub.f32 %v6561_v14, %v5486_v39  ;;  %v6741_v46 = vadd.f32 %v2210_v26, %v8848_v5  ;;  %v6744_v28 = vadd.f32 %v2203_v4, %v8850_v32  ;;  %v2084_v18 = vsub.f32 1.0, %v2020_v19  ;;  %v6746_v8 = vpop.permute.xlu1 %1916  ;;  %v8852_v22 = vld [vmem:[#allocation64_spill] sm:$0xff] }
 0x1c4   : > { %v2029_v9 = vand.u32 2147483647, %v1965_v33  ;;  %v6749_v13 = vadd.f32 %v2204_v44, %v8852_v22  ;;  %v6752_v2 = vadd.f32 %v2213_v41, %v8854_v23  ;;  %v6755_v51 = vadd.f32 %v2214_v62, %v8856_v0  ;;  %v6764_v33 = vld [vmem:[%s5291_s0 + $0x80] sm:$0xff]  ;;  %v8858_v22 = vld [vmem:[#allocation65_spill] sm:$0xff]  ;;  %v8860_v41 = vld [vmem:[#allocation66_spill] sm:$0xff] }
 0x1c5   : > { %8849 = vst [vmem:[#allocation56_spill] sm:$0xff] %v6741_v46  ;;  %8851 = vst [vmem:[#allocation91_spill] sm:$0xff] %v6744_v28  ;;  %v2030_v14 = vand.u32 2147483647, %v1966_v11  ;;  %v6757_v36 = vpop.permute.xlu0 %2320  ;;  %v2154_v26 = vmax.f32 %v2090_v57, 0.0  ;;  %v1959_v4 = vsub.f32 %v6582_v48, %v5482_v3  ;;  %v1960_v19 = vsub.f32 %v6582_v48, %v5486_v39  ;;  %v8862_v11 = vld [vmem:[#allocation70_spill] sm:$0xff] }
 0x1c6   : > { %8853 = vst [vmem:[#allocation67_spill] sm:$0xff] %v6749_v13  ;;  %8855 = vst [vmem:[#allocation95_spill] sm:$0xff] %v6752_v2  ;;  %v2093_v5 = vsub.f32 1.0, %v2029_v9  ;;  %2764 = vperm.xlu1 %4911, %v6764_v33   ;;  %3628 = vperm.xlu0 %4923, %v4994_v1   ;;  %v6768_v44 = vadd.f32 %v2207_v30, %v8858_v22  ;;  %v6771_v62 = vadd.f32 %v2208_v58, %v8860_v41  ;;  %v8863_v22 = vmov 3   ;;  %v4999_v41 = vld [vmem:[%s5291_s0 + $0xc8] sm:$0xff] }
 0x1c7   : > { %8857 = vst [vmem:[#allocation25_spill] sm:$0xff] %v6755_v51  ;;  %v2217_v57 = vmul.f32 %v2153_v60, %v8862_v11  ;;  %v2147_v32 = vmax.f32 %v2083_v17, 0.0  ;;  %v2148_v9 = vmax.f32 %v2084_v18, 0.0  ;;  %v2023_v23 = vand.u32 2147483647, %v1959_v4  ;;  %v6776_v51 = vpop.permute.xlu1 %1924 }
 0x1c8   : > { %8859 = vst [vmem:[#allocation57_spill] sm:$0xff] %v6768_v44  ;;  %8861 = vst [vmem:[#allocation92_spill] sm:$0xff] %v6771_v62  ;;  %v2024_v0 = vand.u32 2147483647, %v1960_v19  ;;  %v1969_v48 = vsub.f32 %v6584_v63, %v5482_v3  ;;  %v2094_v2 = vsub.f32 1.0, %v2030_v14  ;;  %v2157_v1 = vmax.f32 %v2093_v5, 0.0 }
 0x1c9   : > { %v1970_v30 = vsub.f32 %v6584_v63, %v5486_v39  ;;  %v1963_v58 = vsub.f32 %v6599_v37, %v5482_v3  ;;  %v6782_v60 = vpop.permute.xlu0 %2332  ;;  %v2218_v17 = vmul.f32 %v2154_v26, %v6378_v29  ;;  %v2087_v18 = vsub.f32 1.0, %v2023_v23  ;;  %v8864_v14 = vld [vmem:[#allocation61_spill] sm:$0xff]  ;;  %v6791_v62 = vld [vmem:[%s5291_s0] sm:$0xff] }
 0x1ca   : > { %v2088_v4 = vsub.f32 1.0, %v2024_v0  ;;  %v2033_v19 = vand.u32 2147483647, %v1969_v48  ;;  %4912 = vset.pattern.permute.xlu1 %v8863_v22  ;;  %3696 = vperm.xlu0 %4923, %v4999_v41   ;;  %v2211_v11 = vmul.f32 %v2147_v32, %v8864_v14  ;;  %v1964_v63 = vsub.f32 %v6599_v37, %v5486_v39  ;;  %v8865_v29 = vld [vmem:[#allocation75_spill] sm:$0xff] }
 0x1cb   : > { %v2034_v5 = vand.u32 2147483647, %v1970_v30  ;;  %v2027_v44 = vand.u32 2147483647, %v1963_v58  ;;  %3212 = vperm.xlu1 %4912, %v6791_v62   ;;  %v2212_v26 = vmul.f32 %v2148_v9, %v8865_v29  ;;  %v2151_v23 = vmax.f32 %v2087_v18, 0.0  ;;  %v8866_v58 = vld [vmem:[#allocation29_spill] sm:$0xff] }
 0x1cc   : > { %v2152_v0 = vmax.f32 %v2088_v4, 0.0  ;;  %v2097_v48 = vsub.f32 1.0, %v2033_v19  ;;  %v2158_v28 = vmax.f32 %v2094_v2, 0.0  ;;  %v2221_v41 = vmul.f32 %v2157_v1, %v6392_v12  ;;  %v6798_v30 = vpop.permute.xlu1 %2316  ;;  %v6808_v18 = vld [vmem:[%s5291_s0 + $0x58] sm:$0xff]  ;;  %v8868_v12 = vld [vmem:[#allocation93_spill] sm:$0xff] }
 0x1cd   : > { %v2098_v13 = vsub.f32 1.0, %v2034_v5  ;;  %v1973_v32 = vsub.f32 %v6601_v38, %v5482_v3  ;;  %v6800_v37 = vpop.permute.xlu0 %2340  ;;  %v6803_v14 = vadd.f32 %v2217_v57, %v8866_v58  ;;  %v2028_v46 = vand.u32 2147483647, %v1964_v63  ;;  %v8869_v1 = vld [vmem:[#allocation94_spill] sm:$0xff] }
 0x1ce   : > { %v2091_v21 = vsub.f32 1.0, %v2027_v44  ;;  %v1974_v9 = vsub.f32 %v6601_v38, %v5486_v39  ;;  %3640 = vperm.xlu0 %4923, %v6808_v18   ;;  %v2215_v2 = vmul.f32 %v2151_v23, %v8868_v12  ;;  %v2216_v4 = vmul.f32 %v2152_v0, %v8869_v1  ;;  %v8870_v57 = vld [vmem:[#allocation30_spill] sm:$0xff]  ;;  %v8872_v44 = vld [vmem:[#allocation68_spill] sm:$0xff]  ;;  %v8874_v38 = vld [vmem:[#allocation69_spill] sm:$0xff] }
 0x1cf   : > { %8867 = vst [vmem:[#allocation26_spill] sm:$0xff] %v6803_v14  ;;  %v2161_v19 = vmax.f32 %v2097_v48, 0.0  ;;  %v2037_v5 = vand.u32 2147483647, %v1973_v32  ;;  %3276 = vperm.xlu1 %4912, %v6764_v33   ;;  %v6815_v29 = vadd.f32 %v2218_v17, %v8870_v57  ;;  %v6818_v63 = vadd.f32 %v2211_v11, %v8872_v44  ;;  %v8878_v23 = vld [vmem:[#allocation31_spill] sm:$0xff] }
 0x1d0   : > { %v6821_v58 = vadd.f32 %v2212_v26, %v8874_v38  ;;  %v2038_v14 = vand.u32 2147483647, %v1974_v9  ;;  %v6824_v27 = vmul.f32 %v2158_v28, %v8876_v10  ;;  %v6827_v0 = vadd.f32 %v2221_v41, %v8878_v23  ;;  %v6829_v12 = vpop.permute.xlu1 %2324  ;;  %v6838_v9 = vld [vmem:[%s5291_s0 + $0x60] sm:$0xff]  ;;  %v8880_v10 = vld [vmem:[#allocation72_spill] sm:$0xff] }
 0x1d1   : > { %8871 = vst [vmem:[#allocation63_spill] sm:$0xff] %v6815_v29  ;;  %8873 = vst [vmem:[#allocation64_spill] sm:$0xff] %v6818_v63  ;;  %v2162_v48 = vmax.f32 %v2098_v13, 0.0  ;;  %v2101_v32 = vsub.f32 1.0, %v2037_v5  ;;  %v6831_v1 = vpop.permute.xlu0 %2348  ;;  %v2092_v17 = vsub.f32 1.0, %v2028_v46  ;;  %v1967_v11 = vsub.f32 %v6624_v20, %v5482_v3  ;;  %v8882_v13 = vld [vmem:[#allocation73_spill] sm:$0xff] }
 0x1d2   : > { %8875 = vst [vmem:[#allocation27_spill] sm:$0xff] %v6821_v58  ;;  %8877 = vst [vmem:[#allocation28_spill] sm:$0xff] %v6824_v27  ;;  %v2102_v57 = vsub.f32 1.0, %v2038_v14  ;;  %v1968_v26 = vsub.f32 %v6624_v20, %v5486_v39  ;;  %3644 = vperm.xlu0 %4923, %v6838_v9   ;;  %v6842_v28 = vadd.f32 %v2215_v2, %v8880_v10  ;;  %v8884_v5 = vld [vmem:[#allocation74_spill] sm:$0xff]  ;;  %v2155_v46 = vmax.f32 %v2091_v21, 0.0 }
 0x1d3   : > { %8879 = vst [vmem:[#allocation65_spill] sm:$0xff] %v6827_v0  ;;  %v6845_v41 = vadd.f32 %v2216_v4, %v8882_v13  ;;  %v2225_v44 = vmul.f32 %v2161_v19, %v8884_v5  ;;  %3280 = vperm.xlu1 %4912, %v6638_v35   ;;  %v2165_v14 = vmax.f32 %v2101_v32, 0.0  ;;  %v2031_v38 = vand.u32 2147483647, %v1967_v11  ;;  %v6862_v5 = vld [vmem:[%s5291_s0 + $0xe8] sm:$0xff] }
 0x1d4   : > { %8881 = vst [vmem:[#allocation66_spill] sm:$0xff] %v6842_v28  ;;  %v2032_v23 = vand.u32 2147483647, %v1968_v26  ;;  %v1977_v20 = vsub.f32 %v6626_v42, %v5482_v3  ;;  %v2166_v29 = vmax.f32 %v2102_v57, 0.0  ;;  %v1978_v2 = vsub.f32 %v6626_v42, %v5486_v39  ;;  %v6857_v21 = vpop.permute.xlu1 %2328  ;;  %8885 = vst [vmem:[#allocation61_spill] sm:$0xff] %v6862_v5  ;;  %v8886_v42 = vld [vmem:[#allocation102_spill] sm:$0xff] }
 0x1d5   : > { %8883 = vst [vmem:[#allocation70_spill] sm:$0xff] %v6845_v41  ;;  %v1971_v4 = vsub.f32 %v6648_v31, %v5482_v3  ;;  %v1972_v19 = vsub.f32 %v6648_v31, %v5486_v39  ;;  %v6859_v10 = vpop.permute.xlu0 %2356  ;;  %v2156_v32 = vmax.f32 %v2092_v17, 0.0  ;;  %v2095_v11 = vsub.f32 1.0, %v2031_v38  ;;  %v8888_v31 = vld [vmem:[#allocation96_spill] sm:$0xff] }
 0x1d6   : > { %v2096_v26 = vsub.f32 1.0, %v2032_v23  ;;  %v2041_v13 = vand.u32 2147483647, %v1977_v20  ;;  %3712 = vperm.xlu0 %4923, %v6862_v5   ;;  %v2226_v57 = vmul.f32 %v2162_v48, %v8886_v42  ;;  %v2042_v41 = vand.u32 2147483647, %v1978_v2  ;;  %v5004_v17 = vld [vmem:[%s5291_s0 + $0x8] sm:$0xff] }
 0x1d7   : > { %v2035_v28 = vand.u32 2147483647, %v1971_v4  ;;  %v2036_v58 = vand.u32 2147483647, %v1972_v19  ;;  %v8887_v63 = vmov 7   ;;  %v2219_v27 = vmul.f32 %v2155_v46, %v8888_v31  ;;  %v8889_v38 = vld [vmem:[#allocation104_spill] sm:$0xff] }
 0x1d8   : > { %4914 = vset.pattern.permute.xlu1 %v8887_v63  ;;  %v2159_v0 = vmax.f32 %v2095_v11, 0.0  ;;  %v2160_v16 = vmax.f32 %v2096_v26, 0.0  ;;  %v2105_v34 = vsub.f32 1.0, %v2041_v13  ;;  %v2229_v23 = vmul.f32 %v2165_v14, %v8889_v38  ;;  %v6873_v2 = vpop.permute.xlu1 %2336  ;;  %v8890_v19 = vld [vmem:[#allocation79_spill] sm:$0xff]  ;;  %v8895_v38 = vld [vmem:[#allocation80_spill] sm:$0xff] }
 0x1d9   : > { %3600 = vperm.xlu1 %4914, %v5004_v17   ;;  %v2230_v20 = vmul.f32 %v2166_v29, %v6446_v6  ;;  %v2106_v47 = vsub.f32 1.0, %v2042_v41  ;;  %v1981_v48 = vsub.f32 %v6650_v7, %v5482_v3  ;;  %v6875_v4 = vpop.permute.xlu0 %2364  ;;  %v6878_v42 = vadd.f32 %v2225_v44, %v8890_v19  ;;  %v8893_v14 = vld [vmem:[#allocation71_spill] sm:$0xff]  ;;  %v8894_v29 = vld [vmem:[#allocation98_spill] sm:$0xff]  ;;  %v8897_v44 = vld [vmem:[#allocation97_spill] sm:$0xff] }
 0x1da   : > { %v2099_v46 = vsub.f32 1.0, %v2035_v28  ;;  %v2100_v11 = vsub.f32 1.0, %v2036_v58  ;;  %v1982_v26 = vsub.f32 %v6650_v7, %v5486_v39  ;;  %v8892_v13 = vmov 6   ;;  %v8899_v58 = vld [vmem:[#allocation33_spill] sm:$0xff] }
 0x1db   : > { %8891 = vst [vmem:[#allocation75_spill] sm:$0xff] %v6878_v42  ;;  %4934 = vset.pattern.permute.xlu0 %v8892_v13  ;;  %v2223_v6 = vmul.f32 %v2159_v0, %v8893_v14  ;;  %v2224_v41 = vmul.f32 %v2160_v16, %v8894_v29  ;;  %v2169_v31 = vmax.f32 %v2105_v34, 0.0  ;;  %v2045_v17 = vand.u32 2147483647, %v1981_v48  ;;  %v8901_v0 = vld [vmem:[#allocation35_spill] sm:$0xff]  ;;  %v8903_v16 = vld [vmem:[#allocation36_spill] sm:$0xff] }
 0x1dc   : > { %2700 = vperm.xlu0 %4934, %v6791_v62   ;;  %v6887_v5 = vadd.f32 %v2226_v57, %v8895_v38  ;;  %v6890_v19 = vmul.f32 %v2156_v32, %v8897_v44  ;;  %v6893_v28 = vadd.f32 %v2219_v27, %v8899_v58  ;;  %v2046_v7 = vand.u32 2147483647, %v1982_v26  ;;  %v6902_v48 = vpop.permute.xlu1 %2344  ;;  %v4940_v58 = vld [vmem:[%s5300_s14 + $0x78] sm:$0xff]  }
 0x1dd   : > { %3660 = vperm.xlu1 %4914, %v6764_v33   ;;  %v6897_v14 = vadd.f32 %v2229_v23, %v8901_v0  ;;  %v6900_v34 = vadd.f32 %v2230_v20, %v8903_v16  ;;  %v2170_v62 = vmax.f32 %v2106_v47, 0.0  ;;  %v2109_v57 = vsub.f32 1.0, %v2045_v17  ;;  %v6908_v26 = vpop.permute.xlu0 %2372  ;;  %v8905_v23 = vld [vmem:[#allocation77_spill] sm:$0xff]  ;;  %v8907_v20 = vld [vmem:[#allocation78_spill] sm:$0xff]  ;;  %4705 = vmatprep.subr.bf16.mxu0 %v4940_v58 }
 0x1de   : > { %8896 = vst [vmem:[#allocation29_spill] sm:$0xff] %v6887_v5  ;;  %8898 = vst [vmem:[#allocation93_spill] sm:$0xff] %v6890_v19  ;;  %v2163_v32 = vmax.f32 %v2099_v46, 0.0  ;;  %v2110_v29 = vsub.f32 1.0, %v2046_v7  ;;  %v1975_v27 = vsub.f32 %v6677_v61, %v5482_v3  ;;  %v1976_v33 = vsub.f32 %v6677_v61, %v5486_v39  ;;  %v6918_v46 = vld [vmem:[%s5291_s0 + $0x18] sm:$0xff]  ;;  %4817 = vmatprep.subr.bf16.mxu1 %v4940_v58  ;;  %v6938_v5 = vld [vmem:[%s5291_s0 + $0x28] sm:$0xff] }
 0x1df   : > { %8900 = vst [vmem:[#allocation94_spill] sm:$0xff] %v6893_v28  ;;  %8902 = vst [vmem:[#allocation30_spill] sm:$0xff] %v6897_v14  ;;  %v6911_v38 = vadd.f32 %v2223_v6, %v8905_v23  ;;  %v6914_v44 = vadd.f32 %v2224_v41, %v8907_v20  ;;  %v2233_v47 = vmul.f32 %v2169_v31, %v6465_v56  ;;  %v2164_v17 = vmax.f32 %v2100_v11, 0.0  ;;  %v4941_v6 = vld [vmem:[%s5300_s14 + $0x38] sm:$0xff]  }
 0x1e0   : > { %8904 = vst [vmem:[#allocation68_spill] sm:$0xff] %v6900_v34  ;;  %2712 = vperm.xlu0 %4934, %v6918_v46   ;;  %v2173_v7 = vmax.f32 %v2109_v57, 0.0  ;;  %v2039_v0 = vand.u32 2147483647, %v1975_v27  ;;  %v2040_v16 = vand.u32 2147483647, %v1976_v33  ;;  %v1985_v61 = vsub.f32 %v6679_v25, %v5482_v3  ;;  %v6933_v31 = vpop.permute.xlu1 %2352  ;;  %4706 = vmatpush3.bf16.msra.mxu0 %v4941_v6 }
 0x1e1   : > { %8906 = vst [vmem:[#allocation69_spill] sm:$0xff] %v6911_v38  ;;  %8908 = vst [vmem:[#allocation99_spill] sm:$0xff] %v6914_v44  ;;  %4915 = vset.pattern.permute.xlu1 %v8892_v13  ;;  %v2174_v23 = vmax.f32 %v2110_v29, 0.0  ;;  %v1986_v56 = vsub.f32 %v6679_v25, %v5486_v39  ;;  %v1979_v11 = vsub.f32 %v6701_v50, %v5482_v3  ;;  %v8909_v57 = vld [vmem:[#allocation107_spill] sm:$0xff]  ;;  %v8910_v25 = vld [vmem:[#allocation100_spill] sm:$0xff]  ;;  %4825 = vmatpush3.bf16.msra.mxu1 %v4941_v6 }
 0x1e2   : > { %v1980_v41 = vsub.f32 %v6701_v50, %v5486_v39  ;;  %2772 = vperm.xlu1 %4915, %v6529_v49   ;;  %v2234_v27 = vmul.f32 %v2170_v62, %v8909_v57  ;;  %v2103_v33 = vsub.f32 1.0, %v2039_v0  ;;  %v2104_v20 = vsub.f32 1.0, %v2040_v16  ;;  %8911 = vst [vmem:[#allocation31_spill] sm:$0xff] %v6938_v5  ;;  %v8912_v50 = vld [vmem:[#allocation101_spill] sm:$0xff]  ;;  %v6942_v57 = vpop.permute.xlu0 %2380  ;;  %v8913_v58 = vld [vmem:[#allocation110_spill] sm:$0xff] }
 0x1e3   : > { %v2049_v29 = vand.u32 2147483647, %v1985_v61  ;;  %v2227_v28 = vmul.f32 %v2163_v32, %v8910_v25  ;;  %v2050_v34 = vand.u32 2147483647, %v1986_v56  ;;  %v2043_v14 = vand.u32 2147483647, %v1979_v11 }
 0x1e4   : > { %v2044_v19 = vand.u32 2147483647, %v1980_v41  ;;  %2720 = vperm.xlu0 %4934, %v6938_v5   ;;  %v2228_v42 = vmul.f32 %v2164_v17, %v8912_v50  ;;  %v2167_v62 = vmax.f32 %v2103_v33, 0.0  ;;  %v2168_v0 = vmax.f32 %v2104_v20, 0.0  ;;  %v4942_v61 = vld [vmem:[%s5300_s14 + $0x70] sm:$0xff]   ;;  %v8914_v56 = vld [vmem:[#allocation111_spill] sm:$0xff]  ;;  %v6960_v38 = vpop.permute.xlu1 %2360 }
 0x1e5   : > { %v2113_v16 = vsub.f32 1.0, %v2049_v29  ;;  %v4943_v44 = vld [vmem:[%s5300_s14 + $0x30] sm:$0xff]   ;;  %v2237_v32 = vmul.f32 %v2173_v7, %v8913_v58  ;;  %v2238_v11 = vmul.f32 %v2174_v23, %v8914_v56  ;;  %v2114_v41 = vsub.f32 1.0, %v2050_v34  ;;  %v8915_v17 = vld [vmem:[#allocation38_spill] sm:$0xff]  ;;  %4707 = vmatprep.subr.bf16.mxu0 %v4942_v61  ;;  %v8917_v7 = vld [vmem:[#allocation103_spill] sm:$0xff]  ;;  %8919 = vst [vmem:[#allocation73_spill] sm:$0xff] %v6960_v38  ;;  %4818 = vmatprep.subr.bf16.mxu1 %v4942_v61 }
 0x1e6   : > { %v1989_v25 = vsub.f32 %v6703_v45, %v5482_v3  ;;  %4916 = vset.pattern.permute.xlu1 %v8863_v22  ;;  %v6952_v33 = vadd.f32 %v2233_v47, %v8915_v17  ;;  %v2107_v20 = vsub.f32 1.0, %v2043_v14  ;;  %v2108_v29 = vsub.f32 1.0, %v2044_v19  ;;  %v8918_v23 = vld [vmem:[#allocation76_spill] sm:$0xff]  ;;  %4708 = vmatpush3.bf16.msra.mxu0 %v4943_v44  ;;  %v8920_v19 = vld [vmem:[#allocation39_spill] sm:$0xff]  ;;  %v8922_v17 = vld [vmem:[#allocation81_spill] sm:$0xff] }
 0x1e7   : > { %v1990_v6 = vsub.f32 %v6703_v45, %v5486_v39  ;;  %3220 = vperm.xlu1 %4916, %v6634_v15   ;;  %v2231_v34 = vmul.f32 %v2167_v62, %v8917_v7  ;;  %v2232_v50 = vmul.f32 %v2168_v0, %v8918_v23  ;;  %v2177_v58 = vmax.f32 %v2113_v16, 0.0  ;;  %v4944_v14 = vld [vmem:[%s5300_s14 + $0x68] sm:$0xff]   ;;  %v8926_v0 = vld [vmem:[#allocation85_spill] sm:$0xff]  ;;  %4826 = vmatpush3.bf16.msra.mxu1 %v4943_v44 }
 0x1e8   : > { %8916 = vst [vmem:[#allocation72_spill] sm:$0xff] %v6952_v33  ;;  %v2053_v56 = vand.u32 2147483647, %v1989_v25  ;;  %2728 = vperm.xlu0 %4934, %v6733_v43   ;;  %v6964_v47 = vadd.f32 %v2234_v27, %v8920_v19  ;;  %v6967_v45 = vadd.f32 %v2227_v28, %v8922_v17  ;;  %v8924_v33 = vld [vmem:[#allocation37_spill] sm:$0xff]  ;;  %v4945_v7 = vld [vmem:[%s5300_s14 + $0x28] sm:$0xff]   ;;  %v6974_v16 = vadd.f32 %v2237_v32, %v8926_v0  ;;  %v8928_v43 = vld [vmem:[#allocation86_spill] sm:$0xff]  ;;  %v6984_v32 = vpop.permute.xlu0 %2388  ;;  %v7008_v0 = vpop.permute.xlu1 %2368 }
 0x1e9   : > { %v6970_v5 = vadd.f32 %v2228_v42, %v8924_v33  ;;  %v2054_v62 = vand.u32 2147483647, %v1990_v6  ;;  %v6977_v25 = vadd.f32 %v2238_v11, %v8928_v43  ;;  %v2178_v23 = vmax.f32 %v2114_v41, 0.0  ;;  %4709 = vmatprep.subr.bf16.mxu0 %v4944_v14  ;;  %4819 = vmatprep.subr.bf16.mxu1 %v4944_v14  ;;  %v8930_v11 = vld [vmem:[#allocation40_spill] sm:$0xff]  ;;  %v8932_v33 = vld [vmem:[#allocation82_spill] sm:$0xff]  ;;  %v4947_v14 = vld [vmem:[%s5300_s14 + $0x20] sm:$0xff]  }
 0x1ea   : > { %8921 = vst [vmem:[#allocation74_spill] sm:$0xff] %v6964_v47  ;;  %8923 = vst [vmem:[#allocation102_spill] sm:$0xff] %v6967_v45  ;;  %v2117_v38 = vsub.f32 1.0, %v2053_v56  ;;  %v2171_v28 = vmax.f32 %v2107_v20, 0.0  ;;  %v2172_v27 = vmax.f32 %v2108_v29, 0.0  ;;  %v1983_v42 = vsub.f32 %v6719_v59, %v5482_v3  ;;  %v6994_v29 = vld [vmem:[%s5291_s0 + $0x48] sm:$0xff]  ;;  %4710 = vmatpush3.bf16.msra.mxu0 %v4945_v7 }
 0x1eb   : > { %8925 = vst [vmem:[#allocation96_spill] sm:$0xff] %v6970_v5  ;;  %8927 = vst [vmem:[#allocation104_spill] sm:$0xff] %v6974_v16  ;;  %v1984_v61 = vsub.f32 %v6719_v59, %v5486_v39  ;;  %3224 = vperm.xlu1 %4916, %v6918_v46   ;;  %v6987_v41 = vadd.f32 %v2231_v34, %v8930_v11  ;;  %v6990_v6 = vadd.f32 %v2232_v50, %v8932_v33  ;;  %v4946_v59 = vld [vmem:[%s5300_s14 + $0x60] sm:$0xff]   ;;  %v8934_v17 = vld [vmem:[#allocation114_spill] sm:$0xff] }
 0x1ec   : > { %8929 = vst [vmem:[#allocation79_spill] sm:$0xff] %v6977_v25  ;;  %v2241_v44 = vmul.f32 %v2177_v58, %v6507_v52  ;;  %v2118_v20 = vsub.f32 1.0, %v2054_v62  ;;  %2736 = vperm.xlu0 %4934, %v6994_v29   ;;  %v2181_v46 = vmax.f32 %v2117_v38, 0.0  ;;  %v2047_v56 = vand.u32 2147483647, %v1983_v42  ;;  %4711 = vmatprep.subr.bf16.mxu0 %v4946_v59  ;;  %v8935_v38 = vld [vmem:[#allocation105_spill] sm:$0xff] }
 0x1ed   : > { %8931 = vst [vmem:[#allocation71_spill] sm:$0xff] %v6987_v41  ;;  %8933 = vst [vmem:[#allocation98_spill] sm:$0xff] %v6990_v6  ;;  %v2048_v19 = vand.u32 2147483647, %v1984_v61  ;;  %v1993_v34 = vsub.f32 %v6724_v40, %v5482_v3  ;;  %v2242_v50 = vmul.f32 %v2178_v23, %v8934_v17  ;;  %v1994_v52 = vsub.f32 %v6724_v40, %v5486_v39  ;;  %v7012_v23 = vld [vmem:[%s5291_s0 + $0x98] sm:$0xff] }
 0x1ee   : > { %v1987_v58 = vsub.f32 %v6746_v8, %v5482_v3  ;;  %v1988_v62 = vsub.f32 %v6746_v8, %v5486_v39  ;;  %v2235_v43 = vmul.f32 %v2171_v28, %v8935_v38  ;;  %v2111_v42 = vsub.f32 1.0, %v2047_v56  ;;  %4827 = vmatpush3.bf16.msra.mxu1 %v4945_v7  ;;  %v8936_v40 = vld [vmem:[#allocation106_spill] sm:$0xff]  ;;  %4712 = vmatpush3.bf16.msra.mxu0 %v4947_v14  ;;  %v8937_v28 = vld [vmem:[#allocation117_spill] sm:$0xff] }
 0x1ef   : > { %v2112_v61 = vsub.f32 1.0, %v2048_v19  ;;  %v2057_v11 = vand.u32 2147483647, %v1993_v34  ;;  %3288 = vperm.xlu1 %4916, %v7012_v23   ;;  %v2236_v33 = vmul.f32 %v2172_v27, %v8936_v40  ;;  %v2058_v17 = vand.u32 2147483647, %v1994_v52  ;;  %v7018_v34 = vpop.permute.xlu0 %2396  ;;  %v4948_v6 = vld [vmem:[%s5300_s14 + $0x58] sm:$0xff]   ;;  %4820 = vmatprep.subr.bf16.mxu1 %v4946_v59 }
 0x1f0   : > { %v2051_v25 = vand.u32 2147483647, %v1987_v58  ;;  %v2052_v8 = vand.u32 2147483647, %v1988_v62  ;;  %2744 = vperm.xlu0 %4934, %v6808_v18   ;;  %v2182_v16 = vmax.f32 %v2118_v20, 0.0  ;;  %v2245_v56 = vmul.f32 %v2181_v46, %v8937_v28  ;;  %v4949_v41 = vld [vmem:[%s5300_s14 + $0x18] sm:$0xff]   ;;  %4713 = vmatprep.subr.bf16.mxu0 %v4948_v6 }
 0x1f1   : > { %v2175_v19 = vmax.f32 %v2111_v42, 0.0  ;;  %v2121_v38 = vsub.f32 1.0, %v2057_v11  ;;  %v2122_v47 = vsub.f32 1.0, %v2058_v17  ;;  %v1991_v52 = vsub.f32 %v6776_v51, %v5482_v3  ;;  %v8938_v58 = vld [vmem:[#allocation41_spill] sm:$0xff]  ;;  %v8940_v20 = vld [vmem:[#allocation42_spill] sm:$0xff]  ;;  %v8942_v17 = vld [vmem:[#allocation83_spill] sm:$0xff] }
 0x1f2   : > { %v2115_v7 = vsub.f32 1.0, %v2051_v25  ;;  %v2116_v27 = vsub.f32 1.0, %v2052_v8  ;;  %v7025_v18 = vadd.f32 %v2241_v44, %v8938_v58  ;;  %v7028_v62 = vadd.f32 %v2242_v50, %v8940_v20  ;;  %v7035_v44 = vpop.permute.xlu1 %2376  ;;  %v4950_v50 = vld [vmem:[%s5300_s14 + $0x50] sm:$0xff]   ;;  %v8944_v8 = vld [vmem:[#allocation84_spill] sm:$0xff]  ;;  %4714 = vmatpush3.bf16.msra.mxu0 %v4949_v41  ;;  %4828 = vmatpush3.bf16.msra.mxu1 %v4947_v14 }
 0x1f3   : > { %v2176_v46 = vmax.f32 %v2112_v61, 0.0  ;;  %v1992_v42 = vsub.f32 %v6776_v51, %v5486_v39  ;;  %4917 = vset.pattern.permute.xlu1 %v8887_v63  ;;  %v2185_v25 = vmax.f32 %v2121_v38, 0.0  ;;  %v2186_v59 = vmax.f32 %v2122_v47, 0.0  ;;  %v4951_v38 = vld [vmem:[%s5300_s14 + $0x10] sm:$0xff]   ;;  %v8946_v47 = vld [vmem:[#allocation118_spill] sm:$0xff]  ;;  %4715 = vmatprep.subr.bf16.mxu0 %v4950_v50 }
 0x1f4   : > { %8939 = vst [vmem:[#allocation80_spill] sm:$0xff] %v7025_v18  ;;  %8941 = vst [vmem:[#allocation97_spill] sm:$0xff] %v7028_v62  ;;  %v2179_v11 = vmax.f32 %v2115_v7, 0.0  ;;  %v2055_v40 = vand.u32 2147483647, %v1991_v52  ;;  %3604 = vperm.xlu1 %4917, %v6634_v15   ;;  %2768 = vperm.xlu0 %4934, %v6638_v35   ;;  %v7039_v61 = vadd.f32 %v2235_v43, %v8942_v17  ;;  %v2180_v28 = vmax.f32 %v2116_v27, 0.0  ;;  %v7055_v18 = vpop.permute.xlu0 %2404 }
 0x1f5   : > { %v7042_v51 = vadd.f32 %v2236_v33, %v8944_v8  ;;  %v2056_v58 = vand.u32 2147483647, %v1992_v42  ;;  %v2246_v7 = vmul.f32 %v2182_v16, %v8946_v47  ;;  %v8947_v52 = vld [vmem:[#allocation43_spill] sm:$0xff]  ;;  %v8949_v35 = vld [vmem:[#allocation108_spill] sm:$0xff]  ;;  %4821 = vmatprep.subr.bf16.mxu1 %v4948_v6  ;;  %v8950_v43 = vld [vmem:[#allocation109_spill] sm:$0xff]  ;;  %v2249_v16 = vmul.f32 %v2185_v25, %v6553_v24 }
 0x1f6   : > { %8943 = vst [vmem:[#allocation33_spill] sm:$0xff] %v7039_v61  ;;  %v7047_v15 = vadd.f32 %v2245_v56, %v8947_v52  ;;  %v2239_v20 = vmul.f32 %v2175_v19, %v8949_v35  ;;  %v2119_v62 = vsub.f32 1.0, %v2055_v40  ;;  %v2240_v17 = vmul.f32 %v2176_v46, %v8950_v43  ;;  %v8951_v8 = vld [vmem:[#allocation15_spill] sm:$0xff]  ;;  %v8952_v42 = vld [vmem:[#allocation16_spill] sm:$0xff]  ;;  %v8954_v46 = vld [vmem:[#allocation113_spill] sm:$0xff]  ;;  %4716 = vmatpush3.bf16.msra.mxu0 %v4951_v38  ;;  %v7072_v25 = vpop.permute.xlu1 %2384 }
 0x1f7   : > { %8945 = vst [vmem:[#allocation35_spill] sm:$0xff] %v7042_v51  ;;  %v2120_v33 = vsub.f32 1.0, %v2056_v58  ;;  %v2445_v27 = vsub.f32 %v6757_v36, %v8951_v8  ;;  %v2446_v14 = vsub.f32 %v6757_v36, %v8952_v42  ;;  %v2250_v56 = vmul.f32 %v2186_v59, %v6574_v54  ;;  %v8953_v19 = vld [vmem:[#allocation112_spill] sm:$0xff]  ;;  %4829 = vmatpush3.bf16.msra.mxu1 %v4949_v41  ;;  %v8957_v43 = vld [vmem:[#allocation87_spill] sm:$0xff] }
 0x1f8   : > { %8948 = vst [vmem:[#allocation36_spill] sm:$0xff] %v7047_v15  ;;  %v2243_v40 = vmul.f32 %v2179_v11, %v8953_v19  ;;  %v2183_v6 = vmax.f32 %v2119_v62, 0.0  ;;  %3668 = vperm.xlu1 %4917, %v6529_v49   ;;  %2776 = vperm.xlu0 %4934, %v7012_v23   ;;  %v2244_v58 = vmul.f32 %v2180_v28, %v8954_v46  ;;  %v4952_v35 = vld [vmem:[%s5300_s14 + $0x48] sm:$0xff]   ;;  %v8962_v19 = vld [vmem:[#allocation47_spill] sm:$0xff] }
 0x1f9   : > { %v2184_v47 = vmax.f32 %v2120_v33, 0.0  ;;  %v2509_v52 = vand.u32 2147483647, %v2445_v27  ;;  %v2451_v36 = vsub.f32 %v6782_v60, %v8951_v8  ;;  %v2510_v24 = vand.u32 2147483647, %v2446_v14  ;;  %v4953_v59 = vld [vmem:[%s5300_s14 + $0x8] sm:$0xff]   ;;  %4822 = vmatprep.subr.bf16.mxu1 %v4950_v50  ;;  %4717 = vmatprep.subr.bf16.mxu0 %v4952_v35 }
 0x1fa   : > { %v2452_v54 = vsub.f32 %v6782_v60, %v8952_v42  ;;  %v2443_v49 = vsub.f32 %v6798_v30, %v8951_v8  ;;  %v2444_v62 = vsub.f32 %v6798_v30, %v8952_v42  ;;  %v8955_v11 = vld [vmem:[#allocation44_spill] sm:$0xff]  ;;  %v7079_v41 = vadd.f32 %v2239_v20, %v8957_v43  ;;  %v8961_v60 = vld [vmem:[#allocation115_spill] sm:$0xff]  ;;  %v8969_v43 = vld [vmem:[#allocation46_spill] sm:$0xff]  ;;  %4718 = vmatpush3.bf16.msra.mxu0 %v4953_v59 }
 0x1fb   : > { %v7076_v28 = vadd.f32 %v2246_v7, %v8955_v11  ;;  %v8959_v33 = vld [vmem:[#allocation88_spill] sm:$0xff]  ;;  %v2247_v14 = vmul.f32 %v2183_v6, %v8961_v60  ;;  %v7086_v46 = vadd.f32 %v2249_v16, %v8962_v19  ;;  %v2515_v51 = vand.u32 2147483647, %v2451_v36  ;;  %v7091_v7 = vld [vmem:[%s5291_s0 + $0xa0] sm:$0xff]  ;;  %v8967_v11 = vld [vmem:[#allocation45_spill] sm:$0xff]  ;;  %v7103_v36 = vpop.permute.xlu0 %2412  ;;  %4830 = vmatpush3.bf16.msra.mxu1 %v4951_v38 }
 0x1fc   : > { %8958 = vst [vmem:[#allocation78_spill] sm:$0xff] %v7079_v41  ;;  %v7082_v27 = vadd.f32 %v2240_v17, %v8959_v33  ;;  %v8964_v30 = vld [vmem:[#allocation116_spill] sm:$0xff]  ;;  %v2516_v50 = vand.u32 2147483647, %v2452_v54  ;;  %3672 = vperm.xlu1 %4917, %v7012_v23   ;;  %2780 = vperm.xlu0 %4934, %v7091_v7   ;;  %v7098_v6 = vadd.f32 %v2243_v40, %v8967_v11  ;;  %v2573_v23 = vsub.f32 1.0, %v2509_v52  ;;  %v4954_v60 = vld [vmem:[%s5300_s14 + $0x40] sm:$0xff]  }
 0x1fd   : > { %8956 = vst [vmem:[#allocation77_spill] sm:$0xff] %v7076_v28  ;;  %8963 = vst [vmem:[#allocation100_spill] sm:$0xff] %v7086_v46  ;;  %v2248_v15 = vmul.f32 %v2184_v47, %v8964_v30  ;;  %v8965_v20 = vld [vmem:[#allocation48_spill] sm:$0xff]  ;;  %v7101_v16 = vadd.f32 %v2244_v58, %v8969_v43  ;;  %v2507_v47 = vand.u32 2147483647, %v2443_v49  ;;  %v2574_v54 = vsub.f32 1.0, %v2510_v24  ;;  %4823 = vmatprep.subr.bf16.mxu1 %v4952_v35 }
 0x1fe   : > { %8960 = vst [vmem:[#allocation107_spill] sm:$0xff] %v7082_v27  ;;  %v7095_v17 = vadd.f32 %v2250_v56, %v8965_v20  ;;  %8968 = vst [vmem:[#allocation110_spill] sm:$0xff] %v7098_v6  ;;  %v2508_v33 = vand.u32 2147483647, %v2444_v62  ;;  %v2455_v56 = vsub.f32 %v6800_v37, %v8951_v8  ;;  %v8971_v40 = vld [vmem:[#allocation89_spill] sm:$0xff]  ;;  %v2456_v58 = vsub.f32 %v6800_v37, %v8952_v42  ;;  %v4955_v52 = vld [vmem:[%s5300_s14] sm:$0xff]   ;;  %v7126_v37 = vpop.permute.xlu1 %2392 }
 0x1ff   : > { %8970 = vst [vmem:[#allocation111_spill] sm:$0xff] %v7101_v16  ;;  %v7109_v19 = vadd.f32 %v2247_v14, %v8971_v40  ;;  %v2447_v49 = vsub.f32 %v6829_v12, %v8951_v8  ;;  %v2448_v38 = vsub.f32 %v6829_v12, %v8952_v42  ;;  %v8973_v24 = vld [vmem:[#allocation90_spill] sm:$0xff]  ;;  %v2579_v30 = vsub.f32 1.0, %v2515_v51  ;;  %4719 = vmatprep.subr.bf16.mxu0 %v4954_v60 }
 0x200   : > { %8966 = vst [vmem:[#allocation101_spill] sm:$0xff] %v7095_v17  ;;  %v7119_v62 = vadd.f32 %v2248_v15, %v8973_v24  ;;  %v2580_v20 = vsub.f32 1.0, %v2516_v50  ;;  %v2519_v11 = vand.u32 2147483647, %v2455_v56  ;;  %4918 = vset.pattern.permute.xlu1 %v8892_v13  ;;  %v7123_v35 = vld [vmem:[%s5291_s0 + $0xb8] sm:$0xff]  ;;  %v2571_v14 = vsub.f32 1.0, %v2507_v47  ;;  %4720 = vmatpush3.bf16.msra.mxu0 %v4955_v52  ;;  %v7141_v17 = vpop.permute.xlu0 %2420 }
 0x201   : > { %8972 = vst [vmem:[#allocation38_spill] sm:$0xff] %v7109_v19  ;;  %2792 = vperm.xlu0 %4934, %v7123_v35   ;;  %v2520_v43 = vand.u32 2147483647, %v2456_v58  ;;  %v2511_v40 = vand.u32 2147483647, %v2447_v49  ;;  %v2459_v12 = vsub.f32 %v6831_v1, %v8951_v8  ;;  %2784 = vperm.xlu1 %4918, %v6712_v55   ;;  %v2572_v51 = vsub.f32 1.0, %v2508_v33 }
 0x202   : > { %8974 = vst [vmem:[#allocation103_spill] sm:$0xff] %v7119_v62  ;;  %v2460_v15 = vsub.f32 %v6831_v1, %v8952_v42  ;;  %v2449_v50 = vsub.f32 %v6857_v21, %v8951_v8  ;;  %v2450_v56 = vsub.f32 %v6857_v21, %v8952_v42  ;;  %4831 = vmatpush3.bf16.msra.mxu1 %v4953_v59  ;;  %v7137_v47 = vmax.f32 %v2573_v23, 0.0  ;;  %v7148_v19 = vld [vmem:[%s5291_s0 + $0xc0] sm:$0xff] }
 0x203   : > { %v7139_v58 = vmax.f32 %v2574_v54, 0.0  ;;  %v2512_v49 = vand.u32 2147483647, %v2448_v38  ;;  %v2523_v24 = vand.u32 2147483647, %v2459_v12  ;;  %4824 = vmatprep.subr.bf16.mxu1 %v4954_v60  ;;  %v7143_v33 = vmax.f32 %v2579_v30, 0.0 }
 0x204   : > { %v2583_v1 = vsub.f32 1.0, %v2519_v11  ;;  %v2584_v62 = vsub.f32 1.0, %v2520_v43  ;;  %v2463_v46 = vsub.f32 %v6859_v10, %v8951_v8  ;;  %v7151_v21 = vmax.f32 %v2580_v20, 0.0  ;;  %v7161_v43 = vpop.permute.xlu1 %2400  ;;  %v7179_v16 = vpop.permute.xlu0 %2428 }
 0x205   : > { %8975 = vst [vmem:[#allocation76_spill] sm:$0xff] %v7139_v58  ;;  %2796 = vperm.xlu0 %4934, %v7148_v19   ;;  %v7153_v59 = vmax.f32 %v2571_v14, 0.0  ;;  %v2575_v23 = vsub.f32 1.0, %v2511_v40  ;;  %v2524_v54 = vand.u32 2147483647, %v2460_v15  ;;  %4919 = vset.pattern.permute.xlu1 %v8863_v22  ;;  %v7156_v60 = vmax.f32 %v2572_v51, 0.0 }
 0x206   : > { %v2513_v38 = vand.u32 2147483647, %v2449_v50  ;;  %v2514_v30 = vand.u32 2147483647, %v2450_v56  ;;  %v2464_v11 = vsub.f32 %v6859_v10, %v8952_v42  ;;  %3228 = vperm.xlu1 %4919, %v6663_v53   ;;  %4832 = vmatpush3.bf16.msra.mxu1 %v4955_v52  ;;  %v2576_v20 = vsub.f32 1.0, %v2512_v49  ;;  %v7172_v10 = vld [vmem:[%s5291_s0 + $0xd8] sm:$0xff] }
 0x207   : > { %8976 = vst [vmem:[#allocation39_spill] sm:$0xff] %v7153_v59  ;;  %8977 = vst [vmem:[#allocation81_spill] sm:$0xff] %v7156_v60  ;;  %v2587_v14 = vsub.f32 1.0, %v2523_v24  ;;  %v2453_v40 = vsub.f32 %v6873_v2, %v8951_v8  ;;  %v2454_v12 = vsub.f32 %v6873_v2, %v8952_v42  ;;  %v7167_v51 = vmax.f32 %v2583_v1, 0.0 }
 0x208   : > { %v7169_v15 = vmax.f32 %v2584_v62, 0.0  ;;  %v2527_v50 = vand.u32 2147483647, %v2463_v46  ;;  %v2528_v56 = vand.u32 2147483647, %v2464_v11  ;;  %v7175_v53 = vmax.f32 %v2575_v23, 0.0 }
 0x209   : > { %2808 = vperm.xlu0 %4934, %v7172_v10   ;;  %v2588_v52 = vsub.f32 1.0, %v2524_v54  ;;  %v2517_v49 = vand.u32 2147483647, %v2453_v40  ;;  %v2467_v24 = vsub.f32 %v6875_v4, %v8951_v8  ;;  %v2577_v2 = vsub.f32 1.0, %v2513_v38 }
 0x20a   : > { %v2578_v1 = vsub.f32 1.0, %v2514_v30  ;;  %v2468_v62 = vsub.f32 %v6875_v4, %v8952_v42  ;;  %v2457_v46 = vsub.f32 %v6902_v48, %v8951_v8  ;;  %3292 = vperm.xlu1 %4919, %v7091_v7   ;;  %v7186_v11 = vmax.f32 %v2576_v20, 0.0  ;;  %v7193_v4 = vpop.permute.xlu1 %2408 }
 0x20b   : > { %v7188_v23 = vmax.f32 %v2587_v14, 0.0  ;;  %v2518_v54 = vand.u32 2147483647, %v2454_v12  ;;  %v2531_v40 = vand.u32 2147483647, %v2467_v24  ;;  %v2591_v6 = vsub.f32 1.0, %v2527_v50  ;;  %v7210_v24 = vpop.permute.xlu0 %2436 }
 0x20c   : > { %v2592_v28 = vsub.f32 1.0, %v2528_v56  ;;  %v2532_v41 = vand.u32 2147483647, %v2468_v62  ;;  %v2458_v38 = vsub.f32 %v6902_v48, %v8952_v42  ;;  %v7195_v30 = vmax.f32 %v2588_v52, 0.0 }
 0x20d   : > { %2748 = vperm.xlu0 %4934, %v6838_v9   ;;  %v2581_v27 = vsub.f32 1.0, %v2517_v49  ;;  %v2521_v61 = vand.u32 2147483647, %v2457_v46  ;;  %v2471_v20 = vsub.f32 %v6908_v26, %v8951_v8  ;;  %v7199_v14 = vmax.f32 %v2577_v2, 0.0 }
 0x20e   : > { %v7201_v12 = vmax.f32 %v2578_v1, 0.0  ;;  %v2522_v50 = vand.u32 2147483647, %v2458_v38  ;;  %v2472_v56 = vsub.f32 %v6908_v26, %v8952_v42  ;;  %3296 = vperm.xlu1 %4919, %v6712_v55   ;;  %v2582_v9 = vsub.f32 1.0, %v2518_v54  ;;  %v8980_v38 = vld [vmem:[#allocation61_spill] sm:$0xff] }
 0x20f   : > { %8978 = vst [vmem:[#allocation37_spill] sm:$0xff] %v7199_v14  ;;  %v2595_v48 = vsub.f32 1.0, %v2531_v40  ;;  %v2461_v52 = vsub.f32 %v6933_v31, %v8951_v8  ;;  %v2462_v49 = vsub.f32 %v6933_v31, %v8952_v42  ;;  %v7212_v2 = vmax.f32 %v2591_v6, 0.0 }
 0x210   : > { %8979 = vst [vmem:[#allocation85_spill] sm:$0xff] %v7201_v12  ;;  %v7214_v1 = vmax.f32 %v2592_v28, 0.0  ;;  %v2596_v62 = vsub.f32 1.0, %v2532_v41  ;;  %v2535_v46 = vand.u32 2147483647, %v2471_v20  ;;  %v7217_v26 = vmax.f32 %v2581_v27, 0.0  ;;  %v7226_v41 = vpop.permute.xlu1 %2416 }
 0x211   : > { %2816 = vperm.xlu0 %4934, %v8980_v38   ;;  %v2585_v55 = vsub.f32 1.0, %v2521_v61  ;;  %v2536_v54 = vand.u32 2147483647, %v2472_v56  ;;  %v2475_v40 = vsub.f32 %v6942_v57, %v8951_v8  ;;  %v2586_v5 = vsub.f32 1.0, %v2522_v50  ;;  %v8982_v28 = vld [vmem:[#allocation73_spill] sm:$0xff]  ;;  %v8985_v38 = vld [vmem:[#allocation31_spill] sm:$0xff] }
 0x212   : > { %8981 = vst [vmem:[#allocation86_spill] sm:$0xff] %v7217_v26  ;;  %v2525_v31 = vand.u32 2147483647, %v2461_v52  ;;  %v2476_v6 = vsub.f32 %v6942_v57, %v8952_v42  ;;  %v2465_v45 = vsub.f32 %v8982_v28, %v8951_v8  ;;  %4920 = vset.pattern.permute.xlu1 %v8887_v63  ;;  %v7228_v27 = vmax.f32 %v2582_v9, 0.0  ;;  %v7238_v26 = vld [vmem:[%s5291_s0 + $0x78] sm:$0xff] }
 0x213   : > { %v7230_v61 = vmax.f32 %v2595_v48, 0.0  ;;  %v2526_v20 = vand.u32 2147483647, %v2462_v49  ;;  %v2539_v56 = vand.u32 2147483647, %v2475_v40  ;;  %3616 = vperm.xlu1 %4920, %v8985_v38   ;;  %v7233_v50 = vmax.f32 %v2596_v62, 0.0 }
 0x214   : > { %8983 = vst [vmem:[#allocation40_spill] sm:$0xff] %v7228_v27  ;;  %v2599_v52 = vsub.f32 1.0, %v2535_v46  ;;  %v2540_v58 = vand.u32 2147483647, %v2476_v6  ;;  %v2466_v57 = vsub.f32 %v8982_v28, %v8952_v42  ;;  %v7241_v60 = vmax.f32 %v2585_v55, 0.0  ;;  %v7245_v40 = vpop.permute.xlu0 %3216 }
 0x215   : > { %8984 = vst [vmem:[#allocation82_spill] sm:$0xff] %v7230_v61  ;;  %8986 = vst [vmem:[#allocation114_spill] sm:$0xff] %v7233_v50  ;;  %2760 = vperm.xlu0 %4934, %v7238_v26   ;;  %v2600_v9 = vsub.f32 1.0, %v2536_v54  ;;  %v2529_v48 = vand.u32 2147483647, %v2465_v45  ;;  %v2479_v49 = vsub.f32 %v6984_v32, %v8951_v8  ;;  %v7247_v62 = vmax.f32 %v2586_v5, 0.0 }
 0x216   : > { %8987 = vst [vmem:[#allocation105_spill] sm:$0xff] %v7241_v60  ;;  %v2589_v46 = vsub.f32 1.0, %v2525_v31  ;;  %v2530_v6 = vand.u32 2147483647, %v2466_v57  ;;  %v2480_v28 = vsub.f32 %v6984_v32, %v8952_v42  ;;  %v2590_v38 = vsub.f32 1.0, %v2526_v20  ;;  %v7258_v31 = vpop.permute.xlu1 %2424 }
 0x217   : > { %8988 = vst [vmem:[#allocation106_spill] sm:$0xff] %v7247_v62  ;;  %v2603_v50 = vsub.f32 1.0, %v2539_v56  ;;  %v2469_v55 = vsub.f32 %v7008_v0, %v8951_v8  ;;  %v2470_v45 = vsub.f32 %v7008_v0, %v8952_v42  ;;  %3676 = vperm.xlu1 %4920, %v7091_v7   ;;  %v7256_v54 = vmax.f32 %v2599_v52, 0.0 }
 0x218   : > { %v2604_v61 = vsub.f32 1.0, %v2540_v58  ;;  %v2543_v5 = vand.u32 2147483647, %v2479_v49  ;;  %v2544_v62 = vand.u32 2147483647, %v2480_v28  ;;  %v7261_v32 = vmax.f32 %v2600_v9, 0.0  ;;  %v7265_v0 = vpop.permute.xlu0 %3284 }
 0x219   : > { %8989 = vst [vmem:[#allocation117_spill] sm:$0xff] %v7256_v54  ;;  %4936 = vset.pattern.permute.xlu0 %v8863_v22  ;;  %v2593_v20 = vsub.f32 1.0, %v2529_v48  ;;  %v2533_v56 = vand.u32 2147483647, %v2469_v55  ;;  %v2483_v57 = vsub.f32 %v7018_v34, %v8951_v8  ;;  %v7268_v7 = vmax.f32 %v2589_v46, 0.0 }
 0x21a   : > { %8990 = vst [vmem:[#allocation41_spill] sm:$0xff] %v7261_v32  ;;  %3248 = vperm.xlu0 %4936, %v6994_v29   ;;  %v2594_v58 = vsub.f32 1.0, %v2530_v6  ;;  %v2484_v52 = vsub.f32 %v7018_v34, %v8952_v42  ;;  %v2473_v9 = vsub.f32 %v7035_v44, %v8951_v8  ;;  %v7274_v48 = vmax.f32 %v2590_v38, 0.0  ;;  %v7284_v34 = vld [vmem:[%s5291_s0 + $0xb0] sm:$0xff] }
 0x21b   : > { %8991 = vst [vmem:[#allocation42_spill] sm:$0xff] %v7268_v7  ;;  %v7276_v49 = vmax.f32 %v2603_v50, 0.0  ;;  %v2534_v28 = vand.u32 2147483647, %v2470_v45  ;;  %v2547_v55 = vand.u32 2147483647, %v2483_v57  ;;  %4921 = vset.pattern.permute.xlu1 %v8892_v13  ;;  %v2474_v6 = vsub.f32 %v7035_v44, %v8952_v42 }
 0x21c   : > { %8992 = vst [vmem:[#allocation83_spill] sm:$0xff] %v7274_v48  ;;  %v7279_v32 = vmax.f32 %v2604_v61, 0.0  ;;  %v2607_v46 = vsub.f32 1.0, %v2543_v5  ;;  %v2608_v54 = vsub.f32 1.0, %v2544_v62  ;;  %2788 = vperm.xlu1 %4921, %v7284_v34   ;;  %v7287_v7 = vmax.f32 %v2593_v20, 0.0  ;;  %v7292_v57 = vld [vmem:[%s5291_s0 + $0xd0] sm:$0xff]  ;;  %v7301_v20 = vpop.permute.xlu0 %3232 }
 0x21d   : > { %v2597_v38 = vsub.f32 1.0, %v2533_v56  ;;  %v2548_v50 = vand.u32 2147483647, %v2484_v52  ;;  %v2487_v45 = vsub.f32 %v7055_v18, %v8951_v8  ;;  %v7295_v61 = vmax.f32 %v2594_v58, 0.0 }
 0x21e   : > { %8993 = vst [vmem:[#allocation84_spill] sm:$0xff] %v7279_v32  ;;  %8994 = vst [vmem:[#allocation118_spill] sm:$0xff] %v7287_v7  ;;  %3316 = vperm.xlu0 %4936, %v7292_v57   ;;  %v2537_v62 = vand.u32 2147483647, %v2473_v9  ;;  %v2538_v5 = vand.u32 2147483647, %v2474_v6  ;;  %v2488_v44 = vsub.f32 %v7055_v18, %v8952_v42  ;;  %v7299_v32 = vpop.permute.xlu1 %2432  ;;  %v2477_v7 = vsub.f32 %v7072_v25, %v8951_v8 }
 0x21f   : > { %8995 = vst [vmem:[#allocation43_spill] sm:$0xff] %v7295_v61  ;;  %v2598_v56 = vsub.f32 1.0, %v2534_v28  ;;  %v2611_v52 = vsub.f32 1.0, %v2547_v55  ;;  %v2478_v58 = vsub.f32 %v7072_v25, %v8952_v42  ;;  %v7307_v61 = vmax.f32 %v2607_v46, 0.0  ;;  %v7317_v55 = vld [vmem:[%s5291_s0 + $0x30] sm:$0xff]  ;;  %v7321_v25 = vld [vmem:[%s5291_s0 + $0x68] sm:$0xff] }
 0x220   : > { %v7309_v9 = vmax.f32 %v2608_v54, 0.0  ;;  %v2551_v6 = vand.u32 2147483647, %v2487_v45  ;;  %v2552_v18 = vand.u32 2147483647, %v2488_v44  ;;  %4922 = vset.pattern.permute.xlu1 %v8863_v22  ;;  %v7312_v48 = vmax.f32 %v2597_v38, 0.0 }
 0x221   : > { %8996 = vst [vmem:[#allocation108_spill] sm:$0xff] %v7307_v61  ;;  %v2612_v60 = vsub.f32 1.0, %v2548_v50  ;;  %v2541_v27 = vand.u32 2147483647, %v2477_v7  ;;  %v2491_v28 = vsub.f32 %v7103_v36, %v8951_v8  ;;  %3236 = vperm.xlu1 %4922, %v7317_v55   ;;  %v2601_v54 = vsub.f32 1.0, %v2537_v62 }
 0x222   : > { %8997 = vst [vmem:[#allocation109_spill] sm:$0xff] %v7309_v9  ;;  %8998 = vst [vmem:[#allocation15_spill] sm:$0xff] %v7312_v48  ;;  %3264 = vperm.xlu0 %4936, %v7321_v25   ;;  %v2602_v46 = vsub.f32 1.0, %v2538_v5  ;;  %v2492_v45 = vsub.f32 %v7103_v36, %v8952_v42  ;;  %v2481_v7 = vsub.f32 %v7126_v37, %v8951_v8  ;;  %v7328_v38 = vmax.f32 %v2598_v56, 0.0  ;;  %v7334_v5 = vpop.permute.xlu1 %2440  ;;  %v7336_v36 = vpop.permute.xlu0 %3300 }
 0x223   : > { %v7330_v50 = vmax.f32 %v2611_v52, 0.0  ;;  %v2542_v44 = vand.u32 2147483647, %v2478_v58  ;;  %v2555_v48 = vand.u32 2147483647, %v2491_v28  ;;  %v2615_v9 = vsub.f32 1.0, %v2551_v6 }
 0x224   : > { %8999 = vst [vmem:[#allocation16_spill] sm:$0xff] %v7328_v38  ;;  %v2616_v61 = vsub.f32 1.0, %v2552_v18  ;;  %v2556_v12 = vand.u32 2147483647, %v2492_v45  ;;  %v2482_v62 = vsub.f32 %v7126_v37, %v8952_v42  ;;  %v7338_v14 = vmax.f32 %v2612_v60, 0.0  ;;  %v5018_v38 = vld [vmem:[%s5291_s0 + $0x38] sm:$0xff] }
 0x225   : > { %9000 = vst [vmem:[#allocation112_spill] sm:$0xff] %v7330_v50  ;;  %v2605_v59 = vsub.f32 1.0, %v2541_v27  ;;  %v2545_v56 = vand.u32 2147483647, %v2481_v7  ;;  %v2495_v52 = vsub.f32 %v7141_v17, %v8951_v8  ;;  %3240 = vperm.xlu1 %4922, %v5018_v38   ;;  %v5019_v58 = vld [vmem:[%s5291_s0 + $0x70] sm:$0xff]  ;;  %v7344_v6 = vmax.f32 %v2601_v54, 0.0 }
 0x226   : > { %9001 = vst [vmem:[#allocation113_spill] sm:$0xff] %v7338_v14  ;;  %3268 = vperm.xlu0 %4936, %v5019_v58   ;;  %v7346_v18 = vmax.f32 %v2602_v46, 0.0  ;;  %v2546_v37 = vand.u32 2147483647, %v2482_v62  ;;  %v2496_v28 = vsub.f32 %v7141_v17, %v8952_v42  ;;  %v2606_v60 = vsub.f32 1.0, %v2542_v44 }
 0x227   : > { %9002 = vst [vmem:[#allocation44_spill] sm:$0xff] %v7344_v6  ;;  %v2619_v45 = vsub.f32 1.0, %v2555_v48  ;;  %v2485_v27 = vsub.f32 %v7161_v43, %v8951_v8  ;;  %v2486_v7 = vsub.f32 %v7161_v43, %v8952_v42  ;;  %v7354_v38 = vmax.f32 %v2615_v9, 0.0  ;;  %v5020_v48 = vld [vmem:[%s5291_s0 + $0xf8] sm:$0xff] }
 0x228   : > { %9003 = vst [vmem:[#allocation87_spill] sm:$0xff] %v7346_v18  ;;  %v7356_v58 = vmax.f32 %v2616_v61, 0.0  ;;  %v2620_v54 = vsub.f32 1.0, %v2556_v12  ;;  %v2559_v46 = vand.u32 2147483647, %v2495_v52  ;;  %v7358_v18 = vmax.f32 %v2605_v59, 0.0 }
 0x229   : > { %9004 = vst [vmem:[#allocation88_spill] sm:$0xff] %v7354_v38  ;;  %v2609_v62 = vsub.f32 1.0, %v2545_v56  ;;  %v2560_v6 = vand.u32 2147483647, %v2496_v28  ;;  %v2499_v17 = vsub.f32 %v7179_v16, %v8951_v8  ;;  %3304 = vperm.xlu1 %4922, %v7123_v35   ;;  %v2610_v44 = vsub.f32 1.0, %v2546_v37  ;;  %v7368_v61 = vpop.permute.xlu1 %2704  ;;  %v7370_v59 = vpop.permute.xlu0 %3596 }
 0x22a   : > { %9005 = vst [vmem:[#allocation115_spill] sm:$0xff] %v7356_v58  ;;  %9006 = vst [vmem:[#allocation47_spill] sm:$0xff] %v7358_v18  ;;  %3336 = vperm.xlu0 %4936, %v5020_v48   ;;  %v2549_v14 = vand.u32 2147483647, %v2485_v27  ;;  %v2500_v43 = vsub.f32 %v7179_v16, %v8952_v42  ;;  %v2489_v12 = vsub.f32 %v7193_v4, %v8951_v8  ;;  %v7372_v9 = vmax.f32 %v2606_v60, 0.0 }
 0x22b   : > { %v7374_v56 = vmax.f32 %v2619_v45, 0.0  ;;  %v2550_v52 = vand.u32 2147483647, %v2486_v7  ;;  %v2563_v28 = vand.u32 2147483647, %v2499_v17  ;;  %v7376_v58 = vmax.f32 %v2620_v54, 0.0 }
 0x22c   : > { %v2623_v37 = vsub.f32 1.0, %v2559_v46  ;;  %v2564_v27 = vand.u32 2147483647, %v2500_v43  ;;  %v2490_v16 = vsub.f32 %v7193_v4, %v8952_v42  ;;  %v7380_v48 = vmax.f32 %v2609_v62, 0.0 }
 0x22d   : > { %9007 = vst [vmem:[#allocation116_spill] sm:$0xff] %v7374_v56  ;;  %9008 = vst [vmem:[#allocation48_spill] sm:$0xff] %v7376_v58  ;;  %v2624_v38 = vsub.f32 1.0, %v2560_v6  ;;  %v2553_v50 = vand.u32 2147483647, %v2489_v12  ;;  %v2503_v18 = vsub.f32 %v7210_v24, %v8951_v8  ;;  %4924 = vset.pattern.permute.xlu1 %v8887_v63  ;;  %v7386_v60 = vmax.f32 %v2610_v44, 0.0  ;;  %v7391_v4 = vpop.permute.xlu1 %2708  ;;  %v7393_v6 = vpop.permute.xlu0 %3664 }
 0x22e   : > { %4939 = vset.pattern.permute.xlu0 %v8887_v63  ;;  %v2613_v45 = vsub.f32 1.0, %v2549_v14  ;;  %v2554_v7 = vand.u32 2147483647, %v2490_v16  ;;  %v2504_v54 = vsub.f32 %v7210_v24, %v8952_v42  ;;  %3620 = vperm.xlu1 %4924, %v7317_v55   ;;  %v2614_v46 = vsub.f32 1.0, %v2550_v52 }
 0x22f   : > { %9009 = vst [vmem:[#allocation45_spill] sm:$0xff] %v7386_v60  ;;  %3656 = vperm.xlu0 %4939, %v7238_v26   ;;  %v2627_v62 = vsub.f32 1.0, %v2563_v28  ;;  %v2493_v17 = vsub.f32 %v7226_v41, %v8951_v8  ;;  %v2494_v14 = vsub.f32 %v7226_v41, %v8952_v42  ;;  %v7400_v44 = vmax.f32 %v2623_v37, 0.0 }
 0x230   : > { %v2628_v43 = vsub.f32 1.0, %v2564_v27  ;;  %v2567_v24 = vand.u32 2147483647, %v2503_v18  ;;  %v2568_v12 = vand.u32 2147483647, %v2504_v54  ;;  %v7402_v55 = vmax.f32 %v2624_v38, 0.0 }
 0x231   : > { %9010 = vst [vmem:[#allocation46_spill] sm:$0xff] %v7400_v44  ;;  %v2617_v16 = vsub.f32 1.0, %v2553_v50  ;;  %v2557_v58 = vand.u32 2147483647, %v2493_v17  ;;  %v3341_v26 = vsub.f32 %v7245_v40, %v8951_v8  ;;  %v2618_v52 = vsub.f32 1.0, %v2554_v7  ;;  %v7411_v37 = vpop.permute.xlu1 %2716  ;;  %v7413_v18 = vpop.permute.xlu0 %3608 }
 0x232   : > { %9011 = vst [vmem:[#allocation89_spill] sm:$0xff] %v7402_v55  ;;  %v2558_v28 = vand.u32 2147483647, %v2494_v14  ;;  %v3342_v56 = vsub.f32 %v7245_v40, %v8952_v42  ;;  %v2497_v41 = vsub.f32 %v7258_v31, %v8951_v8  ;;  %3684 = vperm.xlu1 %4924, %v7284_v34   ;;  %v7415_v38 = vmax.f32 %v2613_v45, 0.0 }
 0x233   : > { %v7417_v50 = vmax.f32 %v2614_v46, 0.0  ;;  %v7419_v27 = vmax.f32 %v2627_v62, 0.0  ;;  %v3405_v7 = vand.u32 2147483647, %v3341_v26  ;;  %v7421_v54 = vmax.f32 %v2628_v43, 0.0 }
 0x234   : > { %9012 = vst [vmem:[#allocation90_spill] sm:$0xff] %v7415_v38  ;;  %v2631_v17 = vsub.f32 1.0, %v2567_v24  ;;  %v2632_v40 = vsub.f32 1.0, %v2568_v12  ;;  %v2498_v14 = vsub.f32 %v7258_v31, %v8952_v42  ;;  %v2621_v44 = vsub.f32 1.0, %v2557_v58 }
 0x235   : > { %9013 = vst [vmem:[#allocation61_spill] sm:$0xff] %v7417_v50  ;;  %9014 = vst [vmem:[#allocation73_spill] sm:$0xff] %v7419_v27  ;;  %v3406_v34 = vand.u32 2147483647, %v3342_v56  ;;  %v2561_v55 = vand.u32 2147483647, %v2497_v41  ;;  %v3375_v60 = vsub.f32 %v7265_v0, %v8951_v8  ;;  %v3376_v43 = vsub.f32 %v7265_v0, %v8952_v42  ;;  %v7434_v24 = vpop.permute.xlu1 %2724  ;;  %v7444_v0 = vpop.permute.xlu0 %3612 }
 0x236   : > { %9015 = vst [vmem:[#allocation31_spill] sm:$0xff] %v7421_v54  ;;  %v7427_v45 = vmax.f32 %v2617_v16, 0.0  ;;  %v7429_v46 = vmax.f32 %v2618_v52, 0.0  ;;  %v2622_v62 = vsub.f32 1.0, %v2558_v28  ;;  %3688 = vperm.xlu1 %4924, %v7123_v35   ;;  %v3469_v12 = vsub.f32 1.0, %v3405_v7 }
 0x237   : > { %v2562_v31 = vand.u32 2147483647, %v2498_v14  ;;  %v2501_v58 = vsub.f32 %v7299_v32, %v8951_v8  ;;  %v2502_v56 = vsub.f32 %v7299_v32, %v8952_v42  ;;  %v7440_v16 = vmax.f32 %v2631_v17, 0.0 }
 0x238   : > { %9016 = vst [vmem:[#allocation121_spill] sm:$0xff] %v7427_v45  ;;  %9017 = vst [vmem:[#allocation122_spill] sm:$0xff] %v7429_v46  ;;  %v7442_v26 = vmax.f32 %v2632_v40, 0.0  ;;  %v3439_v52 = vand.u32 2147483647, %v3375_v60  ;;  %v7446_v35 = vmax.f32 %v2621_v44, 0.0  ;;  %v3349_v14 = vsub.f32 %v7301_v20, %v8951_v8 }
 0x239   : > { %9018 = vst [vmem:[#allocation123_spill] sm:$0xff] %v7440_v16  ;;  %v3440_v28 = vand.u32 2147483647, %v3376_v43  ;;  %v3470_v41 = vsub.f32 1.0, %v3406_v34  ;;  %v2625_v7 = vsub.f32 1.0, %v2561_v55  ;;  %v3350_v32 = vsub.f32 %v7301_v20, %v8952_v42  ;;  %v7455_v60 = vpop.permute.xlu1 %2732  ;;  %v5021_v43 = vld [vmem:[%s5291_s0 + $0xc8] sm:$0xff] }
 0x23a   : > { %9019 = vst [vmem:[#allocation124_spill] sm:$0xff] %v7442_v26  ;;  %9020 = vst [vmem:[#allocation125_spill] sm:$0xff] %v7446_v35  ;;  %v2565_v54 = vand.u32 2147483647, %v2501_v58  ;;  %v2566_v27 = vand.u32 2147483647, %v2502_v56  ;;  %v2505_v17 = vsub.f32 %v7334_v5, %v8951_v8  ;;  %4925 = vset.pattern.permute.xlu1 %v8892_v13  ;;  %v2506_v20 = vsub.f32 %v7334_v5, %v8952_v42 }
 0x23b   : > { %v7457_v40 = vmax.f32 %v2622_v62, 0.0  ;;  %v7459_v44 = vmax.f32 %v3469_v12, 0.0  ;;  %v2626_v55 = vsub.f32 1.0, %v2562_v31  ;;  %v3413_v34 = vand.u32 2147483647, %v3349_v14  ;;  %2800 = vperm.xlu1 %4925, %v5021_v43  }
 0x23c   : > { %v3503_v58 = vsub.f32 1.0, %v3439_v52  ;;  %v3504_v56 = vsub.f32 1.0, %v3440_v28  ;;  %v3414_v26 = vand.u32 2147483647, %v3350_v32  ;;  %v7464_v16 = vmax.f32 %v3470_v41, 0.0  ;;  %v7472_v28 = vpop.permute.xlu0 %3680 }
 0x23d   : > { %9021 = vst [vmem:[#allocation126_spill] sm:$0xff] %v7457_v40  ;;  %v7466_v35 = vmax.f32 %v2625_v7, 0.0  ;;  %v2569_v46 = vand.u32 2147483647, %v2505_v17  ;;  %v3383_v62 = vsub.f32 %v7336_v36, %v8951_v8  ;;  %v2629_v12 = vsub.f32 1.0, %v2565_v54  ;;  %v7474_v32 = vpop.permute.xlu1 %2740  ;;  %v5022_v40 = vld [vmem:[%s5291_s0 + $0x40] sm:$0xff] }
 0x23e   : > { %v2630_v31 = vsub.f32 1.0, %v2566_v27  ;;  %v3477_v14 = vsub.f32 1.0, %v3413_v34  ;;  %v3384_v52 = vsub.f32 %v7336_v36, %v8952_v42  ;;  %v2570_v5 = vand.u32 2147483647, %v2506_v20 }
 0x23f   : > { %9022 = vst [vmem:[#allocation127_spill] sm:$0xff] %v7466_v35  ;;  %v3447_v41 = vand.u32 2147483647, %v3383_v62  ;;  %v2829_v7 = vsub.f32 %v7368_v61, %v5482_v3  ;;  %v2830_v17 = vsub.f32 %v7368_v61, %v5486_v39  ;;  %4926 = vset.pattern.permute.xlu1 %v8863_v22  ;;  %v7481_v54 = vmax.f32 %v2626_v55, 0.0 }
 0x240   : > { %v7483_v27 = vmax.f32 %v3503_v58, 0.0  ;;  %v7485_v34 = vmax.f32 %v3504_v56, 0.0  ;;  %v3478_v36 = vsub.f32 1.0, %v3414_v26  ;;  %3244 = vperm.xlu1 %4926, %v5022_v40   ;;  %v2633_v35 = vsub.f32 1.0, %v2569_v46 }
 0x241   : > { %9023 = vst [vmem:[#allocation128_spill] sm:$0xff] %v7481_v54  ;;  %v3448_v20 = vand.u32 2147483647, %v3384_v52  ;;  %v2893_v62 = vand.u32 2147483647, %v2829_v7  ;;  %v3723_v45 = vsub.f32 %v7370_v59, %v5482_v3  ;;  %v7490_v50 = vmax.f32 %v2629_v12, 0.0  ;;  %v7496_v56 = vpop.permute.xlu1 %2764 }
 0x242   : > { %v2894_v61 = vand.u32 2147483647, %v2830_v17  ;;  %v3724_v55 = vsub.f32 %v7370_v59, %v5486_v39  ;;  %v2831_v58 = vsub.f32 %v7391_v4, %v5482_v3  ;;  %v7498_v26 = vmax.f32 %v2630_v31, 0.0 }
 0x243   : > { %9024 = vst [vmem:[#allocation129_spill] sm:$0xff] %v7490_v50  ;;  %v7500_v40 = vmax.f32 %v3477_v14, 0.0  ;;  %v2634_v46 = vsub.f32 1.0, %v2570_v5  ;;  %v3511_v52 = vsub.f32 1.0, %v3447_v41  ;;  %v2957_v7 = vsub.f32 1.0, %v2893_v62  ;;  %v7504_v50 = vpop.permute.xlu0 %3624 }
 0x244   : > { %9025 = vst [vmem:[#allocation130_spill] sm:$0xff] %v7498_v26  ;;  %v3787_v54 = vand.u32 2147483647, %v3723_v45  ;;  %v2832_v12 = vsub.f32 %v7391_v4, %v5486_v39  ;;  %v2895_v17 = vand.u32 2147483647, %v2831_v58  ;;  %3308 = vperm.xlu1 %4926, %v7148_v19   ;;  %v7507_v59 = vmax.f32 %v3478_v36, 0.0 }
 0x245   : > { %9026 = vst [vmem:[#allocation131_spill] sm:$0xff] %v7500_v40  ;;  %v7509_v38 = vmax.f32 %v2633_v35, 0.0  ;;  %v3512_v31 = vsub.f32 1.0, %v3448_v20  ;;  %v3757_v14 = vsub.f32 %v7393_v6, %v5482_v3  ;;  %v2958_v5 = vsub.f32 1.0, %v2894_v61 }
 0x246   : > { %9027 = vst [vmem:[#allocation132_spill] sm:$0xff] %v7507_v59  ;;  %v3788_v41 = vand.u32 2147483647, %v3724_v55  ;;  %v2896_v62 = vand.u32 2147483647, %v2832_v12  ;;  %v3758_v45 = vsub.f32 %v7393_v6, %v5486_v39  ;;  %v7515_v4 = vmax.f32 %v2634_v46, 0.0  ;;  %v7519_v26 = vpop.permute.xlu1 %3212 }
 0x247   : > { %9028 = vst [vmem:[#allocation133_spill] sm:$0xff] %v7509_v38  ;;  %v2959_v58 = vsub.f32 1.0, %v2895_v17  ;;  %v3821_v40 = vand.u32 2147483647, %v3757_v14  ;;  %v2835_v36 = vsub.f32 %v7411_v37, %v5482_v3  ;;  %v7521_v35 = vmax.f32 %v3511_v52, 0.0 }
 0x248   : > { %9029 = vst [vmem:[#allocation134_spill] sm:$0xff] %v7515_v4  ;;  %v3021_v20 = vmax.f32 %v2957_v7, 0.0  ;;  %v3851_v38 = vsub.f32 1.0, %v3787_v54  ;;  %v2960_v59 = vsub.f32 1.0, %v2896_v62  ;;  %3312 = vperm.xlu1 %4926, %v5021_v43   ;;  %v3822_v61 = vand.u32 2147483647, %v3758_v45  ;;  %v7533_v7 = vpop.permute.xlu0 %3628 }
 0x249   : > { %9030 = vst [vmem:[#allocation135_spill] sm:$0xff] %v7521_v35  ;;  %v2836_v55 = vsub.f32 %v7411_v37, %v5486_v39  ;;  %v2899_v6 = vand.u32 2147483647, %v2835_v36  ;;  %v3729_v46 = vsub.f32 %v7413_v18, %v5482_v3  ;;  %v7527_v12 = vmax.f32 %v3512_v31, 0.0 }
 0x24a   : > { %v7529_v17 = vmax.f32 %v2958_v5, 0.0  ;;  %v3852_v14 = vsub.f32 1.0, %v3788_v41  ;;  %v3730_v52 = vsub.f32 %v7413_v18, %v5486_v39  ;;  %v3023_v54 = vmax.f32 %v2959_v58, 0.0  ;;  %v7535_v4 = vpop.permute.xlu1 %3276 }
 0x24b   : > { %9031 = vst [vmem:[#allocation136_spill] sm:$0xff] %v7527_v12  ;;  %v3024_v43 = vmax.f32 %v2960_v59, 0.0  ;;  %v3885_v62 = vsub.f32 1.0, %v3821_v40  ;;  %v2900_v45 = vand.u32 2147483647, %v2836_v55  ;;  %v2963_v37 = vsub.f32 1.0, %v2899_v6 }
 0x24c   : > { %v3793_v36 = vand.u32 2147483647, %v3729_v46  ;;  %v3794_v35 = vand.u32 2147483647, %v3730_v52  ;;  %v2839_v31 = vsub.f32 %v7434_v24, %v5482_v3  ;;  %4927 = vset.pattern.permute.xlu1 %v8887_v63  ;;  %v7541_v5 = vmul.f32 %v3021_v20, %v7137_v47 }
 0x24d   : > { %v7543_v18 = vmax.f32 %v3851_v38, 0.0  ;;  %v3886_v41 = vsub.f32 1.0, %v3822_v61  ;;  %v2840_v40 = vsub.f32 %v7434_v24, %v5486_v39  ;;  %3632 = vperm.xlu1 %4927, %v6994_v29   ;;  %v2964_v59 = vsub.f32 1.0, %v2900_v45 }
 0x24e   : > { %v2903_v58 = vand.u32 2147483647, %v2839_v31  ;;  %v3731_v55 = vsub.f32 %v7444_v0, %v5482_v3  ;;  %v3732_v6 = vsub.f32 %v7444_v0, %v5486_v39  ;;  %v7552_v46 = vmax.f32 %v3852_v14, 0.0  ;;  %v7559_v61 = vpop.permute.xlu1 %3280  ;;  %v7564_v31 = vpop.permute.xlu0 %3696 }
 0x24f   : > { %v7555_v47 = vmul.f32 %v3023_v54, %v7175_v53  ;;  %v7557_v38 = vmax.f32 %v3885_v62, 0.0  ;;  %v2904_v20 = vand.u32 2147483647, %v2840_v40  ;;  %v7562_v29 = vmul.f32 %v3024_v43, %v7186_v11 }
 0x250   : > { %v3027_v24 = vmax.f32 %v2963_v37, 0.0  ;;  %v3857_v52 = vsub.f32 1.0, %v3793_v36  ;;  %v3858_v45 = vsub.f32 1.0, %v3794_v35  ;;  %v2967_v12 = vsub.f32 1.0, %v2903_v58 }
 0x251   : > { %9032 = vst [vmem:[#allocation137_spill] sm:$0xff] %v7555_v47  ;;  %v3795_v0 = vand.u32 2147483647, %v3731_v55  ;;  %v2843_v14 = vsub.f32 %v7455_v60, %v5482_v3  ;;  %v2844_v53 = vsub.f32 %v7455_v60, %v5486_v39  ;;  %3692 = vperm.xlu1 %4927, %v7148_v19   ;;  %v7571_v54 = vmax.f32 %v3886_v41, 0.0 }
 0x252   : > { %v3028_v62 = vmax.f32 %v2964_v59, 0.0  ;;  %v3796_v11 = vand.u32 2147483647, %v3732_v6  ;;  %v3765_v43 = vsub.f32 %v7472_v28, %v5482_v3  ;;  %v2968_v35 = vsub.f32 1.0, %v2904_v20 }
 0x253   : > { %9033 = vst [vmem:[#allocation138_spill] sm:$0xff] %v7571_v54  ;;  %v2907_v37 = vand.u32 2147483647, %v2843_v14  ;;  %v2908_v36 = vand.u32 2147483647, %v2844_v53  ;;  %v3766_v40 = vsub.f32 %v7472_v28, %v5486_v39  ;;  %v7578_v58 = vmul.f32 %v3027_v24, %v7143_v33 }
 0x254   : > { %v7580_v55 = vmax.f32 %v3857_v52, 0.0  ;;  %v7582_v60 = vmax.f32 %v3858_v45, 0.0  ;;  %v3829_v19 = vand.u32 2147483647, %v3765_v43  ;;  %v7584_v41 = vpop.permute.xlu1 %3600  ;;  %v3031_v59 = vmax.f32 %v2967_v12, 0.0  ;;  %v7593_v52 = vpop.permute.xlu0 %3640 }
 0x255   : > { %9034 = vst [vmem:[#allocation139_spill] sm:$0xff] %v7578_v58  ;;  %v3859_v6 = vsub.f32 1.0, %v3795_v0  ;;  %v2971_v54 = vsub.f32 1.0, %v2907_v37  ;;  %v2972_v47 = vsub.f32 1.0, %v2908_v36  ;;  %4928 = vset.pattern.permute.xlu1 %v8892_v13  ;;  %v3830_v20 = vand.u32 2147483647, %v3766_v40 }
 0x256   : > { %v2847_v28 = vsub.f32 %v7474_v32, %v5482_v3  ;;  %v2848_v33 = vsub.f32 %v7474_v32, %v5486_v39  ;;  %v3737_v24 = vsub.f32 %v7504_v50, %v5482_v3  ;;  %2804 = vperm.xlu1 %4928, %v7292_v57   ;;  %v7597_v12 = vmul.f32 %v3028_v62, %v7151_v21 }
 0x257   : > { %v3032_v45 = vmax.f32 %v2968_v35, 0.0  ;;  %v3860_v0 = vsub.f32 1.0, %v3796_v11  ;;  %v3893_v14 = vsub.f32 1.0, %v3829_v19  ;;  %v3738_v37 = vsub.f32 %v7504_v50, %v5486_v39 }
 0x258   : > { %9035 = vst [vmem:[#allocation140_spill] sm:$0xff] %v7597_v12  ;;  %v2911_v53 = vand.u32 2147483647, %v2847_v28  ;;  %v2912_v43 = vand.u32 2147483647, %v2848_v33  ;;  %v2859_v32 = vsub.f32 %v7496_v56, %v5482_v3  ;;  %v7603_v36 = vpop.permute.xlu1 %3660  ;;  %v7606_v40 = vmul.f32 %v3031_v59, %v7167_v51  ;;  %v7618_v59 = vld [vmem:[%s5291_s0 + $0x50] sm:$0xff] }
 0x259   : > { %v7608_v58 = vmax.f32 %v3859_v6, 0.0  ;;  %v3035_v21 = vmax.f32 %v2971_v54, 0.0  ;;  %v3036_v62 = vmax.f32 %v2972_v47, 0.0  ;;  %v3894_v11 = vsub.f32 1.0, %v3830_v20  ;;  %v7628_v20 = vpop.permute.xlu0 %3644 }
 0x25a   : > { %9036 = vst [vmem:[#allocation141_spill] sm:$0xff] %v7606_v40  ;;  %v2975_v35 = vsub.f32 1.0, %v2911_v53  ;;  %v3801_v19 = vand.u32 2147483647, %v3737_v24  ;;  %v2860_v28 = vsub.f32 %v7496_v56, %v5486_v39  ;;  %4929 = vset.pattern.permute.xlu1 %v8863_v22  ;;  %v2976_v50 = vsub.f32 1.0, %v2912_v43 }
 0x25b   : > { %9037 = vst [vmem:[#allocation142_spill] sm:$0xff] %v7608_v58  ;;  %v2923_v33 = vand.u32 2147483647, %v2859_v32  ;;  %v3739_v12 = vsub.f32 %v7533_v7, %v5482_v3  ;;  %v3740_v51 = vsub.f32 %v7533_v7, %v5486_v39  ;;  %3252 = vperm.xlu1 %4929, %v7618_v59   ;;  %v7622_v47 = vmul.f32 %v3032_v45, %v7169_v15 }
 0x25c   : > { %v7624_v54 = vmax.f32 %v3860_v0, 0.0  ;;  %v7626_v56 = vmax.f32 %v3893_v14, 0.0  ;;  %v3802_v6 = vand.u32 2147483647, %v3738_v37  ;;  %v7631_v24 = vmul.f32 %v3035_v21, %v7188_v23  ;;  %v5024_v23 = vld [vmem:[%s5291_s0 + $0x58] sm:$0xff] }
 0x25d   : > { %9038 = vst [vmem:[#allocation143_spill] sm:$0xff] %v7622_v47  ;;  %v2924_v53 = vand.u32 2147483647, %v2860_v28  ;;  %v2987_v7 = vsub.f32 1.0, %v2923_v33  ;;  %v3803_v43 = vand.u32 2147483647, %v3739_v12  ;;  %v7633_v32 = vpop.permute.xlu1 %2772  ;;  %v7636_v40 = vmul.f32 %v3036_v62, %v7195_v30 }
 0x25e   : > { %9039 = vst [vmem:[#allocation144_spill] sm:$0xff] %v7624_v54  ;;  %9040 = vst [vmem:[#allocation145_spill] sm:$0xff] %v7626_v56  ;;  %v7638_v15 = vmax.f32 %v3894_v11, 0.0  ;;  %v3865_v45 = vsub.f32 1.0, %v3801_v19  ;;  %v3804_v0 = vand.u32 2147483647, %v3740_v51  ;;  %v3339_v56 = vsub.f32 %v7519_v26, %v8951_v8 }
 0x25f   : > { %9041 = vst [vmem:[#allocation146_spill] sm:$0xff] %v7631_v24  ;;  %9042 = vst [vmem:[#allocation147_spill] sm:$0xff] %v7636_v40  ;;  %v3039_v14 = vmax.f32 %v2975_v35, 0.0  ;;  %v3040_v47 = vmax.f32 %v2976_v50, 0.0  ;;  %v3051_v37 = vmax.f32 %v2987_v7, 0.0  ;;  %3256 = vperm.xlu1 %4929, %v5024_v23   ;;  %v3866_v21 = vsub.f32 1.0, %v3802_v6  ;;  %v7654_v7 = vpop.permute.xlu0 %3712 }
 0x260   : > { %9043 = vst [vmem:[#allocation148_spill] sm:$0xff] %v7638_v15  ;;  %v3340_v12 = vsub.f32 %v7519_v26, %v8952_v42  ;;  %v3773_v30 = vsub.f32 %v7564_v31, %v5482_v3  ;;  %v3774_v62 = vsub.f32 %v7564_v31, %v5486_v39  ;;  %v2988_v11 = vsub.f32 1.0, %v2924_v53  ;;  %v7757_v15 = vld [vmem:[%s5291_s0 + $0xe0] sm:$0xff] }
 0x261   : > { %v7650_v35 = vmul.f32 %v3051_v37, %v7276_v49  ;;  %v3867_v19 = vsub.f32 1.0, %v3803_v43  ;;  %v3403_v28 = vand.u32 2147483647, %v3339_v56  ;;  %v3868_v50 = vsub.f32 1.0, %v3804_v0 }
 0x262   : > { %v3404_v33 = vand.u32 2147483647, %v3340_v12  ;;  %v3837_v51 = vand.u32 2147483647, %v3773_v30  ;;  %v3371_v6 = vsub.f32 %v7535_v4, %v8951_v8  ;;  %v7656_v26 = vpop.permute.xlu1 %3220  ;;  %v3838_v23 = vand.u32 2147483647, %v3774_v62 }
 0x263   : > { %9044 = vst [vmem:[#allocation149_spill] sm:$0xff] %v7650_v35  ;;  %v3372_v31 = vsub.f32 %v7535_v4, %v8952_v42  ;;  %v3745_v49 = vsub.f32 %v7593_v52, %v5482_v3  ;;  %v3746_v56 = vsub.f32 %v7593_v52, %v5486_v39  ;;  %3320 = vperm.xlu1 %4929, %v7172_v10   ;;  %v7671_v0 = vmax.f32 %v3865_v45, 0.0 }
 0x264   : > { %v7666_v53 = vmul.f32 %v3039_v14, %v7212_v2  ;;  %v7669_v43 = vmul.f32 %v3040_v47, %v7214_v1  ;;  %v3467_v37 = vsub.f32 1.0, %v3403_v28  ;;  %v3435_v12 = vand.u32 2147483647, %v3371_v6 }
 0x265   : > { %9047 = vst [vmem:[#allocation152_spill] sm:$0xff] %v7671_v0  ;;  %v3436_v30 = vand.u32 2147483647, %v3372_v31  ;;  %v3809_v4 = vand.u32 2147483647, %v3745_v49  ;;  %v3373_v62 = vsub.f32 %v7559_v61, %v8951_v8  ;;  %v7675_v24 = vmax.f32 %v3866_v21, 0.0 }
 0x266   : > { %9045 = vst [vmem:[#allocation150_spill] sm:$0xff] %v7666_v53  ;;  %9046 = vst [vmem:[#allocation151_spill] sm:$0xff] %v7669_v43  ;;  %v7677_v52 = vmax.f32 %v2988_v11, 0.0  ;;  %v7679_v40 = vmax.f32 %v3867_v19, 0.0  ;;  %v7681_v2 = vmax.f32 %v3868_v50, 0.0  ;;  %v7683_v14 = vpop.permute.xlu1 %3224  ;;  %v3468_v1 = vsub.f32 1.0, %v3404_v33  ;;  %v2701_v19 = vpop.permute.xlu0 %2700 }
 0x267   : > { %9048 = vst [vmem:[#allocation153_spill] sm:$0xff] %v7675_v24  ;;  %v3901_v47 = vsub.f32 1.0, %v3837_v51  ;;  %v3902_v45 = vsub.f32 1.0, %v3838_v23  ;;  %v3810_v28 = vand.u32 2147483647, %v3746_v56  ;;  %4930 = vset.pattern.permute.xlu1 %v8887_v63  ;;  %v3531_v6 = vmax.f32 %v3467_v37, 0.0 }
 0x268   : > { %9049 = vst [vmem:[#allocation154_spill] sm:$0xff] %v7679_v40  ;;  %9050 = vst [vmem:[#allocation155_spill] sm:$0xff] %v7681_v2  ;;  %v3374_v31 = vsub.f32 %v7559_v61, %v8952_v42  ;;  %v3437_v21 = vand.u32 2147483647, %v3373_v62  ;;  %v3747_v11 = vsub.f32 %v7628_v20, %v5482_v3  ;;  %3636 = vperm.xlu1 %4930, %v7618_v59   ;;  %v3499_v50 = vsub.f32 1.0, %v3435_v12 }
 0x269   : > { %v3500_v49 = vsub.f32 1.0, %v3436_v30  ;;  %v3873_v53 = vsub.f32 1.0, %v3809_v4  ;;  %v3748_v33 = vsub.f32 %v7628_v20, %v5486_v39  ;;  %v3725_v37 = vsub.f32 %v7584_v41, %v5482_v3 }
 0x26a   : > { %v3438_v51 = vand.u32 2147483647, %v3374_v31  ;;  %v3501_v23 = vsub.f32 1.0, %v3437_v21  ;;  %v3811_v56 = vand.u32 2147483647, %v3747_v11  ;;  %v7695_v61 = vpop.permute.xlu1 %3288  ;;  %v3874_v62 = vsub.f32 1.0, %v3810_v28 }
 0x26b   : > { %v3812_v43 = vand.u32 2147483647, %v3748_v33  ;;  %v3726_v2 = vsub.f32 %v7584_v41, %v5486_v39  ;;  %v3781_v59 = vsub.f32 %v7654_v7, %v5482_v3  ;;  %v7701_v12 = vmax.f32 %v3468_v1, 0.0 }
 0x26c   : > { %v7703_v30 = vmax.f32 %v3901_v47, 0.0  ;;  %v7705_v20 = vmax.f32 %v3902_v45, 0.0  ;;  %v3502_v4 = vsub.f32 1.0, %v3438_v51  ;;  %3700 = vperm.xlu1 %4930, %v7292_v57   ;;  %v7709_v31 = vmul.f32 %v7543_v18, %v3531_v6  ;;  %v2713_v47 = vpop.permute.xlu0 %2712 }
 0x26d   : > { %v3875_v28 = vsub.f32 1.0, %v3811_v56  ;;  %v3789_v21 = vand.u32 2147483647, %v3725_v37  ;;  %v3790_v11 = vand.u32 2147483647, %v3726_v2  ;;  %v7711_v33 = vmax.f32 %v3499_v50, 0.0 }
 0x26e   : > { %9051 = vst [vmem:[#allocation156_spill] sm:$0xff] %v7703_v30  ;;  %9052 = vst [vmem:[#allocation157_spill] sm:$0xff] %v7705_v20  ;;  %v7713_v41 = vmax.f32 %v3500_v49, 0.0  ;;  %v3565_v40 = vmax.f32 %v3501_v23, 0.0  ;;  %v3782_v1 = vsub.f32 %v7654_v7, %v5486_v39  ;;  %v7717_v45 = vmax.f32 %v3873_v53, 0.0 }
 0x26f   : > { %v7719_v51 = vmax.f32 %v3874_v62, 0.0  ;;  %v3876_v57 = vsub.f32 1.0, %v3812_v43  ;;  %v3845_v20 = vand.u32 2147483647, %v3781_v59  ;;  %v7721_v18 = vpop.permute.xlu1 %3604  ;;  %v7723_v6 = vmax.f32 %v3502_v4, 0.0 }
 0x270   : > { %9053 = vst [vmem:[#allocation158_spill] sm:$0xff] %v7713_v41  ;;  %9054 = vst [vmem:[#allocation159_spill] sm:$0xff] %v7717_v45  ;;  %v3755_v2 = vsub.f32 %v7603_v36, %v5482_v3  ;;  %v3756_v50 = vsub.f32 %v7603_v36, %v5486_v39  ;;  %v2827_v49 = vsub.f32 %v2701_v19, %v5482_v3  ;;  %3704 = vperm.xlu1 %4930, %v7172_v10  }
 0x271   : > { %9055 = vst [vmem:[#allocation160_spill] sm:$0xff] %v7719_v51  ;;  %9056 = vst [vmem:[#allocation161_spill] sm:$0xff] %v7723_v6  ;;  %v7731_v7 = vmax.f32 %v3875_v28, 0.0  ;;  %v3853_v53 = vsub.f32 1.0, %v3789_v21  ;;  %v3854_v23 = vsub.f32 1.0, %v3790_v11  ;;  %v2828_v43 = vsub.f32 %v2701_v19, %v5486_v39 }
 0x272   : > { %v7735_v56 = vmul.f32 %v7557_v38, %v3565_v40  ;;  %v3846_v37 = vand.u32 2147483647, %v3782_v1  ;;  %v3819_v62 = vand.u32 2147483647, %v3755_v2  ;;  %v2891_v59 = vand.u32 2147483647, %v2827_v49  ;;  %v2721_v38 = vpop.permute.xlu0 %2720 }
 0x273   : > { %9057 = vst [vmem:[#allocation162_spill] sm:$0xff] %v7731_v7  ;;  %v7737_v4 = vmax.f32 %v3876_v57, 0.0  ;;  %v2892_v51 = vand.u32 2147483647, %v2828_v43  ;;  %v2833_v36 = vsub.f32 %v2713_v47, %v5482_v3  ;;  %v2834_v45 = vsub.f32 %v2713_v47, %v5486_v39  ;;  %v7741_v10 = vpop.permute.xlu1 %3668 }
 0x274   : > { %9058 = vst [vmem:[#allocation163_spill] sm:$0xff] %v7735_v56  ;;  %v3909_v28 = vsub.f32 1.0, %v3845_v20  ;;  %v3820_v21 = vand.u32 2147483647, %v3756_v50  ;;  %v3883_v11 = vsub.f32 1.0, %v3819_v62  ;;  %v2863_v19 = vsub.f32 %v7633_v32, %v5482_v3  ;;  %4931 = vset.pattern.permute.xlu1 %v8892_v13 }
 0x275   : > { %9059 = vst [vmem:[#allocation164_spill] sm:$0xff] %v7737_v4  ;;  %v2955_v40 = vsub.f32 1.0, %v2891_v59  ;;  %v2897_v1 = vand.u32 2147483647, %v2833_v36  ;;  %v2898_v57 = vand.u32 2147483647, %v2834_v45  ;;  %v2864_v2 = vsub.f32 %v7633_v32, %v5486_v39  ;;  %2752 = vperm.xlu1 %4931, %v7321_v25  }
 0x276   : > { %v3917_v47 = vmax.f32 %v3853_v53, 0.0  ;;  %v7749_v49 = vmax.f32 %v3854_v23, 0.0  ;;  %v3910_v20 = vsub.f32 1.0, %v3846_v37  ;;  %v2927_v50 = vand.u32 2147483647, %v2863_v19 }
 0x277   : > { %v2956_v43 = vsub.f32 1.0, %v2892_v51  ;;  %v2961_v62 = vsub.f32 1.0, %v2897_v1  ;;  %v2962_v4 = vsub.f32 1.0, %v2898_v57  ;;  %v2928_v7 = vand.u32 2147483647, %v2864_v2  ;;  %v7751_v30 = vpop.permute.xlu1 %3672  ;;  %v2729_v57 = vpop.permute.xlu0 %2728 }
 0x278   : > { %v7753_v59 = vmax.f32 %v3909_v28, 0.0  ;;  %v3884_v45 = vsub.f32 1.0, %v3820_v21  ;;  %v2991_v36 = vsub.f32 1.0, %v2927_v50  ;;  %v2837_v32 = vsub.f32 %v2721_v38, %v5482_v3 }
 0x279   : > { %v3947_v24 = vmax.f32 %v3883_v11, 0.0  ;;  %v3019_v0 = vmax.f32 %v2955_v40, 0.0  ;;  %v3025_v53 = vmax.f32 %v2961_v62, 0.0  ;;  %v2992_v23 = vsub.f32 1.0, %v2928_v7  ;;  %2812 = vperm.xlu1 %4931, %v7757_v15  }
 0x27a   : > { %9060 = vst [vmem:[#allocation165_spill] sm:$0xff] %v7753_v59  ;;  %v3026_v51 = vmax.f32 %v2962_v4, 0.0  ;;  %v3055_v37 = vmax.f32 %v2991_v36, 0.0  ;;  %v2838_v19 = vsub.f32 %v2721_v38, %v5486_v39  ;;  %v2901_v1 = vand.u32 2147483647, %v2837_v32  ;;  %v9066_v32 = vld [vmem:[#allocation85_spill] sm:$0xff] }
 0x27b   : > { %v7762_v28 = vmul.f32 %v3917_v47, %v7459_v44  ;;  %v7764_v21 = vmax.f32 %v3910_v20, 0.0  ;;  %v3020_v2 = vmax.f32 %v2956_v43, 0.0  ;;  %v3343_v7 = vsub.f32 %v7656_v26, %v8951_v8  ;;  %v9064_v47 = vld [vmem:[#allocation39_spill] sm:$0xff]  ;;  %v9065_v43 = vld [vmem:[#allocation37_spill] sm:$0xff] }
 0x27c   : > { %v3056_v11 = vmax.f32 %v2992_v23, 0.0  ;;  %v2902_v40 = vand.u32 2147483647, %v2838_v19  ;;  %v2965_v50 = vsub.f32 1.0, %v2901_v1  ;;  %v3344_v4 = vsub.f32 %v7656_v26, %v8952_v42  ;;  %v7770_v62 = vpop.permute.xlu1 %2784  ;;  %v9067_v19 = vld [vmem:[#allocation108_spill] sm:$0xff]  ;;  %v5026_v26 = vld [vmem:[%s5291_s0 + $0x60] sm:$0xff] }
 0x27d   : > { %9061 = vst [vmem:[#allocation166_spill] sm:$0xff] %v7764_v21  ;;  %v7772_v38 = vmax.f32 %v3884_v45, 0.0  ;;  %v7775_v44 = vmul.f32 %v3947_v24, %v7711_v33  ;;  %v3083_v20 = vmul.f32 %v3019_v0, %v9064_v47  ;;  %v3089_v36 = vmul.f32 %v3025_v53, %v9065_v43  ;;  %4932 = vset.pattern.permute.xlu1 %v8863_v22  ;;  %v9068_v33 = vld [vmem:[#allocation81_spill] sm:$0xff] }
 0x27e   : > { %v3090_v23 = vmul.f32 %v3026_v51, %v9066_v32  ;;  %v3119_v1 = vmul.f32 %v3055_v37, %v9067_v19  ;;  %v2966_v21 = vsub.f32 1.0, %v2902_v40  ;;  %v3407_v59 = vand.u32 2147483647, %v3343_v7  ;;  %3260 = vperm.xlu1 %4932, %v5026_v26   ;;  %v9069_v47 = vld [vmem:[#allocation109_spill] sm:$0xff]  ;;  %v2737_v32 = vpop.permute.xlu0 %2736  ;;  %v9070_v37 = vld [vmem:[#allocation51_spill] sm:$0xff] }
 0x27f   : > { %9062 = vst [vmem:[#allocation167_spill] sm:$0xff] %v7772_v38  ;;  %9063 = vst [vmem:[#allocation168_spill] sm:$0xff] %v7775_v44  ;;  %v3029_v54 = vmax.f32 %v2965_v50, 0.0  ;;  %v3408_v45 = vand.u32 2147483647, %v3344_v4  ;;  %v2841_v58 = vsub.f32 %v2729_v57, %v5482_v3  ;;  %v2842_v24 = vsub.f32 %v2729_v57, %v5486_v39  ;;  %v9071_v26 = vld [vmem:[#allocation55_spill] sm:$0xff] }
 0x280   : > { %v3084_v0 = vmul.f32 %v3020_v2, %v9068_v33  ;;  %v3120_v53 = vmul.f32 %v3056_v11, %v9069_v47  ;;  %v3030_v43 = vmax.f32 %v2966_v21, 0.0  ;;  %v3345_v51 = vsub.f32 %v7683_v14, %v8951_v8  ;;  %v9072_v2 = vld [vmem:[#allocation17_spill] sm:$0xff]  ;;  %v9082_v38 = vld [vmem:[#allocation76_spill] sm:$0xff] }
 0x281   : > { %v3147_v40 = vadd.f32 %v3083_v20, %v9070_v37  ;;  %v2905_v7 = vand.u32 2147483647, %v2841_v58  ;;  %v2906_v19 = vand.u32 2147483647, %v2842_v24  ;;  %v3346_v50 = vsub.f32 %v7683_v14, %v8952_v42  ;;  %v7792_v4 = vpop.permute.xlu1 %3228  ;;  %v9073_v47 = vld [vmem:[#allocation69_spill] sm:$0xff]  ;;  %v9075_v58 = vld [vmem:[#allocation86_spill] sm:$0xff] }
 0x282   : > { %v7795_v57 = vadd.f32 %v3089_v36, %v9071_v26  ;;  %v7798_v33 = vadd.f32 %v3090_v23, %v9072_v2  ;;  %v3471_v21 = vsub.f32 1.0, %v3407_v59  ;;  %v3409_v11 = vand.u32 2147483647, %v3345_v51  ;;  %3324 = vperm.xlu1 %4932, %v7757_v15   ;;  %v9076_v37 = vld [vmem:[#allocation99_spill] sm:$0xff]  ;;  %v9078_v36 = vld [vmem:[#allocation40_spill] sm:$0xff] }
 0x283   : > { %v7802_v44 = vadd.f32 %v3119_v1, %v9073_v47  ;;  %v3093_v20 = vmul.f32 %v3029_v54, %v9075_v58  ;;  %v3472_v24 = vsub.f32 1.0, %v3408_v45  ;;  %v2845_v14 = vsub.f32 %v2737_v32, %v5482_v3  ;;  %v9080_v45 = vld [vmem:[#allocation52_spill] sm:$0xff]  ;;  %v9081_v58 = vld [vmem:[#allocation119_spill] sm:$0xff] }
 0x284   : > { %v7807_v56 = vadd.f32 %v3120_v53, %v9076_v37  ;;  %v3094_v26 = vmul.f32 %v3030_v43, %v9078_v36  ;;  %v2969_v23 = vsub.f32 1.0, %v2905_v7  ;;  %v2846_v59 = vsub.f32 %v2737_v32, %v5486_v39  ;;  %v2745_v37 = vpop.permute.xlu0 %2744  ;;  %v5027_v43 = vld [vmem:[%s5291_s0 + $0xe8] sm:$0xff]  ;;  %v9083_v7 = vld [vmem:[#allocation18_spill] sm:$0xff]  ;;  %v9086_v36 = vld [vmem:[#allocation19_spill] sm:$0xff] }
 0x285   : > { %9074 = vst [vmem:[#allocation39_spill] sm:$0xff] %v7802_v44  ;;  %v2970_v51 = vsub.f32 1.0, %v2906_v19  ;;  %v3410_v2 = vand.u32 2147483647, %v3346_v50  ;;  %v3473_v35 = vsub.f32 1.0, %v3409_v11  ;;  %v7811_v1 = vpop.permute.xlu1 %3292  ;;  %v7813_v47 = vmax.f32 %v3471_v21, 0.0 }
 0x286   : > { %9077 = vst [vmem:[#allocation37_spill] sm:$0xff] %v7807_v56  ;;  %v2909_v6 = vand.u32 2147483647, %v2845_v14  ;;  %9079 = vst [vmem:[#allocation85_spill] sm:$0xff] %v7811_v1  ;;  %v2910_v54 = vand.u32 2147483647, %v2846_v59  ;;  %v2252_v44 = vadd.f32 %v9081_v58, %v9080_v45  ;;  %v3086_v53 = vmul.f32 %v7529_v17, %v9082_v38  ;;  %3328 = vperm.xlu1 %4932, %v5027_v43  }
 0x287   : > { %v7821_v32 = vadd.f32 %v3093_v20, %v9083_v7  ;;  %v7823_v19 = vmax.f32 %v3472_v24, 0.0  ;;  %v9084_v11 = vld [vmem:[#allocation50_spill] sm:$0xff]  ;;  %v9085_v14 = vld [vmem:[#allocation120_spill] sm:$0xff]  ;;  %v7828_v59 = vadd.f32 %v3094_v26, %v9086_v36  ;;  %v3033_v56 = vmax.f32 %v2969_v23, 0.0 }
 0x288   : > { %v2973_v50 = vsub.f32 1.0, %v2909_v6  ;;  %v2254_v21 = vadd.f32 %v9085_v14, %v9084_v11  ;;  %v2974_v45 = vsub.f32 1.0, %v2910_v54  ;;  %v3148_v58 = vadd.f32 %v3084_v0, %v2252_v44  ;;  %v2769_v54 = vpop.permute.xlu0 %2768 }
 0x289   : > { %v3034_v1 = vmax.f32 %v2970_v51, 0.0  ;;  %v3474_v17 = vsub.f32 1.0, %v3410_v2  ;;  %v3537_v38 = vmax.f32 %v3473_v35, 0.0  ;;  %v7830_v43 = vpop.permute.xlu1 %3296  ;;  %v3980_v24 = vmul.f32 %v7552_v46, %v7701_v12  ;;  %v9087_v35 = vld [vmem:[#allocation49_spill] sm:$0xff] }
 0x28a   : > { %v3150_v41 = vadd.f32 %v3086_v53, %v2254_v21  ;;  %v3037_v20 = vmax.f32 %v2973_v50, 0.0  ;;  %v3982_v6 = vmul.f32 %v7749_v49, %v7464_v16  ;;  %v3377_v26 = vsub.f32 %v7695_v61, %v8951_v8  ;;  %4933 = vset.pattern.permute.xlu1 %v8887_v63  ;;  %v9088_v46 = vld [vmem:[#allocation105_spill] sm:$0xff]  ;;  %v9089_v53 = vld [vmem:[#allocation106_spill] sm:$0xff] }
 0x28b   : > { %v3038_v23 = vmax.f32 %v2974_v45, 0.0  ;;  %v3378_v44 = vsub.f32 %v7695_v61, %v8952_v42  ;;  %v3149_v0 = vadd.f32 %v7541_v5, %v9087_v35  ;;  %v4043_v51 = vadd.f32 %v7709_v31, %v3147_v40  ;;  %3648 = vperm.xlu1 %4933, %v7321_v25   ;;  %v9090_v21 = vld [vmem:[#allocation42_spill] sm:$0xff] }
 0x28c   : > { %v3097_v12 = vmul.f32 %v3033_v56, %v9088_v46  ;;  %v4044_v2 = vadd.f32 %v3980_v24, %v3148_v58  ;;  %v4046_v16 = vadd.f32 %v3982_v6, %v3150_v41  ;;  %v3441_v49 = vand.u32 2147483647, %v3377_v26  ;;  %v9091_v56 = vld [vmem:[#allocation83_spill] sm:$0xff] }
 0x28d   : > { %v3098_v7 = vmul.f32 %v3034_v1, %v9089_v53  ;;  %v3442_v50 = vand.u32 2147483647, %v3378_v44  ;;  %v4045_v11 = vadd.f32 %v7762_v28, %v3149_v0  ;;  %v2849_v61 = vsub.f32 %v2745_v37, %v5482_v3  ;;  %v2777_v0 = vpop.permute.xlu0 %2776 }
 0x28e   : > { %v3538_v14 = vmax.f32 %v3474_v17, 0.0  ;;  %v3101_v5 = vmul.f32 %v3037_v20, %v9090_v21  ;;  %v4172_v36 = vpack.c.bf16 %v4046_v16, %v4044_v2  ;;  %v2850_v31 = vsub.f32 %v2745_v37, %v5486_v39  ;;  %v7851_v25 = vpop.permute.xlu1 %3616 }
 0x28f   : > { %v3102_v40 = vmul.f32 %v3038_v23, %v9091_v56  ;;  %v4171_v41 = vpack.c.bf16 %v4045_v11, %v4043_v51  ;;  %v2913_v45 = vand.u32 2147483647, %v2849_v61  ;;  %v3727_v1 = vsub.f32 %v7721_v18, %v5482_v3  ;;  %3708 = vperm.xlu1 %4933, %v7757_v15   ;;  %v7869_v11 = vld [vmem:[%s5291_s0 + $0x70] sm:$0xff]  ;;  %v9092_v61 = vld [vmem:[#allocation60_spill] sm:$0xff] }
 0x290   : > { %4331 = vmatprep.mubr.bf16.mxu0 %v4172_v36  ;;  %v3505_v28 = vsub.f32 1.0, %v3441_v49  ;;  %v2914_v58 = vand.u32 2147483647, %v2850_v31  ;;  %v3728_v17 = vsub.f32 %v7721_v18, %v5486_v39  ;;  %v2861_v20 = vsub.f32 %v2769_v54, %v5482_v3  ;;  %v9093_v31 = vld [vmem:[#allocation118_spill] sm:$0xff] }
 0x291   : > { %v3506_v37 = vsub.f32 1.0, %v3442_v50  ;;  %4332 = vmatmul.mubr.bf16.vlgmr.msra.gmra.mxu0 %v4171_v41  ;;  %v2977_v24 = vsub.f32 1.0, %v2913_v45  ;;  %v3791_v6 = vand.u32 2147483647, %v3727_v1  ;;  %v2862_v26 = vsub.f32 %v2769_v54, %v5486_v39  ;;  %v9094_v41 = vld [vmem:[#allocation22_spill] sm:$0xff] }
 0x292   : > { %v2978_v23 = vsub.f32 1.0, %v2914_v58  ;;  %v3792_v44 = vand.u32 2147483647, %v3728_v17  ;;  %v2925_v35 = vand.u32 2147483647, %v2861_v20  ;;  %v3759_v15 = vsub.f32 %v7741_v10, %v5482_v3  ;;  %v7863_v51 = vpop.permute.xlu1 %3676  ;;  %v9095_v17 = vld [vmem:[#allocation23_spill] sm:$0xff] }
 0x293   : > { %v3041_v46 = vmax.f32 %v2977_v24, 0.0  ;;  %v3855_v18 = vsub.f32 1.0, %v3791_v6  ;;  %v2926_v2 = vand.u32 2147483647, %v2862_v26  ;;  %v3760_v16 = vsub.f32 %v7741_v10, %v5486_v39  ;;  %4935 = vset.pattern.permute.xlu1 %v8892_v13 }
 0x294   : > { %v3042_v49 = vmax.f32 %v2978_v23, 0.0  ;;  %v3856_v54 = vsub.f32 1.0, %v3792_v44  ;;  %v2989_v53 = vsub.f32 1.0, %v2925_v35  ;;  %v3823_v50 = vand.u32 2147483647, %v3759_v15  ;;  %2756 = vperm.xlu1 %4935, %v7869_v11   ;;  %v7899_v35 = vld [vmem:[%s5291_s0 + $0xf0] sm:$0xff] }
 0x295   : > { %v7873_v21 = vadd.f32 %v3097_v12, %v9092_v61  ;;  %v7876_v36 = vmul.f32 %v7580_v55, %v3537_v38  ;;  %v3105_v56 = vmul.f32 %v3041_v46, %v9093_v31  ;;  %v2990_v10 = vsub.f32 1.0, %v2926_v2  ;;  %v9097_v12 = vld [vmem:[#allocation24_spill] sm:$0xff] }
 0x296   : > { %v7880_v13 = vadd.f32 %v3098_v7, %v9094_v41  ;;  %v7883_v45 = vmul.f32 %v7582_v60, %v3538_v14  ;;  %v3053_v1 = vmax.f32 %v2989_v53, 0.0  ;;  %v3824_v58 = vand.u32 2147483647, %v3760_v16  ;;  %v9099_v7 = vld [vmem:[#allocation43_spill] sm:$0xff]  ;;  %v2781_v14 = vpop.permute.xlu0 %2780  ;;  %v7917_v41 = vld [vmem:[%s5291_s0 + $0xf8] sm:$0xff] }
 0x297   : > { %v7886_v20 = vadd.f32 %v3101_v5, %v9095_v17  ;;  %v7889_v24 = vadd.f32 %v3102_v40, %v9097_v12  ;;  %v7891_v55 = vmax.f32 %v3505_v28, 0.0  ;;  %v3887_v38 = vsub.f32 1.0, %v3823_v50  ;;  %v7893_v6 = vpop.permute.xlu1 %2788  ;;  %v9100_v5 = vld [vmem:[#allocation62_spill] sm:$0xff] }
 0x298   : > { %v7895_v26 = vmax.f32 %v3506_v37, 0.0  ;;  %v3106_v23 = vmul.f32 %v3042_v49, %v9099_v7  ;;  %v3919_v44 = vmax.f32 %v3855_v18, 0.0  ;;  %v3920_v60 = vmax.f32 %v3856_v54, 0.0  ;;  %2820 = vperm.xlu1 %4935, %v7899_v35   ;;  %v9102_v37 = vld [vmem:[#allocation47_spill] sm:$0xff] }
 0x299   : > { %9096 = vst [vmem:[#allocation108_spill] sm:$0xff] %v7886_v20  ;;  %9098 = vst [vmem:[#allocation81_spill] sm:$0xff] %v7889_v24  ;;  %v7903_v15 = vadd.f32 %v3105_v56, %v9100_v5  ;;  %v3054_v40 = vmax.f32 %v2990_v10, 0.0  ;;  %v2865_v28 = vsub.f32 %v2777_v0, %v5482_v3  ;;  %v2866_v46 = vsub.f32 %v2777_v0, %v5486_v39 }
 0x29a   : > { %v3117_v2 = vmul.f32 %v3053_v1, %v9102_v37  ;;  %v3888_v16 = vsub.f32 1.0, %v3824_v58  ;;  %v3761_v18 = vsub.f32 %v7751_v30, %v5482_v3  ;;  %v3762_v49 = vsub.f32 %v7751_v30, %v5486_v39 }
 0x29b   : > { %9101 = vst [vmem:[#allocation109_spill] sm:$0xff] %v7903_v15  ;;  %v3951_v54 = vmax.f32 %v3887_v38, 0.0  ;;  %v2929_v53 = vand.u32 2147483647, %v2865_v28  ;;  %v2930_v50 = vand.u32 2147483647, %v2866_v46  ;;  %v2867_v61 = vsub.f32 %v2781_v14, %v5482_v3 }
 0x29c   : > { %v3825_v31 = vand.u32 2147483647, %v3761_v18  ;;  %v3826_v56 = vand.u32 2147483647, %v3762_v49  ;;  %v2868_v10 = vsub.f32 %v2781_v14, %v5486_v39  ;;  %v2869_v0 = vsub.f32 %v7770_v62, %v5482_v3  ;;  %2824 = vperm.xlu1 %4935, %v7917_v41   ;;  %v7920_v1 = vpop.permute.xlu1 %3236  ;;  %v2793_v49 = vpop.permute.xlu0 %2792 }
 0x29d   : > { %v2993_v58 = vsub.f32 1.0, %v2929_v53  ;;  %v2994_v30 = vsub.f32 1.0, %v2930_v50  ;;  %v2931_v17 = vand.u32 2147483647, %v2867_v61  ;;  %v2870_v12 = vsub.f32 %v7770_v62, %v5486_v39  ;;  %v9103_v62 = vld [vmem:[#allocation56_spill] sm:$0xff] }
 0x29e   : > { %v3889_v38 = vsub.f32 1.0, %v3825_v31  ;;  %v3890_v7 = vsub.f32 1.0, %v3826_v56  ;;  %v2932_v5 = vand.u32 2147483647, %v2868_v10  ;;  %v2933_v28 = vand.u32 2147483647, %v2869_v0 }
 0x29f   : > { %v3952_v14 = vmax.f32 %v3888_v16, 0.0  ;;  %v3057_v46 = vmax.f32 %v2993_v58, 0.0  ;;  %v2995_v37 = vsub.f32 1.0, %v2931_v17  ;;  %v2934_v18 = vand.u32 2147483647, %v2870_v12  ;;  %v5031_v16 = vld [vmem:[%s5291_s0 + $0x78] sm:$0xff] }
 0x2a0   : > { %v3983_v15 = vmul.f32 %v3919_v44, %v7813_v47  ;;  %v3058_v20 = vmax.f32 %v2994_v30, 0.0  ;;  %v3953_v24 = vmax.f32 %v3889_v38, 0.0  ;;  %v2996_v53 = vsub.f32 1.0, %v2932_v5  ;;  %4937 = vset.pattern.permute.xlu1 %v8863_v22  ;;  %v7926_v50 = vpop.permute.xlu1 %3240  ;;  %v9104_v30 = vld [vmem:[#allocation65_spill] sm:$0xff]  ;;  %v9107_v5 = vld [vmem:[#allocation54_spill] sm:$0xff] }
 0x2a1   : > { %v7929_v61 = vadd.f32 %v3106_v23, %v9103_v62  ;;  %v3954_v31 = vmax.f32 %v3890_v7, 0.0  ;;  %v3059_v56 = vmax.f32 %v2995_v37, 0.0  ;;  %v2997_v10 = vsub.f32 1.0, %v2933_v28  ;;  %3272 = vperm.xlu1 %4937, %v5031_v16   ;;  %v9105_v38 = vld [vmem:[#allocation45_spill] sm:$0xff]  ;;  %v2797_v28 = vpop.permute.xlu0 %2796 }
 0x2a2   : > { %v3984_v0 = vmul.f32 %v3920_v60, %v7823_v19  ;;  %v7934_v58 = vmul.f32 %v3054_v40, %v7372_v9  ;;  %v3060_v47 = vmax.f32 %v2996_v53, 0.0  ;;  %v2998_v44 = vsub.f32 1.0, %v2934_v18 }
 0x2a3   : > { %v7937_v17 = vadd.f32 %v3117_v2, %v9104_v30  ;;  %v7940_v22 = vmul.f32 %v3951_v54, %v7483_v27  ;;  %v7943_v23 = vmul.f32 %v3952_v14, %v7485_v34  ;;  %v3121_v12 = vmul.f32 %v3057_v46, %v7380_v48  ;;  %v9106_v27 = vld [vmem:[#allocation112_spill] sm:$0xff] }
 0x2a4   : > { %v3122_v7 = vmul.f32 %v3058_v20, %v9105_v38  ;;  %v7948_v19 = vmul.f32 %v3953_v24, %v7891_v55  ;;  %v2873_v9 = vsub.f32 %v2793_v49, %v5482_v3  ;;  %v2874_v60 = vsub.f32 %v2793_v49, %v5486_v39  ;;  %v7952_v40 = vpop.permute.xlu1 %3304  ;;  %v9108_v20 = vld [vmem:[#allocation113_spill] sm:$0xff]  ;;  %v9111_v38 = vld [vmem:[#allocation90_spill] sm:$0xff] }
 0x2a5   : > { %v7955_v2 = vmul.f32 %v3954_v31, %v7895_v26  ;;  %v3123_v54 = vmul.f32 %v3059_v56, %v9106_v27  ;;  %v3061_v34 = vmax.f32 %v2997_v10, 0.0  ;;  %v3152_v48 = vadd.f32 %v7562_v29, %v9107_v5  ;;  %3332 = vperm.xlu1 %4937, %v7899_v35   ;;  %v9109_v26 = vld [vmem:[#allocation53_spill] sm:$0xff] }
 0x2a6   : > { %v3124_v24 = vmul.f32 %v3060_v47, %v9108_v20  ;;  %v3062_v55 = vmax.f32 %v2998_v44, 0.0  ;;  %v2937_v14 = vand.u32 2147483647, %v2873_v9  ;;  %v2938_v46 = vand.u32 2147483647, %v2874_v60  ;;  %v9110_v49 = vld [vmem:[#allocation137_spill] sm:$0xff] }
 0x2a7   : > { %v4048_v37 = vadd.f32 %v3984_v0, %v3152_v48  ;;  %v4050_v18 = vadd.f32 %v7883_v45, %v7798_v33  ;;  %v3151_v53 = vadd.f32 %v9110_v49, %v9109_v26  ;;  %v4049_v62 = vadd.f32 %v7876_v36, %v7795_v57  ;;  %v9112_v60 = vld [vmem:[#allocation61_spill] sm:$0xff]  ;;  %v9113_v48 = vld [vmem:[#allocation75_spill] sm:$0xff]  ;;  %v9115_v20 = vld [vmem:[#allocation102_spill] sm:$0xff] }
 0x2a8   : > { %v3001_v31 = vsub.f32 1.0, %v2937_v14  ;;  %v3002_v29 = vsub.f32 1.0, %v2938_v46  ;;  %v2875_v56 = vsub.f32 %v2797_v28, %v5482_v3  ;;  %v2876_v10 = vsub.f32 %v2797_v28, %v5486_v39 }
 0x2a9   : > { %v4174_v16 = vpack.c.bf16 %v4050_v18, %v4048_v37  ;;  %v4047_v47 = vadd.f32 %v3983_v15, %v3151_v53  ;;  %v3347_v0 = vsub.f32 %v7792_v4, %v8951_v8  ;;  %v3348_v33 = vsub.f32 %v7792_v4, %v8952_v42  ;;  %4938 = vset.pattern.permute.xlu1 %v8887_v63  ;;  %v7975_v45 = vpop.permute.xlu1 %3620  ;;  %v9114_v4 = vld [vmem:[#allocation29_spill] sm:$0xff]  ;;  %v2809_v37 = vpop.permute.xlu0 %2808 }
 0x2aa   : > { %v3065_v44 = vmax.f32 %v3001_v31, 0.0  ;;  %v3066_v57 = vmax.f32 %v3002_v29, 0.0  ;;  %v2939_v36 = vand.u32 2147483647, %v2875_v56  ;;  %v2940_v30 = vand.u32 2147483647, %v2876_v10  ;;  %3652 = vperm.xlu1 %4938, %v7869_v11  }
 0x2ab   : > { %v3125_v9 = vmul.f32 %v3061_v34, %v9111_v38  ;;  %v3126_v15 = vmul.f32 %v3062_v55, %v9112_v60  ;;  %4339 = vmatprep.mubr.bf16.mxu0 %v4174_v16  ;;  %v4173_v27 = vpack.c.bf16 %v4049_v62, %v4047_v47  ;;  %v3411_v5 = vand.u32 2147483647, %v3347_v0  ;;  %v9116_v18 = vld [vmem:[#allocation121_spill] sm:$0xff]  ;;  %v9117_v11 = vld [vmem:[#allocation122_spill] sm:$0xff]  ;;  %v9118_v34 = vld [vmem:[#allocation32_spill] sm:$0xff] }
 0x2ac   : > { %v7981_v28 = vadd.f32 %v3121_v12, %v9113_v48  ;;  %v3186_v63 = vadd.f32 %v3122_v7, %v9114_v4  ;;  %v7985_v14 = vadd.f32 %v3123_v54, %v9115_v20  ;;  %v3412_v46 = vand.u32 2147483647, %v3348_v33  ;;  %v9119_v55 = vld [vmem:[#allocation28_spill] sm:$0xff]  ;;  %v9122_v10 = vld [vmem:[#allocation34_spill] sm:$0xff]  ;;  %v9123_v16 = vld [vmem:[#allocation93_spill] sm:$0xff] }
 0x2ad   : > { %v3129_v26 = vmul.f32 %v3065_v44, %v9116_v18  ;;  %v3130_v49 = vmul.f32 %v3066_v57, %v9117_v11  ;;  %4340 = vmatmul.mubr.bf16.gmra.mxu0 %v4173_v27  ;;  %v2286_v53 = vadd.f32 %v9119_v55, %v9118_v34  ;;  %v9120_v62 = vld [vmem:[#allocation84_spill] sm:$0xff]  ;;  %v7993_v12 = vpop.permute.xlu1 %3684  ;;  %v3003_v54 = vsub.f32 1.0, %v2939_v36  ;;  %v9124_v0 = vld [vmem:[#allocation30_spill] sm:$0xff]  ;;  %v9127_v48 = vld [vmem:[#allocation167_spill] sm:$0xff] }
 0x2ae   : > { %v3116_v31 = vmul.f32 %v7677_v52, %v9120_v62  ;;  %v9121_v29 = vld [vmem:[#allocation96_spill] sm:$0xff]  ;;  %v3004_v56 = vsub.f32 1.0, %v2940_v30  ;;  %v2284_v47 = vadd.f32 %v9123_v16, %v9122_v10  ;;  %3716 = vperm.xlu1 %4938, %v7899_v35   ;;  %v8002_v33 = vadd.f32 %v3125_v9, %v9124_v0  ;;  %v9128_v30 = vld [vmem:[#allocation161_spill] sm:$0xff]  ;;  %v9129_v4 = vld [vmem:[#allocation138_spill] sm:$0xff]  ;;  %v2749_v10 = vpop.permute.xlu0 %2748 }
 0x2af   : > { %v7996_v7 = vadd.f32 %v3124_v24, %v9121_v29  ;;  %v9125_v44 = vld [vmem:[#allocation68_spill] sm:$0xff]  ;;  %v3475_v38 = vsub.f32 1.0, %v3411_v5  ;;  %v3182_v52 = vadd.f32 %v7934_v58, %v2286_v53  ;;  %v3476_v60 = vsub.f32 1.0, %v3412_v46  ;;  %v9126_v24 = vld [vmem:[#allocation158_spill] sm:$0xff]  ;;  %v9134_v5 = vld [vmem:[#allocation163_spill] sm:$0xff] }
 0x2b0   : > { %v8005_v57 = vadd.f32 %v3126_v15, %v9125_v44  ;;  %v3180_v27 = vadd.f32 %v3116_v31, %v2284_v47  ;;  %v4012_v36 = vmul.f32 %v9127_v48, %v9126_v24  ;;  %v4014_v20 = vmul.f32 %v9129_v4, %v9128_v30  ;;  %v9130_v18 = vld [vmem:[#allocation72_spill] sm:$0xff]  ;;  %v9131_v35 = vld [vmem:[#allocation74_spill] sm:$0xff]  ;;  %v9133_v15 = vld [vmem:[#allocation149_spill] sm:$0xff] }
 0x2b1   : > { %v8013_v11 = vadd.f32 %v3129_v26, %v9130_v18  ;;  %v8016_v9 = vadd.f32 %v3130_v49, %v9131_v35  ;;  %v9132_v34 = vld [vmem:[#allocation94_spill] sm:$0xff]  ;;  %v4077_v58 = vadd.f32 %v9134_v5, %v7937_v17  ;;  %v8022_v46 = vpop.permute.xlu1 %3688  ;;  %v3067_v53 = vmax.f32 %v3003_v54, 0.0  ;;  %v9135_v26 = vld [vmem:[#allocation168_spill] sm:$0xff]  ;;  %v9136_v0 = vld [vmem:[#allocation85_spill] sm:$0xff] }
 0x2b2   : > { %v3179_v55 = vadd.f32 %v9133_v15, %v9132_v34  ;;  %v3068_v62 = vmax.f32 %v3004_v56, 0.0  ;;  %v4076_v31 = vadd.f32 %v4012_v36, %v3180_v27  ;;  %v4078_v29 = vadd.f32 %v4014_v20, %v3182_v52  ;;  %3720 = vperm.xlu1 %4938, %v7917_v41   ;;  %v9137_v54 = vld [vmem:[#allocation37_spill] sm:$0xff] }
 0x2b3   : > { %v2881_v49 = vsub.f32 %v2809_v37, %v5482_v3  ;;  %v2882_v47 = vsub.f32 %v2809_v37, %v5486_v39  ;;  %v3379_v44 = vsub.f32 %v9136_v0, %v8951_v8  ;;  %v3380_v17 = vsub.f32 %v9136_v0, %v8952_v42 }
 0x2b4   : > { %v4075_v16 = vadd.f32 %v9135_v26, %v3179_v55  ;;  %v4188_v24 = vpack.c.bf16 %v4078_v29, %v4076_v31  ;;  %v4080_v56 = vadd.f32 %v7943_v23, %v9137_v54  ;;  %v4082_v52 = vadd.f32 %v7955_v2, %v3186_v63  ;;  %v9138_v31 = vld [vmem:[#allocation116_spill] sm:$0xff] }
 0x2b5   : > { %v2945_v41 = vand.u32 2147483647, %v2881_v49  ;;  %v2946_v48 = vand.u32 2147483647, %v2882_v47  ;;  %v3443_v36 = vand.u32 2147483647, %v3379_v44  ;;  %v2851_v37 = vsub.f32 %v2749_v10, %v5482_v3 }
 0x2b6   : > { %v4187_v27 = vpack.c.bf16 %v4077_v58, %v4075_v16  ;;  %4395 = vmatprep.mubr.bf16.mxu1 %v4188_v24  ;;  %v3444_v30 = vand.u32 2147483647, %v3380_v17  ;;  %v4190_v4 = vpack.c.bf16 %v4082_v52, %v4080_v56  ;;  %v2852_v20 = vsub.f32 %v2749_v10, %v5486_v39  ;;  %v8037_v18 = vpop.permute.xlu1 %2800  ;;  %v2817_v58 = vpop.permute.xlu0 %2816  ;;  %v9139_v10 = vld [vmem:[#allocation48_spill] sm:$0xff]  ;;  %v9140_v44 = vld [vmem:[#allocation142_spill] sm:$0xff]  ;;  %v9142_v52 = vld [vmem:[#allocation39_spill] sm:$0xff] }
 0x2b7   : > { %v3539_v35 = vmax.f32 %v3475_v38, 0.0  ;;  %v3540_v34 = vmax.f32 %v3476_v60, 0.0  ;;  %v3009_v15 = vsub.f32 1.0, %v2945_v41  ;;  %v3381_v23 = vsub.f32 %v7830_v43, %v8951_v8  ;;  %v9141_v17 = vld [vmem:[#allocation144_spill] sm:$0xff] }
 0x2b8   : > { %4396 = vmatmul.mubr.bf16.vlgmr.msra.gmra.mxu1 %v4187_v27  ;;  %v3010_v2 = vsub.f32 1.0, %v2946_v48  ;;  %v2915_v63 = vand.u32 2147483647, %v2851_v37  ;;  %v2916_v55 = vand.u32 2147483647, %v2852_v20  ;;  %v3382_v5 = vsub.f32 %v7830_v43, %v8952_v42 }
 0x2b9   : > { %4403 = vmatprep.mubr.bf16.mxu1 %v4190_v4  ;;  %v3131_v29 = vmul.f32 %v3067_v53, %v9138_v31  ;;  %v3132_v26 = vmul.f32 %v3068_v62, %v9139_v10  ;;  %v3507_v16 = vsub.f32 1.0, %v3443_v36  ;;  %v3445_v38 = vand.u32 2147483647, %v3381_v23  ;;  %v9143_v36 = vld [vmem:[#allocation33_spill] sm:$0xff]  ;;  %v9144_v4 = vld [vmem:[#allocation35_spill] sm:$0xff] }
 0x2ba   : > { %v3073_v60 = vmax.f32 %v3009_v15, 0.0  ;;  %v3508_v49 = vsub.f32 1.0, %v3444_v30  ;;  %v2979_v47 = vsub.f32 1.0, %v2915_v63  ;;  %v2980_v0 = vsub.f32 1.0, %v2916_v55  ;;  %v2761_v63 = vpop.permute.xlu0 %2760 }
 0x2bb   : > { %v8046_v24 = vmul.f32 %v9140_v44, %v3539_v35  ;;  %v8049_v54 = vmul.f32 %v9141_v17, %v3540_v34  ;;  %v3446_v56 = vand.u32 2147483647, %v3382_v5  ;;  %v4079_v43 = vadd.f32 %v7940_v22, %v9142_v52  ;;  %v8053_v27 = vpop.permute.xlu1 %3244  ;;  %v9145_v34 = vld [vmem:[#allocation127_spill] sm:$0xff] }
 0x2bc   : > { %v3074_v53 = vmax.f32 %v3010_v2, 0.0  ;;  %v3043_v62 = vmax.f32 %v2979_v47, 0.0  ;;  %v3509_v41 = vsub.f32 1.0, %v3445_v38  ;;  %v4081_v48 = vadd.f32 %v7948_v19, %v7981_v28 }
 0x2bd   : > { %v8058_v30 = vadd.f32 %v3131_v29, %v9143_v36  ;;  %v8061_v37 = vadd.f32 %v3132_v26, %v9144_v4  ;;  %v8063_v20 = vmax.f32 %v3507_v16, 0.0  ;;  %v2885_v35 = vsub.f32 %v2817_v58, %v5482_v3  ;;  %v9146_v29 = vld [vmem:[#allocation128_spill] sm:$0xff]  ;;  %v9147_v26 = vld [vmem:[#allocation82_spill] sm:$0xff] }
 0x2be   : > { %v3137_v22 = vmul.f32 %v3073_v60, %v9145_v34  ;;  %v3572_v15 = vmax.f32 %v3508_v49, 0.0  ;;  %v3044_v23 = vmax.f32 %v2980_v0, 0.0  ;;  %v4189_v2 = vpack.c.bf16 %v4081_v48, %v4079_v43  ;;  %v9148_v43 = vld [vmem:[#allocation114_spill] sm:$0xff] }
 0x2bf   : > { %v3510_v55 = vsub.f32 1.0, %v3446_v56  ;;  %v2886_v5 = vsub.f32 %v2817_v58, %v5486_v39  ;;  %v2949_v19 = vand.u32 2147483647, %v2885_v35  ;;  %v3733_v28 = vsub.f32 %v7851_v25, %v5482_v3  ;;  %v8070_v31 = vpop.permute.xlu1 %3308 }
 0x2c0   : > { %v3138_v10 = vmul.f32 %v3074_v53, %v9146_v29  ;;  %v3107_v16 = vmul.f32 %v3043_v62, %v9147_v26  ;;  %v3573_v38 = vmax.f32 %v3509_v41, 0.0  ;;  %4404 = vmatmul.mubr.bf16.gmra.mxu1 %v4189_v2  ;;  %v3734_v60 = vsub.f32 %v7851_v25, %v5486_v39  ;;  %v9149_v2 = vld [vmem:[#allocation80_spill] sm:$0xff] }
 0x2c1   : > { %v2950_v49 = vand.u32 2147483647, %v2886_v5  ;;  %v3013_v47 = vsub.f32 1.0, %v2949_v19  ;;  %v3797_v0 = vand.u32 2147483647, %v3733_v28  ;;  %v2857_v58 = vsub.f32 %v2761_v63, %v5482_v3 }
 0x2c2   : > { %v3798_v44 = vand.u32 2147483647, %v3734_v60  ;;  %v2858_v17 = vsub.f32 %v2761_v63, %v5486_v39  ;;  %v3763_v56 = vsub.f32 %v7863_v51, %v5482_v3  ;;  %v3764_v52 = vsub.f32 %v7863_v51, %v5486_v39  ;;  %v9150_v63 = vld [vmem:[#allocation97_spill] sm:$0xff]  ;;  %v9151_v60 = vld [vmem:[#allocation64_spill] sm:$0xff] }
 0x2c3   : > { %v3108_v53 = vmul.f32 %v3044_v23, %v9148_v43  ;;  %v3574_v62 = vmax.f32 %v3510_v55, 0.0  ;;  %v3014_v41 = vsub.f32 1.0, %v2950_v49  ;;  %v3861_v48 = vsub.f32 1.0, %v3797_v0  ;;  %v8083_v25 = vpop.permute.xlu1 %3312  ;;  %v9156_v43 = vld [vmem:[#allocation129_spill] sm:$0xff] }
 0x2c4   : > { %v3077_v36 = vmax.f32 %v3013_v47, 0.0  ;;  %v3862_v4 = vsub.f32 1.0, %v3798_v44  ;;  %v2921_v35 = vand.u32 2147483647, %v2857_v58  ;;  %v3827_v34 = vand.u32 2147483647, %v3763_v56 }
 0x2c5   : > { %v8086_v5 = vadd.f32 %v3137_v22, %v9149_v2  ;;  %v8089_v19 = vadd.f32 %v3138_v10, %v9150_v63  ;;  %v2922_v28 = vand.u32 2147483647, %v2858_v17  ;;  %v2871_v51 = vsub.f32 %v7893_v6, %v5482_v3  ;;  %v9153_v47 = vld [vmem:[#allocation27_spill] sm:$0xff]  ;;  %v9154_v58 = vld [vmem:[#allocation145_spill] sm:$0xff]  ;;  %v9155_v56 = vld [vmem:[#allocation148_spill] sm:$0xff] }
 0x2c6   : > { %v3078_v23 = vmax.f32 %v3014_v41, 0.0  ;;  %v3925_v55 = vmax.f32 %v3861_v48, 0.0  ;;  %v3926_v29 = vmax.f32 %v3862_v4, 0.0  ;;  %v3828_v26 = vand.u32 2147483647, %v3764_v52  ;;  %v9157_v48 = vld [vmem:[#allocation132_spill] sm:$0xff] }
 0x2c7   : > { %v8094_v49 = vadd.f32 %v3107_v16, %v9151_v60  ;;  %v8097_v0 = vadd.f32 %v3108_v53, %v9153_v47  ;;  %v4021_v22 = vmul.f32 %v9154_v58, %v3573_v38  ;;  %v3891_v44 = vsub.f32 1.0, %v3827_v34  ;;  %v9158_v60 = vld [vmem:[#allocation130_spill] sm:$0xff]  ;;  %v9159_v38 = vld [vmem:[#allocation131_spill] sm:$0xff] }
 0x2c8   : > { %v4022_v10 = vmul.f32 %v9155_v56, %v3574_v62  ;;  %v8102_v17 = vmul.f32 %v3077_v36, %v9156_v43  ;;  %v2985_v2 = vsub.f32 1.0, %v2921_v35  ;;  %v3892_v63 = vsub.f32 1.0, %v3828_v26  ;;  %v8104_v41 = vpop.permute.xlu1 %3632  ;;  %v9161_v43 = vld [vmem:[#allocation140_spill] sm:$0xff] }
 0x2c9   : > { %9152 = vst [vmem:[#allocation51_spill] sm:$0xff] %v8094_v49  ;;  %v3990_v52 = vmul.f32 %v3926_v29, %v9157_v48  ;;  %v2986_v4 = vsub.f32 1.0, %v2922_v28  ;;  %v2872_v16 = vsub.f32 %v7893_v6, %v5486_v39  ;;  %v2935_v53 = vand.u32 2147483647, %v2871_v51  ;;  %v9160_v51 = vld [vmem:[#allocation21_spill] sm:$0xff]  ;;  %v9163_v49 = vld [vmem:[#allocation139_spill] sm:$0xff] }
 0x2ca   : > { %v8110_v47 = vmul.f32 %v3078_v23, %v9158_v60  ;;  %v3989_v34 = vmul.f32 %v3925_v55, %v9159_v38  ;;  %v3956_v62 = vmax.f32 %v3892_v63, 0.0  ;;  %v3351_v36 = vsub.f32 %v7920_v1, %v8951_v8 }
 0x2cb   : > { %v3955_v35 = vmax.f32 %v3891_v44, 0.0  ;;  %v2936_v26 = vand.u32 2147483647, %v2872_v16  ;;  %v2999_v58 = vsub.f32 1.0, %v2935_v53  ;;  %v3352_v29 = vsub.f32 %v7920_v1, %v8952_v42  ;;  %v9162_v53 = vld [vmem:[#allocation20_spill] sm:$0xff] }
 0x2cc   : > { %v8117_v28 = vmax.f32 %v2985_v2, 0.0  ;;  %v4020_v56 = vmul.f32 %v3956_v62, %v3572_v15  ;;  %v3415_v6 = vand.u32 2147483647, %v3351_v36  ;;  %v3156_v23 = vadd.f32 %v9161_v43, %v9160_v51  ;;  %v8121_v48 = vpop.permute.xlu1 %3692  ;;  %v9164_v36 = vld [vmem:[#allocation88_spill] sm:$0xff] }
 0x2cd   : > { %v3000_v55 = vsub.f32 1.0, %v2936_v26  ;;  %v3063_v63 = vmax.f32 %v2999_v58, 0.0  ;;  %v3416_v60 = vand.u32 2147483647, %v3352_v29  ;;  %v4054_v38 = vadd.f32 %v3990_v52, %v7828_v59  ;;  %v9165_v52 = vld [vmem:[#allocation115_spill] sm:$0xff] }
 0x2ce   : > { %v3479_v44 = vsub.f32 1.0, %v3415_v6  ;;  %v4052_v16 = vadd.f32 %v8049_v54, %v3156_v23  ;;  %v3155_v1 = vadd.f32 %v9163_v49, %v9162_v53  ;;  %v4053_v2 = vadd.f32 %v3989_v34, %v7821_v32 }
 0x2cf   : > { %v4019_v15 = vmul.f32 %v3955_v35, %v8063_v20  ;;  %v3064_v62 = vmax.f32 %v3000_v55, 0.0  ;;  %v3127_v51 = vmul.f32 %v3063_v63, %v9164_v36  ;;  %v3353_v26 = vsub.f32 %v7926_v50, %v8951_v8  ;;  %v9166_v55 = vld [vmem:[#allocation71_spill] sm:$0xff] }
 0x2d0   : > { %v8132_v58 = vmax.f32 %v2986_v4, 0.0  ;;  %v4176_v29 = vpack.c.bf16 %v4054_v38, %v4052_v16  ;;  %v4051_v59 = vadd.f32 %v8046_v24, %v3155_v1  ;;  %v3354_v54 = vsub.f32 %v7926_v50, %v8952_v42 }
 0x2d1   : > { %v3128_v49 = vmul.f32 %v3064_v62, %v9165_v52  ;;  %v3480_v6 = vsub.f32 1.0, %v3416_v60  ;;  %v3543_v32 = vmax.f32 %v3479_v44, 0.0  ;;  %v3417_v34 = vand.u32 2147483647, %v3353_v26  ;;  %v8138_v20 = vpop.permute.xlu1 %2804 }
 0x2d2   : > { %4347 = vmatprep.mubr.bf16.mxu0 %v4176_v29  ;;  %v4175_v35 = vpack.c.bf16 %v4053_v2, %v4051_v59  ;;  %v3418_v43 = vand.u32 2147483647, %v3354_v54  ;;  %v4084_v23 = vadd.f32 %v4020_v56, %v7996_v7  ;;  %v4086_v4 = vadd.f32 %v4022_v10, %v8005_v57  ;;  %v9168_v29 = vld [vmem:[#allocation152_spill] sm:$0xff] }
 0x2d3   : > { %v8143_v63 = vadd.f32 %v3127_v51, %v9166_v55  ;;  %v3481_v24 = vsub.f32 1.0, %v3417_v34  ;;  %v4083_v50 = vadd.f32 %v4019_v15, %v7985_v14  ;;  %v4085_v38 = vadd.f32 %v4021_v22, %v8002_v33  ;;  %v9167_v51 = vld [vmem:[#allocation98_spill] sm:$0xff] }
 0x2d4   : > { %4348 = vmatmul.mubr.bf16.gmra.mxu0 %v4175_v35  ;;  %v3482_v60 = vsub.f32 1.0, %v3418_v43  ;;  %v4192_v44 = vpack.c.bf16 %v4086_v4, %v4084_v23  ;;  %v3385_v16 = vsub.f32 %v7952_v40, %v8951_v8  ;;  %v3386_v53 = vsub.f32 %v7952_v40, %v8952_v42  ;;  %v9169_v23 = vld [vmem:[#allocation153_spill] sm:$0xff] }
 0x2d5   : > { %v3545_v7 = vmax.f32 %v3481_v24, 0.0  ;;  %v4191_v56 = vpack.c.bf16 %v4085_v38, %v4083_v50  ;;  %v3735_v57 = vsub.f32 %v7975_v45, %v5482_v3  ;;  %v3736_v10 = vsub.f32 %v7975_v45, %v5486_v39 }
 0x2d6   : > { %v3546_v14 = vmax.f32 %v3482_v60, 0.0  ;;  %4411 = vmatprep.mubr.bf16.mxu1 %v4192_v44  ;;  %v3449_v33 = vand.u32 2147483647, %v3385_v16  ;;  %v3450_v22 = vand.u32 2147483647, %v3386_v53  ;;  %v3767_v1 = vsub.f32 %v7993_v12, %v5482_v3  ;;  %v8157_v2 = vpop.permute.xlu1 %3252 }
 0x2d7   : > { %v3544_v15 = vmax.f32 %v3480_v6, 0.0  ;;  %4412 = vmatmul.mubr.bf16.gmra.mxu1 %v4191_v56  ;;  %v3799_v40 = vand.u32 2147483647, %v3735_v57  ;;  %v3800_v62 = vand.u32 2147483647, %v3736_v10  ;;  %v3768_v36 = vsub.f32 %v7993_v12, %v5486_v39 }
 0x2d8   : > { %v3192_v26 = vadd.f32 %v3128_v49, %v9167_v51  ;;  %v3993_v45 = vmul.f32 %v9168_v29, %v3545_v7  ;;  %v3513_v59 = vsub.f32 1.0, %v3449_v33  ;;  %v3831_v54 = vand.u32 2147483647, %v3767_v1 }
 0x2d9   : > { %v3863_v52 = vsub.f32 1.0, %v3799_v40  ;;  %v3864_v34 = vsub.f32 1.0, %v3800_v62  ;;  %v3832_v35 = vand.u32 2147483647, %v3768_v36  ;;  %v3769_v43 = vsub.f32 %v8022_v46, %v5482_v3  ;;  %v9170_v36 = vld [vmem:[#allocation135_spill] sm:$0xff] }
 0x2da   : > { %v3994_v6 = vmul.f32 %v9169_v23, %v3546_v14  ;;  %v3514_v4 = vsub.f32 1.0, %v3450_v22  ;;  %v3895_v55 = vsub.f32 1.0, %v3831_v54  ;;  %v3770_v24 = vsub.f32 %v8022_v46, %v5486_v39  ;;  %v8168_v12 = vpop.permute.xlu1 %3256  ;;  %v9171_v54 = vld [vmem:[#allocation59_spill] sm:$0xff] }
 0x2db   : > { %v3927_v49 = vmax.f32 %v3863_v52, 0.0  ;;  %v3928_v50 = vmax.f32 %v3864_v34, 0.0  ;;  %v3896_v38 = vsub.f32 1.0, %v3832_v35  ;;  %v3833_v60 = vand.u32 2147483647, %v3769_v43  ;;  %v9172_v52 = vld [vmem:[#allocation143_spill] sm:$0xff] }
 0x2dc   : > { %v3959_v44 = vmax.f32 %v3895_v55, 0.0  ;;  %v3834_v16 = vand.u32 2147483647, %v3770_v24  ;;  %v2877_v53 = vsub.f32 %v8037_v18, %v5482_v3  ;;  %v2878_v7 = vsub.f32 %v8037_v18, %v5486_v39  ;;  %v9175_v55 = vld [vmem:[#allocation136_spill] sm:$0xff] }
 0x2dd   : > { %v3577_v56 = vmax.f32 %v3513_v59, 0.0  ;;  %v3992_v57 = vmul.f32 %v3928_v50, %v3544_v15  ;;  %v3960_v10 = vmax.f32 %v3896_v38, 0.0  ;;  %v3897_v14 = vsub.f32 1.0, %v3833_v60  ;;  %v9173_v59 = vld [vmem:[#allocation58_spill] sm:$0xff]  ;;  %v9174_v15 = vld [vmem:[#allocation141_spill] sm:$0xff] }
 0x2de   : > { %v3991_v33 = vmul.f32 %v3927_v49, %v3543_v32  ;;  %v3898_v46 = vsub.f32 1.0, %v3834_v16  ;;  %v2941_v22 = vand.u32 2147483647, %v2877_v53  ;;  %v2942_v1 = vand.u32 2147483647, %v2878_v7  ;;  %v8174_v40 = vpop.permute.xlu1 %3320 }
 0x2df   : > { %v3578_v62 = vmax.f32 %v3514_v4, 0.0  ;;  %v4023_v51 = vmul.f32 %v3959_v44, %v9170_v36  ;;  %v3961_v29 = vmax.f32 %v3897_v14, 0.0  ;;  %v3160_v34 = vadd.f32 %v9172_v52, %v9171_v54 }
 0x2e0   : > { %v3962_v35 = vmax.f32 %v3898_v46, 0.0  ;;  %v3005_v43 = vsub.f32 1.0, %v2941_v22  ;;  %v3006_v18 = vsub.f32 1.0, %v2942_v1  ;;  %v3159_v23 = vadd.f32 %v9174_v15, %v9173_v59  ;;  %v9176_v1 = vld [vmem:[#allocation44_spill] sm:$0xff]  ;;  %v3249_v59 = vpop.permute.xlu0 %3248  ;;  %v9178_v15 = vld [vmem:[#allocation126_spill] sm:$0xff] }
 0x2e1   : > { %v4024_v32 = vmul.f32 %v3960_v10, %v9175_v55  ;;  %v4056_v24 = vadd.f32 %v3992_v57, %v3160_v34  ;;  %v4058_v49 = vadd.f32 %v3994_v6, %v7880_v13  ;;  %v3355_v4 = vsub.f32 %v8053_v27, %v8951_v8 }
 0x2e2   : > { %v4026_v50 = vmul.f32 %v3962_v35, %v3578_v62  ;;  %v3069_v38 = vmax.f32 %v3005_v43, 0.0  ;;  %v4055_v60 = vadd.f32 %v3991_v33, %v3159_v23  ;;  %v4057_v44 = vadd.f32 %v3993_v45, %v7873_v21  ;;  %v9177_v62 = vld [vmem:[#allocation125_spill] sm:$0xff] }
 0x2e3   : > { %v4178_v16 = vpack.c.bf16 %v4058_v49, %v4056_v24  ;;  %v3356_v53 = vsub.f32 %v8053_v27, %v8952_v42  ;;  %v3419_v7 = vand.u32 2147483647, %v3355_v4  ;;  %v3387_v14 = vsub.f32 %v8070_v31, %v8951_v8  ;;  %v8190_v10 = vpop.permute.xlu1 %3636 }
 0x2e4   : > { %v4025_v57 = vmul.f32 %v3961_v29, %v3577_v56  ;;  %v3070_v13 = vmax.f32 %v3006_v18, 0.0  ;;  %v4177_v6 = vpack.c.bf16 %v4057_v44, %v4055_v60  ;;  %v3388_v46 = vsub.f32 %v8070_v31, %v8952_v42 }
 0x2e5   : > { %4355 = vmatprep.mubr.bf16.mxu0 %v4178_v16  ;;  %v3420_v33 = vand.u32 2147483647, %v3356_v53  ;;  %v3483_v22 = vsub.f32 1.0, %v3419_v7  ;;  %v3451_v21 = vand.u32 2147483647, %v3387_v14  ;;  %v4088_v45 = vadd.f32 %v4024_v32, %v3192_v26 }
 0x2e6   : > { %v8196_v27 = vmul.f32 %v8117_v28, %v9176_v1  ;;  %v8199_v36 = vmul.f32 %v3069_v38, %v9177_v62  ;;  %4356 = vmatmul.mubr.bf16.gmra.mxu0 %v4177_v6  ;;  %v3452_v54 = vand.u32 2147483647, %v3388_v46  ;;  %v4090_v56 = vadd.f32 %v4026_v50, %v8016_v9  ;;  %v9179_v9 = vld [vmem:[#allocation154_spill] sm:$0xff] }
 0x2e7   : > { %v3484_v29 = vsub.f32 1.0, %v3420_v33  ;;  %v3547_v52 = vmax.f32 %v3483_v22, 0.0  ;;  %v3515_v34 = vsub.f32 1.0, %v3451_v21  ;;  %v4087_v31 = vadd.f32 %v4023_v51, %v8143_v63  ;;  %v8203_v35 = vpop.permute.xlu1 %3700  ;;  %v9180_v21 = vld [vmem:[#allocation155_spill] sm:$0xff] }
 0x2e8   : > { %v3516_v43 = vsub.f32 1.0, %v3452_v54  ;;  %v4194_v26 = vpack.c.bf16 %v4090_v56, %v4088_v45  ;;  %v4089_v18 = vadd.f32 %v4025_v57, %v8013_v11  ;;  %v3389_v28 = vsub.f32 %v8083_v25, %v8951_v8 }
 0x2e9   : > { %v8209_v23 = vmul.f32 %v3070_v13, %v9178_v15  ;;  %v3548_v55 = vmax.f32 %v3484_v29, 0.0  ;;  %v8212_v32 = vmul.f32 %v9179_v9, %v3547_v52  ;;  %v3390_v63 = vsub.f32 %v8083_v25, %v8952_v42 }
 0x2ea   : > { %v3579_v51 = vmax.f32 %v3515_v34, 0.0  ;;  %4419 = vmatprep.mubr.bf16.mxu1 %v4194_v26  ;;  %v4193_v24 = vpack.c.bf16 %v4089_v18, %v4087_v31  ;;  %v3453_v49 = vand.u32 2147483647, %v3389_v28  ;;  %v3741_v11 = vsub.f32 %v8104_v41, %v5482_v3 }
 0x2eb   : > { %v3580_v4 = vmax.f32 %v3516_v43, 0.0  ;;  %v3454_v50 = vand.u32 2147483647, %v3390_v63  ;;  %v3742_v38 = vsub.f32 %v8104_v41, %v5486_v39  ;;  %v3357_v60 = vsub.f32 %v3249_v59, %v8951_v8  ;;  %v8221_v44 = vpop.permute.xlu1 %3704  ;;  %v9181_v43 = vld [vmem:[#allocation156_spill] sm:$0xff] }
 0x2ec   : > { %4420 = vmatmul.mubr.bf16.gmra.mxu1 %v4193_v24  ;;  %v3517_v16 = vsub.f32 1.0, %v3453_v49  ;;  %v3805_v53 = vand.u32 2147483647, %v3741_v11  ;;  %v3358_v25 = vsub.f32 %v3249_v59, %v8952_v42  ;;  %v3771_v7 = vsub.f32 %v8121_v48, %v5482_v3 }
 0x2ed   : > { %v3518_v14 = vsub.f32 1.0, %v3454_v50  ;;  %v3806_v57 = vand.u32 2147483647, %v3742_v38  ;;  %v3421_v13 = vand.u32 2147483647, %v3357_v60  ;;  %v3772_v6 = vsub.f32 %v8121_v48, %v5486_v39  ;;  %v9182_v50 = vld [vmem:[#allocation157_spill] sm:$0xff] }
 0x2ee   : > { %v3581_v46 = vmax.f32 %v3517_v16, 0.0  ;;  %v3869_v41 = vsub.f32 1.0, %v3805_v53  ;;  %v3422_v33 = vand.u32 2147483647, %v3358_v25  ;;  %v3835_v22 = vand.u32 2147483647, %v3771_v7 }
 0x2ef   : > { %v3996_v45 = vmul.f32 %v9180_v21, %v3548_v55  ;;  %v3870_v1 = vsub.f32 1.0, %v3806_v57  ;;  %v3485_v62 = vsub.f32 1.0, %v3421_v13  ;;  %v3836_v54 = vand.u32 2147483647, %v3772_v6  ;;  %v9183_v13 = vld [vmem:[#allocation67_spill] sm:$0xff] }
 0x2f0   : > { %v3582_v56 = vmax.f32 %v3518_v14, 0.0  ;;  %v3933_v29 = vmax.f32 %v3869_v41, 0.0  ;;  %v3486_v52 = vsub.f32 1.0, %v3422_v33  ;;  %v3899_v34 = vsub.f32 1.0, %v3835_v22  ;;  %v8229_v31 = vpop.permute.xlu1 %2752  ;;  %v9185_v33 = vld [vmem:[#allocation81_spill] sm:$0xff]  ;;  %v9186_v21 = vld [vmem:[#allocation91_spill] sm:$0xff] }
 0x2f1   : > { %v4029_v26 = vmul.f32 %v9181_v43, %v3581_v46  ;;  %v3934_v18 = vmax.f32 %v3870_v1, 0.0  ;;  %v3549_v28 = vmax.f32 %v3485_v62, 0.0  ;;  %v3900_v48 = vsub.f32 1.0, %v3836_v54  ;;  %v9187_v1 = vld [vmem:[#allocation146_spill] sm:$0xff] }
 0x2f2   : > { %v3550_v59 = vmax.f32 %v3486_v52, 0.0  ;;  %v3963_v15 = vmax.f32 %v3899_v34, 0.0  ;;  %v2879_v9 = vsub.f32 %v8138_v20, %v5482_v3  ;;  %v2880_v55 = vsub.f32 %v8138_v20, %v5486_v39  ;;  %v9184_v20 = vld [vmem:[#allocation147_spill] sm:$0xff] }
 0x2f3   : > { %v3997_v63 = vmul.f32 %v3933_v29, %v3549_v28  ;;  %v3964_v24 = vmax.f32 %v3900_v48, 0.0  ;;  %v3359_v49 = vsub.f32 %v8157_v2, %v8951_v8  ;;  %v3360_v11 = vsub.f32 %v8157_v2, %v8952_v42  ;;  %v9188_v29 = vld [vmem:[#allocation108_spill] sm:$0xff] }
 0x2f4   : > { %v4030_v38 = vmul.f32 %v9182_v50, %v3582_v56  ;;  %v3998_v60 = vmul.f32 %v3934_v18, %v3550_v59  ;;  %v2943_v16 = vand.u32 2147483647, %v2879_v9  ;;  %v2944_v53 = vand.u32 2147483647, %v2880_v55  ;;  %v8241_v25 = vpop.permute.xlu1 %2812  ;;  %v9189_v28 = vld [vmem:[#allocation104_spill] sm:$0xff]  ;;  %v9190_v59 = vld [vmem:[#allocation79_spill] sm:$0xff] }
 0x2f5   : > { %v4027_v7 = vmul.f32 %v3963_v15, %v3579_v51  ;;  %v3423_v14 = vand.u32 2147483647, %v3359_v49  ;;  %v3424_v57 = vand.u32 2147483647, %v3360_v11  ;;  %v3164_v6 = vadd.f32 %v9184_v20, %v9183_v13 }
 0x2f6   : > { %v3007_v46 = vsub.f32 1.0, %v2943_v16  ;;  %v3008_v41 = vsub.f32 1.0, %v2944_v53  ;;  %v4062_v22 = vadd.f32 %v3998_v60, %v9185_v33  ;;  %v3163_v2 = vadd.f32 %v9187_v1, %v9186_v21  ;;  %v9191_v60 = vld [vmem:[#allocation89_spill] sm:$0xff]  ;;  %v9192_v21 = vld [vmem:[#allocation46_spill] sm:$0xff] }
 0x2f7   : > { %v4028_v62 = vmul.f32 %v3964_v24, %v3580_v4  ;;  %v3487_v54 = vsub.f32 1.0, %v3423_v14  ;;  %v4060_v56 = vadd.f32 %v3996_v45, %v3164_v6  ;;  %v4061_v52 = vadd.f32 %v3997_v63, %v9188_v29 }
 0x2f8   : > { %v3072_v34 = vmax.f32 %v3008_v41, 0.0  ;;  %v3488_v43 = vsub.f32 1.0, %v3424_v57  ;;  %v4059_v51 = vadd.f32 %v8212_v32, %v3163_v2  ;;  %v3361_v18 = vsub.f32 %v8168_v12, %v8951_v8 }
 0x2f9   : > { %v3197_v48 = vadd.f32 %v8199_v36, %v9189_v28  ;;  %v3198_v15 = vadd.f32 %v8209_v23, %v9190_v59  ;;  %v4180_v9 = vpack.c.bf16 %v4062_v22, %v4060_v56  ;;  %v3362_v4 = vsub.f32 %v8168_v12, %v8952_v42  ;;  %v8258_v45 = vpop.permute.xlu1 %3260  ;;  %v3317_v22 = vpop.permute.xlu0 %3316 }
 0x2fa   : > { %v3071_v55 = vmax.f32 %v3007_v46, 0.0  ;;  %v3551_v63 = vmax.f32 %v3487_v54, 0.0  ;;  %v4179_v24 = vpack.c.bf16 %v4061_v52, %v4059_v51  ;;  %v3425_v49 = vand.u32 2147483647, %v3361_v18  ;;  %v9193_v54 = vld [vmem:[#allocation107_spill] sm:$0xff]  ;;  %v9195_v52 = vld [vmem:[#allocation160_spill] sm:$0xff] }
 0x2fb   : > { %4363 = vmatprep.mubr.bf16.mxu0 %v4180_v9  ;;  %v3426_v32 = vand.u32 2147483647, %v3362_v4  ;;  %v4092_v11 = vadd.f32 %v4028_v62, %v8061_v37  ;;  %v4094_v50 = vadd.f32 %v4030_v38, %v3198_v15  ;;  %v4091_v36 = vadd.f32 %v4027_v7, %v8058_v30 }
 0x2fc   : > { %v3136_v16 = vmul.f32 %v3072_v34, %v9191_v60  ;;  %v3552_v23 = vmax.f32 %v3488_v43, 0.0  ;;  %4364 = vmatmul.mubr.bf16.gmra.mxu0 %v4179_v24  ;;  %v3489_v53 = vsub.f32 1.0, %v3425_v49  ;;  %v4093_v14 = vadd.f32 %v4029_v26, %v3197_v48 }
 0x2fd   : > { %v3490_v12 = vsub.f32 1.0, %v3426_v32  ;;  %v4196_v57 = vpack.c.bf16 %v4094_v50, %v4092_v11  ;;  %v3393_v13 = vsub.f32 %v8174_v40, %v8951_v8  ;;  %v3394_v20 = vsub.f32 %v8174_v40, %v8952_v42  ;;  %v8267_v6 = vpop.permute.xlu1 %3324 }
 0x2fe   : > { %v3553_v37 = vmax.f32 %v3489_v53, 0.0  ;;  %v4195_v38 = vpack.c.bf16 %v4093_v14, %v4091_v36  ;;  %v3743_v30 = vsub.f32 %v8190_v10, %v5482_v3  ;;  %v3744_v7 = vsub.f32 %v8190_v10, %v5486_v39  ;;  %v9194_v10 = vld [vmem:[#allocation159_spill] sm:$0xff] }
 0x2ff   : > { %v3554_v46 = vmax.f32 %v3490_v12, 0.0  ;;  %4427 = vmatprep.mubr.bf16.mxu1 %v4196_v57  ;;  %v3457_v26 = vand.u32 2147483647, %v3393_v13  ;;  %v3458_v41 = vand.u32 2147483647, %v3394_v20  ;;  %v3775_v33 = vsub.f32 %v8203_v35, %v5482_v3 }
 0x300   : > { %v8276_v40 = vmul.f32 %v3071_v55, %v9192_v21  ;;  %4428 = vmatmul.mubr.bf16.gmra.mxu1 %v4195_v38  ;;  %v3807_v1 = vand.u32 2147483647, %v3743_v30  ;;  %v3808_v2 = vand.u32 2147483647, %v3744_v7  ;;  %v3776_v62 = vsub.f32 %v8203_v35, %v5486_v39 }
 0x301   : > { %v8281_v56 = vadd.f32 %v3136_v16, %v9193_v54  ;;  %v4001_v29 = vmul.f32 %v9194_v10, %v3553_v37  ;;  %v4002_v34 = vmul.f32 %v9195_v52, %v3554_v46  ;;  %v3839_v43 = vand.u32 2147483647, %v3775_v33  ;;  %v8285_v51 = vpop.permute.xlu1 %3328  ;;  %v9196_v46 = vld [vmem:[#allocation92_spill] sm:$0xff]  ;;  %v9199_v54 = vld [vmem:[#allocation150_spill] sm:$0xff] }
 0x302   : > { %v3871_v18 = vsub.f32 1.0, %v3807_v1  ;;  %v3872_v28 = vsub.f32 1.0, %v3808_v2  ;;  %v3840_v48 = vand.u32 2147483647, %v3776_v62  ;;  %v3391_v59 = vsub.f32 %v3317_v22, %v8951_v8  ;;  %v9198_v62 = vld [vmem:[#allocation57_spill] sm:$0xff] }
 0x303   : > { %v3521_v15 = vsub.f32 1.0, %v3457_v26  ;;  %v3522_v9 = vsub.f32 1.0, %v3458_v41  ;;  %v3903_v4 = vsub.f32 1.0, %v3839_v43  ;;  %v3392_v35 = vsub.f32 %v3317_v22, %v8952_v42  ;;  %v9197_v26 = vld [vmem:[#allocation151_spill] sm:$0xff] }
 0x304   : > { %v3935_v55 = vmax.f32 %v3871_v18, 0.0  ;;  %v3936_v24 = vmax.f32 %v3872_v28, 0.0  ;;  %v3904_v49 = vsub.f32 1.0, %v3840_v48  ;;  %v3455_v32 = vand.u32 2147483647, %v3391_v59 }
 0x305   : > { %v3967_v11 = vmax.f32 %v3903_v4, 0.0  ;;  %v3456_v50 = vand.u32 2147483647, %v3392_v35  ;;  %v3777_v36 = vsub.f32 %v8221_v44, %v5482_v3  ;;  %v3778_v60 = vsub.f32 %v8221_v44, %v5486_v39 }
 0x306   : > { %v3999_v16 = vmul.f32 %v3935_v55, %v3551_v63  ;;  %v4000_v53 = vmul.f32 %v3936_v24, %v3552_v23  ;;  %v3968_v14 = vmax.f32 %v3904_v49, 0.0  ;;  %v3519_v12 = vsub.f32 1.0, %v3455_v32  ;;  %v8293_v57 = vpop.permute.xlu1 %3648 }
 0x307   : > { %v3520_v13 = vsub.f32 1.0, %v3456_v50  ;;  %v3841_v20 = vand.u32 2147483647, %v3777_v36  ;;  %v3842_v37 = vand.u32 2147483647, %v3778_v60  ;;  %v2853_v38 = vsub.f32 %v8229_v31, %v5482_v3 }
 0x308   : > { %v3583_v30 = vmax.f32 %v3519_v12, 0.0  ;;  %v2854_v7 = vsub.f32 %v8229_v31, %v5486_v39  ;;  %v3168_v41 = vadd.f32 %v9197_v26, %v9196_v46  ;;  %v4066_v44 = vadd.f32 %v4002_v34, %v7929_v61  ;;  %v9200_v61 = vld [vmem:[#allocation109_spill] sm:$0xff]  ;;  %v9203_v46 = vld [vmem:[#allocation15_spill] sm:$0xff] }
 0x309   : > { %v3584_v63 = vmax.f32 %v3520_v13, 0.0  ;;  %v3905_v23 = vsub.f32 1.0, %v3841_v20  ;;  %v3906_v33 = vsub.f32 1.0, %v3842_v37  ;;  %v2917_v22 = vand.u32 2147483647, %v2853_v38  ;;  %v9201_v20 = vld [vmem:[#allocation87_spill] sm:$0xff] }
 0x30a   : > { %v3586_v21 = vmax.f32 %v3522_v9, 0.0  ;;  %v2918_v1 = vand.u32 2147483647, %v2854_v7  ;;  %v4064_v2 = vadd.f32 %v4000_v53, %v3168_v41  ;;  %v3167_v10 = vadd.f32 %v9199_v54, %v9198_v62  ;;  %v8304_v52 = vpop.permute.xlu1 %3708  ;;  %v9202_v37 = vld [vmem:[#allocation78_spill] sm:$0xff] }
 0x30b   : > { %v4032_v43 = vmul.f32 %v3968_v14, %v3584_v63  ;;  %v3969_v18 = vmax.f32 %v3905_v23, 0.0  ;;  %v3970_v31 = vmax.f32 %v3906_v33, 0.0  ;;  %v2981_v28 = vsub.f32 1.0, %v2917_v22  ;;  %v9204_v63 = vld [vmem:[#allocation16_spill] sm:$0xff] }
 0x30c   : > { %v2982_v48 = vsub.f32 1.0, %v2918_v1  ;;  %v4182_v59 = vpack.c.bf16 %v4066_v44, %v4064_v2  ;;  %v4063_v4 = vadd.f32 %v3999_v16, %v3167_v10  ;;  %v4065_v34 = vadd.f32 %v4001_v29, %v9200_v61  ;;  %v9205_v2 = vld [vmem:[#allocation36_spill] sm:$0xff]  ;;  %v9208_v61 = vld [vmem:[#allocation63_spill] sm:$0xff] }
 0x30d   : > { %v3585_v35 = vmax.f32 %v3521_v15, 0.0  ;;  %v4031_v55 = vmul.f32 %v3967_v11, %v3583_v30  ;;  %v4034_v24 = vmul.f32 %v3970_v31, %v3586_v21  ;;  %v2883_v9 = vsub.f32 %v8241_v25, %v5482_v3 }
 0x30e   : > { %v3045_v49 = vmax.f32 %v2981_v28, 0.0  ;;  %4371 = vmatprep.mubr.bf16.mxu0 %v4182_v59  ;;  %v4181_v32 = vpack.c.bf16 %v4065_v34, %v4063_v4  ;;  %v2884_v50 = vsub.f32 %v8241_v25, %v5486_v39  ;;  %v3363_v36 = vsub.f32 %v8258_v45, %v8951_v8  ;;  %v9207_v59 = vld [vmem:[#allocation26_spill] sm:$0xff]  ;;  %v9209_v34 = vld [vmem:[#allocation95_spill] sm:$0xff] }
 0x30f   : > { %v4033_v60 = vmul.f32 %v3969_v18, %v3585_v35  ;;  %v3046_v53 = vmax.f32 %v2982_v48, 0.0  ;;  %v2947_v16 = vand.u32 2147483647, %v2883_v9  ;;  %v3364_v29 = vsub.f32 %v8258_v45, %v8952_v42  ;;  %v8315_v15 = vpop.permute.xlu1 %2756 }
 0x310   : > { %4372 = vmatmul.mubr.bf16.gmra.mxu0 %v4181_v32  ;;  %v2948_v11 = vand.u32 2147483647, %v2884_v50  ;;  %v3427_v14 = vand.u32 2147483647, %v3363_v36  ;;  %v4096_v12 = vadd.f32 %v4032_v43, %v8281_v56  ;;  %v4098_v13 = vadd.f32 %v4034_v24, %v8089_v19  ;;  %v9206_v43 = vld [vmem:[#allocation77_spill] sm:$0xff] }
 0x311   : > { %v3114_v25 = vmul.f32 %v8132_v58, %v9201_v20  ;;  %v3199_v38 = vadd.f32 %v8276_v40, %v9202_v37  ;;  %v3011_v30 = vsub.f32 1.0, %v2947_v16  ;;  %v3428_v7 = vand.u32 2147483647, %v3364_v29 }
 0x312   : > { %v3109_v26 = vmul.f32 %v3045_v49, %v9203_v46  ;;  %v3012_v45 = vsub.f32 1.0, %v2948_v11  ;;  %v3491_v41 = vsub.f32 1.0, %v3427_v14  ;;  %v4198_v44 = vpack.c.bf16 %v4098_v13, %v4096_v12 }
 0x313   : > { %v3110_v23 = vmul.f32 %v3046_v53, %v9204_v63  ;;  %v4095_v33 = vadd.f32 %v4031_v55, %v3199_v38  ;;  %v4097_v56 = vadd.f32 %v4033_v60, %v8086_v5  ;;  %v3395_v19 = vsub.f32 %v8267_v6, %v8951_v8  ;;  %v8328_v22 = vpop.permute.xlu1 %2820  ;;  %v9210_v55 = vld [vmem:[#allocation25_spill] sm:$0xff]  ;;  %v9213_v60 = vld [vmem:[#allocation162_spill] sm:$0xff]  ;;  %v9216_v63 = vld [vmem:[#allocation164_spill] sm:$0xff] }
 0x314   : > { %v3075_v58 = vmax.f32 %v3011_v30, 0.0  ;;  %v3492_v21 = vsub.f32 1.0, %v3428_v7  ;;  %4435 = vmatprep.mubr.bf16.mxu1 %v4198_v44  ;;  %v3396_v40 = vsub.f32 %v8267_v6, %v8952_v42  ;;  %v3397_v1 = vsub.f32 %v8285_v51, %v8951_v8  ;;  %v3265_v6 = vpop.permute.xlu0 %3264  ;;  %v9214_v30 = vld [vmem:[#allocation110_spill] sm:$0xff] }
 0x315   : > { %v8336_v62 = vadd.f32 %v8102_v17, %v9205_v2  ;;  %v3076_v54 = vmax.f32 %v3012_v45, 0.0  ;;  %v3555_v5 = vmax.f32 %v3491_v41, 0.0  ;;  %v4197_v10 = vpack.c.bf16 %v4097_v56, %v4095_v33  ;;  %v9215_v41 = vld [vmem:[#allocation111_spill] sm:$0xff] }
 0x316   : > { %v8340_v18 = vadd.f32 %v8110_v47, %v9206_v43  ;;  %v3459_v31 = vand.u32 2147483647, %v3395_v19  ;;  %v3460_v28 = vand.u32 2147483647, %v3396_v40  ;;  %v3398_v48 = vsub.f32 %v8285_v51, %v8952_v42  ;;  %v9211_v47 = vld [vmem:[#allocation73_spill] sm:$0xff] }
 0x317   : > { %v8346_v4 = vadd.f32 %v8196_v27, %v9207_v59  ;;  %v8349_v17 = vadd.f32 %v3114_v25, %v9208_v61  ;;  %v8352_v35 = vadd.f32 %v3109_v26, %v9209_v34  ;;  %v8355_v24 = vadd.f32 %v3110_v23, %v9210_v55  ;;  %4436 = vmatmul.mubr.bf16.gmra.mxu1 %v4197_v10  ;;  %v8360_v50 = vpop.permute.xlu1 %2824  ;;  %v9212_v27 = vld [vmem:[#allocation31_spill] sm:$0xff] }
 0x318   : > { %v3139_v9 = vmul.f32 %v3075_v58, %v9211_v47  ;;  %v3556_v49 = vmax.f32 %v3492_v21, 0.0  ;;  %v3461_v32 = vand.u32 2147483647, %v3397_v1  ;;  %v3749_v51 = vsub.f32 %v8293_v57, %v5482_v3  ;;  %v3269_v45 = vpop.permute.xlu0 %3268 }
 0x319   : > { %v3140_v36 = vmul.f32 %v3076_v54, %v9212_v27  ;;  %v8364_v53 = vmul.f32 %v9213_v60, %v3555_v5  ;;  %v3750_v16 = vsub.f32 %v8293_v57, %v5486_v39  ;;  %v3365_v29 = vsub.f32 %v3265_v6, %v8951_v8  ;;  %v9217_v60 = vld [vmem:[#allocation165_spill] sm:$0xff] }
 0x31a   : > { %v3523_v11 = vsub.f32 1.0, %v3459_v31  ;;  %v3524_v14 = vsub.f32 1.0, %v3460_v28  ;;  %v3462_v12 = vand.u32 2147483647, %v3398_v48  ;;  %v3366_v13 = vsub.f32 %v3265_v6, %v8952_v42 }
 0x31b   : > { %v3813_v20 = vand.u32 2147483647, %v3749_v51  ;;  %v3814_v25 = vand.u32 2147483647, %v3750_v16  ;;  %v3429_v37 = vand.u32 2147483647, %v3365_v29  ;;  %v3779_v38 = vsub.f32 %v8304_v52, %v5482_v3 }
 0x31c   : > { %v8373_v7 = vadd.f32 %v3139_v9, %v9214_v30  ;;  %v3525_v46 = vsub.f32 1.0, %v3461_v32  ;;  %v3430_v26 = vand.u32 2147483647, %v3366_v13  ;;  %v3780_v57 = vsub.f32 %v8304_v52, %v5486_v39  ;;  %v8381_v1 = vpop.permute.xlu1 %3272 }
 0x31d   : > { %v8378_v44 = vadd.f32 %v3140_v36, %v9215_v41  ;;  %v4004_v23 = vmul.f32 %v9216_v63, %v3556_v49  ;;  %v3878_v33 = vsub.f32 1.0, %v3814_v25  ;;  %v3843_v56 = vand.u32 2147483647, %v3779_v38  ;;  %v3337_v49 = vpop.permute.xlu0 %3336  ;;  %v9218_v63 = vld [vmem:[#allocation166_spill] sm:$0xff] }
 0x31e   : > { %v3587_v19 = vmax.f32 %v3523_v11, 0.0  ;;  %v3526_v58 = vsub.f32 1.0, %v3462_v12  ;;  %v3494_v21 = vsub.f32 1.0, %v3430_v26  ;;  %v3844_v40 = vand.u32 2147483647, %v3780_v57 }
 0x31f   : > { %v3588_v2 = vmax.f32 %v3524_v14, 0.0  ;;  %v3877_v54 = vsub.f32 1.0, %v3813_v20  ;;  %v3493_v5 = vsub.f32 1.0, %v3429_v37  ;;  %v2855_v52 = vsub.f32 %v8315_v15, %v5482_v3 }
 0x320   : > { %v3589_v10 = vmax.f32 %v3525_v46, 0.0  ;;  %v3907_v43 = vsub.f32 1.0, %v3843_v56  ;;  %v2856_v31 = vsub.f32 %v8315_v15, %v5486_v39  ;;  %v3367_v28 = vsub.f32 %v3269_v45, %v8951_v8  ;;  %v8394_v14 = vpop.permute.xlu1 %3332 }
 0x321   : > { %v3942_v48 = vmax.f32 %v3878_v33, 0.0  ;;  %v3558_v6 = vmax.f32 %v3494_v21, 0.0  ;;  %v3908_v59 = vsub.f32 1.0, %v3844_v40  ;;  %v2919_v61 = vand.u32 2147483647, %v2855_v52 }
 0x322   : > { %v3590_v34 = vmax.f32 %v3526_v58, 0.0  ;;  %v2920_v55 = vand.u32 2147483647, %v2856_v31  ;;  %v3368_v47 = vsub.f32 %v3269_v45, %v8952_v42  ;;  %v3431_v9 = vand.u32 2147483647, %v3367_v28  ;;  %v9219_v31 = vld [vmem:[#allocation51_spill] sm:$0xff] }
 0x323   : > { %v3941_v32 = vmax.f32 %v3877_v54, 0.0  ;;  %v3557_v51 = vmax.f32 %v3493_v5, 0.0  ;;  %v2983_v27 = vsub.f32 1.0, %v2919_v61  ;;  %v2887_v36 = vsub.f32 %v8328_v22, %v5482_v3  ;;  %v9221_v61 = vld [vmem:[#allocation41_spill] sm:$0xff] }
 0x324   : > { %v4037_v15 = vmul.f32 %v9217_v60, %v3589_v10  ;;  %v3971_v16 = vmax.f32 %v3907_v43, 0.0  ;;  %v2984_v29 = vsub.f32 1.0, %v2920_v55  ;;  %v2888_v11 = vsub.f32 %v8328_v22, %v5486_v39 }
 0x325   : > { %v4006_v12 = vmul.f32 %v3942_v48, %v3558_v6  ;;  %v3972_v13 = vmax.f32 %v3908_v59, 0.0  ;;  %v2951_v20 = vand.u32 2147483647, %v2887_v36  ;;  %v3401_v25 = vsub.f32 %v3337_v49, %v8951_v8  ;;  %v8405_v48 = vpop.permute.xlu1 %3652  ;;  %v9220_v6 = vld [vmem:[#allocation117_spill] sm:$0xff] }
 0x326   : > { %v3432_v37 = vand.u32 2147483647, %v3368_v47  ;;  %v3495_v38 = vsub.f32 1.0, %v3431_v9  ;;  %v2952_v30 = vand.u32 2147483647, %v2888_v11  ;;  %v3402_v46 = vsub.f32 %v3337_v49, %v8952_v42 }
 0x327   : > { %v4005_v26 = vmul.f32 %v3941_v32, %v3557_v51  ;;  %v3047_v57 = vmax.f32 %v2983_v27, 0.0  ;;  %v3048_v45 = vmax.f32 %v2984_v29, 0.0  ;;  %v3015_v41 = vsub.f32 1.0, %v2951_v20  ;;  %v3657_v32 = vpop.permute.xlu0 %3656  ;;  %v9222_v51 = vld [vmem:[#allocation123_spill] sm:$0xff] }
 0x328   : > { %v4038_v33 = vmul.f32 %v9218_v63, %v3590_v34  ;;  %v3016_v56 = vsub.f32 1.0, %v2952_v30  ;;  %v3465_v22 = vand.u32 2147483647, %v3401_v25  ;;  %v4068_v58 = vadd.f32 %v4004_v23, %v8097_v0 }
 0x329   : > { %v4035_v21 = vmul.f32 %v3971_v16, %v3587_v19  ;;  %v4036_v40 = vmul.f32 %v3972_v13, %v3588_v2  ;;  %v3466_v54 = vand.u32 2147483647, %v3402_v46  ;;  %v4070_v5 = vadd.f32 %v4006_v12, %v8355_v24  ;;  %v3717_v20 = vpop.permute.xlu1 %3716 }
 0x32a   : > { %v3496_v52 = vsub.f32 1.0, %v3432_v37  ;;  %v8401_v10 = vmax.f32 %v3495_v38, 0.0  ;;  %v3079_v43 = vmax.f32 %v3015_v41, 0.0  ;;  %v4067_v28 = vadd.f32 %v8364_v53, %v9219_v31  ;;  %v9223_v41 = vld [vmem:[#allocation66_spill] sm:$0xff] }
 0x32b   : > { %v3111_v59 = vmul.f32 %v3047_v57, %v9220_v6  ;;  %v3112_v34 = vmul.f32 %v3048_v45, %v9221_v61  ;;  %v4184_v55 = vpack.c.bf16 %v4070_v5, %v4068_v58  ;;  %v4069_v0 = vadd.f32 %v4005_v26, %v8352_v35  ;;  %v9228_v6 = vld [vmem:[#allocation134_spill] sm:$0xff] }
 0x32c   : > { %v3080_v23 = vmax.f32 %v3016_v56, 0.0  ;;  %v3529_v19 = vsub.f32 1.0, %v3465_v22  ;;  %v2889_v24 = vsub.f32 %v8360_v50, %v5482_v3  ;;  %v2890_v2 = vsub.f32 %v8360_v50, %v5486_v39 }
 0x32d   : > { %v3530_v47 = vsub.f32 1.0, %v3466_v54  ;;  %4379 = vmatprep.mubr.bf16.mxu0 %v4184_v55  ;;  %v4183_v53 = vpack.c.bf16 %v4069_v0, %v4067_v28  ;;  %v4100_v9 = vadd.f32 %v4036_v40, %v8378_v44  ;;  %v4102_v49 = vadd.f32 %v4038_v33, %v8340_v18  ;;  %v9224_v33 = vld [vmem:[#allocation70_spill] sm:$0xff] }
 0x32e   : > { %v3143_v27 = vmul.f32 %v3079_v43, %v9222_v51  ;;  %v2953_v36 = vand.u32 2147483647, %v2889_v24  ;;  %v2954_v35 = vand.u32 2147483647, %v2890_v2  ;;  %v4099_v60 = vadd.f32 %v4035_v21, %v8373_v7  ;;  %v9225_v21 = vld [vmem:[#allocation124_spill] sm:$0xff]  ;;  %v9226_v43 = vld [vmem:[#allocation38_spill] sm:$0xff] }
 0x32f   : > { %4380 = vmatmul.mubr.bf16.gmra.mxu0 %v4183_v53  ;;  %v4200_v16 = vpack.c.bf16 %v4102_v49, %v4100_v9  ;;  %v4101_v29 = vadd.f32 %v4037_v15, %v8336_v62  ;;  %v3369_v50 = vsub.f32 %v8381_v1, %v8951_v8  ;;  %v3370_v11 = vsub.f32 %v8381_v1, %v8952_v42 }
 0x330   : > { %v3017_v44 = vsub.f32 1.0, %v2953_v36  ;;  %v3018_v12 = vsub.f32 1.0, %v2954_v35  ;;  %v3753_v18 = vsub.f32 %v3657_v32, %v5482_v3  ;;  %v3754_v13 = vsub.f32 %v3657_v32, %v5486_v39 }
 0x331   : > { %4443 = vmatprep.mubr.bf16.mxu1 %v4200_v16  ;;  %v4199_v25 = vpack.c.bf16 %v4101_v29, %v4099_v60  ;;  %v3433_v7 = vand.u32 2147483647, %v3369_v50  ;;  %v3434_v37 = vand.u32 2147483647, %v3370_v11  ;;  %v3399_v62 = vsub.f32 %v8394_v14, %v8951_v8 }
 0x332   : > { %v3081_v15 = vmax.f32 %v3017_v44, 0.0  ;;  %v3082_v38 = vmax.f32 %v3018_v12, 0.0  ;;  %v3817_v30 = vand.u32 2147483647, %v3753_v18  ;;  %v3818_v46 = vand.u32 2147483647, %v3754_v13 }
 0x333   : > { %v3560_v26 = vmax.f32 %v3496_v52, 0.0  ;;  %4444 = vmatmul.mubr.bf16.gmra.mxu1 %v4199_v25  ;;  %v3497_v1 = vsub.f32 1.0, %v3433_v7  ;;  %v3400_v57 = vsub.f32 %v8394_v14, %v8952_v42  ;;  %v3463_v45 = vand.u32 2147483647, %v3399_v62  ;;  %v9227_v52 = vld [vmem:[#allocation133_spill] sm:$0xff]  ;;  %v3721_v42 = vpop.permute.xlu1 %3720  ;;  %v9229_v62 = vld [vmem:[#allocation100_spill] sm:$0xff] }
 0x334   : > { %v3175_v63 = vadd.f32 %v3111_v59, %v9223_v41  ;;  %v3176_v56 = vadd.f32 %v3112_v34, %v9224_v33  ;;  %v3498_v22 = vsub.f32 1.0, %v3434_v37  ;;  %v3882_v58 = vsub.f32 1.0, %v3818_v46 }
 0x335   : > { %v3144_v40 = vmul.f32 %v3080_v23, %v9225_v21  ;;  %v3593_v8 = vmax.f32 %v3529_v19, 0.0  ;;  %v3594_v54 = vmax.f32 %v3530_v47, 0.0  ;;  %v3881_v5 = vsub.f32 1.0, %v3817_v30  ;;  %v9230_v21 = vld [vmem:[#allocation103_spill] sm:$0xff] }
 0x336   : > { %v3207_v31 = vadd.f32 %v3143_v27, %v9226_v43  ;;  %v3145_v28 = vmul.f32 %v3081_v15, %v9227_v52  ;;  %v3146_v61 = vmul.f32 %v3082_v38, %v9228_v6  ;;  %v3464_v55 = vand.u32 2147483647, %v3400_v57  ;;  %v9231_v43 = vld [vmem:[#allocation101_spill] sm:$0xff] }
 0x337   : > { %v3561_v14 = vmax.f32 %v3497_v1, 0.0  ;;  %v3527_v0 = vsub.f32 1.0, %v3463_v45  ;;  %v3751_v59 = vsub.f32 %v8405_v48, %v5482_v3  ;;  %v3752_v34 = vsub.f32 %v8405_v48, %v5486_v39 }
 0x338   : > { %v3562_v23 = vmax.f32 %v3498_v22, 0.0  ;;  %v3946_v19 = vmax.f32 %v3882_v58, 0.0  ;;  %v3783_v24 = vsub.f32 %v3717_v20, %v5482_v3  ;;  %v3784_v2 = vsub.f32 %v3717_v20, %v5486_v39 }
 0x339   : > { %v3945_v47 = vmax.f32 %v3881_v5, 0.0  ;;  %v3815_v53 = vand.u32 2147483647, %v3751_v59  ;;  %v3816_v9 = vand.u32 2147483647, %v3752_v34  ;;  %v3785_v49 = vsub.f32 %v3721_v42, %v5482_v3 }
 0x33a   : > { %v3528_v32 = vsub.f32 1.0, %v3464_v55  ;;  %v3847_v51 = vand.u32 2147483647, %v3783_v24  ;;  %v3848_v27 = vand.u32 2147483647, %v3784_v2  ;;  %v3786_v36 = vsub.f32 %v3721_v42, %v5486_v39 }
 0x33b   : > { %v3591_v35 = vmax.f32 %v3527_v0, 0.0  ;;  %v3879_v60 = vsub.f32 1.0, %v3815_v53  ;;  %v3880_v16 = vsub.f32 1.0, %v3816_v9  ;;  %v3849_v48 = vand.u32 2147483647, %v3785_v49  ;;  %v4142_v9 = vld [vmem:[%s5251_s20 + $0x18] sm:$0xff] }
 0x33c   : > { %v4010_v29 = vmul.f32 %v3946_v19, %v3562_v23  ;;  %v3911_v50 = vsub.f32 1.0, %v3847_v51  ;;  %v3912_v11 = vsub.f32 1.0, %v3848_v27  ;;  %v3850_v44 = vand.u32 2147483647, %v3786_v36  ;;  %v4141_v19 = vld [vmem:[%s5251_s20 + $0x10] sm:$0xff]  ;;  %v4155_v36 = vld [vmem:[%s5251_s20 + $0x80] sm:$0xff] }
 0x33d   : > { %v4009_v12 = vmul.f32 %v3945_v47, %v3561_v14  ;;  %v3943_v18 = vmax.f32 %v3879_v60, 0.0  ;;  %v3944_v13 = vmax.f32 %v3880_v16, 0.0  ;;  %v3913_v20 = vsub.f32 1.0, %v3849_v48 }
 0x33e   : > { %v3592_v25 = vmax.f32 %v3528_v32, 0.0  ;;  %v3975_v7 = vmax.f32 %v3911_v50, 0.0  ;;  %v3976_v3 = vmax.f32 %v3912_v11, 0.0  ;;  %v3914_v37 = vsub.f32 1.0, %v3850_v44 }
 0x33f   : > { %v3209_v15 = vadd.f32 %v3145_v28, %v9229_v62  ;;  %v4007_v39 = vmul.f32 %v3943_v18, %v8401_v10  ;;  %v4008_v38 = vmul.f32 %v3944_v13, %v3560_v26  ;;  %v3977_v30 = vmax.f32 %v3913_v20, 0.0  ;;  %v4157_v18 = vld [vmem:[%s5251_s20 + $0x90] sm:$0xff] }
 0x340   : > { %v4039_v46 = vmul.f32 %v3975_v7, %v3591_v35  ;;  %v4040_v1 = vmul.f32 %v3976_v3, %v3592_v25  ;;  %v3978_v57 = vmax.f32 %v3914_v37, 0.0  ;;  %v4074_v45 = vadd.f32 %v4010_v29, %v8349_v17  ;;  %v4156_v29 = vld [vmem:[%s5251_s20 + $0x88] sm:$0xff]  ;;  %v4158_v3 = vld [vmem:[%s5251_s20 + $0x98] sm:$0xff] }
 0x341   : > { %v4041_v41 = vmul.f32 %v3977_v30, %v3593_v8  ;;  %v4072_v33 = vadd.f32 %v4008_v38, %v3176_v56  ;;  %v4071_v22 = vadd.f32 %v4007_v39, %v3175_v63  ;;  %v4073_v58 = vadd.f32 %v4009_v12, %v8346_v4  ;;  %v4139_v56 = vld [vmem:[%s5251_s20] sm:$0xff] }
 0x342   : > { %v3208_v5 = vadd.f32 %v3144_v40, %v9230_v21  ;;  %v3210_v52 = vadd.f32 %v3146_v61, %v9231_v43  ;;  %v4042_v28 = vmul.f32 %v3978_v57, %v3594_v54  ;;  %v4103_v26 = vadd.f32 %v4039_v46, %v3207_v31  ;;  %v4140_v61 = vld [vmem:[%s5251_s20 + $0x8] sm:$0xff]  ;;  %v4143_v38 = vld [vmem:[%s5251_s20 + $0x20] sm:$0xff] }
 0x343   : > { %v4186_v6 = vpack.c.bf16 %v4074_v45, %v4072_v33  ;;  %v4185_v10 = vpack.c.bf16 %v4073_v58, %v4071_v22  ;;  %v4105_v55 = vadd.f32 %v4041_v41, %v3209_v15  ;;  %v4159_v41 = vld [vmem:[%s5251_s20 + $0xa0] sm:$0xff]  ;;  %v4144_v22 = vld [vmem:[%s5251_s20 + $0x28] sm:$0xff] }
 0x344   : > { %v4104_v42 = vadd.f32 %v4040_v1, %v3208_v5  ;;  %v4106_v14 = vadd.f32 %v4042_v28, %v3210_v52 }
 0x345   : > { %4387 = vmatprep.mubr.bf16.mxu0 %v4186_v6  ;;  %v4201_v17 = vpack.c.bf16 %v4105_v55, %v4103_v26  ;;  %v4160_v6 = vld [vmem:[%s5251_s20 + $0xa8] sm:$0xff] }
 0x346   : > { %4388 = vmatmul.mubr.bf16.gmra.mxu0 %v4185_v10  ;;  %v4202_v63 = vpack.c.bf16 %v4106_v14, %v4104_v42  ;;  %v4145_v14 = vld [vmem:[%s5251_s20 + $0x30] sm:$0xff] }
 0x348   : > { %4451 = vmatprep.mubr.bf16.mxu1 %v4202_v63 }
 0x349   : > { %4452 = vmatmul.mubr.bf16.gmra.mxu1 %v4201_v17 }
 0x351   : > { %v4721_v4 = vpop.f32.mrf.mxu0 }
 0x353   : > { %v4722_v40 = vpop.f32.mrf.mxu0 }
 0x354   : > { %v4723_v8 = vadd.f32 %v4722_v40, %v4721_v4  ;;  %v4146_v40 = vld [vmem:[%s5251_s20 + $0x38] sm:$0xff] }
 0x355   : > { %v4724_v54 = vpop.f32.mrf.mxu0 }
 0x356   : > { %v4460_v31 = vadd.f32 %v4723_v8, %v4139_v56 }
 0x357   : > { %v4725_v0 = vpop.f32.mrf.mxu0 }
 0x358   : > { %4492 = vst [vmem:[%s5251_s20] sm:$0xff] %v4460_v31  ;;  %v4726_v59 = vadd.f32 %v4725_v0, %v4724_v54 }
 0x35a   : > { %v4461_v34 = vadd.f32 %v4726_v59, %v4140_v61  ;;  %v4161_v61 = vld [vmem:[%s5251_s20 + $0xb0] sm:$0xff] }
 0x35c   : > { %4493 = vst [vmem:[%s5251_s20 + $0x8] sm:$0xff] %v4461_v34 }
 0x36d   : > { %v4727_v23 = vpop.f32.mrf.mxu0 }
 0x36f   : > { %v4728_v24 = vpop.f32.mrf.mxu0 }
 0x370   : > { %v4729_v2 = vadd.f32 %v4728_v24, %v4727_v23  ;;  %v4162_v24 = vld [vmem:[%s5251_s20 + $0xb8] sm:$0xff] }
 0x371   : > { %v4730_v47 = vpop.f32.mrf.mxu0 }
 0x372   : > { %v4462_v53 = vadd.f32 %v4729_v2, %v4141_v19 }
 0x373   : > { %v4731_v49 = vpop.f32.mrf.mxu0 }
 0x374   : > { %4494 = vst [vmem:[%s5251_s20 + $0x10] sm:$0xff] %v4462_v53  ;;  %v4732_v32 = vadd.f32 %v4731_v49, %v4730_v47  ;;  %v4147_v49 = vld [vmem:[%s5251_s20 + $0x40] sm:$0xff] }
 0x376   : > { %v4463_v51 = vadd.f32 %v4732_v32, %v4142_v9 }
 0x378   : > { %v4769_v27 = vpop.f32.mrf.mxu1  ;;  %4495 = vst [vmem:[%s5251_s20 + $0x18] sm:$0xff] %v4463_v51 }
 0x37a   : > { %v4770_v35 = vpop.f32.mrf.mxu1 }
 0x37b   : > { %v4771_v60 = vadd.f32 %v4770_v35, %v4769_v27 }
 0x37c   : > { %v4772_v16 = vpop.f32.mrf.mxu1 }
 0x37d   : > { %v4476_v48 = vadd.f32 %v4771_v60, %v4155_v36  ;;  %v4148_v60 = vld [vmem:[%s5251_s20 + $0x48] sm:$0xff] }
 0x37e   : > { %v4773_v50 = vpop.f32.mrf.mxu1 }
 0x37f   : > { %4508 = vst [vmem:[%s5251_s20 + $0x80] sm:$0xff] %v4476_v48  ;;  %v4774_v11 = vadd.f32 %v4773_v50, %v4772_v16  ;;  %v4163_v48 = vld [vmem:[%s5251_s20 + $0xc0] sm:$0xff] }
 0x380   : > { %v4775_v12 = vpop.f32.mrf.mxu1 }
 0x381   : > { %v4477_v44 = vadd.f32 %v4774_v11, %v4156_v29 }
 0x382   : > { %v4776_v13 = vpop.f32.mrf.mxu1 }
 0x383   : > { %4509 = vst [vmem:[%s5251_s20 + $0x88] sm:$0xff] %v4477_v44  ;;  %v4777_v20 = vadd.f32 %v4776_v13, %v4775_v12  ;;  %v4164_v13 = vld [vmem:[%s5251_s20 + $0xc8] sm:$0xff] }
 0x384   : > { %v4778_v25 = vpop.f32.mrf.mxu1 }
 0x385   : > { %v4478_v7 = vadd.f32 %v4777_v20, %v4157_v18 }
 0x386   : > { %v4779_v37 = vpop.f32.mrf.mxu1 }
 0x387   : > { %4510 = vst [vmem:[%s5251_s20 + $0x90] sm:$0xff] %v4478_v7  ;;  %v4780_v62 = vadd.f32 %v4779_v37, %v4778_v25  ;;  %v4149_v37 = vld [vmem:[%s5251_s20 + $0x50] sm:$0xff] }
 0x389   : > { %v4479_v15 = vadd.f32 %v4780_v62, %v4158_v3 }
 0x38b   : > { %4511 = vst [vmem:[%s5251_s20 + $0x98] sm:$0xff] %v4479_v15 }
 0x394   : > { %v4733_v39 = vpop.f32.mrf.mxu0 }
 0x396   : > { %v4734_v30 = vpop.f32.mrf.mxu0 }
 0x397   : > { %v4735_v46 = vadd.f32 %v4734_v30, %v4733_v39  ;;  %v4781_v1 = vpop.f32.mrf.mxu1  ;;  %v4150_v30 = vld [vmem:[%s5251_s20 + $0x58] sm:$0xff] }
 0x398   : > { %v4736_v57 = vpop.f32.mrf.mxu0 }
 0x399   : > { %v4464_v45 = vadd.f32 %v4735_v46, %v4143_v38  ;;  %v4782_v33 = vpop.f32.mrf.mxu1 }
 0x39a   : > { %v4737_v58 = vpop.f32.mrf.mxu0  ;;  %v4783_v21 = vadd.f32 %v4782_v33, %v4781_v1 }
 0x39b   : > { %4496 = vst [vmem:[%s5251_s20 + $0x20] sm:$0xff] %v4464_v45  ;;  %v4738_v5 = vadd.f32 %v4737_v58, %v4736_v57  ;;  %v4784_v43 = vpop.f32.mrf.mxu1 }
 0x39c   : > { %v4480_v52 = vadd.f32 %v4783_v21, %v4159_v41  ;;  %v4165_v41 = vld [vmem:[%s5251_s20 + $0xd0] sm:$0xff] }
 0x39d   : > { %v4465_v28 = vadd.f32 %v4738_v5, %v4144_v22  ;;  %v4785_v10 = vpop.f32.mrf.mxu1  ;;  %v4166_v5 = vld [vmem:[%s5251_s20 + $0xd8] sm:$0xff] }
 0x39e   : > { %4512 = vst [vmem:[%s5251_s20 + $0xa0] sm:$0xff] %v4480_v52  ;;  %v4786_v26 = vadd.f32 %v4785_v10, %v4784_v43  ;;  %v4151_v10 = vld [vmem:[%s5251_s20 + $0x60] sm:$0xff] }
 0x39f   : > { %4497 = vst [vmem:[%s5251_s20 + $0x28] sm:$0xff] %v4465_v28 }
 0x3a0   : > { %v4481_v55 = vadd.f32 %v4786_v26, %v4160_v6 }
 0x3a2   : > { %4513 = vst [vmem:[%s5251_s20 + $0xa8] sm:$0xff] %v4481_v55 }
 0x3a6   : > { %v4739_v42 = vpop.f32.mrf.mxu0 }
 0x3a8   : > { %v4740_v17 = vpop.f32.mrf.mxu0 }
 0x3a9   : > { %v4741_v63 = vadd.f32 %v4740_v17, %v4739_v42 }
 0x3aa   : > { %v4742_v4 = vpop.f32.mrf.mxu0 }
 0x3ab   : > { %v4466_v56 = vadd.f32 %v4741_v63, %v4145_v14  ;;  %v4152_v63 = vld [vmem:[%s5251_s20 + $0x68] sm:$0xff] }
 0x3ac   : > { %v4743_v8 = vpop.f32.mrf.mxu0  ;;  %v4787_v54 = vpop.f32.mrf.mxu1 }
 0x3ad   : > { %4498 = vst [vmem:[%s5251_s20 + $0x30] sm:$0xff] %v4466_v56  ;;  %v4744_v31 = vadd.f32 %v4743_v8, %v4742_v4  ;;  %v4167_v56 = vld [vmem:[%s5251_s20 + $0xe0] sm:$0xff] }
 0x3ae   : > { %v4788_v0 = vpop.f32.mrf.mxu1 }
 0x3af   : > { %v4467_v59 = vadd.f32 %v4744_v31, %v4146_v40  ;;  %v4789_v34 = vadd.f32 %v4788_v0, %v4787_v54 }
 0x3b0   : > { %v4790_v23 = vpop.f32.mrf.mxu1 }
 0x3b1   : > { %4499 = vst [vmem:[%s5251_s20 + $0x38] sm:$0xff] %v4467_v59  ;;  %v4482_v19 = vadd.f32 %v4789_v34, %v4161_v61  ;;  %v4168_v59 = vld [vmem:[%s5251_s20 + $0xe8] sm:$0xff] }
 0x3b2   : > { %v4791_v2 = vpop.f32.mrf.mxu1 }
 0x3b3   : > { %4514 = vst [vmem:[%s5251_s20 + $0xb0] sm:$0xff] %v4482_v19  ;;  %v4792_v47 = vadd.f32 %v4791_v2, %v4790_v23  ;;  %v4153_v2 = vld [vmem:[%s5251_s20 + $0x70] sm:$0xff] }
 0x3b5   : > { %v4483_v53 = vadd.f32 %v4792_v47, %v4162_v24 }
 0x3b7   : > { %4515 = vst [vmem:[%s5251_s20 + $0xb8] sm:$0xff] %v4483_v53 }
 0x3bc   : > { %v4745_v9 = vpop.f32.mrf.mxu0 }
 0x3be   : > { %v4746_v32 = vpop.f32.mrf.mxu0 }
 0x3bf   : > { %v4747_v51 = vadd.f32 %v4746_v32, %v4745_v9 }
 0x3c0   : > { %v4748_v27 = vpop.f32.mrf.mxu0  ;;  %v4793_v36 = vpop.f32.mrf.mxu1 }
 0x3c1   : > { %v4468_v35 = vadd.f32 %v4747_v51, %v4147_v49  ;;  %v4169_v51 = vld [vmem:[%s5251_s20 + $0xf0] sm:$0xff] }
 0x3c2   : > { %v4749_v16 = vpop.f32.mrf.mxu0  ;;  %v4794_v29 = vpop.f32.mrf.mxu1 }
 0x3c3   : > { %4500 = vst [vmem:[%s5251_s20 + $0x40] sm:$0xff] %v4468_v35  ;;  %v4750_v50 = vadd.f32 %v4749_v16, %v4748_v27  ;;  %v4795_v11 = vadd.f32 %v4794_v29, %v4793_v36  ;;  %v4154_v36 = vld [vmem:[%s5251_s20 + $0x78] sm:$0xff] }
 0x3c4   : > { %v4796_v44 = vpop.f32.mrf.mxu1 }
 0x3c5   : > { %v4469_v12 = vadd.f32 %v4750_v50, %v4148_v60  ;;  %v4484_v18 = vadd.f32 %v4795_v11, %v4163_v48  ;;  %v4170_v11 = vld [vmem:[%s5251_s20 + $0xf8] sm:$0xff] }
 0x3c6   : > { %v4797_v20 = vpop.f32.mrf.mxu1 }
 0x3c7   : > { %4501 = vst [vmem:[%s5251_s20 + $0x48] sm:$0xff] %v4469_v12  ;;  %4516 = vst [vmem:[%s5251_s20 + $0xc0] sm:$0xff] %v4484_v18  ;;  %v4798_v25 = vadd.f32 %v4797_v20, %v4796_v44 }
 0x3c9   : > { %v4485_v7 = vadd.f32 %v4798_v25, %v4164_v13 }
 0x3cb   : > { %4517 = vst [vmem:[%s5251_s20 + $0xc8] sm:$0xff] %v4485_v7 }
 0x3d0   : > { %v4751_v3 = vpop.f32.mrf.mxu0 }
 0x3d2   : > { %v4752_v62 = vpop.f32.mrf.mxu0 }
 0x3d3   : > { %v4753_v15 = vadd.f32 %v4752_v62, %v4751_v3 }
 0x3d4   : > { %v4754_v39 = vpop.f32.mrf.mxu0 }
 0x3d5   : > { %v4470_v38 = vadd.f32 %v4753_v15, %v4149_v37 }
 0x3d6   : > { %v4755_v46 = vpop.f32.mrf.mxu0 }
 0x3d7   : > { %4502 = vst [vmem:[%s5251_s20 + $0x50] sm:$0xff] %v4470_v38  ;;  %v4756_v1 = vadd.f32 %v4755_v46, %v4754_v39  ;;  %v4799_v57 = vpop.f32.mrf.mxu1 }
 0x3d9   : > { %v4471_v45 = vadd.f32 %v4756_v1, %v4150_v30  ;;  %v4800_v33 = vpop.f32.mrf.mxu1 }
 0x3da   : > { %v4801_v22 = vadd.f32 %v4800_v33, %v4799_v57 }
 0x3db   : > { %4503 = vst [vmem:[%s5251_s20 + $0x58] sm:$0xff] %v4471_v45  ;;  %v4802_v58 = vpop.f32.mrf.mxu1 }
 0x3dc   : > { %v4486_v21 = vadd.f32 %v4801_v22, %v4165_v41 }
 0x3dd   : > { %v4803_v43 = vpop.f32.mrf.mxu1 }
 0x3de   : > { %4518 = vst [vmem:[%s5251_s20 + $0xd0] sm:$0xff] %v4486_v21  ;;  %v4804_v52 = vadd.f32 %v4803_v43, %v4802_v58 }
 0x3e0   : > { %v4487_v28 = vadd.f32 %v4804_v52, %v4166_v5 }
 0x3e2   : > { %4519 = vst [vmem:[%s5251_s20 + $0xd8] sm:$0xff] %v4487_v28 }
 0x3ef   : > { %v4757_v6 = vpop.f32.mrf.mxu0 }
 0x3f1   : > { %v4758_v26 = vpop.f32.mrf.mxu0 }
 0x3f2   : > { %v4759_v55 = vadd.f32 %v4758_v26, %v4757_v6 }
 0x3f3   : > { %v4760_v42 = vpop.f32.mrf.mxu0  ;;  %v4805_v14 = vpop.f32.mrf.mxu1 }
 0x3f4   : > { %v4472_v17 = vadd.f32 %v4759_v55, %v4151_v10 }
 0x3f5   : > { %v4761_v4 = vpop.f32.mrf.mxu0  ;;  %v4806_v40 = vpop.f32.mrf.mxu1 }
 0x3f6   : > { %4504 = vst [vmem:[%s5251_s20 + $0x60] sm:$0xff] %v4472_v17  ;;  %v4762_v8 = vadd.f32 %v4761_v4, %v4760_v42  ;;  %v4807_v54 = vadd.f32 %v4806_v40, %v4805_v14 }
 0x3f7   : > { %v4808_v31 = vpop.f32.mrf.mxu1 }
 0x3f8   : > { %v4473_v61 = vadd.f32 %v4762_v8, %v4152_v63  ;;  %v4488_v0 = vadd.f32 %v4807_v54, %v4167_v56 }
 0x3f9   : > { %v4809_v34 = vpop.f32.mrf.mxu1 }
 0x3fa   : > { %4505 = vst [vmem:[%s5251_s20 + $0x68] sm:$0xff] %v4473_v61  ;;  %4520 = vst [vmem:[%s5251_s20 + $0xe0] sm:$0xff] %v4488_v0  ;;  %v4810_v23 = vadd.f32 %v4809_v34, %v4808_v31 }
 0x3fc   : > { %v4489_v19 = vadd.f32 %v4810_v23, %v4168_v59 }
 0x3fe   : > { %4521 = vst [vmem:[%s5251_s20 + $0xe8] sm:$0xff] %v4489_v19 }
 0x406   : > { %v4763_v24 = vpop.f32.mrf.mxu0 }
 0x408   : > { %v4764_v47 = vpop.f32.mrf.mxu0 }
 0x409   : > { %v4765_v53 = vadd.f32 %v4764_v47, %v4763_v24  ;;  %v4811_v9 = vpop.f32.mrf.mxu1 }
 0x40a   : > { %v4766_v49 = vpop.f32.mrf.mxu0 }
 0x40b   : > { %v4474_v32 = vadd.f32 %v4765_v53, %v4153_v2  ;;  %v4812_v27 = vpop.f32.mrf.mxu1 }
 0x40c   : > { %v4767_v35 = vpop.f32.mrf.mxu0  ;;  %v4813_v60 = vadd.f32 %v4812_v27, %v4811_v9 }
 0x40d   : > { %4506 = vst [vmem:[%s5251_s20 + $0x70] sm:$0xff] %v4474_v32  ;;  %v4768_v16 = vadd.f32 %v4767_v35, %v4766_v49  ;;  %v4814_v48 = vpop.f32.mrf.mxu1 }
 0x40e   : > { %v4490_v29 = vadd.f32 %v4813_v60, %v4169_v51 }
 0x40f   : > { %v4475_v50 = vadd.f32 %v4768_v16, %v4154_v36  ;;  %v4815_v44 = vpop.f32.mrf.mxu1 }
 0x410   : > { %4522 = vst [vmem:[%s5251_s20 + $0xf0] sm:$0xff] %v4490_v29  ;;  %v4816_v12 = vadd.f32 %v4815_v44, %v4814_v48 }
 0x411   : > { %4507 = vst [vmem:[%s5251_s20 + $0x78] sm:$0xff] %v4475_v50 }
 0x412   : > { %v4491_v18 = vadd.f32 %v4816_v12, %v4170_v11 }
 0x414   : > { %4523 = vst [vmem:[%s5251_s20 + $0xf8] sm:$0xff] %v4491_v18 }
 0x415 PF: > { %s4704_s22 = sshll.u32 %s5126_s29, 12  ;;  %s4538_s0 = sshll.u32 %s5251_s20, 4  ;;  %s8520_s0 = int_to_ptr.vmem [resolvable:$true] %s4538_s0 }
 0x416   : > { %s8517_s26 = scalar_lea.hbm %s8573_s5, %s4704_s22  ;;  %s9232_s7 = sand.u32 1, %s5118_s27  }
 0x417   : > { %s8524_s8 = scalar_lea.sflag [#allocation6], %s9232_s7  ;;  %s5056_s10 = scalar_lea.vmem %s8520_s0, 4096 }
 0x418   : > { %p5057_p2 = scmp.ne.s32.totalorder %s8520_s0, %s5056_s10  ;;  %s5147_s29 = smov [#allocation5]  }
 0x419   : > { %s5060_s12 = sshll.u32 %s5147_s29, 4  ;;  %s5061_s12 = int_to_ptr.vmem [resolvable:$false] %s5060_s12 }
 0x41a   : > { %p5058_p3 = pnand %p5057_p2, %p5226_p0  ;;  %s5062_s16 = scalar_lea.vmem %s5061_s12, 8192 }
 0x41b   : > { %p5063_p6 = scmp.lt.s32.totalorder %s8520_s0, %s5061_s12  ;;  %p5064_p7 = scmp.lt.s32.totalorder %s5062_s16, %s5056_s10 }
 0x41c   : > { %p5059_p5 = pneg %p5058_p3 }
 0x41d   : > { %p5065_p8 = por %p5064_p7, %p5063_p6 }
 0x41f   : > { %p5066_p9 = pnand %p5065_p8, %p5059_p5 }
 0x421   : > { %5069 = shalt.err (!%p5066_p9)
}
 0x422   : > { %s5070_s20 = scalar_lea.hbm %s8517_s26, 4096  ;;  %s5074_s21 = scalar_lea.hbm %s8573_s5, 8192 }
 0x423   : > { %p5071_p10 = scmp.ne.s32.totalorder %s8517_s26, %s5070_s20  ;;  %p5075_p13 = scmp.lt.s32.totalorder %s8517_s26, %s8573_s5 }
 0x424   : > { %p5076_p1 = scmp.lt.s32.totalorder %s5074_s21, %s5070_s20 }
 0x425   : > { %p5072_p11 = pnand %p5071_p10, %p5226_p0 }
 0x426   : > { %p5077_p2 = por %p5076_p1, %p5075_p13 }
 0x427   : > { %p5073_p12 = pneg %p5072_p11 }
 0x429   : > { %p5078_p3 = pnand %p5077_p2, %p5073_p12 }
 0x42b   : > { %5081 = shalt.err (!%p5078_p3)
}
 0x42c   : > { %s5148_s18 = smov 128   ;;  %s5149_s30 = smov 8  }
 0x42d   : > { %4833 = dma.vmem_to_hbm [thread:$0]  (%p5226_p0), %s8520_s0, 4096, %s8517_s26, %s8524_s8, %s5148_s18, %s5148_s18, %s5149_s30  }
 0x42e PF: > { %s9233_s14 = sld [smem:[#allocation9_spill]]  ;;  %p4839_p5 = scmp.ge.s32.totalorder %s5134_s6, 2 }
 0x430   : > { %p4836_p6 = pnand %p4839_p5, %p5233_p4 }
 0x432   : > { %p4837_p7 = pneg %p4836_p6 }
 0x434   : > { %s4553_s28 = sand.u32 1, %s9233_s14  }
 0x435   : > { %s4554_s9 = scalar_lea.sflag [#allocation6], %s4553_s28 }
 0x436   : > { %5109 = dma.done.wait (%p4837_p7), %s4554_s9, 4096  }
 0x437   : > { %5111 = vsyncadd (%p4837_p7), %s4554_s9, 4294963200  ;;  %s28_s6 = sadd.s32 1, %s5134_s6   ;;  %s9235_s13 = sld [smem:[#allocation10_spill]] }
 0x438   : > { %p25_p8 = scmp.ge.s32.totalorder %s28_s6, 4   ;;  %s9236_s28 = sld [smem:[#allocation14_spill]] }
 0x439   : > { %s9237_s29 = sld [smem:[#allocation11_spill]]  ;;  %s9239_s1 = smov %s5118_s27 }
 0x43a   : > { %s9238_s30 = sld [smem:[#allocation12_spill]]  ;;  %27 = sbr.rel (!%p25_p8) target bundleno = 29 (0x1d), region = 82 }
 0x43d   : > { %s9240_s27 = smov %s9235_s13 }
 0x43f   :  { %4559 = vsyncpa [#allocation6], 1 }
 0x440   :  { %4561 = vsyncpa [#allocation6 + $0x1], 1 }

</bundles_post_ra>
